<compile_context>
chip_gen: v5e
topology: v5e:2x2
jax: 0.10.0
libtpu: 0.0.40
codegen_flags: <defaults>
</compile_context>

<pallas_src>
import functools
import math

import jax
import jax.numpy as jnp
from jax.experimental import pallas as pl
from jax.experimental.pallas import tpu as pltpu

BN_EPS = 1e-5


# ----------------------------------------------------------------------------
# Fused Pallas kernel
# ----------------------------------------------------------------------------
def _conv3x3_gemm(pad_ref, w_ref, H, W):
    """3x3 / stride-1 conv as a single wide-K MXU matmul.

    pad_ref: (H+2, W+2, Cin) bf16 VMEM scratch (zero halo already in place)
    w_ref:   (9*Cin, Cout)   bf16 (BN scale folded in, K index order = kh,kw,cin)
    returns  (H*W, Cout) f32
    """
    cin = pad_ref.shape[-1]
    taps = []
    for di in range(3):
        for dj in range(3):
            t = pad_ref[di:di + H, dj:dj + W, :]            # (H, W, Cin)
            taps.append(t.reshape(H * W, cin))
    lhs = jnp.concatenate(taps, axis=-1)                    # (H*W, 9*Cin)
    return jnp.dot(lhs, w_ref[...], preferred_element_type=jnp.float32)


def _se_block_kernel(x_ref, w1_ref, b1_ref, w2_ref, b2_ref,
                     fc1w_ref, fc1b_ref, fc2w_ref, fc2b_ref,
                     o_ref, pad1_ref, pad2_ref, *, H, W, C):
    HW = H * W

    # --- conv1 input halo: zero-filled padded VMEM scratch, interior = x (bf16) ---
    pad1_ref[...] = jnp.zeros_like(pad1_ref)
    pad1_ref[1:H + 1, 1:W + 1, :] = x_ref[0].astype(jnp.bfloat16)

    # --- conv1 -> bn1 (folded) -> relu ---
    y1 = _conv3x3_gemm(pad1_ref, w1_ref, H, W) + b1_ref[...]
    y1 = jnp.maximum(y1, 0.0)                               # (H*W, C) f32

    # --- conv2 input halo from conv1 output (stays on-chip, never hits HBM) ---
    pad2_ref[...] = jnp.zeros_like(pad2_ref)
    pad2_ref[1:H + 1, 1:W + 1, :] = y1.reshape(H, W, C).astype(jnp.bfloat16)

    # --- conv2 -> bn2 (folded), no relu ---
    y2 = _conv3x3_gemm(pad2_ref, w2_ref, H, W) + b2_ref[...]   # (H*W, C) f32

    # --- SE squeeze: global average pool over the H*W pixels ---
    pooled = jnp.sum(y2, axis=0, keepdims=True) * (1.0 / float(HW))   # (1, C)

    # --- SE excitation: fc1 -> relu -> fc2 -> sigmoid ---
    h = jnp.dot(pooled, fc1w_ref[...],
                preferred_element_type=jnp.float32) + fc1b_ref[...]
    h = jnp.maximum(h, 0.0)                                 # (1, Cr)
    z = jnp.dot(h, fc2w_ref[...],
                preferred_element_type=jnp.float32) + fc2b_ref[...]
    gate = 1.0 / (1.0 + jnp.exp(-z))                        # (1, C) sigmoid

    # --- channel rescale + identity residual + final ReLU (all f32) ---
    res = x_ref[0].reshape(HW, C)                           # f32 residual stream
    y = jnp.maximum(y2 * gate + res, 0.0)
    o_ref[...] = y.reshape(1, H, W, C).astype(o_ref.dtype)


def se_basic_block_fused(x_nhwc, params):
    """Whole SEBasicBlock (downsample=None) as one pallas_call, one image per step."""
    N, H, W, Cin = x_nhwc.shape
    C = params["conv1_b"].shape[-1]
    assert Cin == C, "downsample=None path requires inplanes == planes"
    Cr = params["fc1_w"].shape[-1]

    kern = functools.partial(_se_block_kernel, H=H, W=W, C=C)
    const2 = lambda n: (0, 0)   # resident weight/bias blocks

    return pl.pallas_call(
        kern,
        out_shape=jax.ShapeDtypeStruct((N, H, W, C), jnp.float32),
        grid_spec=pltpu.PrefetchScalarGridSpec(
            num_scalar_prefetch=0,
            grid=(N,),
            in_specs=[
                pl.BlockSpec((1, H, W, Cin), lambda n: (n, 0, 0, 0)),   # x / residual
                pl.BlockSpec((9 * Cin, C), const2),                     # conv1 folded w
                pl.BlockSpec((1, C), const2),                           # conv1 folded b
                pl.BlockSpec((9 * C, C), const2),                       # conv2 folded w
                pl.BlockSpec((1, C), const2),                           # conv2 folded b
                pl.BlockSpec((C, Cr), const2),                          # fc1 w
                pl.BlockSpec((1, Cr), const2),                          # fc1 b
                pl.BlockSpec((Cr, C), const2),                          # fc2 w
                pl.BlockSpec((1, C), const2),                           # fc2 b
            ],
            out_specs=pl.BlockSpec((1, H, W, C), lambda n: (n, 0, 0, 0)),
            scratch_shapes=[
                pltpu.VMEM((H + 2, W + 2, Cin), jnp.bfloat16),   # padded conv1 input
                pltpu.VMEM((H + 2, W + 2, C), jnp.bfloat16),     # padded conv1 output
            ]),
        compiler_params=pltpu.CompilerParams(
            dimension_semantics=("parallel",)),
    )(x_nhwc,
      params["conv1_w"], params["conv1_b"],
      params["conv2_w"], params["conv2_b"],
      params["fc1_w"], params["fc1_b"],
      params["fc2_w"], params["fc2_b"])


# ----------------------------------------------------------------------------
# Parameters (PyTorch-style init, BN folded into wide-K conv weights)
# ----------------------------------------------------------------------------
def _fold_conv_bn(w_oihw, gamma, beta, mean, var):
    """OIHW conv weight + inference BN -> (9*Cin, Cout) bf16 weight, (1, Cout) f32 bias."""
    s = gamma / jnp.sqrt(var + BN_EPS)                      # (Cout,)
    w = jnp.transpose(w_oihw, (2, 3, 1, 0))                 # (3, 3, Cin, Cout)
    cin, cout = w.shape[2], w.shape[3]
    w = (w * s).reshape(9 * cin, cout)                      # K index order = (kh, kw, cin)
    b = beta - mean * s
    return w.astype(jnp.bfloat16), b.reshape(1, -1).astype(jnp.float32)


def init_params(key, inplanes, planes):
    k1, k2, k3, k4, k5, k6 = jax.random.split(key, 6)

    def conv_w(k, cin, cout):
        fan = 3 * 3 * cin
        return math.sqrt(2.0 / fan) * jax.random.normal(k, (cout, cin, 3, 3), jnp.float32)

    ones = lambda c: jnp.ones((c,), jnp.float32)
    zeros = lambda c: jnp.zeros((c,), jnp.float32)

    # BatchNorm in inference mode with default running stats (mean=0, var=1, gamma=1, beta=0).
    w1c, b1c = _fold_conv_bn(conv_w(k1, inplanes, planes),
                             ones(planes), zeros(planes), zeros(planes), ones(planes))
    w2c, b2c = _fold_conv_bn(conv_w(k2, planes, planes),
                             ones(planes), zeros(planes), zeros(planes), ones(planes))

    cr = int(round(planes / 16))        # matches torch: int(round(planes / 16))
    assert cr >= 1, "planes too small for a non-degenerate SE reduction"
    bound1 = 1.0 / math.sqrt(planes)
    bound2 = 1.0 / math.sqrt(cr)
    return dict(
        conv1_w=w1c, conv1_b=b1c,
        conv2_w=w2c, conv2_b=b2c,
        fc1_w=jax.random.uniform(k3, (planes, cr), jnp.float32, -bound1, bound1),
        fc1_b=jax.random.uniform(k4, (1, cr), jnp.float32, -bound1, bound1),
        fc2_w=jax.random.uniform(k5, (cr, planes), jnp.float32, -bound2, bound2),
        fc2_b=jax.random.uniform(k6, (1, planes), jnp.float32, -bound2, bound2),
    )


# ----------------------------------------------------------------------------
# Forward pass (matches SEBasicBlock.forward with downsample=None, stride=1)
# ----------------------------------------------------------------------------
def se_basic_block_forward(params, x_nchw):
    # NCHW -> NHWC at the boundary; the fused kernel runs channels-last.
    x = jnp.transpose(x_nchw.astype(jnp.float32), (0, 2, 3, 1))
    y = se_basic_block_fused(x, params)
    return jnp.transpose(y, (0, 3, 1, 2))                   # back to NCHW


if __name__ == "__main__":
    key = jax.random.PRNGKey(0)
    pkey, xkey = jax.random.split(key)
    # inplanes == planes == 64 so the identity residual is valid (downsample=None)
    # and the SE reduction round(planes/16)=4 is non-degenerate.
    N, C, H, W = 2, 64, 16, 16
    params = init_params(pkey, inplanes=C, planes=C)
    x = jax.random.normal(xkey, (N, C, H, W), jnp.float32)   # NCHW like PyTorch

    out = jax.jit(se_basic_block_forward)(params, x)
    out = jax.block_until_ready(out)
    assert out.shape == (N, C, H, W) and out.dtype == jnp.float32
    assert bool(jnp.all(jnp.isfinite(out)))
    assert bool(jnp.all(out >= 0.0))   # final ReLU
    print("KERNEL_OK")
</pallas_src>

<mosaic_0001>
module attributes {stable_mosaic.version = 11 : i64} {
  func.func @_se_block_kernel(%arg0: i32, %arg1: memref<1x16x16x64xf32, #tpu.memory_space<vmem>>, %arg2: memref<576x64xbf16, #tpu.memory_space<vmem>>, %arg3: memref<1x64xf32, #tpu.memory_space<vmem>>, %arg4: memref<576x64xbf16, #tpu.memory_space<vmem>>, %arg5: memref<1x64xf32, #tpu.memory_space<vmem>>, %arg6: memref<64x4xf32, #tpu.memory_space<vmem>>, %arg7: memref<1x4xf32, #tpu.memory_space<vmem>>, %arg8: memref<4x64xf32, #tpu.memory_space<vmem>>, %arg9: memref<1x64xf32, #tpu.memory_space<vmem>>, %arg10: memref<1x16x16x64xf32, #tpu.memory_space<vmem>>, %arg11: memref<18x18x64xbf16, #tpu.memory_space<vmem>>, %arg12: memref<18x18x64xbf16, #tpu.memory_space<vmem>>) attributes {dimension_semantics = [#tpu.dimension_semantics<parallel>], iteration_bounds = array<i64: 2>, scalar_prefetch = 0 : i64, scratch_operands = 2 : i64, tpu.core_type = #tpu.core_type<tc>, window_params = [{transform_indices = @transform_0, window_bounds = array<i64: 1, 16, 16, 64>}, {pipeline_mode = #tpu.pipeline_mode<synchronous>, transform_indices = @transform_1, window_bounds = array<i64: 576, 64>}, {pipeline_mode = #tpu.pipeline_mode<synchronous>, transform_indices = @transform_2, window_bounds = array<i64: 1, 64>}, {pipeline_mode = #tpu.pipeline_mode<synchronous>, transform_indices = @transform_3, window_bounds = array<i64: 576, 64>}, {pipeline_mode = #tpu.pipeline_mode<synchronous>, transform_indices = @transform_4, window_bounds = array<i64: 1, 64>}, {pipeline_mode = #tpu.pipeline_mode<synchronous>, transform_indices = @transform_5, window_bounds = array<i64: 64, 4>}, {pipeline_mode = #tpu.pipeline_mode<synchronous>, transform_indices = @transform_6, window_bounds = array<i64: 1, 4>}, {pipeline_mode = #tpu.pipeline_mode<synchronous>, transform_indices = @transform_7, window_bounds = array<i64: 4, 64>}, {pipeline_mode = #tpu.pipeline_mode<synchronous>, transform_indices = @transform_8, window_bounds = array<i64: 1, 64>}, {transform_indices = @transform_9, window_bounds = array<i64: 1, 16, 16, 64>}]} {
    %cst = arith.constant 0.000000e+00 : bf16
    %0 = vector.broadcast %cst : bf16 to vector<18x18x64xbf16>
    %c0 = arith.constant 0 : index
    %c0_0 = arith.constant 0 : index
    %c0_1 = arith.constant 0 : index
    %1 = vector.load %arg11[%c0, %c0_0, %c0_1] : memref<18x18x64xbf16, #tpu.memory_space<vmem>>, vector<18x18x64xbf16>
    tpu.vector_store %arg11[%c0, %c0_0, %c0_1], %0 {strides = array<i32>} : memref<18x18x64xbf16, #tpu.memory_space<vmem>>, vector<18x18x64xbf16>,
    %c0_2 = arith.constant 0 : index
    %c0_3 = arith.constant 0 : index
    %c0_4 = arith.constant 0 : index
    %c0_5 = arith.constant 0 : index
    %2 = vector.load %arg1[%c0_2, %c0_3, %c0_4, %c0_5] : memref<1x16x16x64xf32, #tpu.memory_space<vmem>>, vector<1x16x16x64xf32>
    %3 = vector.shape_cast %2 : vector<1x16x16x64xf32> to vector<16x16x64xf32>
    %4 = arith.truncf %3 : vector<16x16x64xf32> to vector<16x16x64xbf16>
    %c1 = arith.constant 1 : index
    %c1_6 = arith.constant 1 : index
    %c0_7 = arith.constant 0 : index
    %5 = vector.load %arg11[%c1, %c1_6, %c0_7] : memref<18x18x64xbf16, #tpu.memory_space<vmem>>, vector<16x16x64xbf16>
    tpu.vector_store %arg11[%c1, %c1_6, %c0_7], %4 {strides = array<i32>} : memref<18x18x64xbf16, #tpu.memory_space<vmem>>, vector<16x16x64xbf16>,
    %c0_8 = arith.constant 0 : index
    %c0_9 = arith.constant 0 : index
    %c0_10 = arith.constant 0 : index
    %6 = vector.load %arg11[%c0_8, %c0_9, %c0_10] : memref<18x18x64xbf16, #tpu.memory_space<vmem>>, vector<16x16x64xbf16>
    %7 = vector.shape_cast %6 : vector<16x16x64xbf16> to vector<256x64xbf16>
    %c0_11 = arith.constant 0 : index
    %c1_12 = arith.constant 1 : index
    %c0_13 = arith.constant 0 : index
    %8 = vector.load %arg11[%c0_11, %c1_12, %c0_13] : memref<18x18x64xbf16, #tpu.memory_space<vmem>>, vector<16x16x64xbf16>
    %9 = vector.shape_cast %8 : vector<16x16x64xbf16> to vector<256x64xbf16>
    %c0_14 = arith.constant 0 : index
    %c2 = arith.constant 2 : index
    %c0_15 = arith.constant 0 : index
    %10 = vector.load %arg11[%c0_14, %c2, %c0_15] : memref<18x18x64xbf16, #tpu.memory_space<vmem>>, vector<16x16x64xbf16>
    %11 = vector.shape_cast %10 : vector<16x16x64xbf16> to vector<256x64xbf16>
    %c1_16 = arith.constant 1 : index
    %c0_17 = arith.constant 0 : index
    %c0_18 = arith.constant 0 : index
    %12 = vector.load %arg11[%c1_16, %c0_17, %c0_18] : memref<18x18x64xbf16, #tpu.memory_space<vmem>>, vector<16x16x64xbf16>
    %13 = vector.shape_cast %12 : vector<16x16x64xbf16> to vector<256x64xbf16>
    %c1_19 = arith.constant 1 : index
    %c1_20 = arith.constant 1 : index
    %c0_21 = arith.constant 0 : index
    %14 = vector.load %arg11[%c1_19, %c1_20, %c0_21] : memref<18x18x64xbf16, #tpu.memory_space<vmem>>, vector<16x16x64xbf16>
    %15 = vector.shape_cast %14 : vector<16x16x64xbf16> to vector<256x64xbf16>
    %c1_22 = arith.constant 1 : index
    %c2_23 = arith.constant 2 : index
    %c0_24 = arith.constant 0 : index
    %16 = vector.load %arg11[%c1_22, %c2_23, %c0_24] : memref<18x18x64xbf16, #tpu.memory_space<vmem>>, vector<16x16x64xbf16>
    %17 = vector.shape_cast %16 : vector<16x16x64xbf16> to vector<256x64xbf16>
    %c2_25 = arith.constant 2 : index
    %c0_26 = arith.constant 0 : index
    %c0_27 = arith.constant 0 : index
    %18 = vector.load %arg11[%c2_25, %c0_26, %c0_27] : memref<18x18x64xbf16, #tpu.memory_space<vmem>>, vector<16x16x64xbf16>
    %19 = vector.shape_cast %18 : vector<16x16x64xbf16> to vector<256x64xbf16>
    %c2_28 = arith.constant 2 : index
    %c1_29 = arith.constant 1 : index
    %c0_30 = arith.constant 0 : index
    %20 = vector.load %arg11[%c2_28, %c1_29, %c0_30] : memref<18x18x64xbf16, #tpu.memory_space<vmem>>, vector<16x16x64xbf16>
    %21 = vector.shape_cast %20 : vector<16x16x64xbf16> to vector<256x64xbf16>
    %c2_31 = arith.constant 2 : index
    %c2_32 = arith.constant 2 : index
    %c0_33 = arith.constant 0 : index
    %22 = vector.load %arg11[%c2_31, %c2_32, %c0_33] : memref<18x18x64xbf16, #tpu.memory_space<vmem>>, vector<16x16x64xbf16>
    %23 = vector.shape_cast %22 : vector<16x16x64xbf16> to vector<256x64xbf16>
    %24 = tpu.concatenate %7, %9, %11, %13, %15, %17, %19, %21, %23 in 1 : vector<256x64xbf16>, vector<256x64xbf16>, vector<256x64xbf16>, vector<256x64xbf16>, vector<256x64xbf16>, vector<256x64xbf16>, vector<256x64xbf16>, vector<256x64xbf16>, vector<256x64xbf16> -> vector<256x576xbf16>
    %c0_34 = arith.constant 0 : index
    %c0_35 = arith.constant 0 : index
    %25 = vector.load %arg2[%c0_34, %c0_35] : memref<576x64xbf16, #tpu.memory_space<vmem>>, vector<576x64xbf16>
    %cst_36 = arith.constant dense<0.000000e+00> : vector<256x64xf32>
    %26 = tpu.matmul %24, %25, %cst_36 {dimension_numbers = #tpu.dot_dimension_numbers<[1], [0], [0], [1], [0, 0, 1, 1], [], []>} : vector<256x576xbf16>, vector<576x64xbf16>, vector<256x64xf32> -> vector<256x64xf32>
    %c0_37 = arith.constant 0 : index
    %c0_38 = arith.constant 0 : index
    %27 = vector.load %arg3[%c0_37, %c0_38] : memref<1x64xf32, #tpu.memory_space<vmem>>, vector<1x64xf32>
    %28 = vector.broadcast %27 : vector<1x64xf32> to vector<256x64xf32>
    %29 = arith.addf %26, %28 : vector<256x64xf32>
    %cst_39 = arith.constant 0.000000e+00 : f32
    %30 = vector.broadcast %cst_39 : f32 to vector<256x64xf32>
    %31 = arith.maximumf %29, %30 : vector<256x64xf32>
    %cst_40 = arith.constant 0.000000e+00 : bf16
    %32 = vector.broadcast %cst_40 : bf16 to vector<18x18x64xbf16>
    %c0_41 = arith.constant 0 : index
    %c0_42 = arith.constant 0 : index
    %c0_43 = arith.constant 0 : index
    %33 = vector.load %arg12[%c0_41, %c0_42, %c0_43] : memref<18x18x64xbf16, #tpu.memory_space<vmem>>, vector<18x18x64xbf16>
    tpu.vector_store %arg12[%c0_41, %c0_42, %c0_43], %32 {strides = array<i32>} : memref<18x18x64xbf16, #tpu.memory_space<vmem>>, vector<18x18x64xbf16>,
    %34 = vector.shape_cast %31 : vector<256x64xf32> to vector<16x16x64xf32>
    %35 = arith.truncf %34 : vector<16x16x64xf32> to vector<16x16x64xbf16>
    %c1_44 = arith.constant 1 : index
    %c1_45 = arith.constant 1 : index
    %c0_46 = arith.constant 0 : index
    %36 = vector.load %arg12[%c1_44, %c1_45, %c0_46] : memref<18x18x64xbf16, #tpu.memory_space<vmem>>, vector<16x16x64xbf16>
    tpu.vector_store %arg12[%c1_44, %c1_45, %c0_46], %35 {strides = array<i32>} : memref<18x18x64xbf16, #tpu.memory_space<vmem>>, vector<16x16x64xbf16>,
    %c0_47 = arith.constant 0 : index
    %c0_48 = arith.constant 0 : index
    %c0_49 = arith.constant 0 : index
    %37 = vector.load %arg12[%c0_47, %c0_48, %c0_49] : memref<18x18x64xbf16, #tpu.memory_space<vmem>>, vector<16x16x64xbf16>
    %38 = vector.shape_cast %37 : vector<16x16x64xbf16> to vector<256x64xbf16>
    %c0_50 = arith.constant 0 : index
    %c1_51 = arith.constant 1 : index
    %c0_52 = arith.constant 0 : index
    %39 = vector.load %arg12[%c0_50, %c1_51, %c0_52] : memref<18x18x64xbf16, #tpu.memory_space<vmem>>, vector<16x16x64xbf16>
    %40 = vector.shape_cast %39 : vector<16x16x64xbf16> to vector<256x64xbf16>
    %c0_53 = arith.constant 0 : index
    %c2_54 = arith.constant 2 : index
    %c0_55 = arith.constant 0 : index
    %41 = vector.load %arg12[%c0_53, %c2_54, %c0_55] : memref<18x18x64xbf16, #tpu.memory_space<vmem>>, vector<16x16x64xbf16>
    %42 = vector.shape_cast %41 : vector<16x16x64xbf16> to vector<256x64xbf16>
    %c1_56 = arith.constant 1 : index
    %c0_57 = arith.constant 0 : index
    %c0_58 = arith.constant 0 : index
    %43 = vector.load %arg12[%c1_56, %c0_57, %c0_58] : memref<18x18x64xbf16, #tpu.memory_space<vmem>>, vector<16x16x64xbf16>
    %44 = vector.shape_cast %43 : vector<16x16x64xbf16> to vector<256x64xbf16>
    %c1_59 = arith.constant 1 : index
    %c1_60 = arith.constant 1 : index
    %c0_61 = arith.constant 0 : index
    %45 = vector.load %arg12[%c1_59, %c1_60, %c0_61] : memref<18x18x64xbf16, #tpu.memory_space<vmem>>, vector<16x16x64xbf16>
    %46 = vector.shape_cast %45 : vector<16x16x64xbf16> to vector<256x64xbf16>
    %c1_62 = arith.constant 1 : index
    %c2_63 = arith.constant 2 : index
    %c0_64 = arith.constant 0 : index
    %47 = vector.load %arg12[%c1_62, %c2_63, %c0_64] : memref<18x18x64xbf16, #tpu.memory_space<vmem>>, vector<16x16x64xbf16>
    %48 = vector.shape_cast %47 : vector<16x16x64xbf16> to vector<256x64xbf16>
    %c2_65 = arith.constant 2 : index
    %c0_66 = arith.constant 0 : index
    %c0_67 = arith.constant 0 : index
    %49 = vector.load %arg12[%c2_65, %c0_66, %c0_67] : memref<18x18x64xbf16, #tpu.memory_space<vmem>>, vector<16x16x64xbf16>
    %50 = vector.shape_cast %49 : vector<16x16x64xbf16> to vector<256x64xbf16>
    %c2_68 = arith.constant 2 : index
    %c1_69 = arith.constant 1 : index
    %c0_70 = arith.constant 0 : index
    %51 = vector.load %arg12[%c2_68, %c1_69, %c0_70] : memref<18x18x64xbf16, #tpu.memory_space<vmem>>, vector<16x16x64xbf16>
    %52 = vector.shape_cast %51 : vector<16x16x64xbf16> to vector<256x64xbf16>
    %c2_71 = arith.constant 2 : index
    %c2_72 = arith.constant 2 : index
    %c0_73 = arith.constant 0 : index
    %53 = vector.load %arg12[%c2_71, %c2_72, %c0_73] : memref<18x18x64xbf16, #tpu.memory_space<vmem>>, vector<16x16x64xbf16>
    %54 = vector.shape_cast %53 : vector<16x16x64xbf16> to vector<256x64xbf16>
    %55 = tpu.concatenate %38, %40, %42, %44, %46, %48, %50, %52, %54 in 1 : vector<256x64xbf16>, vector<256x64xbf16>, vector<256x64xbf16>, vector<256x64xbf16>, vector<256x64xbf16>, vector<256x64xbf16>, vector<256x64xbf16>, vector<256x64xbf16>, vector<256x64xbf16> -> vector<256x576xbf16>
    %c0_74 = arith.constant 0 : index
    %c0_75 = arith.constant 0 : index
    %56 = vector.load %arg4[%c0_74, %c0_75] : memref<576x64xbf16, #tpu.memory_space<vmem>>, vector<576x64xbf16>
    %cst_76 = arith.constant dense<0.000000e+00> : vector<256x64xf32>
    %57 = tpu.matmul %55, %56, %cst_76 {dimension_numbers = #tpu.dot_dimension_numbers<[1], [0], [0], [1], [0, 0, 1, 1], [], []>} : vector<256x576xbf16>, vector<576x64xbf16>, vector<256x64xf32> -> vector<256x64xf32>
    %c0_77 = arith.constant 0 : index
    %c0_78 = arith.constant 0 : index
    %58 = vector.load %arg5[%c0_77, %c0_78] : memref<1x64xf32, #tpu.memory_space<vmem>>, vector<1x64xf32>
    %59 = vector.broadcast %58 : vector<1x64xf32> to vector<256x64xf32>
    %60 = arith.addf %57, %59 : vector<256x64xf32>
    %cst_79 = arith.constant dense<0.000000e+00> : vector<64xf32>
    %61 = vector.multi_reduction <add>, %60, %cst_79 [0] : vector<256x64xf32> to vector<64xf32>
    %62 = vector.shape_cast %61 : vector<64xf32> to vector<1x64xf32>
    %cst_80 = arith.constant 3.906250e-03 : f32
    %63 = vector.broadcast %cst_80 : f32 to vector<1x64xf32>
    %64 = arith.mulf %62, %63 : vector<1x64xf32>
    %c0_81 = arith.constant 0 : index
    %c0_82 = arith.constant 0 : index
    %65 = vector.load %arg6[%c0_81, %c0_82] : memref<64x4xf32, #tpu.memory_space<vmem>>, vector<64x4xf32>
    %cst_83 = arith.constant dense<0.000000e+00> : vector<1x4xf32>
    %66 = tpu.matmul %64, %65, %cst_83 {dimension_numbers = #tpu.dot_dimension_numbers<[1], [0], [0], [1], [0, 0, 1, 1], [], []>} : vector<1x64xf32>, vector<64x4xf32>, vector<1x4xf32> -> vector<1x4xf32>
    %c0_84 = arith.constant 0 : index
    %c0_85 = arith.constant 0 : index
    %67 = vector.load %arg7[%c0_84, %c0_85] : memref<1x4xf32, #tpu.memory_space<vmem>>, vector<1x4xf32>
    %68 = arith.addf %66, %67 : vector<1x4xf32>
    %cst_86 = arith.constant 0.000000e+00 : f32
    %69 = vector.broadcast %cst_86 : f32 to vector<1x4xf32>
    %70 = arith.maximumf %68, %69 : vector<1x4xf32>
    %c0_87 = arith.constant 0 : index
    %c0_88 = arith.constant 0 : index
    %71 = vector.load %arg8[%c0_87, %c0_88] : memref<4x64xf32, #tpu.memory_space<vmem>>, vector<4x64xf32>
    %cst_89 = arith.constant dense<0.000000e+00> : vector<1x64xf32>
    %72 = tpu.matmul %70, %71, %cst_89 {dimension_numbers = #tpu.dot_dimension_numbers<[1], [0], [0], [1], [0, 0, 1, 1], [], []>} : vector<1x4xf32>, vector<4x64xf32>, vector<1x64xf32> -> vector<1x64xf32>
    %c0_90 = arith.constant 0 : index
    %c0_91 = arith.constant 0 : index
    %73 = vector.load %arg9[%c0_90, %c0_91] : memref<1x64xf32, #tpu.memory_space<vmem>>, vector<1x64xf32>
    %74 = arith.addf %72, %73 : vector<1x64xf32>
    %cst_92 = arith.constant 0.000000e+00 : f32
    %75 = vector.broadcast %cst_92 : f32 to vector<1x64xf32>
    %76 = arith.subf %75, %74 : vector<1x64xf32>
    %77 = math.exp %76 : vector<1x64xf32>
    %cst_93 = arith.constant 1.000000e+00 : f32
    %78 = vector.broadcast %cst_93 : f32 to vector<1x64xf32>
    %79 = arith.addf %78, %77 : vector<1x64xf32>
    %cst_94 = arith.constant 1.000000e+00 : f32
    %80 = vector.broadcast %cst_94 : f32 to vector<1x64xf32>
    %81 = arith.divf %80, %79 : vector<1x64xf32>
    %c0_95 = arith.constant 0 : index
    %c0_96 = arith.constant 0 : index
    %c0_97 = arith.constant 0 : index
    %c0_98 = arith.constant 0 : index
    %82 = vector.load %arg1[%c0_95, %c0_96, %c0_97, %c0_98] : memref<1x16x16x64xf32, #tpu.memory_space<vmem>>, vector<1x16x16x64xf32>
    %83 = vector.shape_cast %82 : vector<1x16x16x64xf32> to vector<16x16x64xf32>
    %84 = vector.shape_cast %83 : vector<16x16x64xf32> to vector<256x64xf32>
    %85 = vector.broadcast %81 : vector<1x64xf32> to vector<256x64xf32>
    %86 = arith.mulf %60, %85 : vector<256x64xf32>
    %87 = arith.addf %86, %84 : vector<256x64xf32>
    %cst_99 = arith.constant 0.000000e+00 : f32
    %88 = vector.broadcast %cst_99 : f32 to vector<256x64xf32>
    %89 = arith.maximumf %87, %88 : vector<256x64xf32>
    %90 = vector.shape_cast %89 : vector<256x64xf32> to vector<1x16x16x64xf32>
    %c0_100 = arith.constant 0 : index
    %c0_101 = arith.constant 0 : index
    %c0_102 = arith.constant 0 : index
    %c0_103 = arith.constant 0 : index
    %91 = vector.load %arg10[%c0_100, %c0_101, %c0_102, %c0_103] : memref<1x16x16x64xf32, #tpu.memory_space<vmem>>, vector<1x16x16x64xf32>
    tpu.vector_store %arg10[%c0_100, %c0_101, %c0_102, %c0_103], %90 {strides = array<i32>} : memref<1x16x16x64xf32, #tpu.memory_space<vmem>>, vector<1x16x16x64xf32>,
    return
  }
  func.func @transform_0(%arg0: i32) -> (i32, i32, i32, i32) {
    %c0_i32 = arith.constant 0 : i32
    %c0_i32_0 = arith.constant 0 : i32
    %c0_i32_1 = arith.constant 0 : i32
    %c0_i32_2 = arith.constant 0 : i32
    return %arg0, %c0_i32, %c0_i32_0, %c0_i32_1 : i32, i32, i32, i32
  }
  func.func @transform_1(%arg0: i32) -> (i32, i32) {
    %c0_i32 = arith.constant 0 : i32
    %c0_i32_0 = arith.constant 0 : i32
    %c0_i32_1 = arith.constant 0 : i32
    return %c0_i32, %c0_i32_0 : i32, i32
  }
  func.func @transform_2(%arg0: i32) -> (i32, i32) {
    %c0_i32 = arith.constant 0 : i32
    %c0_i32_0 = arith.constant 0 : i32
    %c0_i32_1 = arith.constant 0 : i32
    return %c0_i32, %c0_i32_0 : i32, i32
  }
  func.func @transform_3(%arg0: i32) -> (i32, i32) {
    %c0_i32 = arith.constant 0 : i32
    %c0_i32_0 = arith.constant 0 : i32
    %c0_i32_1 = arith.constant 0 : i32
    return %c0_i32, %c0_i32_0 : i32, i32
  }
  func.func @transform_4(%arg0: i32) -> (i32, i32) {
    %c0_i32 = arith.constant 0 : i32
    %c0_i32_0 = arith.constant 0 : i32
    %c0_i32_1 = arith.constant 0 : i32
    return %c0_i32, %c0_i32_0 : i32, i32
  }
  func.func @transform_5(%arg0: i32) -> (i32, i32) {
    %c0_i32 = arith.constant 0 : i32
    %c0_i32_0 = arith.constant 0 : i32
    %c0_i32_1 = arith.constant 0 : i32
    return %c0_i32, %c0_i32_0 : i32, i32
  }
  func.func @transform_6(%arg0: i32) -> (i32, i32) {
    %c0_i32 = arith.constant 0 : i32
    %c0_i32_0 = arith.constant 0 : i32
    %c0_i32_1 = arith.constant 0 : i32
    return %c0_i32, %c0_i32_0 : i32, i32
  }
  func.func @transform_7(%arg0: i32) -> (i32, i32) {
    %c0_i32 = arith.constant 0 : i32
    %c0_i32_0 = arith.constant 0 : i32
    %c0_i32_1 = arith.constant 0 : i32
    return %c0_i32, %c0_i32_0 : i32, i32
  }
  func.func @transform_8(%arg0: i32) -> (i32, i32) {
    %c0_i32 = arith.constant 0 : i32
    %c0_i32_0 = arith.constant 0 : i32
    %c0_i32_1 = arith.constant 0 : i32
    return %c0_i32, %c0_i32_0 : i32, i32
  }
  func.func @transform_9(%arg0: i32) -> (i32, i32, i32, i32) {
    %c0_i32 = arith.constant 0 : i32
    %c0_i32_0 = arith.constant 0 : i32
    %c0_i32_1 = arith.constant 0 : i32
    %c0_i32_2 = arith.constant 0 : i32
    return %arg0, %c0_i32, %c0_i32_0, %c0_i32_1 : i32, i32, i32, i32
  }
}

</mosaic_0001>

<bundles_post_ra>
// kernel: se_basic_block_forward.1
= control target key start
LH: loop header
LB: loop body
LE: loop exit
PB: predicated region body
PF: predicated region fallthrough
CT: control target
= control target key end

     0   :  { %14 = vsyncpa [#allocation5], 0  ;;  %s13877_s0 = inlined_call_operand.vmem [shape: f32[2,16,16,64], index: 0, kind: input, shape index: {}]   ;;  %s13878_s1 = inlined_call_operand.vmem [shape: bf16[576,64], index: 1, kind: input, shape index: {}]   ;;  %s13879_s2 = inlined_call_operand.vmem [shape: f32[1,64], index: 2, kind: input, shape index: {}]   ;;  %s13880_s3 = inlined_call_operand.vmem [shape: bf16[576,64], index: 3, kind: input, shape index: {}]   ;;  %s13881_s4 = inlined_call_operand.vmem [shape: f32[1,64], index: 4, kind: input, shape index: {}]   ;;  %s13882_s5 = inlined_call_operand.vmem [shape: f32[64,4], index: 5, kind: input, shape index: {}]   ;;  %s13883_s6 = inlined_call_operand.vmem [shape: f32[1,4], index: 6, kind: input, shape index: {}]   ;;  %s13884_s7 = inlined_call_operand.vmem [shape: f32[4,64], index: 7, kind: input, shape index: {}]   ;;  %s13885_s8 = inlined_call_operand.vmem [shape: f32[1,64], index: 8, kind: input, shape index: {}]   ;;  %s13886_s9 = inlined_call_operand.hbm [shape: f32[2,16,16,64], index: 9, kind: output, shape index: {}]  }
   0x1   :  { %16 = vsyncpa [#allocation5 + $0x1], 0  ;;  %s10114_s30 = smov 0   ;;  %s10116_s10 = smov 0  }
   0x2   :  { %s10118_s11 = smov 0   ;;  %s10120_s12 = smov 0  }
   0x3 LB: > { %s10135_s13 = sadd.s32 4294967295, %s10058_s12   ;;  %s8790_s14 = sadd.s32 4294967294, %s10058_s12   ;;  %s10058_s12 = sphi %s10120_s12, %s14045_s12   ;;  %s10054_s11 = sphi %s10118_s11, %s14044_s11   ;;  %s10050_s10 = sphi %s10116_s10, %s14043_s10   ;;  %s10046_s30 = sphi %s10114_s30, %s14042_s30  }
   0x4   : > { %s10139_s15 = sadd.s32 1, %s10058_s12   ;;  %s223_s16 = sadd.s32 1, %s10054_s11 }
   0x5   : > { %s220_s17 = ssub.s32 %s10058_s12, %s10139_s15  ;;  %p233_p0 = scmp.ne.s32.totalorder %s10054_s11, %s10050_s10 }
   0x6   : > { %p221_p1 = scmp.eq.s32.totalorder %s220_s17, 0  ;;  %p234_p2 = scmp.eq.s32.totalorder %s10135_s13, 1 }
   0x7   : > { %p239_p3 = scmp.ne.s32.totalorder %s10050_s10, %s10046_s30  ;;  %p240_p4 = scmp.eq.s32.totalorder %s8790_s14, 1 }
   0x8   : > { %s10150_s18 = scalar_select %p221_p1, %s10054_s11, %s223_s16  }
   0x9   : > { %p10152_p5 = por %p234_p2, %p233_p0  ;;  %p10156_p6 = por %p240_p4, %p239_p3 }
   0xa   : > { %p8793_p7 = scmp.ge.s32.totalorder %s10058_s12, 1  ;;  %p290_p8 = scmp.lt.s32.totalorder %s10058_s12, 3 }
   0xc   : > { %p291_p9 = pnand %p8793_p7, %p290_p8 }
   0xe   : > { %294 = sbr.rel (%p291_p9) target bundleno = 1697 (0x6a1), region = 56 }
  0x13   : > { %vm332_vm0 = vcmask 519168   ;;  %vm335_vm1 = vcmask 516096   ;;  %v10060_v0 = vmov 0   ;;  %vm941_vm2 = vsmask.f32 3328  ;;  %s10061_s21 = smov 64  }
  0x14   : > { %333 = vst.msk [vmem:[#allocation2] sm:$0xf] %vm332_vm0, %v10060_v0  ;;  %vm942_vm3 = vsmask.f32 7440  ;;  %p326_p10 = scmp.lt.s32.totalorder %s10135_s13, 1  ;;  %vm3332_vm11 = vcmask 523264  }
  0x15   : > { %334 = vst.msk [vmem:[#allocation2 + $0x4] sm:$0xf] %vm332_vm0, %v10060_v0  ;;  %vm10190_vm4 = vmor %vm941_vm2, %vm942_vm3  ;;  %vm452_vm5 = vsmask.f32 256  ;;  %vm453_vm6 = vsmask.f32 4368 }
  0x16   : > { %336 = vst.msk [vmem:[#allocation2 + $0x8] sm:$0x1] %vm335_vm1, %v10060_v0  ;;  %s327_s22 = scalar_select %p326_p10, %s10135_s13, 1  ;;  %vm777_vm7 = vsmask.f32 7938  ;;  %vm10405_vm8 = vmor %vm452_vm5, %vm453_vm6  ;;  %vm1392_vm12 = vcmask 1042432  }
  0x17   : > { %337 = vst.msk [vmem:[#allocation2 + $0xc] sm:$0xf] %vm332_vm0, %v10060_v0  ;;  %vm10420_vm9 = vmand %vm332_vm0, %vm777_vm7  ;;  %vm1393_vm13 = vcmask 1046532   ;;  %vm8508_vm15 = vcmask 1043456  }
  0x18   : > { %338 = vst.msk [vmem:[#allocation2 + $0x10] sm:$0xf] %vm332_vm0, %v10060_v0  ;;  %s9605_s23 = sshll.u32 %s327_s22, 8  ;;  %vm10439_vm10 = vmand %vm335_vm1, %vm452_vm5  ;;  %s9774_s22 = sshll.u32 %s10135_s13, 8 }
  0x19   : > { %339 = vst.msk [vmem:[#allocation2 + $0x14] sm:$0x1] %vm335_vm1, %v10060_v0  ;;  %s10332_s26 = scalar_lea.vmem %s13877_s0, %s9605_s23  ;;  %vm10953_vm14 = vmor %vm1392_vm12, %vm1393_vm13 }
  0x1a   : > { %340 = vst.msk [vmem:[#allocation2 + $0x18] sm:$0xf] %vm332_vm0, %v10060_v0  ;;  %v404_v24 = vld [vmem:[%s10332_s26 + $0x80] sm:$0xff]  ;;  %v405_v25 = vld [vmem:[%s10332_s26 + $0x88] sm:$0xff]  ;;  %v406_v40 = vld [vmem:[%s10332_s26 + $0x90] sm:$0xff] }
  0x1b   : > { %v893_v1 = vld [vmem:[#allocation2] sm:$0xf]  ;;  %341 = vst.msk [vmem:[#allocation2 + $0x1c] sm:$0xf] %vm332_vm0, %v10060_v0  ;;  %v389_v27 = vld [vmem:[%s10332_s26 + $0x8] sm:$0xff]  ;;  %v436_v28 = vpack.c.bf16 %v404_v24, %v404_v24  ;;  %v437_v29 = vpack.c.bf16 %v405_v25, %v405_v25  ;;  %v407_v41 = vld [vmem:[%s10332_s26 + $0x98] sm:$0xff]  ;;  %v438_v45 = vpack.c.bf16 %v406_v40, %v406_v40 }
  0x1c   : > { %v894_v2 = vld [vmem:[#allocation2 + $0x4] sm:$0xf]  ;;  %v945_v3 = vshrl.u32 %v893_v1, 16  ;;  %v948_v4 = vshll.u32 %v893_v1, 16  ;;  %342 = vst.msk [vmem:[#allocation2 + $0x20] sm:$0x1] %vm335_vm1, %v10060_v0  ;;  %v421_v31 = vpack.c.bf16 %v389_v27, %v389_v27  ;;  %v10385_v51 = vpack.c.bf16 %v407_v41, %v407_v41 }
  0x1d   : > { %v925_v5 = vld [vmem:[#allocation2 + $0x8] sm:$0x1]  ;;  %v954_v6 = vshll.u32 %v894_v2, 16  ;;  %v958_v7 = vshrl.u32 %v894_v2, 16  ;;  %343 = vst.msk [vmem:[#allocation2 + $0x24] sm:$0xf] %vm332_vm0, %v10060_v0 }
  0x1e   : > { %v947_v8 = vrot.slane %v945_v3, 4  ;;  %v950_v9 = vrot.slane %v948_v4, 5  ;;  %v964_v10 = vshll.u32 %v925_v5, 16  ;;  %344 = vst.msk [vmem:[#allocation2 + $0x28] sm:$0xf] %vm332_vm0, %v10060_v0  ;;  %v388_v26 = vld [vmem:[%s10332_s26] sm:$0xff] }
  0x1f   : > { %v956_v11 = vrot.slane %v954_v6, 5  ;;  %v960_v12 = vrot.slane %v958_v7, 4  ;;  %345 = vst.msk [vmem:[#allocation2 + $0x2c] sm:$0x1] %vm335_vm1, %v10060_v0  ;;  %v10354_v30 = vpack.c.bf16 %v388_v26, %v388_v26  ;;  %v392_v32 = vld [vmem:[%s10332_s26 + $0x20] sm:$0xff]  ;;  %v393_v33 = vld [vmem:[%s10332_s26 + $0x28] sm:$0xff] }
  0x20   : > { %v951_v13 = vor.u32 %v950_v9, %v947_v8  ;;  %346 = vst.msk [vmem:[#allocation2 + $0x30] sm:$0xf] %vm332_vm0, %v10060_v0  ;;  %v966_v16 = vrot.slane %v964_v10, 5  ;;  %v592_v34 = vshrl.u32 %v436_v28, 16  ;;  %v600_v35 = vshrl.u32 %v437_v29, 16  ;;  %v394_v54 = vld [vmem:[%s10332_s26 + $0x30] sm:$0xff] }
  0x21   : > { %v961_v15 = vor.u32 %v960_v12, %v956_v11  ;;  %347 = vst.msk [vmem:[#allocation2 + $0x34] sm:$0xf] %vm332_vm0, %v10060_v0  ;;  %v10364_v36 = vpack.c.bf16 %v392_v32, %v392_v32  ;;  %v10366_v37 = vpack.c.bf16 %v393_v33, %v393_v33  ;;  %v456_v38 = vshrl.u32 %v10354_v30, 16  ;;  %v395_v55 = vld [vmem:[%s10332_s26 + $0x38] sm:$0xff]  ;;  %v10424_v10 = vld [vmem:[#allocation2 + $0xc] sm:$0xf] }
  0x22   : > { %v952_v17 = vrot.slane %v951_v13, 4  ;;  %348 = vst.msk [vmem:[#allocation2 + $0x38] sm:$0x1] %vm335_vm1, %v10060_v0  ;;  %v464_v39 = vshrl.u32 %v421_v31, 16  ;;  %v594_v42 = vrot.slane %v592_v34, 7  ;;  %v10377_v43 = vrot.slane %v600_v35, 7 }
  0x23   : > { %v962_v18 = vrot.slane %v961_v15, 4  ;;  %349 = vst.msk [vmem:[#allocation2 + $0x3c] sm:$0xf] %vm332_vm0, %v10060_v0  ;;  %v603_v44 = vshll.u32 %v437_v29, 16  ;;  %v490_v46 = vshrl.u32 %v10364_v36, 16  ;;  %v498_v47 = vshrl.u32 %v10366_v37, 16 }
  0x24   : > { %v957_v19 = vsel %vm10190_vm4, %v952_v17, %v956_v11  ;;  %350 = vst.msk [vmem:[#allocation2 + $0x40] sm:$0xf] %vm332_vm0, %v10060_v0  ;;  %v595_v48 = vshll.u32 %v436_v28, 16  ;;  %v458_v49 = vrot.slane %v456_v38, 7  ;;  %v466_v50 = vrot.slane %v464_v39, 7  ;;  %v390_v38 = vld [vmem:[%s10332_s26 + $0x10] sm:$0xff] }
  0x25   : > { %v967_v20 = vsel %vm10190_vm4, %v962_v18, %v966_v16  ;;  %v2788_v21 = vunpack.c.l.b16 %v957_v19  ;;  %351 = vst.msk [vmem:[#allocation2 + $0x44] sm:$0x1] %vm335_vm1, %v10060_v0  ;;  %v467_v52 = vshll.u32 %v421_v31, 16  ;;  %v609_v53 = vshrl.u32 %v438_v45, 16 }
  0x26   : > { %v2789_v22 = vunpack.c.l.b16 %v967_v20  ;;  %352 = vst.msk [vmem:[#allocation2 + $0x48] sm:$0xf] %vm332_vm0, %v10060_v0  ;;  %v598_v56 = vrot.slane %v594_v42, 4  ;;  %v605_v57 = vor.u32 %v603_v44, %v10377_v43  ;;  %v607_v58 = vrot.slane %v10377_v43, 4  ;;  %v785_v20 = vld [vmem:[#allocation2 + $0x14] sm:$0x1] }
  0x27   : > { %353 = vst.msk [vmem:[#allocation2 + $0x4c] sm:$0xf] %vm332_vm0, %v10060_v0  ;;  %v459_v59 = vshll.u32 %v10354_v30, 16  ;;  %v492_v60 = vrot.slane %v490_v46, 7  ;;  %v10398_v61 = vrot.slane %v498_v47, 7  ;;  %v501_v62 = vshll.u32 %v10366_v37, 16 }
  0x28   : > { %v2820_v23 = vpack.c.b16 %v2789_v22, %v2788_v21  ;;  %354 = vst.msk [vmem:[#allocation2 + $0x50] sm:$0x1] %vm335_vm1, %v10060_v0  ;;  %v426_v63 = vpack.c.bf16 %v394_v54, %v394_v54  ;;  %v10409_v2 = vor.u32 %v595_v48, %v594_v42  ;;  %v462_v4 = vrot.slane %v458_v49, 4  ;;  %v397_v37 = vld [vmem:[%s10332_s26 + $0x48] sm:$0xff] }
  0x29   : > { %355 = vst.msk [vmem:[#allocation2 + $0x54] sm:$0xf] %vm332_vm0, %v10060_v0  ;;  %v617_v5 = vshrl.u32 %v10385_v51, 16  ;;  %v10414_v6 = vpack.c.bf16 %v395_v55, %v395_v55  ;;  %v469_v9 = vor.u32 %v467_v52, %v466_v50  ;;  %v10426_v11 = vrot.slane %v609_v53, 7  ;;  %v409_v52 = vld [vmem:[%s10332_s26 + $0xa8] sm:$0xff] }
  0x2a   : > { %2836 = vrot.lane.b32.xlu0 %v2820_v23, %s10061_s21  ;;  %356 = vst.msk [vmem:[#allocation2 + $0x58] sm:$0xf] %vm332_vm0, %v10060_v0  ;;  %v612_v12 = vshll.u32 %v438_v45, 16  ;;  %v10430_v13 = vor.u32 %v459_v59, %v458_v49  ;;  %v471_v15 = vrot.slane %v466_v50, 4  ;;  %v493_v16 = vshll.u32 %v10364_v36, 16  ;;  %v396_v36 = vld [vmem:[%s10332_s26 + $0x40] sm:$0xff] }
  0x2b   : > { %357 = vst.msk [vmem:[#allocation2 + $0x5c] sm:$0x1] %vm335_vm1, %v10060_v0  ;;  %v507_v17 = vshrl.u32 %v426_v63, 16  ;;  %v606_v18 = vsel %vm10405_vm8, %v598_v56, %v605_v57  ;;  %v13913_v19 = vmov 0  ;;  %v496_v21 = vrot.slane %v492_v60, 4  ;;  %v391_v57 = vld [vmem:[%s10332_s26 + $0x18] sm:$0xff] }
  0x2c   : > { %358 = vst.msk [vmem:[#allocation2 + $0x60] sm:$0xf] %vm332_vm0, %v10060_v0  ;;  %v13914_v19 = vsel %vm10439_vm10, 4294967295, %v13913_v19  ;;  %v503_v22 = vor.u32 %v501_v62, %v10398_v61  ;;  %v10450_v24 = vrot.slane %v617_v5, 7  ;;  %v620_v25 = vshll.u32 %v10385_v51, 16  ;;  %v408_v51 = vld [vmem:[%s10332_s26 + $0xa0] sm:$0xff] }
  0x2d   : > { %359 = vst.msk [vmem:[#allocation2 + $0x64] sm:$0xf] %vm332_vm0, %v10060_v0  ;;  %v515_v26 = vshrl.u32 %v10414_v6, 16  ;;  %v10458_v27 = vsel %vm10405_vm8, %v462_v4, %v469_v9  ;;  %v10461_v28 = vor.u32 %v612_v12, %v10426_v11  ;;  %v10465_v30 = vrot.slane %v507_v17, 7  ;;  %v806_v9 = vld [vmem:[#allocation2 + $0x38] sm:$0x1] }
  0x2e   : > { %360 = vst.msk [vmem:[#allocation2 + $0x68] sm:$0x1] %vm335_vm1, %v10060_v0  ;;  %v510_v31 = vshll.u32 %v426_v63, 16  ;;  %v780_v33 = vsel %vm10420_vm9, %v10430_v13, %v10424_v10  ;;  %v10477_v34 = vsel %vm10439_vm10, %v471_v15, %v785_v20  ;;  %v10479_v35 = vor.u32 %v493_v16, %v492_v60  ;;  %v799_v63 = vld [vmem:[#allocation2 + $0x2c] sm:$0x1] }
  0x2f   : > { %361 = vst.msk [vmem:[#allocation2 + $0x6c] sm:$0xf] %vm332_vm0, %v10060_v0  ;;  %v10488_v39 = vsel %vm10405_vm8, %v496_v21, %v503_v22  ;;  %v428_v40 = vpack.c.bf16 %v396_v36, %v396_v36  ;;  %v429_v41 = vpack.c.bf16 %v397_v37, %v397_v37  ;;  %v422_v42 = vpack.c.bf16 %v390_v38, %v390_v38  ;;  %v10524_v21 = vld [vmem:[#allocation2 + $0x3c] sm:$0xf] }
  0x30   : > { %362 = vst.msk [vmem:[#allocation2 + $0x70] sm:$0xf] %vm332_vm0, %v10060_v0  ;;  %v615_v43 = vrot.slane %v10426_v11, 4  ;;  %v622_v44 = vor.u32 %v620_v25, %v10450_v24  ;;  %v505_v45 = vrot.slane %v10398_v61, 4  ;;  %v517_v46 = vrot.slane %v515_v26, 7 }
  0x31   : > { %363 = vst.msk [vmem:[#allocation2 + $0x74] sm:$0x1] %vm335_vm1, %v10060_v0  ;;  %v10502_v48 = vor.u32 %v510_v31, %v10465_v30  ;;  %v513_v49 = vrot.slane %v10465_v30, 4  ;;  %v518_v50 = vshll.u32 %v10414_v6, 16  ;;  %v440_v54 = vpack.c.bf16 %v408_v51, %v408_v51 }
  0x32   : > { %364 = vst.msk [vmem:[#allocation2 + $0x78] sm:$0xf] %vm332_vm0, %v10060_v0  ;;  %v522_v53 = vrot.slane %v517_v46, 4  ;;  %v441_v55 = vpack.c.bf16 %v409_v52, %v409_v52  ;;  %v524_v56 = vshrl.u32 %v428_v40, 16  ;;  %v527_v59 = vshll.u32 %v428_v40, 16 }
  0x33   : > { %365 = vst.msk [vmem:[#allocation2 + $0x7c] sm:$0xf] %vm332_vm0, %v10060_v0  ;;  %v532_v60 = vshrl.u32 %v429_v41, 16  ;;  %v535_v61 = vshll.u32 %v429_v41, 16  ;;  %v473_v62 = vshrl.u32 %v422_v42, 16  ;;  %v476_v5 = vshll.u32 %v422_v42, 16 }
  0x34   : > { %366 = vst.msk [vmem:[#allocation2 + $0x80] sm:$0x1] %vm335_vm1, %v10060_v0  ;;  %v526_v4 = vrot.slane %v524_v56, 7  ;;  %v520_v6 = vor.u32 %v518_v50, %v517_v46  ;;  %v10516_v11 = vpack.c.bf16 %v391_v57, %v391_v57  ;;  %v629_v13 = vshll.u32 %v440_v54, 16  ;;  %v813_v40 = vld [vmem:[#allocation2 + $0x44] sm:$0x1] }
  0x35   : > { %367 = vst.msk [vmem:[#allocation2 + $0x84] sm:$0xf] %vm332_vm0, %v10060_v0  ;;  %v534_v10 = vrot.slane %v532_v60, 7  ;;  %v637_v16 = vshll.u32 %v441_v55, 16  ;;  %v624_v30 = vrot.slane %v10450_v24, 4  ;;  %v800_v31 = vsel %vm10439_vm10, %v505_v45, %v799_v63  ;;  %v399_v56 = vld [vmem:[%s10332_s26 + $0x58] sm:$0xff] }
  0x36   : > { %368 = vst.msk [vmem:[#allocation2 + $0x88] sm:$0xf] %vm332_vm0, %v10060_v0  ;;  %v10411_v3 = vld [vmem:[#allocation2 + $0x6c] sm:$0xf]  ;;  %v10522_v17 = vor.u32 %v527_v59, %v526_v4 }
  0x37   : > { %369 = vst.msk [vmem:[#allocation2 + $0x8c] sm:$0x1] %vm335_vm1, %v10060_v0  ;;  %v838_v23 = vsel %vm10420_vm9, %v10409_v2, %v10411_v3  ;;  %v626_v2 = vshrl.u32 %v440_v54, 16  ;;  %v634_v3 = vshrl.u32 %v441_v55, 16  ;;  %v537_v20 = vor.u32 %v535_v61, %v534_v10  ;;  %v401_v24 = vld [vmem:[%s10332_s26 + $0x68] sm:$0xff] }
  0x38   : > { %370 = vst.msk [vmem:[#allocation2 + $0x90] sm:$0xf] %vm332_vm0, %v10060_v0  ;;  %v841_v8 = vld [vmem:[#allocation2 + $0x74] sm:$0x1]  ;;  %v810_v42 = vsel %vm10420_vm9, %v10522_v17, %v10524_v21  ;;  %v484_v61 = vshll.u32 %v10516_v11, 16 }
  0x39   : > { %371 = vst.msk [vmem:[#allocation2 + $0x94] sm:$0xf] %vm332_vm0, %v10060_v0  ;;  %v10463_v29 = vld [vmem:[#allocation2 + $0x78] sm:$0xf]  ;;  %v842_v32 = vsel %vm10439_vm10, %v607_v58, %v841_v8  ;;  %v795_v58 = vld [vmem:[#allocation2 + $0x24] sm:$0xf] }
  0x3a   : > { %372 = vst.msk [vmem:[#allocation2 + $0x98] sm:$0x1] %vm335_vm1, %v10060_v0  ;;  %v845_v47 = vsel %vm10420_vm9, %v10461_v28, %v10463_v29  ;;  %v10514_v8 = vld [vmem:[#allocation2 + $0x30] sm:$0xf]  ;;  %v628_v12 = vrot.slane %v626_v2, 7  ;;  %v10520_v15 = vrot.slane %v634_v3, 7  ;;  %v796_v25 = vsel %vm10420_vm9, %v10479_v35, %v795_v58 }
  0x3b   : > { %373 = vst.msk [vmem:[#allocation2 + $0x9c] sm:$0xf] %vm332_vm0, %v10060_v0  ;;  %v10537_v29 = vld [vmem:[#allocation2 + $0x18] sm:$0xf]  ;;  %v521_v35 = vsel %vm10405_vm8, %v513_v49, %v520_v6  ;;  %v803_v36 = vsel %vm10420_vm9, %v10502_v48, %v10514_v8 }
  0x3c   : > { %374 = vst.msk [vmem:[#allocation2 + $0xa0] sm:$0xf] %vm332_vm0, %v10060_v0  ;;  %v632_v26 = vrot.slane %v628_v12, 4  ;;  %v639_v28 = vor.u32 %v637_v16, %v10520_v15  ;;  %v10554_v37 = vld [vmem:[#allocation2 + $0x84] sm:$0xf] }
  0x3d   : > { %375 = vst.msk [vmem:[#allocation2 + $0xa4] sm:$0x1] %vm335_vm1, %v10060_v0 }
  0x3e   : > { %376 = vst.msk [vmem:[#allocation2 + $0xa8] sm:$0xf] %vm332_vm0, %v10060_v0  ;;  %v640_v49 = vsel %vm10405_vm8, %v632_v26, %v639_v28  ;;  %v10588_v26 = vpack.c.bf16 %v399_v56, %v399_v56 }
  0x3f   : > { %377 = vst.msk [vmem:[#allocation2 + $0xac] sm:$0xf] %vm332_vm0, %v10060_v0 }
  0x40   : > { %378 = vst.msk [vmem:[#allocation2 + $0xb0] sm:$0x1] %vm335_vm1, %v10060_v0 }
  0x41   : > { %379 = vst.msk [vmem:[#allocation2 + $0xb4] sm:$0xf] %vm332_vm0, %v10060_v0 }
  0x42   : > { %380 = vst.msk [vmem:[#allocation2 + $0xb8] sm:$0xf] %vm332_vm0, %v10060_v0 }
  0x43   : > { %381 = vst.msk [vmem:[#allocation2 + $0xbc] sm:$0x1] %vm335_vm1, %v10060_v0 }
  0x44   : > { %382 = vst.msk [vmem:[#allocation2 + $0xc0] sm:$0xf] %vm332_vm0, %v10060_v0 }
  0x45   : > { %383 = vst.msk [vmem:[#allocation2 + $0xc4] sm:$0xf] %vm332_vm0, %v10060_v0 }
  0x46   : > { %384 = vst.msk [vmem:[#allocation2 + $0xc8] sm:$0x1] %vm335_vm1, %v10060_v0 }
  0x47   : > { %385 = vst.msk [vmem:[#allocation2 + $0xcc] sm:$0xf] %vm332_vm0, %v10060_v0 }
  0x48   : > { %386 = vst.msk [vmem:[#allocation2 + $0xd0] sm:$0xf] %vm332_vm0, %v10060_v0 }
  0x49   : > { %387 = vst.msk [vmem:[#allocation2 + $0xd4] sm:$0x1] %vm335_vm1, %v10060_v0 }
  0x4a   : > { %4406 = vst.msk [vmem:[#allocation3] sm:$0xf] %vm332_vm0, %v10060_v0 }
  0x4b   : > { %4407 = vst.msk [vmem:[#allocation3 + $0x4] sm:$0xf] %vm332_vm0, %v10060_v0 }
  0x4c   : > { %4408 = vst.msk [vmem:[#allocation3 + $0x8] sm:$0x1] %vm335_vm1, %v10060_v0 }
  0x4d   : > { %4409 = vst.msk [vmem:[#allocation3 + $0xc] sm:$0xf] %vm332_vm0, %v10060_v0 }
  0x4e   : > { %4410 = vst.msk [vmem:[#allocation3 + $0x10] sm:$0xf] %vm332_vm0, %v10060_v0 }
  0x4f   : > { %4411 = vst.msk [vmem:[#allocation3 + $0x14] sm:$0x1] %vm335_vm1, %v10060_v0 }
  0x50   : > { %4412 = vst.msk [vmem:[#allocation3 + $0x18] sm:$0xf] %vm332_vm0, %v10060_v0 }
  0x51   : > { %4413 = vst.msk [vmem:[#allocation3 + $0x1c] sm:$0xf] %vm332_vm0, %v10060_v0 }
  0x52   : > { %4414 = vst.msk [vmem:[#allocation3 + $0x20] sm:$0x1] %vm335_vm1, %v10060_v0 }
  0x53   : > { %4415 = vst.msk [vmem:[#allocation3 + $0x24] sm:$0xf] %vm332_vm0, %v10060_v0 }
  0x54   : > { %4416 = vst.msk [vmem:[#allocation3 + $0x28] sm:$0xf] %vm332_vm0, %v10060_v0 }
  0x55   : > { %4417 = vst.msk [vmem:[#allocation3 + $0x2c] sm:$0x1] %vm335_vm1, %v10060_v0 }
  0x56   : > { %4418 = vst.msk [vmem:[#allocation3 + $0x30] sm:$0xf] %vm332_vm0, %v10060_v0 }
  0x57   : > { %4419 = vst.msk [vmem:[#allocation3 + $0x34] sm:$0xf] %vm332_vm0, %v10060_v0 }
  0x58   : > { %4420 = vst.msk [vmem:[#allocation3 + $0x38] sm:$0x1] %vm335_vm1, %v10060_v0 }
  0x59   : > { %4421 = vst.msk [vmem:[#allocation3 + $0x3c] sm:$0xf] %vm332_vm0, %v10060_v0 }
  0x5a   : > { %4422 = vst.msk [vmem:[#allocation3 + $0x40] sm:$0xf] %vm332_vm0, %v10060_v0 }
  0x5b   : > { %4423 = vst.msk [vmem:[#allocation3 + $0x44] sm:$0x1] %vm335_vm1, %v10060_v0 }
  0x5c   : > { %4424 = vst.msk [vmem:[#allocation3 + $0x48] sm:$0xf] %vm332_vm0, %v10060_v0 }
  0x5d   : > { %4425 = vst.msk [vmem:[#allocation3 + $0x4c] sm:$0xf] %vm332_vm0, %v10060_v0 }
  0x5e   : > { %4426 = vst.msk [vmem:[#allocation3 + $0x50] sm:$0x1] %vm335_vm1, %v10060_v0 }
  0x5f   : > { %4427 = vst.msk [vmem:[#allocation3 + $0x54] sm:$0xf] %vm332_vm0, %v10060_v0 }
  0x60   : > { %4428 = vst.msk [vmem:[#allocation3 + $0x58] sm:$0xf] %vm332_vm0, %v10060_v0 }
  0x61   : > { %4429 = vst.msk [vmem:[#allocation3 + $0x5c] sm:$0x1] %vm335_vm1, %v10060_v0 }
  0x62   : > { %4430 = vst.msk [vmem:[#allocation3 + $0x60] sm:$0xf] %vm332_vm0, %v10060_v0 }
  0x63   : > { %4431 = vst.msk [vmem:[#allocation3 + $0x64] sm:$0xf] %vm332_vm0, %v10060_v0 }
  0x64   : > { %4432 = vst.msk [vmem:[#allocation3 + $0x68] sm:$0x1] %vm335_vm1, %v10060_v0 }
  0x65   : > { %4433 = vst.msk [vmem:[#allocation3 + $0x6c] sm:$0xf] %vm332_vm0, %v10060_v0 }
  0x66   : > { %4434 = vst.msk [vmem:[#allocation3 + $0x70] sm:$0xf] %vm332_vm0, %v10060_v0 }
  0x67   : > { %4435 = vst.msk [vmem:[#allocation3 + $0x74] sm:$0x1] %vm335_vm1, %v10060_v0 }
  0x68   : > { %4436 = vst.msk [vmem:[#allocation3 + $0x78] sm:$0xf] %vm332_vm0, %v10060_v0 }
  0x69   : > { %4437 = vst.msk [vmem:[#allocation3 + $0x7c] sm:$0xf] %vm332_vm0, %v10060_v0 }
  0x6a   : > { %4438 = vst.msk [vmem:[#allocation3 + $0x80] sm:$0x1] %vm335_vm1, %v10060_v0 }
  0x6b   : > { %4439 = vst.msk [vmem:[#allocation3 + $0x84] sm:$0xf] %vm332_vm0, %v10060_v0 }
  0x6c   : > { %4440 = vst.msk [vmem:[#allocation3 + $0x88] sm:$0xf] %vm332_vm0, %v10060_v0 }
  0x6d   : > { %4441 = vst.msk [vmem:[#allocation3 + $0x8c] sm:$0x1] %vm335_vm1, %v10060_v0 }
  0x6e   : > { %4442 = vst.msk [vmem:[#allocation3 + $0x90] sm:$0xf] %vm332_vm0, %v10060_v0 }
  0x6f   : > { %4443 = vst.msk [vmem:[#allocation3 + $0x94] sm:$0xf] %vm332_vm0, %v10060_v0 }
  0x70   : > { %4444 = vst.msk [vmem:[#allocation3 + $0x98] sm:$0x1] %vm335_vm1, %v10060_v0 }
  0x71   : > { %4445 = vst.msk [vmem:[#allocation3 + $0x9c] sm:$0xf] %vm332_vm0, %v10060_v0 }
  0x72   : > { %4446 = vst.msk [vmem:[#allocation3 + $0xa0] sm:$0xf] %vm332_vm0, %v10060_v0 }
  0x73   : > { %4447 = vst.msk [vmem:[#allocation3 + $0xa4] sm:$0x1] %vm335_vm1, %v10060_v0 }
  0x74   : > { %4448 = vst.msk [vmem:[#allocation3 + $0xa8] sm:$0xf] %vm332_vm0, %v10060_v0 }
  0x75   : > { %4449 = vst.msk [vmem:[#allocation3 + $0xac] sm:$0xf] %vm332_vm0, %v10060_v0 }
  0x76   : > { %4450 = vst.msk [vmem:[#allocation3 + $0xb0] sm:$0x1] %vm335_vm1, %v10060_v0 }
  0x77   : > { %4451 = vst.msk [vmem:[#allocation3 + $0xb4] sm:$0xf] %vm332_vm0, %v10060_v0 }
  0x78   : > { %13915 = vst [vmem:[#allocation7_spill] sm:$0xff] %v13914_v19 }
  0x79   : > { %4452 = vst.msk [vmem:[#allocation3 + $0xb8] sm:$0xf] %vm332_vm0, %v10060_v0 }
  0x7a   : > { %4453 = vst.msk [vmem:[#allocation3 + $0xbc] sm:$0x1] %vm335_vm1, %v10060_v0 }
  0x7b   : > { %4454 = vst.msk [vmem:[#allocation3 + $0xc0] sm:$0xf] %vm332_vm0, %v10060_v0 }
  0x7c   : > { %4455 = vst.msk [vmem:[#allocation3 + $0xc4] sm:$0xf] %vm332_vm0, %v10060_v0 }
  0x7d   : > { %4456 = vst.msk [vmem:[#allocation3 + $0xc8] sm:$0x1] %vm335_vm1, %v10060_v0 }
  0x7e   : > { %4457 = vst.msk [vmem:[#allocation3 + $0xcc] sm:$0xf] %vm332_vm0, %v10060_v0 }
  0x7f   : > { %4458 = vst.msk [vmem:[#allocation3 + $0xd0] sm:$0xf] %vm332_vm0, %v10060_v0 }
  0x80   : > { %4459 = vst.msk [vmem:[#allocation3 + $0xd4] sm:$0x1] %vm335_vm1, %v10060_v0  ;;  %v10518_v0 = vrot.slane %v473_v62, 7 }
  0x81   : > { %839 = vst [vmem:[#allocation2 + $0x6c] sm:$0xf] %v838_v23  ;;  %v623_v23 = vsel %vm10405_vm8, %v615_v43, %v622_v44  ;;  %v481_v44 = vshrl.u32 %v10516_v11, 16 }
  0x82   : > { %840 = vst.msk [vmem:[#allocation2 + $0x70] sm:$0xf] %vm332_vm0, %v606_v18  ;;  %v530_v18 = vrot.slane %v526_v4, 4  ;;  %v10527_v22 = vor.u32 %v476_v5, %v10518_v0  ;;  %v479_v43 = vrot.slane %v10518_v0, 4 }
  0x83   : > { %843 = vst [vmem:[#allocation2 + $0x74] sm:$0x1] %v842_v32  ;;  %v539_v32 = vrot.slane %v534_v10, 4 }
  0x84   : > { %781 = vst [vmem:[#allocation2 + $0xc] sm:$0xf] %v780_v33  ;;  %v398_v33 = vld [vmem:[%s10332_s26 + $0x50] sm:$0xff]  ;;  %v10558_v38 = vsel %vm10405_vm8, %v530_v18, %v537_v20  ;;  %v789_v45 = vsel %vm10420_vm9, %v10527_v22, %v10537_v29 }
  0x85   : > { %782 = vst.msk [vmem:[#allocation2 + $0x10] sm:$0xf] %vm332_vm0, %v10458_v27  ;;  %v10543_v27 = vor.u32 %v629_v13, %v628_v12  ;;  %v10573_v50 = vpack.c.bf16 %v398_v33, %v398_v33  ;;  %v10583_v55 = vsel %vm10439_vm10, %v539_v32, %v813_v40  ;;  %v410_v18 = vld [vmem:[%s10332_s26 + $0xb0] sm:$0xff] }
  0x86   : > { %787 = vst [vmem:[#allocation2 + $0x14] sm:$0x1] %v10477_v34  ;;  %v807_v34 = vsel %vm10439_vm10, %v522_v53, %v806_v9 }
  0x87   : > { %846 = vst [vmem:[#allocation2 + $0x78] sm:$0xf] %v845_v47  ;;  %v852_v54 = vsel %vm10420_vm9, %v10543_v27, %v10554_v37  ;;  %v10591_v37 = vpack.c.bf16 %v410_v18, %v410_v18  ;;  %v541_v0 = vshrl.u32 %v10573_v50, 16 }
  0x88   : > { %v911_v41 = vld [vmem:[#allocation2 + $0x6c] sm:$0xf]  ;;  %847 = vst.msk [vmem:[#allocation2 + $0x7c] sm:$0xf] %vm332_vm0, %v623_v23 }
  0x89   : > { %v912_v46 = vld [vmem:[#allocation2 + $0x70] sm:$0xf]  ;;  %v1161_v47 = vshrl.u32 %v911_v41, 16  ;;  %v1164_v48 = vshll.u32 %v911_v41, 16  ;;  %797 = vst [vmem:[#allocation2 + $0x24] sm:$0xf] %v796_v25 }
  0x8a   : > { %v934_v51 = vld [vmem:[#allocation2 + $0x74] sm:$0x1]  ;;  %v1170_v52 = vshll.u32 %v912_v46, 16  ;;  %v1174_v53 = vshrl.u32 %v912_v46, 16  ;;  %798 = vst.msk [vmem:[#allocation2 + $0x28] sm:$0xf] %vm332_vm0, %v10488_v39 }
  0x8b   : > { %v1163_v57 = vrot.slane %v1161_v47, 4  ;;  %v1166_v58 = vrot.slane %v1164_v48, 5  ;;  %v1180_v59 = vshll.u32 %v934_v51, 16  ;;  %v895_v60 = vld [vmem:[#allocation2 + $0xc] sm:$0xf] }
  0x8c   : > { %v1172_v62 = vrot.slane %v1170_v52, 5  ;;  %v1176_v63 = vrot.slane %v1174_v53, 4  ;;  %v896_v39 = vld [vmem:[#allocation2 + $0x10] sm:$0xf]  ;;  %v969_v2 = vshrl.u32 %v895_v60, 16  ;;  %v972_v3 = vshll.u32 %v895_v60, 16 }
  0x8d   : > { %v1167_v4 = vor.u32 %v1166_v58, %v1163_v57  ;;  %v1182_v5 = vrot.slane %v1180_v59, 5  ;;  %v926_v6 = vld [vmem:[#allocation2 + $0x14] sm:$0x1]  ;;  %v978_v8 = vshll.u32 %v896_v39, 16  ;;  %v982_v9 = vshrl.u32 %v896_v39, 16  ;;  %v400_v58 = vld [vmem:[%s10332_s26 + $0x60] sm:$0xff] }
  0x8e   : > { %v1177_v10 = vor.u32 %v1176_v63, %v1172_v62  ;;  %v971_v12 = vrot.slane %v969_v2, 4  ;;  %v974_v13 = vrot.slane %v972_v3, 5  ;;  %v988_v16 = vshll.u32 %v926_v6, 16  ;;  %801 = vst [vmem:[#allocation2 + $0x2c] sm:$0x1] %v800_v31 }
  0x8f   : > { %v1168_v20 = vrot.slane %v1167_v4, 4  ;;  %v980_v23 = vrot.slane %v978_v8, 5  ;;  %v984_v25 = vrot.slane %v982_v9, 4  ;;  %804 = vst [vmem:[#allocation2 + $0x30] sm:$0xf] %v803_v36  ;;  %v10612_v8 = vpack.c.bf16 %v400_v58, %v400_v58 }
  0x90   : > { %v1178_v28 = vrot.slane %v1177_v10, 4  ;;  %v975_v27 = vor.u32 %v974_v13, %v971_v12  ;;  %v990_v32 = vrot.slane %v988_v16, 5  ;;  %v899_v33 = vld [vmem:[#allocation2 + $0x24] sm:$0xf]  ;;  %805 = vst.msk [vmem:[#allocation2 + $0x34] sm:$0xf] %vm332_vm0, %v521_v35 }
  0x91   : > { %v1173_v40 = vsel %vm10190_vm4, %v1168_v20, %v1172_v62  ;;  %v985_v31 = vor.u32 %v984_v25, %v980_v23  ;;  %v900_v41 = vld [vmem:[#allocation2 + $0x28] sm:$0xf]  ;;  %v1017_v46 = vshrl.u32 %v899_v33, 16  ;;  %v1020_v47 = vshll.u32 %v899_v33, 16  ;;  %808 = vst [vmem:[#allocation2 + $0x38] sm:$0x1] %v807_v34 }
  0x92   : > { %v1183_v36 = vsel %vm10190_vm4, %v1178_v28, %v1182_v5  ;;  %v2806_v48 = vunpack.c.l.b16 %v1173_v40  ;;  %v976_v51 = vrot.slane %v975_v27, 4  ;;  %v1026_v52 = vshll.u32 %v900_v41, 16  ;;  %853 = vst [vmem:[#allocation2 + $0x84] sm:$0xf] %v852_v54  ;;  %v9631_v33 = vld [vmem:[#allocation2 + $0x78] sm:$0xff] }
  0x93   : > { %v2807_v53 = vunpack.c.l.b16 %v1183_v36  ;;  %v986_v35 = vrot.slane %v985_v31, 4  ;;  %v1019_v56 = vrot.slane %v1017_v46, 4  ;;  %v1022_v57 = vrot.slane %v1020_v47, 5  ;;  %854 = vst.msk [vmem:[#allocation2 + $0x88] sm:$0xf] %vm332_vm0, %v640_v49 }
  0x94   : > { %v981_v59 = vsel %vm10190_vm4, %v976_v51, %v980_v23  ;;  %v1028_v60 = vrot.slane %v1026_v52, 5  ;;  %v1030_v62 = vshrl.u32 %v900_v41, 16  ;;  %v641_v34 = vrot.slane %v10520_v15, 4  ;;  %811 = vst [vmem:[#allocation2 + $0x3c] sm:$0xf] %v810_v42  ;;  %v411_v51 = vld [vmem:[%s10332_s26 + $0xb8] sm:$0xff] }
  0x95   : > { %v2829_v54 = vpack.c.b16 %v2807_v53, %v2806_v48  ;;  %v991_v63 = vsel %vm10190_vm4, %v986_v35, %v990_v32  ;;  %v2790_v39 = vunpack.c.l.b16 %v981_v59  ;;  %v928_v49 = vld [vmem:[#allocation2 + $0x2c] sm:$0x1]  ;;  %v1023_v2 = vor.u32 %v1022_v57, %v1019_v56  ;;  %812 = vst.msk [vmem:[#allocation2 + $0x40] sm:$0xf] %vm332_vm0, %v10558_v38  ;;  %v792_v58 = vld [vmem:[#allocation2 + $0x20] sm:$0x1] }
  0x96   : > { %v2791_v3 = vunpack.c.l.b16 %v991_v63  ;;  %v1032_v4 = vrot.slane %v1030_v62, 4  ;;  %v1036_v5 = vshll.u32 %v928_v49, 16  ;;  %v901_v6 = vld [vmem:[#allocation2 + $0x30] sm:$0xf]  ;;  %815 = vst [vmem:[#allocation2 + $0x44] sm:$0x1] %v10583_v55 }
  0x97   : > { %2854 = vrot.lane.b32.xlu1 %v2829_v54, %s10061_s21  ;;  %v1024_v17 = vrot.slane %v1023_v2, 4  ;;  %v902_v21 = vld [vmem:[#allocation2 + $0x34] sm:$0xf]  ;;  %v1041_v42 = vshrl.u32 %v901_v6, 16  ;;  %v1044_v9 = vshll.u32 %v901_v6, 16  ;;  %v483_v10 = vrot.slane %v481_v44, 7 }
  0x98   : > { %v2821_v12 = vpack.c.b16 %v2791_v3, %v2790_v39  ;;  %v1033_v13 = vor.u32 %v1032_v4, %v1028_v60  ;;  %v1038_v38 = vrot.slane %v1036_v5, 5  ;;  %v929_v16 = vld [vmem:[#allocation2 + $0x38] sm:$0x1]  ;;  %v1050_v18 = vshll.u32 %v902_v21, 16  ;;  %790 = vst [vmem:[#allocation2 + $0x18] sm:$0xf] %v789_v45 }
  0x99   : > { %v1029_v55 = vsel %vm10190_vm4, %v1024_v17, %v1028_v60  ;;  %v1043_v20 = vrot.slane %v1041_v42, 4  ;;  %v1046_v23 = vrot.slane %v1044_v9, 5  ;;  %v1054_v25 = vshrl.u32 %v902_v21, 16 }
  0x9a   : > { %2838 = vrot.lane.b32.xlu0 %v2821_v12, %s10061_s21  ;;  %v1034_v44 = vrot.slane %v1033_v13, 4  ;;  %v10625_v28 = vunpack.c.l.b16 %v1029_v55  ;;  %v1052_v27 = vrot.slane %v1050_v18, 5  ;;  %v1060_v32 = vshll.u32 %v929_v16, 16  ;;  %v9632_v59 = vld [vmem:[#allocation2 + $0x84] sm:$0xff]  ;;  %v913_v12 = vld [vmem:[#allocation2 + $0x78] sm:$0xf] }
  0x9b   : > { %v1047_v40 = vor.u32 %v1046_v23, %v1043_v20  ;;  %v1056_v31 = vrot.slane %v1054_v25, 4  ;;  %v903_v41 = vld [vmem:[#allocation2 + $0x3c] sm:$0xf]  ;;  %v486_v22 = vor.u32 %v484_v61, %v483_v10  ;;  %v488_v29 = vrot.slane %v483_v10, 4  ;;  %v848_v10 = vld [vmem:[#allocation2 + $0x80] sm:$0x1] }
  0x9c   : > { %v1039_v45 = vsel %vm10190_vm4, %v1034_v44, %v1038_v38  ;;  %v1062_v46 = vrot.slane %v1060_v32, 5  ;;  %v904_v47 = vld [vmem:[#allocation2 + $0x40] sm:$0xf]  ;;  %v1065_v36 = vshrl.u32 %v903_v41, 16  ;;  %v1068_v48 = vshll.u32 %v903_v41, 16 }
  0x9d   : > { %v2795_v52 = vunpack.c.l.b16 %v1039_v45  ;;  %v1048_v53 = vrot.slane %v1047_v40, 4  ;;  %v1057_v35 = vor.u32 %v1056_v31, %v1052_v27  ;;  %v930_v56 = vld [vmem:[#allocation2 + $0x44] sm:$0x1]  ;;  %v1074_v57 = vshll.u32 %v904_v47, 16 }
  0x9e   : > { %v1067_v60 = vrot.slane %v1065_v36, 4  ;;  %v1070_v62 = vrot.slane %v1068_v48, 5  ;;  %v1078_v11 = vshrl.u32 %v904_v47, 16  ;;  %v1084_v61 = vshll.u32 %v930_v56, 16  ;;  %v820_v48 = vld [vmem:[#allocation2 + $0x50] sm:$0x1] }
  0x9f   : > { %2998 = vrot.lane.b32.xlu1 %v9631_v33, %s10061_s21  ;;  %v1053_v54 = vsel %vm10190_vm4, %v1048_v53, %v1052_v27  ;;  %v1058_v63 = vrot.slane %v1057_v35, 4  ;;  %v1076_v39 = vrot.slane %v1074_v57, 5  ;;  %v897_v49 = vld [vmem:[#allocation2 + $0x18] sm:$0xf]  ;;  %v10635_v2 = vpack.c.bf16 %v411_v51, %v411_v51 }
  0xa0   : > { %v2823_v3 = vpack.c.b16 %v2795_v52, %v10625_v28  ;;  %v10638_v4 = vunpack.c.l.b16 %v1053_v54  ;;  %v1071_v5 = vor.u32 %v1070_v62, %v1067_v60  ;;  %v1080_v6 = vrot.slane %v1078_v11, 4 }
  0xa1   : > { %v1063_v17 = vsel %vm10190_vm4, %v1058_v63, %v1062_v46  ;;  %v487_v21 = vsel %vm10405_vm8, %v479_v43, %v486_v22  ;;  %v793_v42 = vsel %vm10439_vm10, %v488_v29, %v792_v58  ;;  %v993_v9 = vshrl.u32 %v897_v49, 16  ;;  %v914_v29 = vld [vmem:[#allocation2 + $0x7c] sm:$0xf] }
  0xa2   : > { %3000 = vrot.lane.b32.xlu0 %v9632_v59, %s10061_s21  ;;  %v1072_v13 = vrot.slane %v1071_v5, 4  ;;  %v1081_v38 = vor.u32 %v1080_v6, %v1076_v39  ;;  %v1086_v16 = vrot.slane %v1084_v61, 5  ;;  %791 = vst.msk [vmem:[#allocation2 + $0x1c] sm:$0xf] %vm332_vm0, %v487_v21  ;;  %v996_v18 = vshll.u32 %v897_v49, 16 }
  0xa3   : > { %794 = vst [vmem:[#allocation2 + $0x20] sm:$0x1] %v793_v42  ;;  %v995_v55 = vrot.slane %v993_v9, 4  ;;  %v544_v43 = vshll.u32 %v10573_v50, 16  ;;  %v549_v20 = vshrl.u32 %v10588_v26, 16  ;;  %v2797_v23 = vunpack.c.l.b16 %v1063_v17 }
  0xa4   : > { %v1077_v25 = vsel %vm10190_vm4, %v1072_v13, %v1076_v39  ;;  %v1082_v44 = vrot.slane %v1081_v38, 4  ;;  %v998_v28 = vrot.slane %v996_v18, 5  ;;  %v543_v32 = vrot.slane %v541_v0, 7  ;;  %v816_v50 = vld [vmem:[#allocation2 + $0x48] sm:$0xf] }
  0xa5   : > { %v10655_v27 = vunpack.c.l.b16 %v1077_v25  ;;  %v551_v33 = vrot.slane %v549_v20, 7  ;;  %v552_v40 = vshll.u32 %v10588_v26, 16  ;;  %v849_v22 = vsel %vm10439_vm10, %v624_v30, %v848_v10 }
  0xa6   : > { %v1087_v31 = vsel %vm10190_vm4, %v1082_v44, %v1086_v16  ;;  %v999_v41 = vor.u32 %v998_v28, %v995_v55  ;;  %v1185_v45 = vshrl.u32 %v913_v12, 16  ;;  %v546_v47 = vor.u32 %v544_v43, %v543_v32  ;;  %850 = vst [vmem:[#allocation2 + $0x80] sm:$0x1] %v849_v22 }
  0xa7   : > { %2842 = vrot.lane.b32.xlu1 %v2823_v3, %s10061_s21  ;;  %v10665_v46 = vunpack.c.l.b16 %v1087_v31  ;;  %v547_v36 = vrot.slane %v543_v32, 4  ;;  %v554_v26 = vor.u32 %v552_v40, %v551_v33  ;;  %v2824_v51 = vpack.c.b16 %v2797_v23, %v10638_v4 }
  0xa8   : > { %v1000_v52 = vrot.slane %v999_v41, 4  ;;  %v556_v53 = vrot.slane %v551_v33, 4  ;;  %v1188_v35 = vshll.u32 %v913_v12, 16  ;;  %v817_v57 = vsel %vm10420_vm9, %v546_v47, %v816_v50 }
  0xa9   : > { %v898_v56 = vld [vmem:[#allocation2 + $0x1c] sm:$0xf]  ;;  %v555_v30 = vsel %vm10405_vm8, %v547_v36, %v554_v26  ;;  %v1187_v58 = vrot.slane %v1185_v45, 4  ;;  %v1194_v59 = vshll.u32 %v914_v29, 16  ;;  %v2825_v60 = vpack.c.b16 %v10665_v46, %v10655_v27  ;;  %818 = vst [vmem:[#allocation2 + $0x48] sm:$0xf] %v817_v57 }
  0xaa   : > { %v927_v62 = vld [vmem:[#allocation2 + $0x20] sm:$0x1]  ;;  %v1002_v11 = vshll.u32 %v898_v56, 16  ;;  %v1006_v61 = vshrl.u32 %v898_v56, 16  ;;  %v821_v54 = vsel %vm10439_vm10, %v556_v53, %v820_v48  ;;  %819 = vst.msk [vmem:[#allocation2 + $0x4c] sm:$0xf] %vm332_vm0, %v555_v30  ;;  %v10678_v3 = vpack.c.bf16 %v401_v24, %v401_v24 }
  0xab   : > { %v1012_v63 = vshll.u32 %v927_v62, 16  ;;  %v1190_v39 = vrot.slane %v1188_v35, 5  ;;  %v1196_v49 = vrot.slane %v1194_v59, 5  ;;  %822 = vst [vmem:[#allocation2 + $0x50] sm:$0x1] %v821_v54  ;;  %v1198_v6 = vshrl.u32 %v914_v29, 16 }
  0xac   : > { %v1004_v4 = vrot.slane %v1002_v11, 5  ;;  %v1008_v5 = vrot.slane %v1006_v61, 4  ;;  %v643_v17 = vshrl.u32 %v10591_v37, 16  ;;  %v646_v9 = vshll.u32 %v10591_v37, 16  ;;  %v402_v54 = vld [vmem:[%s10332_s26 + $0x70] sm:$0xff] }
  0xad   : > { %v1014_v21 = vrot.slane %v1012_v63, 5  ;;  %v1191_v42 = vor.u32 %v1190_v39, %v1187_v58  ;;  %v651_v10 = vshrl.u32 %v10635_v2, 16  ;;  %v935_v38 = vld [vmem:[#allocation2 + $0x80] sm:$0x1]  ;;  %v1200_v16 = vrot.slane %v1198_v6, 4  ;;  %v403_v63 = vld [vmem:[%s10332_s26 + $0x78] sm:$0xff] }
  0xae   : > { %v1005_v12 = vsel %vm10190_vm4, %v1000_v52, %v1004_v4  ;;  %v1009_v13 = vor.u32 %v1008_v5, %v1004_v4  ;;  %v645_v18 = vrot.slane %v643_v17, 7  ;;  %v1204_v43 = vshll.u32 %v935_v38, 16  ;;  %v858_v52 = vld [vmem:[#allocation2 + $0x90] sm:$0xf]  ;;  %v855_v39 = vld [vmem:[#allocation2 + $0x8c] sm:$0x1] }
  0xaf   : > { %2844 = vrot.lane.b32.xlu1 %v2824_v51, %s10061_s21  ;;  %v2792_v55 = vunpack.c.l.b16 %v1005_v12  ;;  %v1192_v0 = vrot.slane %v1191_v42, 4  ;;  %v10686_v20 = vrot.slane %v651_v10, 7  ;;  %v1201_v25 = vor.u32 %v1200_v16, %v1196_v49  ;;  %v915_v17 = vld [vmem:[#allocation2 + $0x84] sm:$0xf] }
  0xb0   : > { %v1010_v23 = vrot.slane %v1009_v13, 4  ;;  %v648_v44 = vor.u32 %v646_v9, %v645_v18  ;;  %v649_v37 = vrot.slane %v645_v18, 4  ;;  %v905_v28 = vld [vmem:[#allocation2 + $0x48] sm:$0xf]  ;;  %v1206_v33 = vrot.slane %v1204_v43, 5 }
  0xb1   : > { %v1197_v32 = vsel %vm10190_vm4, %v1192_v0, %v1196_v49  ;;  %v654_v40 = vshll.u32 %v10635_v2, 16  ;;  %v658_v31 = vrot.slane %v10686_v20, 4  ;;  %v906_v50 = vld [vmem:[#allocation2 + $0x4c] sm:$0xf]  ;;  %v1089_v22 = vshrl.u32 %v905_v28, 16 }
  0xb2   : > { %v1015_v41 = vsel %vm10190_vm4, %v1010_v23, %v1014_v21  ;;  %v1092_v29 = vshll.u32 %v905_v28, 16  ;;  %v1202_v45 = vrot.slane %v1201_v25, 4  ;;  %v931_v36 = vld [vmem:[#allocation2 + $0x50] sm:$0x1]  ;;  %v1098_v26 = vshll.u32 %v906_v50, 16 }
  0xb3   : > { %v2793_v47 = vunpack.c.l.b16 %v1015_v41  ;;  %v1102_v48 = vshrl.u32 %v906_v50, 16  ;;  %v10694_v51 = vunpack.c.l.b16 %v1197_v32  ;;  %v1091_v53 = vrot.slane %v1089_v22, 4  ;;  %v827_v23 = vld [vmem:[#allocation2 + $0x5c] sm:$0x1]  ;;  %v916_v32 = vld [vmem:[#allocation2 + $0x88] sm:$0xf] }
  0xb4   : > { %v1094_v2 = vrot.slane %v1092_v29, 5  ;;  %v1108_v35 = vshll.u32 %v931_v36, 16  ;;  %v1207_v24 = vsel %vm10190_vm4, %v1202_v45, %v1206_v33  ;;  %v1100_v30 = vrot.slane %v1098_v26, 5  ;;  %v830_v41 = vld [vmem:[#allocation2 + $0x60] sm:$0xf]  ;;  %v413_v26 = vld [vmem:[%s10332_s26 + $0xc8] sm:$0xff] }
  0xb5   : > { %v2822_v56 = vpack.c.b16 %v2793_v47, %v2792_v55  ;;  %v1104_v57 = vrot.slane %v1102_v48, 4  ;;  %v2809_v58 = vunpack.c.l.b16 %v1207_v24  ;;  %v656_v11 = vor.u32 %v654_v40, %v10686_v20  ;;  %v412_v50 = vld [vmem:[%s10332_s26 + $0xc0] sm:$0xff]  ;;  %v834_v36 = vld [vmem:[#allocation2 + $0x68] sm:$0x1] }
  0xb6   : > { %v1095_v59 = vor.u32 %v1094_v2, %v1091_v53  ;;  %v1110_v62 = vrot.slane %v1108_v35, 5  ;;  %v859_v61 = vsel %vm10420_vm9, %v648_v44, %v858_v52  ;;  %v558_v5 = vshrl.u32 %v10612_v8, 16 }
  0xb7   : > { %2846 = vrot.lane.b32.xlu1 %v2825_v60, %s10061_s21  ;;  %2840 = vrot.lane.b32.xlu2 %v2822_v56, %s10061_s21  ;;  %v1105_v49 = vor.u32 %v1104_v57, %v1100_v30  ;;  %v2830_v4 = vpack.c.b16 %v2809_v58, %v10694_v51  ;;  %860 = vst [vmem:[#allocation2 + $0x90] sm:$0xf] %v859_v61  ;;  %v561_v6 = vshll.u32 %v10612_v8, 16  ;;  %v566_v9 = vshrl.u32 %v10678_v3, 16  ;;  %v823_v8 = vld [vmem:[#allocation2 + $0x54] sm:$0xf] }
  0xb8   : > { %v1096_v21 = vrot.slane %v1095_v59, 4  ;;  %v657_v42 = vsel %vm10405_vm8, %v649_v37, %v656_v11  ;;  %v569_v27 = vshll.u32 %v10678_v3, 16  ;;  %v560_v60 = vrot.slane %v558_v5, 7  ;;  %v862_v11 = vld [vmem:[#allocation2 + $0x98] sm:$0x1] }
  0xb9   : > { %v1106_v46 = vrot.slane %v1105_v49, 4  ;;  %861 = vst.msk [vmem:[#allocation2 + $0x94] sm:$0xf] %vm332_vm0, %v657_v42  ;;  %v434_v10 = vpack.c.bf16 %v402_v54, %v402_v54  ;;  %v435_v12 = vpack.c.bf16 %v403_v63, %v403_v63  ;;  %v568_v38 = vrot.slane %v566_v9, 7 }
  0xba   : > { %v1101_v13 = vsel %vm10190_vm4, %v1096_v21, %v1100_v30  ;;  %v856_v16 = vsel %vm10439_vm10, %v641_v34, %v855_v39  ;;  %v1209_v18 = vshrl.u32 %v915_v17, 16  ;;  %v563_v0 = vor.u32 %v561_v6, %v560_v60 }
  0xbb   : > { %v1111_v3 = vsel %vm10190_vm4, %v1106_v46, %v1110_v62  ;;  %v2800_v55 = vunpack.c.l.b16 %v1101_v13  ;;  %v564_v43 = vrot.slane %v560_v60, 4  ;;  %857 = vst [vmem:[#allocation2 + $0x8c] sm:$0x1] %v856_v16  ;;  %v571_v44 = vor.u32 %v569_v27, %v568_v38  ;;  %v9661_v60 = vld [vmem:[%s13878_s1 + $0x38] sm:$0xff] }
  0xbc   : > { %v2801_v25 = vunpack.c.l.b16 %v1111_v3  ;;  %v573_v37 = vrot.slane %v568_v38, 4  ;;  %v575_v28 = vshrl.u32 %v434_v10, 16  ;;  %v824_v15 = vsel %vm10420_vm9, %v563_v0, %v823_v8  ;;  %3929 = vmatpush.bf16.msra.mxu0 %v9661_v60  ;;  %9775 = vmatpush.bf16.msra.mxu2 %v9661_v60 }
  0xbd   : > { %v578_v34 = vshll.u32 %v434_v10, 16  ;;  %v583_v33 = vshrl.u32 %v435_v12, 16  ;;  %v586_v40 = vshll.u32 %v435_v12, 16  ;;  %v572_v29 = vsel %vm10405_vm8, %v564_v43, %v571_v44  ;;  %825 = vst [vmem:[#allocation2 + $0x54] sm:$0xf] %v824_v15 }
  0xbe   : > { %v2826_v22 = vpack.c.b16 %v2801_v25, %v2800_v55  ;;  %v828_v45 = vsel %vm10439_vm10, %v573_v37, %v827_v23  ;;  %v577_v47 = vrot.slane %v575_v28, 7  ;;  %826 = vst.msk [vmem:[#allocation2 + $0x58] sm:$0xf] %vm332_vm0, %v572_v29  ;;  %v1211_v51 = vrot.slane %v1209_v18, 4 }
  0xbf   : > { %2856 = vrot.lane.b32.xlu2 %v2830_v4, %s10061_s21  ;;  %v585_v48 = vrot.slane %v583_v33, 7  ;;  %v1212_v52 = vshll.u32 %v915_v17, 16  ;;  %v1218_v53 = vshll.u32 %v916_v32, 16  ;;  %829 = vst [vmem:[#allocation2 + $0x5c] sm:$0x1] %v828_v45  ;;  %v1222_v56 = vshrl.u32 %v916_v32, 16 }
  0xc0   : > { %2848 = vrot.lane.b32.xlu1 %v2826_v22, %s10061_s21  ;;  %v9633_v2 = vld [vmem:[#allocation2 + $0x90] sm:$0xff]  ;;  %v580_v35 = vor.u32 %v578_v34, %v577_v47  ;;  %v581_v24 = vrot.slane %v577_v47, 4  ;;  %v444_v30 = vpack.c.bf16 %v412_v50, %v412_v50  ;;  %v445_v39 = vpack.c.bf16 %v413_v26, %v413_v26 }
  0xc1   : > { %v588_v57 = vor.u32 %v586_v40, %v585_v48  ;;  %v590_v58 = vrot.slane %v585_v48, 4  ;;  %v1214_v59 = vrot.slane %v1212_v52, 5  ;;  %v1220_v62 = vrot.slane %v1218_v53, 5  ;;  %3002 = vrot.lane.b32.xlu0 %v9633_v2, %s10061_s21  ;;  %v414_v4 = vld [vmem:[%s10332_s26 + $0xd0] sm:$0xff]  ;;  %v865_v2 = vld [vmem:[#allocation2 + $0x9c] sm:$0xf] }
  0xc2   : > { %v831_v61 = vsel %vm10420_vm9, %v580_v35, %v830_v41  ;;  %v10738_v54 = vld [vmem:[#allocation2 + $0x8c] sm:$0x1]  ;;  %v1224_v63 = vrot.slane %v1222_v56, 4  ;;  %v660_v49 = vshrl.u32 %v444_v30, 16  ;;  %v663_v27 = vshll.u32 %v444_v30, 16 }
  0xc3   : > { %v589_v5 = vsel %vm10405_vm8, %v581_v24, %v588_v57  ;;  %832 = vst [vmem:[#allocation2 + $0x60] sm:$0xf] %v831_v61  ;;  %v835_v6 = vsel %vm10439_vm10, %v590_v58, %v834_v36  ;;  %v1215_v17 = vor.u32 %v1214_v59, %v1211_v51  ;;  %v1228_v21 = vshll.u32 %v10738_v54, 16  ;;  %v9659_v36 = vld [vmem:[%s13878_s1 + $0x28] sm:$0xff]  ;;  %v917_v61 = vld [vmem:[#allocation2 + $0x90] sm:$0xf] }
  0xc4   : > { %833 = vst.msk [vmem:[#allocation2 + $0x64] sm:$0xf] %vm332_vm0, %v589_v5  ;;  %v1225_v42 = vor.u32 %v1224_v63, %v1220_v62  ;;  %v662_v9 = vrot.slane %v660_v49, 7  ;;  %v668_v46 = vshrl.u32 %v445_v39, 16  ;;  %v907_v10 = vld [vmem:[#allocation2 + $0x54] sm:$0xf]  ;;  %v863_v38 = vsel %vm10439_vm10, %v658_v31, %v862_v11 }
  0xc5   : > { %836 = vst [vmem:[#allocation2 + $0x68] sm:$0x1] %v835_v6  ;;  %v1216_v12 = vrot.slane %v1215_v17, 4  ;;  %v1230_v13 = vrot.slane %v1228_v21, 5  ;;  %v10754_v8 = vpack.c.bf16 %v414_v4, %v414_v4  ;;  %v908_v16 = vld [vmem:[#allocation2 + $0x58] sm:$0xf] }
  0xc6   : > { %v1113_v18 = vshrl.u32 %v907_v10, 16  ;;  %v1116_v3 = vshll.u32 %v907_v10, 16  ;;  %v1226_v55 = vrot.slane %v1225_v42, 4  ;;  %v10756_v0 = vor.u32 %v663_v27, %v662_v9  ;;  %v932_v43 = vld [vmem:[#allocation2 + $0x5c] sm:$0x1]  ;;  %v9660_v31 = vld [vmem:[%s13878_s1 + $0x30] sm:$0xff] }
  0xc7   : > { %v1122_v23 = vshll.u32 %v908_v16, 16  ;;  %v1126_v25 = vshrl.u32 %v908_v16, 16  ;;  %v1221_v44 = vsel %vm10190_vm4, %v1216_v12, %v1220_v62  ;;  %v666_v20 = vrot.slane %v662_v9, 4  ;;  %864 = vst [vmem:[#allocation2 + $0x98] sm:$0x1] %v863_v38  ;;  %3930 = vmatpush.bf16.msra.mxu0 %v9660_v31  ;;  %9776 = vmatpush.bf16.msra.mxu2 %v9660_v31  ;;  %v9658_v6 = vld [vmem:[%s13878_s1 + $0x20] sm:$0xff] }
  0xc8   : > { %v1115_v37 = vrot.slane %v1113_v18, 4  ;;  %v1118_v28 = vrot.slane %v1116_v3, 5  ;;  %v1132_v32 = vshll.u32 %v932_v43, 16  ;;  %v1231_v15 = vsel %vm10190_vm4, %v1226_v55, %v1230_v13  ;;  %v10776_v5 = vld [vmem:[#allocation2 + $0x94] sm:$0xf]  ;;  %v9669_v13 = vld [vmem:[%s13878_s1 + $0x78] sm:$0xff] }
  0xc9   : > { %v1124_v34 = vrot.slane %v1122_v23, 5  ;;  %v1128_v33 = vrot.slane %v1126_v25, 4  ;;  %v2810_v40 = vunpack.c.l.b16 %v1221_v44  ;;  %v2811_v41 = vunpack.c.l.b16 %v1231_v15  ;;  %v415_v44 = vld [vmem:[%s10332_s26 + $0xd8] sm:$0xff]  ;;  %9783 = vmatpush.bf16.msra.mxu3 %v9669_v13  ;;  %v416_v15 = vld [vmem:[%s10332_s26 + $0xe0] sm:$0xff]  ;;  %4018 = vmatpush.bf16.msra.mxu1 %v9669_v13 }
  0xca   : > { %v1119_v50 = vor.u32 %v1118_v28, %v1115_v37  ;;  %v1134_v22 = vrot.slane %v1132_v32, 5  ;;  %v909_v29 = vld [vmem:[#allocation2 + $0x60] sm:$0xf]  ;;  %v10765_v45 = vrot.slane %v668_v46, 7  ;;  %v671_v47 = vshll.u32 %v445_v39, 16 }
  0xcb   : > { %v1129_v26 = vor.u32 %v1128_v33, %v1124_v34  ;;  %v910_v48 = vld [vmem:[#allocation2 + $0x64] sm:$0xf]  ;;  %v1137_v51 = vshrl.u32 %v909_v29, 16  ;;  %v1140_v52 = vshll.u32 %v909_v29, 16  ;;  %v2831_v53 = vpack.c.b16 %v2811_v41, %v2810_v40  ;;  %3931 = vmatpush.bf16.msra.mxu0 %v9659_v36  ;;  %9777 = vmatpush.bf16.msra.mxu2 %v9659_v36  ;;  %v417_v36 = vld [vmem:[%s10332_s26 + $0xe8] sm:$0xff] }
  0xcc   : > { %v1120_v35 = vrot.slane %v1119_v50, 4  ;;  %v933_v24 = vld [vmem:[#allocation2 + $0x68] sm:$0x1]  ;;  %v1146_v56 = vshll.u32 %v910_v48, 16  ;;  %v1150_v30 = vshrl.u32 %v910_v48, 16  ;;  %v673_v57 = vor.u32 %v671_v47, %v10765_v45  ;;  %v9668_v50 = vld [vmem:[%s13878_s1 + $0x70] sm:$0xff] }
  0xcd   : > { %v1130_v58 = vrot.slane %v1129_v26, 4  ;;  %v1139_v59 = vrot.slane %v1137_v51, 4  ;;  %v1142_v62 = vrot.slane %v1140_v52, 5  ;;  %v1156_v11 = vshll.u32 %v933_v24, 16  ;;  %2858 = vrot.lane.b32.xlu2 %v2831_v53, %s10061_s21  ;;  %v869_v32 = vld [vmem:[#allocation2 + $0xa4] sm:$0x1]  ;;  %9784 = vmatpush.bf16.msra.mxu3 %v9668_v50 }
  0xce   : > { %v1125_v63 = vsel %vm10190_vm4, %v1120_v35, %v1124_v34  ;;  %v1148_v39 = vrot.slane %v1146_v56, 5  ;;  %v1152_v49 = vrot.slane %v1150_v30, 4  ;;  %v674_v4 = vsel %vm10405_vm8, %v666_v20, %v673_v57  ;;  %v10784_v27 = vld [vmem:[#allocation2 + $0x98] sm:$0x1]  ;;  %v872_v51 = vld [vmem:[#allocation2 + $0xa8] sm:$0xf]  ;;  %4019 = vmatpush.bf16.msra.mxu1 %v9668_v50 }
  0xcf   : > { %v1135_v17 = vsel %vm10190_vm4, %v1130_v58, %v1134_v22  ;;  %v2802_v21 = vunpack.c.l.b16 %v1125_v63  ;;  %v1143_v42 = vor.u32 %v1142_v62, %v1139_v59  ;;  %v1158_v9 = vrot.slane %v1156_v11, 5  ;;  %868 = vst.msk [vmem:[#allocation2 + $0xa0] sm:$0xf] %vm332_vm0, %v674_v4  ;;  %3932 = vmatpush.bf16.msra.mxu0 %v9658_v6  ;;  %9778 = vmatpush.bf16.msra.mxu2 %v9658_v6  ;;  %v9656_v35 = vld [vmem:[%s13878_s1 + $0x10] sm:$0xff] }
  0xd0   : > { %v2803_v46 = vunpack.c.l.b16 %v1135_v17  ;;  %v1153_v60 = vor.u32 %v1152_v49, %v1148_v39  ;;  %v675_v10 = vrot.slane %v10765_v45, 4  ;;  %v866_v12 = vsel %vm10420_vm9, %v10756_v0, %v865_v2  ;;  %v9657_v0 = vld [vmem:[%s13878_s1 + $0x18] sm:$0xff] }
  0xd1   : > { %v1144_v38 = vrot.slane %v1143_v42, 4  ;;  %867 = vst [vmem:[#allocation2 + $0x9c] sm:$0xf] %v866_v12  ;;  %v1233_v16 = vshrl.u32 %v917_v61, 16  ;;  %v1236_v18 = vshll.u32 %v917_v61, 16  ;;  %v1242_v3 = vshll.u32 %v10776_v5, 16 }
  0xd2   : > { %v2827_v55 = vpack.c.b16 %v2803_v46, %v2802_v21  ;;  %v1154_v43 = vrot.slane %v1153_v60, 4  ;;  %v1246_v23 = vshrl.u32 %v10776_v5, 16  ;;  %v1252_v25 = vshll.u32 %v10784_v27, 16  ;;  %v9655_v46 = vld [vmem:[%s13878_s1 + $0x8] sm:$0xff] }
  0xd3   : > { %v1149_v20 = vsel %vm10190_vm4, %v1144_v38, %v1148_v39  ;;  %v1235_v31 = vrot.slane %v1233_v16, 4  ;;  %v1238_v37 = vrot.slane %v1236_v18, 5  ;;  %v1244_v28 = vrot.slane %v1242_v3, 5  ;;  %3933 = vmatpush.bf16.msra.mxu0 %v9657_v0  ;;  %9779 = vmatpush.bf16.msra.mxu2 %v9657_v0  ;;  %v9606_v38 = vld [vmem:[#allocation2] sm:$0xff]  ;;  %v876_v16 = vld [vmem:[#allocation2 + $0xb0] sm:$0x1] }
  0xd4   : > { %2850 = vrot.lane.b32.xlu1 %v2827_v55, %s10061_s21  ;;  %v1159_v34 = vsel %vm10190_vm4, %v1154_v43, %v1158_v9  ;;  %v2804_v33 = vunpack.c.l.b16 %v1149_v20  ;;  %v1248_v40 = vrot.slane %v1246_v23, 4  ;;  %v1254_v41 = vrot.slane %v1252_v25, 5  ;;  %v9666_v18 = vld [vmem:[%s13878_s1 + $0x60] sm:$0xff] }
  0xd5   : > { %v2805_v22 = vunpack.c.l.b16 %v1159_v34  ;;  %v1239_v29 = vor.u32 %v1238_v37, %v1235_v31  ;;  %v447_v45 = vpack.c.bf16 %v415_v44, %v415_v44  ;;  %v677_v47 = vshrl.u32 %v10754_v8, 16  ;;  %v9654_v25 = vld [vmem:[%s13878_s1] sm:$0xff]  ;;  %v2837_v37 = vpop.permute.xlu0 %2836 }
  0xd6   : > { %v1249_v26 = vor.u32 %v1248_v40, %v1244_v28  ;;  %v680_v48 = vshll.u32 %v10754_v8, 16  ;;  %v870_v52 = vsel %vm10439_vm10, %v675_v10, %v869_v32  ;;  %v10814_v53 = vld [vmem:[#allocation2 + $0xa0] sm:$0xf]  ;;  %v10816_v2 = vpack.c.bf16 %v416_v15, %v416_v15  ;;  %v9667_v8 = vld [vmem:[%s13878_s1 + $0x68] sm:$0xff]  ;;  %v418_v32 = vld [vmem:[%s10332_s26 + $0xf0] sm:$0xff] }
  0xd7   : > { %v2828_v24 = vpack.c.b16 %v2805_v22, %v2804_v33  ;;  %v1240_v56 = vrot.slane %v1239_v29, 4  ;;  %v679_v30 = vrot.slane %v677_v47, 7  ;;  %v685_v57 = vshrl.u32 %v447_v45, 16  ;;  %871 = vst [vmem:[#allocation2 + $0xa4] sm:$0x1] %v870_v52  ;;  %3934 = vmatpush.bf16.msra.mxu0 %v9656_v35  ;;  %9785 = vmatpush.bf16.msra.mxu3 %v9667_v8  ;;  %v9665_v15 = vld [vmem:[%s13878_s1 + $0x58] sm:$0xff] }
  0xd8   : > { %v9634_v58 = vld [vmem:[#allocation2 + $0x9c] sm:$0xff]  ;;  %v1250_v59 = vrot.slane %v1249_v26, 4  ;;  %v688_v62 = vshll.u32 %v447_v45, 16  ;;  %v1266_v61 = vshll.u32 %v10814_v53, 16  ;;  %v10825_v63 = vpack.c.bf16 %v417_v36, %v417_v36  ;;  %9780 = vmatpush.bf16.msra.mxu2 %v9656_v35  ;;  %4020 = vmatpush.bf16.msra.mxu1 %v9667_v8  ;;  %v9622_v47 = vld [vmem:[#allocation2 + $0xc] sm:$0xff] }
  0xd9   : > { %v919_v11 = vld [vmem:[#allocation2 + $0x9c] sm:$0xf]  ;;  %v1245_v39 = vsel %vm10190_vm4, %v1240_v56, %v1244_v28  ;;  %v682_v49 = vor.u32 %v680_v48, %v679_v30  ;;  %v683_v4 = vrot.slane %v679_v30, 4  ;;  %v687_v6 = vrot.slane %v685_v57, 7  ;;  %3004 = vrot.lane.b32.xlu0 %v9634_v58, %s10061_s21 }
  0xda   : > { %v1255_v17 = vsel %vm10190_vm4, %v1250_v59, %v1254_v41  ;;  %v2812_v21 = vunpack.c.l.b16 %v1245_v39  ;;  %v1257_v42 = vshrl.u32 %v919_v11, 16  ;;  %v1260_v9 = vshll.u32 %v919_v11, 16  ;;  %v9689_v28 = vld [vmem:[%s13878_s1 + $0x118] sm:$0xff] }
  0xdb   : > { %v2813_v60 = vunpack.c.l.b16 %v1255_v17  ;;  %v690_v10 = vor.u32 %v688_v62, %v687_v6  ;;  %v692_v12 = vrot.slane %v687_v6, 4  ;;  %v873_v13 = vsel %vm10420_vm9, %v682_v49, %v872_v51  ;;  %3935 = vmatpush.bf16.msra.mxu0 %v9655_v46  ;;  %9786 = vmatpush.bf16.msra.mxu3 %v9666_v18  ;;  %v879_v51 = vld [vmem:[#allocation2 + $0xb4] sm:$0xf] }
  0xdc   : > { %2852 = vrot.lane.b32.xlu1 %v2828_v24, %s10061_s21  ;;  %874 = vst [vmem:[#allocation2 + $0xa8] sm:$0xf] %v873_v13  ;;  %v1259_v3 = vrot.slane %v1257_v42, 4  ;;  %v1262_v55 = vrot.slane %v1260_v9, 5  ;;  %v1268_v43 = vrot.slane %v1266_v61, 5  ;;  %v1270_v23 = vshrl.u32 %v10814_v53, 16  ;;  %9781 = vmatpush.bf16.msra.mxu2 %v9655_v46 }
  0xdd   : > { %v2832_v44 = vpack.c.b16 %v2813_v60, %v2812_v21  ;;  %v691_v0 = vsel %vm10405_vm8, %v683_v4, %v690_v10  ;;  %v694_v20 = vshrl.u32 %v10816_v2, 16  ;;  %v697_v31 = vshll.u32 %v10816_v2, 16  ;;  %v419_v2 = vld [vmem:[%s10332_s26 + $0xf8] sm:$0xff]  ;;  %4021 = vmatpush.bf16.msra.mxu1 %v9666_v18  ;;  %v9664_v49 = vld [vmem:[%s13878_s1 + $0x50] sm:$0xff] }
  0xde   : > { %875 = vst.msk [vmem:[#allocation2 + $0xac] sm:$0xf] %vm332_vm0, %v691_v0  ;;  %v10857_v34 = vld [vmem:[#allocation2 + $0xa4] sm:$0x1]  ;;  %v1263_v33 = vor.u32 %v1262_v55, %v1259_v3  ;;  %v1272_v40 = vrot.slane %v1270_v23, 4  ;;  %v702_v41 = vshrl.u32 %v10825_v63, 16  ;;  %v877_v50 = vsel %vm10439_vm10, %v692_v12, %v876_v16 }
  0xdf   : > { %2860 = vrot.lane.b32.xlu2 %v2832_v44, %s10061_s21  ;;  %v1276_v22 = vshll.u32 %v10857_v34, 16  ;;  %v696_v29 = vrot.slane %v694_v20, 7  ;;  %v705_v45 = vshll.u32 %v10825_v63, 16  ;;  %878 = vst [vmem:[#allocation2 + $0xb0] sm:$0x1] %v877_v50  ;;  %v3335_v52 = vsel %vm3332_vm11, %v9606_v38, %v2837_v37  ;;  %3936 = vmatpush.bf16.msra.mxu0 %v9654_v25 }
  0xe0   : > { %v1264_v36 = vrot.slane %v1263_v33, 4  ;;  %v1273_v26 = vor.u32 %v1272_v40, %v1268_v43  ;;  %v10865_v48 = vrot.slane %v702_v41, 7  ;;  %v450_v30 = vpack.c.bf16 %v418_v32, %v418_v32  ;;  %9787 = vmatpush.bf16.msra.mxu3 %v9665_v15  ;;  %9782 = vmatpush.bf16.msra.mxu2 %v9654_v25  ;;  %v886_v20 = vld [vmem:[#allocation2 + $0xc0] sm:$0xf] }
  0xe1   : > { %v1278_v35 = vrot.slane %v1276_v22, 5  ;;  %v699_v24 = vor.u32 %v697_v31, %v696_v29  ;;  %v700_v56 = vrot.slane %v696_v29, 4  ;;  %v451_v63 = vpack.c.bf16 %v419_v2, %v419_v2  ;;  %4022 = vmatpush.bf16.msra.mxu1 %v9665_v15  ;;  %v883_v15 = vld [vmem:[#allocation2 + $0xbc] sm:$0x1] }
  0xe2   : > { %v1269_v57 = vsel %vm10190_vm4, %v1264_v36, %v1268_v43  ;;  %v1274_v8 = vrot.slane %v1273_v26, 4  ;;  %v707_v58 = vor.u32 %v705_v45, %v10865_v48  ;;  %v709_v59 = vrot.slane %v10865_v48, 4  ;;  %3937 = vmatmul.bf16.vlgmr.msra.gmra.mxu0 %v3335_v52  ;;  %v9623_v43 = vld [vmem:[#allocation2 + $0x18] sm:$0xff]  ;;  %v9663_v52 = vld [vmem:[%s13878_s1 + $0x48] sm:$0xff] }
  0xe3   : > { %v2814_v62 = vunpack.c.l.b16 %v1269_v57  ;;  %v880_v11 = vsel %vm10420_vm9, %v699_v24, %v879_v51  ;;  %4289 = vmatpush.bf16.msrb.mxu0 %v9689_v28  ;;  %v921_v61 = vld [vmem:[#allocation2 + $0xa8] sm:$0xf]  ;;  %v711_v39 = vshrl.u32 %v450_v30, 16  ;;  %v714_v55 = vshll.u32 %v450_v30, 16 }
  0xe4   : > { %2980 = vrot.lane.b32.xlu1 %v9622_v47, %s10061_s21  ;;  %v1279_v4 = vsel %vm10190_vm4, %v1274_v8, %v1278_v35  ;;  %v708_v6 = vsel %vm10405_vm8, %v700_v56, %v707_v58  ;;  %881 = vst [vmem:[#allocation2 + $0xb4] sm:$0xf] %v880_v11  ;;  %v1281_v17 = vshrl.u32 %v921_v61, 16  ;;  %v1284_v21 = vshll.u32 %v921_v61, 16  ;;  %9788 = vmatpush.bf16.msra.mxu3 %v9664_v49  ;;  %v9624_v24 = vld [vmem:[#allocation2 + $0x24] sm:$0xff] }
  0xe5   : > { %v9635_v42 = vld [vmem:[#allocation2 + $0xa8] sm:$0xff]  ;;  %v2815_v9 = vunpack.c.l.b16 %v1279_v4  ;;  %882 = vst.msk [vmem:[#allocation2 + $0xb8] sm:$0xf] %vm332_vm0, %v708_v6  ;;  %v713_v60 = vrot.slane %v711_v39, 7  ;;  %v719_v0 = vshrl.u32 %v451_v63, 16  ;;  %v722_v32 = vshll.u32 %v451_v63, 16  ;;  %4023 = vmatpush.bf16.msra.mxu1 %v9664_v49 }
  0xe6   : > { %v10884_v46 = vld [vmem:[#allocation2 + $0xac] sm:$0xf]  ;;  %v10886_v10 = vld [vmem:[#allocation2 + $0xb0] sm:$0x1]  ;;  %v1283_v12 = vrot.slane %v1281_v17, 4  ;;  %v1286_v13 = vrot.slane %v1284_v21, 5  ;;  %3006 = vrot.lane.b32.xlu0 %v9635_v42, %s10061_s21  ;;  %v884_v50 = vsel %vm10439_vm10, %v709_v59, %v883_v15 }
  0xe7   : > { %v1290_v38 = vshll.u32 %v10884_v46, 16  ;;  %v1294_v16 = vshrl.u32 %v10884_v46, 16  ;;  %v2833_v18 = vpack.c.b16 %v2815_v9, %v2814_v62  ;;  %v1300_v3 = vshll.u32 %v10886_v10, 16  ;;  %885 = vst [vmem:[#allocation2 + $0xbc] sm:$0x1] %v884_v50  ;;  %v9662_v11 = vld [vmem:[%s13878_s1 + $0x40] sm:$0xff] }
  0xe8   : > { %v1287_v23 = vor.u32 %v1286_v13, %v1283_v12  ;;  %v716_v37 = vor.u32 %v714_v55, %v713_v60  ;;  %v717_v28 = vrot.slane %v713_v60, 4  ;;  %v10893_v41 = vrot.slane %v719_v0, 7  ;;  %9789 = vmatpush.bf16.msra.mxu3 %v9663_v52  ;;  %v2116_v59 = vld [vmem:[#allocation2 + $0x18] sm:$0xf]  ;;  %v2117_v62 = vld [vmem:[#allocation2 + $0x1c] sm:$0xf] }
  0xe9   : > { %v1292_v25 = vrot.slane %v1290_v38, 5  ;;  %v1296_v44 = vrot.slane %v1294_v16, 4  ;;  %2862 = vrot.lane.b32.xlu2 %v2833_v18, %s10061_s21  ;;  %v1302_v31 = vrot.slane %v1300_v3, 5  ;;  %4024 = vmatpush.bf16.msra.mxu1 %v9663_v52  ;;  %v2148_v4 = vld [vmem:[#allocation2 + $0x20] sm:$0x1]  ;;  %v9677_v6 = vld [vmem:[%s13878_s1 + $0xb8] sm:$0xff] }
  0xea   : > { %v1288_v33 = vrot.slane %v1287_v23, 4  ;;  %v887_v22 = vsel %vm10420_vm9, %v716_v37, %v886_v20  ;;  %v724_v36 = vor.u32 %v722_v32, %v10893_v41  ;;  %v2165_v42 = vshrl.u32 %v2116_v59, 16  ;;  %4107 = vmatpush.bf16.msrb.mxu2 %v9677_v6  ;;  %v9685_v18 = vld [vmem:[%s13878_s1 + $0xf8] sm:$0xff]  ;;  %v1337_v52 = vld [vmem:[#allocation2 + $0x6c] sm:$0xe] }
  0xeb   : > { %v1297_v40 = vor.u32 %v1296_v44, %v1292_v25  ;;  %888 = vst [vmem:[#allocation2 + $0xc0] sm:$0xf] %v887_v22  ;;  %v923_v2 = vld [vmem:[#allocation2 + $0xb4] sm:$0xf]  ;;  %v2168_v9 = vshll.u32 %v2116_v59, 16  ;;  %v2174_v60 = vshll.u32 %v2117_v62, 16 }
  0xec   : > { %2982 = vrot.lane.b32.xlu1 %v9623_v43, %s10061_s21  ;;  %v9636_v29 = vld [vmem:[#allocation2 + $0xb4] sm:$0xff]  ;;  %v1293_v45 = vsel %vm10190_vm4, %v1288_v33, %v1292_v25  ;;  %v725_v51 = vsel %vm10405_vm8, %v717_v28, %v724_v36  ;;  %v1305_v30 = vshrl.u32 %v923_v2, 16  ;;  %v1308_v57 = vshll.u32 %v923_v2, 16  ;;  %9790 = vmatpush.bf16.msra.mxu3 %v9662_v11  ;;  %v1939_v59 = vld [vmem:[#allocation2 + $0xc] sm:$0xe] }
  0xed   : > { %v1298_v47 = vrot.slane %v1297_v40, 4  ;;  %v2816_v26 = vunpack.c.l.b16 %v1293_v45  ;;  %v10910_v35 = vld [vmem:[#allocation2 + $0xb8] sm:$0xf]  ;;  %889 = vst.msk [vmem:[#allocation2 + $0xc4] sm:$0xf] %vm332_vm0, %v725_v51  ;;  %v2178_v38 = vshrl.u32 %v2117_v62, 16  ;;  %4025 = vmatpush.bf16.msra.mxu1 %v9662_v11 }
  0xee   : > { %3008 = vrot.lane.b32.xlu0 %v9636_v29, %s10061_s21  ;;  %v1314_v8 = vshll.u32 %v10910_v35, 16  ;;  %v1318_v58 = vshrl.u32 %v10910_v35, 16  ;;  %v1307_v63 = vrot.slane %v1305_v30, 4  ;;  %v1310_v39 = vrot.slane %v1308_v57, 5  ;;  %v10922_v17 = vld [vmem:[#allocation2 + $0xbc] sm:$0x1] }
  0xef   : > { %v1303_v48 = vsel %vm10190_vm4, %v1298_v47, %v1302_v31  ;;  %v1324_v13 = vshll.u32 %v10922_v17, 16  ;;  %v2184_v16 = vshll.u32 %v2148_v4, 16  ;;  %v2167_v55 = vrot.slane %v2165_v42, 4  ;;  %v9625_v33 = vld [vmem:[#allocation2 + $0x30] sm:$0xff]  ;;  %v9626_v11 = vld [vmem:[#allocation2 + $0x3c] sm:$0xff] }
  0xf0   : > { %v2817_v56 = vunpack.c.l.b16 %v1303_v48  ;;  %v1316_v49 = vrot.slane %v1314_v8, 5  ;;  %v1320_v21 = vrot.slane %v1318_v58, 4  ;;  %v1311_v12 = vor.u32 %v1310_v39, %v1307_v63  ;;  %4196 = vmatpush.bf16.msrb.mxu3 %v9685_v18  ;;  %v9840_v2 = vld [vmem:[#allocation2 + $0x74] sm:$0x1]  ;;  %v10941_v8 = vld [vmem:[#allocation2 + $0x10] sm:$0xf] }
  0xf1   : > { %v2170_v43 = vrot.slane %v2168_v9, 5  ;;  %v2176_v23 = vrot.slane %v2174_v60, 5  ;;  %v1326_v44 = vrot.slane %v1324_v13, 5  ;;  %v2180_v0 = vrot.slane %v2178_v38, 4  ;;  %v10943_v58 = vld [vmem:[#allocation2 + $0x14] sm:$0x1] }
  0xf2   : > { %v2834_v61 = vpack.c.b16 %v2817_v56, %v2816_v26  ;;  %v1321_v3 = vor.u32 %v1320_v21, %v1316_v49  ;;  %v1312_v25 = vrot.slane %v1311_v12, 4  ;;  %v2186_v15 = vrot.slane %v2184_v16, 5  ;;  %v9841_v56 = vld [vmem:[#allocation2 + $0x70] sm:$0xf]  ;;  %v2118_v63 = vld [vmem:[#allocation2 + $0x24] sm:$0xf] }
  0xf3   : > { %v2171_v37 = vor.u32 %v2170_v43, %v2167_v55  ;;  %v2181_v32 = vor.u32 %v2180_v0, %v2176_v23  ;;  %v1460_v30 = vrot.slane %v9841_v56, 5  ;;  %v8806_v62 = vrot.slane %v1337_v52, 9  ;;  %v9676_v39 = vld [vmem:[%s13878_s1 + $0xb0] sm:$0xff]  ;;  %v2119_v6 = vld [vmem:[#allocation2 + $0x28] sm:$0xf] }
  0xf4   : > { %2864 = vrot.lane.b32.xlu2 %v2834_v61, %s10061_s21  ;;  %2984 = vrot.lane.b32.xlu1 %v9624_v24, %s10061_s21  ;;  %v9637_v20 = vld [vmem:[#allocation2 + $0xc0] sm:$0xff]  ;;  %v1322_v31 = vrot.slane %v1321_v3, 4  ;;  %v1317_v28 = vsel %vm10190_vm4, %v1312_v25, %v1316_v49  ;;  %v1463_v24 = vrot.slane %v9840_v2, 5  ;;  %v8813_v61 = vrot.slane %v1939_v59, 9  ;;  %v2149_v21 = vld [vmem:[#allocation2 + $0x2c] sm:$0x1] }
  0xf5   : > { %v2818_v50 = vunpack.c.l.b16 %v1317_v28  ;;  %v2172_v22 = vrot.slane %v2171_v37, 4  ;;  %v2182_v45 = vrot.slane %v2181_v32, 4  ;;  %v2005_v49 = vrot.slane %v10941_v8, 5  ;;  %4108 = vmatpush.bf16.msrb.mxu2 %v9676_v39  ;;  %v9688_v38 = vld [vmem:[%s13878_s1 + $0x110] sm:$0xff]  ;;  %v9842_v52 = vld [vmem:[#allocation2 + $0x7c] sm:$0xf] }
  0xf6   : > { %3010 = vrot.lane.b32.xlu0 %v9637_v20, %s10061_s21  ;;  %v1327_v40 = vsel %vm10190_vm4, %v1322_v31, %v1326_v44  ;;  %v2008_v4 = vrot.slane %v10943_v58, 5  ;;  %v2189_v9 = vshrl.u32 %v2118_v63, 16  ;;  %v2192_v60 = vshll.u32 %v2118_v63, 16  ;;  %v9684_v16 = vld [vmem:[%s13878_s1 + $0xf0] sm:$0xff]  ;;  %4290 = vmatpush.bf16.msrb.mxu0 %v9688_v38  ;;  %v1338_v59 = vld [vmem:[#allocation2 + $0x78] sm:$0xe] }
  0xf7   : > { %v2819_v29 = vunpack.c.l.b16 %v1327_v40  ;;  %v2177_v47 = vsel %vm10190_vm4, %v2172_v22, %v2176_v23  ;;  %v2187_v26 = vsel %vm10190_vm4, %v2182_v45, %v2186_v15  ;;  %v2198_v12 = vshll.u32 %v2119_v6, 16  ;;  %4197 = vmatpush.bf16.msrb.mxu3 %v9684_v16  ;;  %v9615_v32 = vld [vmem:[#allocation2 + $0x6c] sm:$0xff] }
  0xf8   : > { %v3204_v48 = vunpack.c.l.b16 %v2177_v47  ;;  %v3205_v51 = vunpack.c.l.b16 %v2187_v26  ;;  %v2202_v13 = vshrl.u32 %v2119_v6, 16  ;;  %v1462_v18 = vrot.slane %v1460_v30, 4  ;;  %v9627_v47 = vld [vmem:[#allocation2 + $0x48] sm:$0xff]  ;;  %v9843_v6 = vld [vmem:[#allocation2 + $0x80] sm:$0x1] }
  0xf9   : > { %v2835_v36 = vpack.c.b16 %v2819_v29, %v2818_v50  ;;  %v2006_v3 = vsel %vm10953_vm14, %v8813_v61, %v2005_v49  ;;  %v2007_v55 = vrot.slane %v2005_v49, 4  ;;  %v2208_v43 = vshll.u32 %v2149_v21, 16  ;;  %v9607_v26 = vld [vmem:[#allocation2 + $0xc] sm:$0xff] }
  0xfa   : > { %v3236_v57 = vpack.c.b16 %v3205_v51, %v3204_v48  ;;  %v3060_v23 = vunpack.c.l.b16 %v2006_v3  ;;  %v2191_v25 = vrot.slane %v2189_v9, 4  ;;  %v2194_v44 = vrot.slane %v2192_v60, 5  ;;  %v9675_v9 = vld [vmem:[%s13878_s1 + $0xa8] sm:$0xff]  ;;  %v10983_v60 = vld [vmem:[#allocation2 + $0x1c] sm:$0xf] }
  0xfb   : > { %v2200_v0 = vrot.slane %v2198_v12, 5  ;;  %v2009_v20 = vsel %vm10953_vm14, %v2007_v55, %v2008_v4  ;;  %v2204_v31 = vrot.slane %v2202_v13, 4  ;;  %v1461_v15 = vsel %vm10953_vm14, %v8806_v62, %v1460_v30  ;;  %v10985_v12 = vld [vmem:[#allocation2 + $0x20] sm:$0x1]  ;;  %v1940_v13 = vld [vmem:[#allocation2 + $0x18] sm:$0xe]  ;;  %4109 = vmatpush.bf16.msrb.mxu2 %v9675_v9 }
  0xfc   : > { %2986 = vrot.lane.b32.xlu1 %v9625_v33, %s10061_s21  ;;  %2866 = vrot.lane.b32.xlu2 %v2835_v36, %s10061_s21  ;;  %v3061_v37 = vunpack.c.l.b16 %v2009_v20  ;;  %v2195_v28 = vor.u32 %v2194_v44, %v2191_v25  ;;  %v2210_v40 = vrot.slane %v2208_v43, 5  ;;  %v1464_v50 = vsel %vm10953_vm14, %v1462_v18, %v1463_v24  ;;  %v2120_v18 = vld [vmem:[#allocation2 + $0x30] sm:$0xf]  ;;  %v2121_v55 = vld [vmem:[#allocation2 + $0x34] sm:$0xf] }
  0xfd   : > { %v2205_v33 = vor.u32 %v2204_v31, %v2200_v0  ;;  %v2886_v48 = vunpack.c.l.b16 %v1461_v15  ;;  %v1467_v2 = vrot.slane %v9842_v52, 5  ;;  %v2887_v30 = vunpack.c.l.b16 %v1464_v50  ;;  %v2150_v43 = vld [vmem:[#allocation2 + $0x38] sm:$0x1] }
  0xfe   : > { %3252 = vrot.lane.b32.xlu0 %v3236_v57, %s10061_s21  ;;  %v3092_v22 = vpack.c.b16 %v3061_v37, %v3060_v23  ;;  %v2196_v29 = vrot.slane %v2195_v28, 4  ;;  %v8807_v39 = vrot.slane %v1338_v59, 9  ;;  %v1470_v21 = vrot.slane %v9843_v6, 5  ;;  %v9683_v28 = vld [vmem:[%s13878_s1 + $0xe8] sm:$0xff]  ;;  %v9616_v52 = vld [vmem:[#allocation2 + $0x78] sm:$0xff] }
  0xff   : > { %v2206_v45 = vrot.slane %v2205_v33, 4  ;;  %v1469_v49 = vrot.slane %v1467_v2, 4  ;;  %v2909_v4 = vpack.c.b16 %v2887_v30, %v2886_v48  ;;  %v2012_v38 = vrot.slane %v10983_v60, 5  ;;  %4198 = vmatpush.bf16.msrb.mxu3 %v9683_v28 }
 0x100   : > { %v2201_v51 = vsel %vm10190_vm4, %v2196_v29, %v2200_v0  ;;  %v2015_v16 = vrot.slane %v10985_v12, 5  ;;  %v8814_v3 = vrot.slane %v1940_v13, 9  ;;  %v2213_v23 = vshrl.u32 %v2120_v18, 16 }
 0x101   : > { %v2211_v24 = vsel %vm10190_vm4, %v2206_v45, %v2210_v40  ;;  %v3206_v57 = vunpack.c.l.b16 %v2201_v51  ;;  %v2014_v0 = vrot.slane %v2012_v38, 4  ;;  %v2216_v20 = vshll.u32 %v2120_v18, 16 }
 0x102   : > { %v3207_v62 = vunpack.c.l.b16 %v2211_v24  ;;  %v2222_v31 = vshll.u32 %v2121_v55, 16  ;;  %v2226_v37 = vshrl.u32 %v2121_v55, 16  ;;  %v2013_v15 = vsel %vm10953_vm14, %v8814_v3, %v2012_v38  ;;  %v2122_v3 = vld [vmem:[#allocation2 + $0x3c] sm:$0xf]  ;;  %v2123_v55 = vld [vmem:[#allocation2 + $0x40] sm:$0xf] }
 0x103   : > { %v2215_v33 = vrot.slane %v2213_v23, 4  ;;  %v2016_v40 = vsel %vm10953_vm14, %v2014_v0, %v2015_v16  ;;  %v3062_v50 = vunpack.c.l.b16 %v2013_v15  ;;  %v1471_v48 = vsel %vm10953_vm14, %v1469_v49, %v1470_v21 }
 0x104   : > { %2988 = vrot.lane.b32.xlu1 %v9626_v11, %s10061_s21  ;;  %3108 = vrot.lane.b32.xlu2 %v3092_v22, %s10061_s21  ;;  %v3237_v63 = vpack.c.b16 %v3207_v62, %v3206_v57  ;;  %v2218_v22 = vrot.slane %v2216_v20, 5  ;;  %v2224_v29 = vrot.slane %v2222_v31, 5  ;;  %v3063_v45 = vunpack.c.l.b16 %v2016_v40  ;;  %v9628_v57 = vld [vmem:[#allocation2 + $0x54] sm:$0xff]  ;;  %v1339_v31 = vld [vmem:[#allocation2 + $0x84] sm:$0xe] }
 0x105   : > { %v2240_v23 = vshll.u32 %v2122_v3, 16  ;;  %v2250_v0 = vshrl.u32 %v2123_v55, 16  ;;  %v11012_v40 = vld [vmem:[#allocation2 + $0x28] sm:$0xf] }
 0x106   : > { %3254 = vrot.lane.b32.xlu0 %v3237_v63, %s10061_s21  ;;  %v2219_v51 = vor.u32 %v2218_v22, %v2215_v33  ;;  %v2019_v22 = vrot.slane %v11012_v40, 5 }
 0x107   : > { %v2242_v28 = vrot.slane %v2240_v23, 5  ;;  %v2252_v15 = vrot.slane %v2250_v0, 4 }
 0x108   : > { %v2220_v59 = vrot.slane %v2219_v51, 4  ;;  %v1941_v51 = vld [vmem:[#allocation2 + $0x24] sm:$0xe] }
 0x109   : > { %v2855_v36 = vpop.permute.xlu1 %2854 }
 0x10a   : > { %v3371_v56 = vsel %vm3332_vm11, %v9615_v32, %v2855_v36  ;;  %v2232_v36 = vshll.u32 %v2150_v43, 16  ;;  %v2237_v43 = vshrl.u32 %v2122_v3, 16 }
 0x10b   : > { %3982 = vmatmul.bf16.vlgmr.msra.gmra.mxu2 %v3371_v56  ;;  %v3093_v56 = vpack.c.b16 %v3063_v45, %v3062_v50  ;;  %v2151_v50 = vld [vmem:[#allocation2 + $0x44] sm:$0x1] }
 0x10c   : > { %v2839_v11 = vpop.permute.xlu0 %2838  ;;  %2990 = vrot.lane.b32.xlu1 %v9627_v47, %s10061_s21  ;;  %v2228_v47 = vrot.slane %v2226_v37, 4  ;;  %v2234_v24 = vrot.slane %v2232_v36, 5  ;;  %v2239_v37 = vrot.slane %v2237_v43, 4  ;;  %v9617_v36 = vld [vmem:[#allocation2 + $0x84] sm:$0xff] }
 0x10d   : > { %v3339_v61 = vsel %vm3332_vm11, %v9607_v26, %v2839_v11  ;;  %v1468_v26 = vsel %vm10953_vm14, %v8807_v39, %v1467_v2  ;;  %v2889_v11 = vunpack.c.l.b16 %v1471_v48  ;;  %3110 = vrot.lane.b32.xlu2 %v3093_v56, %s10061_s21  ;;  %v2225_v2 = vsel %vm10190_vm4, %v2220_v59, %v2224_v29  ;;  %v11015_v48 = vld [vmem:[#allocation2 + $0x2c] sm:$0x1] }
 0x10e   : > { %3942 = vmatmul.bf16.gmra.mxu0 %v3339_v61  ;;  %v2229_v30 = vor.u32 %v2228_v47, %v2224_v29  ;;  %v2888_v62 = vunpack.c.l.b16 %v1468_v26  ;;  %v3208_v6 = vunpack.c.l.b16 %v2225_v2  ;;  %v2243_v29 = vor.u32 %v2242_v28, %v2239_v37  ;;  %v9609_v2 = vld [vmem:[#allocation2 + $0x24] sm:$0xff] }
 0x10f   : > { %v2256_v47 = vshll.u32 %v2151_v50, 16  ;;  %v8808_v26 = vrot.slane %v1339_v31, 9  ;;  %v2021_v56 = vrot.slane %v2019_v22, 4  ;;  %v1477_v59 = vrot.slane %v10738_v54, 5  ;;  %v9687_v37 = vld [vmem:[%s13878_s1 + $0x108] sm:$0xff]  ;;  %v9629_v28 = vld [vmem:[#allocation2 + $0x60] sm:$0xff] }
 0x110   : > { %v2230_v61 = vrot.slane %v2229_v30, 4  ;;  %v2910_v9 = vpack.c.b16 %v2889_v11, %v2888_v62  ;;  %v2022_v30 = vrot.slane %v11015_v48, 5  ;;  %v9674_v62 = vld [vmem:[%s13878_s1 + $0xa0] sm:$0xff]  ;;  %4291 = vmatpush.bf16.msrb.mxu0 %v9687_v37 }
 0x111   : > { %v2999_v25 = vpop.permute.xlu1 %2998  ;;  %v2841_v44 = vpop.permute.xlu2 %2840  ;;  %v9682_v11 = vld [vmem:[%s13878_s1 + $0xe0] sm:$0xff]  ;;  %4110 = vmatpush.bf16.msrb.mxu2 %v9674_v62  ;;  %v11050_v62 = vld [vmem:[#allocation2 + $0x38] sm:$0x1] }
 0x112   : > { %v3435_v32 = vsel %vm3332_vm11, %v2909_v4, %v2999_v25  ;;  %v9608_v4 = vld [vmem:[#allocation2 + $0x18] sm:$0xff]  ;;  %v2235_v49 = vsel %vm10190_vm4, %v2230_v61, %v2234_v24  ;;  %v2246_v25 = vshll.u32 %v2123_v55, 16  ;;  %v2244_v24 = vrot.slane %v2243_v29, 4  ;;  %4199 = vmatpush.bf16.msrb.mxu3 %v9682_v11  ;;  %v1942_v11 = vld [vmem:[#allocation2 + $0x30] sm:$0xe] }
 0x113   : > { %4071 = vmatmul.bf16.vlgmr.msra.gmra.mxu3 %v3435_v32  ;;  %v3209_v21 = vunpack.c.l.b16 %v2235_v49  ;;  %v3343_v13 = vsel %vm3332_vm11, %v9608_v4, %v2841_v44  ;;  %v9844_v44 = vld [vmem:[#allocation2 + $0x88] sm:$0xf]  ;;  %v2023_v49 = vsel %vm10953_vm14, %v2021_v56, %v2022_v30  ;;  %v1340_v56 = vld [vmem:[#allocation2 + $0x90] sm:$0xe] }
 0x114   : > { %2992 = vrot.lane.b32.xlu1 %v9628_v57, %s10061_s21  ;;  %v3001_v38 = vpop.permute.xlu0 %3000  ;;  %v2248_v32 = vrot.slane %v2246_v25, 5  ;;  %v1474_v33 = vrot.slane %v9844_v44, 5 }
 0x115   : > { %v3238_v16 = vpack.c.b16 %v3209_v21, %v3208_v6  ;;  %v3439_v20 = vsel %vm3332_vm11, %v2910_v9, %v3001_v38 }
 0x116   : > { %v2253_v45 = vor.u32 %v2252_v15, %v2248_v32  ;;  %v1476_v57 = vrot.slane %v1474_v33, 4  ;;  %v2249_v54 = vsel %vm10190_vm4, %v2244_v24, %v2248_v32  ;;  %v1475_v3 = vsel %vm10953_vm14, %v8808_v26, %v1474_v33  ;;  %v2124_v32 = vld [vmem:[#allocation2 + $0x48] sm:$0xf]  ;;  %v2125_v15 = vld [vmem:[#allocation2 + $0x4c] sm:$0xf] }
 0x117   : > { %3256 = vrot.lane.b32.xlu0 %v3238_v16, %s10061_s21  ;;  %v3210_v16 = vunpack.c.l.b16 %v2249_v54  ;;  %v2261_v44 = vshrl.u32 %v2124_v32, 16  ;;  %v2264_v33 = vshll.u32 %v2124_v32, 16  ;;  %v2274_v50 = vshrl.u32 %v2125_v15, 16  ;;  %v2152_v26 = vld [vmem:[#allocation2 + $0x50] sm:$0x1]  ;;  %v9673_v54 = vld [vmem:[%s13878_s1 + $0x98] sm:$0xff] }
 0x118   : > { %v2254_v61 = vrot.slane %v2253_v45, 4  ;;  %v1478_v55 = vsel %vm10953_vm14, %v1476_v57, %v1477_v59  ;;  %v1481_v59 = vrot.slane %v10776_v5, 5  ;;  %4111 = vmatpush.bf16.msrb.mxu2 %v9673_v54 }
 0x119   : > { %v2857_v63 = vpop.permute.xlu2 %2856  ;;  %v2843_v18 = vpop.permute.xlu1 %2842  ;;  %v2891_v31 = vunpack.c.l.b16 %v1478_v55  ;;  %v2263_v29 = vrot.slane %v2261_v44, 4  ;;  %v2266_v45 = vrot.slane %v2264_v33, 5 }
 0x11a   : > { %v3375_v39 = vsel %vm3332_vm11, %v9616_v52, %v2857_v63  ;;  %v8815_v52 = vrot.slane %v1941_v51, 9  ;;  %v2258_v63 = vrot.slane %v2256_v47, 5  ;;  %v3347_v25 = vsel %vm3332_vm11, %v9609_v2, %v2843_v18 }
 0x11b   : > { %3987 = vmatmul.bf16.gmra.mxu2 %v3375_v39  ;;  %v2270_v18 = vshll.u32 %v2125_v15, 16  ;;  %v2267_v24 = vor.u32 %v2266_v45, %v2263_v29  ;;  %v8816_v2 = vrot.slane %v1942_v11, 9  ;;  %v1483_v55 = vrot.slane %v1481_v59, 4  ;;  %v9630_v45 = vld [vmem:[#allocation2 + $0x6c] sm:$0xff] }
 0x11c   : > { %v2020_v39 = vsel %vm10953_vm14, %v8815_v52, %v2019_v22  ;;  %v2259_v38 = vsel %vm10190_vm4, %v2254_v61, %v2258_v63  ;;  %2994 = vrot.lane.b32.xlu1 %v9629_v28, %s10061_s21  ;;  %v2276_v52 = vrot.slane %v2274_v50, 4  ;;  %v2280_v63 = vshll.u32 %v2152_v26, 16  ;;  %v2126_v26 = vld [vmem:[#allocation2 + $0x54] sm:$0xf] }
 0x11d   : > { %v3064_v9 = vunpack.c.l.b16 %v2020_v39  ;;  %v3211_v23 = vunpack.c.l.b16 %v2259_v38  ;;  %v2272_v51 = vrot.slane %v2270_v18, 5  ;;  %v9610_v38 = vld [vmem:[#allocation2 + $0x30] sm:$0xff] }
 0x11e   : > { %3947 = vmatmul.bf16.gmra.mxu0 %v3343_v13  ;;  %v3065_v13 = vunpack.c.l.b16 %v2023_v49  ;;  %v9618_v49 = vld [vmem:[#allocation2 + $0x90] sm:$0xff]  ;;  %v2282_v5 = vrot.slane %v2280_v63, 5 }
 0x11f   : > { %v3239_v0 = vpack.c.b16 %v3211_v23, %v3210_v16  ;;  %v2277_v61 = vor.u32 %v2276_v52, %v2272_v51  ;;  %v8809_v16 = vrot.slane %v1340_v56, 9 }
 0x120   : > { %v3094_v43 = vpack.c.b16 %v3065_v13, %v3064_v9  ;;  %v2268_v9 = vrot.slane %v2267_v24, 4  ;;  %v2127_v24 = vld [vmem:[#allocation2 + $0x58] sm:$0xf] }
 0x121   : > { %v11031_v6 = vpop.permute.xlu1 %2844  ;;  %3258 = vrot.lane.b32.xlu0 %v3239_v0, %s10061_s21  ;;  %v2278_v13 = vrot.slane %v2277_v61, 4  ;;  %v2288_v61 = vshll.u32 %v2126_v26, 16  ;;  %v2294_v63 = vshll.u32 %v2127_v24, 16 }
 0x122   : > { %3112 = vrot.lane.b32.xlu2 %v3094_v43, %s10061_s21  ;;  %v9681_v43 = vld [vmem:[%s13878_s1 + $0xd8] sm:$0xff]  ;;  %v2273_v0 = vsel %vm10190_vm4, %v2268_v9, %v2272_v51  ;;  %v3351_v33 = vsel %vm3332_vm11, %v9610_v38, %v11031_v6  ;;  %v9672_v6 = vld [vmem:[%s13878_s1 + $0x90] sm:$0xff]  ;;  %v9845_v51 = vld [vmem:[#allocation2 + $0x8] sm:$0x1] }
 0x123   : > { %4076 = vmatmul.bf16.gmra.mxu3 %v3439_v20  ;;  %v2890_v20 = vunpack.c.l.b16 %v1475_v3  ;;  %v2283_v28 = vsel %vm10190_vm4, %v2278_v13, %v2282_v5  ;;  %v3212_v32 = vunpack.c.l.b16 %v2273_v0  ;;  %v1400_v52 = vrot.slane %v9845_v51, 5  ;;  %4112 = vmatpush.bf16.msrb.mxu2 %v9672_v6  ;;  %v2153_v13 = vld [vmem:[#allocation2 + $0x5c] sm:$0x1] }
 0x124   : > { %4200 = vmatpush.bf16.msrb.mxu3 %v9681_v43  ;;  %v3213_v44 = vunpack.c.l.b16 %v2283_v28  ;;  %2996 = vrot.lane.b32.xlu1 %v9630_v45, %s10061_s21  ;;  %v2290_v5 = vrot.slane %v2288_v61, 5  ;;  %v1491_v51 = vrot.slane %v10857_v34, 5 }
 0x125   : > { %v2911_v22 = vpack.c.b16 %v2891_v31, %v2890_v20  ;;  %v1484_v31 = vrot.slane %v10784_v27, 5  ;;  %v1482_v27 = vsel %vm10953_vm14, %v8809_v16, %v1481_v59  ;;  %v9846_v59 = vld [vmem:[#allocation2 + $0x4] sm:$0xf] }
 0x126   : > { %v2892_v56 = vunpack.c.l.b16 %v1482_v27  ;;  %v1397_v11 = vrot.slane %v9846_v59, 5  ;;  %v1543_v16 = vld [vmem:[#allocation2 + $0x44] sm:$0x1] }
 0x127   : > { %v2859_v4 = vpop.permute.xlu2 %2858  ;;  %v1485_v29 = vsel %vm10953_vm14, %v1483_v55, %v1484_v31  ;;  %v2296_v55 = vrot.slane %v2294_v63, 5  ;;  %v2036_v31 = vrot.slane %v1543_v16, 5  ;;  %v11123_v16 = vld [vmem:[#allocation2 + $0x20] sm:$0x1] }
 0x128   : > { %v3379_v21 = vsel %vm3332_vm11, %v9617_v36, %v2859_v4  ;;  %v1514_v36 = vld [vmem:[#allocation2 + $0x34] sm:$0xf] }
 0x129   : > { %v11047_v47 = vpop.permute.xlu1 %2846  ;;  %v2026_v30 = vrot.slane %v1514_v36, 5  ;;  %v9680_v36 = vld [vmem:[%s13878_s1 + $0xd0] sm:$0xff] }
 0x12a   : > { %4201 = vmatpush.bf16.msrb.mxu3 %v9680_v36 }
 0x12b   : > { %3992 = vmatmul.bf16.gmra.mxu2 %v3379_v21  ;;  %v2028_v39 = vrot.slane %v2026_v30, 4  ;;  %v2029_v21 = vrot.slane %v11050_v62, 5  ;;  %v2027_v3 = vsel %vm10953_vm14, %v8816_v2, %v2026_v30  ;;  %v2893_v30 = vunpack.c.l.b16 %v1485_v29  ;;  %v9619_v2 = vld [vmem:[#allocation2 + $0x9c] sm:$0xff] }
 0x12d   : > { %v2030_v23 = vsel %vm10953_vm14, %v2028_v39, %v2029_v21  ;;  %v1328_v39 = vld [vmem:[#allocation2] sm:$0xe]  ;;  %v1341_v21 = vld [vmem:[#allocation2 + $0x9c] sm:$0xe]  ;;  %v2912_v38 = vpack.c.b16 %v2893_v30, %v2892_v56 }
 0x12e   : > { %3952 = vmatmul.bf16.gmra.mxu0 %v3347_v25  ;;  %v3066_v25 = vunpack.c.l.b16 %v2027_v3  ;;  %v3067_v37 = vunpack.c.l.b16 %v2030_v23  ;;  %v1943_v3 = vld [vmem:[#allocation2 + $0x3c] sm:$0xe]  ;;  %v8797_v28 = vrot.slane %v1328_v39, 9 }
 0x12f   : > { %v8817_v0 = vrot.slane %v1943_v3, 9  ;;  %v1414_v3 = vrot.slane %v11123_v16, 5 }
 0x130   : > { %v3095_v18 = vpack.c.b16 %v3067_v37, %v3066_v25  ;;  %v1488_v25 = vrot.slane %v10814_v53, 5 }
 0x132   : > { %v11072_v50 = vpop.permute.xlu1 %2848  ;;  %3114 = vrot.lane.b32.xlu2 %v3095_v18, %s10061_s21  ;;  %v9611_v18 = vld [vmem:[#allocation2 + $0x3c] sm:$0xff] }
 0x133   : > { %v3003_v57 = vpop.permute.xlu0 %3002  ;;  %v3355_v63 = vsel %vm3332_vm11, %v9611_v18, %v11047_v47  ;;  %v1342_v18 = vld [vmem:[#allocation2 + $0xa8] sm:$0xe] }
 0x134   : > { %v3443_v4 = vsel %vm3332_vm11, %v2911_v22, %v3003_v57  ;;  %v3240_v22 = vpack.c.b16 %v3213_v44, %v3212_v32  ;;  %v2285_v57 = vshrl.u32 %v2126_v26, 16  ;;  %v2304_v44 = vshll.u32 %v2153_v13, 16  ;;  %v9671_v13 = vld [vmem:[%s13878_s1 + $0x88] sm:$0xff] }
 0x135   : > { %4081 = vmatmul.bf16.gmra.mxu3 %v3443_v4  ;;  %v2298_v4 = vshrl.u32 %v2127_v24, 16  ;;  %v1490_v26 = vrot.slane %v1488_v25, 4  ;;  %v1398_v24 = vsel %vm10953_vm14, %v8797_v28, %v1397_v11  ;;  %4113 = vmatpush.bf16.msrb.mxu2 %v9671_v13  ;;  %v2129_v28 = vld [vmem:[#allocation2 + $0x64] sm:$0xf]  ;;  %v1498_v13 = vrot.slane %v10886_v10, 5 }
 0x136   : > { %3260 = vrot.lane.b32.xlu0 %v3240_v22, %s10061_s21  ;;  %v2287_v54 = vrot.slane %v2285_v57, 4  ;;  %v8810_v22 = vrot.slane %v1341_v21, 9  ;;  %v2306_v30 = vrot.slane %v2304_v44, 5  ;;  %v2868_v47 = vunpack.c.l.b16 %v1398_v24  ;;  %v9849_v44 = vld [vmem:[#allocation2 + $0x14] sm:$0x1] }
 0x137   : > { %v2300_v43 = vrot.slane %v2298_v4, 4 }
 0x138   : > { %v2291_v32 = vor.u32 %v2290_v5, %v2287_v54  ;;  %v1492_v54 = vsel %vm10953_vm14, %v1490_v26, %v1491_v51  ;;  %v9679_v5 = vld [vmem:[%s13878_s1 + $0xc8] sm:$0xff] }
 0x139   : > { %v2861_v20 = vpop.permute.xlu2 %2860  ;;  %4202 = vmatpush.bf16.msrb.mxu3 %v9679_v5  ;;  %v9620_v51 = vld [vmem:[#allocation2 + $0xa8] sm:$0xff] }
 0x13a   : > { %v3383_v15 = vsel %vm3332_vm11, %v9618_v49, %v2861_v20  ;;  %v1516_v49 = vld [vmem:[#allocation2 + $0x40] sm:$0xf]  ;;  %v2292_v36 = vrot.slane %v2291_v32, 4 }
 0x13b   : > { %3997 = vmatmul.bf16.gmra.mxu2 %v3383_v15  ;;  %v2033_v9 = vrot.slane %v1516_v49, 5  ;;  %v2301_v15 = vor.u32 %v2300_v43, %v2296_v55  ;;  %v1489_v49 = vsel %vm10953_vm14, %v8810_v22, %v1488_v25  ;;  %v9848_v43 = vld [vmem:[#allocation2 + $0x10] sm:$0xf]  ;;  %v2128_v25 = vld [vmem:[#allocation2 + $0x60] sm:$0xf]  ;;  %v1495_v22 = vrot.slane %v10884_v46, 5 }
 0x13c   : > { %v2297_v59 = vsel %vm10190_vm4, %v2292_v36, %v2296_v55  ;;  %v1569_v55 = vshrl.u32 %v10941_v8, 16  ;;  %v2309_v32 = vshrl.u32 %v2128_v25, 16 }
 0x13d   : > { %v2035_v20 = vrot.slane %v2033_v9, 4  ;;  %v2034_v27 = vsel %vm10953_vm14, %v8817_v0, %v2033_v9  ;;  %v2302_v56 = vrot.slane %v2301_v15, 4  ;;  %v3214_v34 = vunpack.c.l.b16 %v2297_v59 }
 0x13e   : > { %3957 = vmatmul.bf16.gmra.mxu0 %v3351_v33  ;;  %v1399_v33 = vrot.slane %v1397_v11, 4  ;;  %v3068_v45 = vunpack.c.l.b16 %v2034_v27  ;;  %v2894_v0 = vunpack.c.l.b16 %v1489_v49  ;;  %v2312_v15 = vshll.u32 %v2128_v25, 16 }
 0x13f   : > { %v2037_v29 = vsel %vm10953_vm14, %v2035_v20, %v2036_v31  ;;  %v2307_v4 = vsel %vm10190_vm4, %v2302_v56, %v2306_v30  ;;  %v2895_v20 = vunpack.c.l.b16 %v1492_v54  ;;  %v1329_v31 = vld [vmem:[#allocation2 + $0xc] sm:$0xe]  ;;  %v2318_v27 = vshll.u32 %v2129_v28, 16 }
 0x140   : > { %v3069_v6 = vunpack.c.l.b16 %v2037_v29  ;;  %v1401_v61 = vsel %vm10953_vm14, %v1399_v33, %v1400_v52  ;;  %v3215_v39 = vunpack.c.l.b16 %v2307_v4  ;;  %v1407_v33 = vrot.slane %v9849_v44, 5 }
 0x141   : > { %v2869_v21 = vunpack.c.l.b16 %v1401_v61  ;;  %v2322_v29 = vshrl.u32 %v2129_v28, 16  ;;  %v2311_v36 = vrot.slane %v2309_v32, 4  ;;  %v2314_v26 = vrot.slane %v2312_v15, 5  ;;  %v1544_v61 = vld [vmem:[#allocation2 + $0x50] sm:$0x1] }
 0x142   : > { %v3096_v57 = vpack.c.b16 %v3069_v6, %v3068_v45  ;;  %v3241_v9 = vpack.c.b16 %v3215_v39, %v3214_v34  ;;  %v1518_v45 = vld [vmem:[#allocation2 + $0x4c] sm:$0xf]  ;;  %v2154_v6 = vld [vmem:[#allocation2 + $0x68] sm:$0x1]  ;;  %v8798_v56 = vrot.slane %v1329_v31, 9  ;;  %v2913_v59 = vpack.c.b16 %v2895_v20, %v2894_v0 }
 0x143   : > { %v2863_v23 = vpop.permute.xlu2 %2862  ;;  %v2040_v24 = vrot.slane %v1518_v45, 5  ;;  %v2315_v4 = vor.u32 %v2314_v26, %v2311_v36  ;;  %v2324_v34 = vrot.slane %v2322_v29, 4  ;;  %v2328_v46 = vshll.u32 %v2154_v6, 16  ;;  %v1330_v32 = vld [vmem:[#allocation2 + $0x18] sm:$0xe] }
 0x144   : > { %v3387_v53 = vsel %vm3332_vm11, %v9619_v2, %v2863_v23  ;;  %3116 = vrot.lane.b32.xlu2 %v3096_v57, %s10061_s21  ;;  %v1404_v23 = vrot.slane %v9848_v43, 5  ;;  %3262 = vrot.lane.b32.xlu0 %v3241_v9, %s10061_s21  ;;  %v2320_v57 = vrot.slane %v2318_v27, 5  ;;  %v8811_v39 = vrot.slane %v1342_v18, 9  ;;  %v9850_v15 = vld [vmem:[#allocation2 + $0x1c] sm:$0xf] }
 0x145   : > { %v2042_v49 = vrot.slane %v2040_v24, 4  ;;  %v2043_v54 = vrot.slane %v1544_v61, 5  ;;  %v1497_v9 = vrot.slane %v1495_v22, 4  ;;  %v2316_v5 = vrot.slane %v2315_v4, 4  ;;  %v1507_v6 = vld [vmem:[#allocation2 + $0xc] sm:$0xf] }
 0x146   : > { %v11088_v37 = vpop.permute.xlu1 %2850  ;;  %v1406_v30 = vrot.slane %v1404_v23, 4  ;;  %v2330_v20 = vrot.slane %v2328_v46, 5  ;;  %v1405_v28 = vsel %vm10953_vm14, %v8798_v56, %v1404_v23  ;;  %v1411_v44 = vrot.slane %v9850_v15, 5  ;;  %v11177_v15 = vld [vmem:[#allocation2 + $0x58] sm:$0xf] }
 0x147   : > { %v2044_v0 = vsel %vm10953_vm14, %v2042_v49, %v2043_v54  ;;  %v1496_v23 = vsel %vm10953_vm14, %v8811_v39, %v1495_v22  ;;  %v8799_v56 = vrot.slane %v1330_v32, 9  ;;  %v1559_v4 = vshll.u32 %v1507_v6, 16  ;;  %v1343_v22 = vld [vmem:[#allocation2 + $0xb4] sm:$0xe]  ;;  %v9670_v49 = vld [vmem:[%s13878_s1 + $0x80] sm:$0xff] }
 0x148   : > { %v1408_v10 = vsel %vm10953_vm14, %v1406_v30, %v1407_v33  ;;  %v3071_v29 = vunpack.c.l.b16 %v2044_v0  ;;  %v1499_v33 = vsel %vm10953_vm14, %v1497_v9, %v1498_v13  ;;  %v1502_v46 = vrot.slane %v10910_v35, 5  ;;  %v9678_v54 = vld [vmem:[%s13878_s1 + $0xc0] sm:$0xff]  ;;  %v9621_v13 = vld [vmem:[#allocation2 + $0xb4] sm:$0xff]  ;;  %4114 = vmatpush.bf16.msrb.mxu2 %v9670_v49  ;;  %v2130_v0 = vld [vmem:[#allocation2 + $0x6c] sm:$0xf] }
 0x149   : > { %v2897_v39 = vunpack.c.l.b16 %v1499_v33  ;;  %v1571_v35 = vrot.slane %v1569_v55, 4  ;;  %4203 = vmatpush.bf16.msrb.mxu3 %v9678_v54  ;;  %v1331_v49 = vld [vmem:[#allocation2 + $0x24] sm:$0xe]  ;;  %v9852_v54 = vld [vmem:[#allocation2 + $0x2c] sm:$0x1] }
 0x14a   : > { %v1504_v55 = vrot.slane %v1502_v46, 4 }
 0x14b   : > { %4002 = vmatmul.bf16.gmra.mxu2 %v3387_v53  ;;  %v3005_v2 = vpop.permute.xlu0 %3004  ;;  %v2900_v53 = vpack.c.b16 %v2869_v21, %v2868_v47  ;;  %v9612_v21 = vld [vmem:[#allocation2 + $0x48] sm:$0xff] }
 0x14c   : > { %v3447_v11 = vsel %vm3332_vm11, %v2912_v38, %v3005_v2  ;;  %v9686_v38 = vld [vmem:[%s13878_s1 + $0x100] sm:$0xff]  ;;  %v3359_v36 = vsel %vm3332_vm11, %v9612_v21, %v11072_v50  ;;  %v2870_v50 = vunpack.c.l.b16 %v1405_v28  ;;  %v1561_v21 = vrot.slane %v1559_v4, 5 }
 0x14d   : > { %4086 = vmatmul.bf16.gmra.mxu3 %v3447_v11  ;;  %4292 = vmatpush.bf16.msrb.mxu0 %v9686_v38  ;;  %v2325_v38 = vor.u32 %v2324_v34, %v2320_v57  ;;  %v2871_v34 = vunpack.c.l.b16 %v1408_v10  ;;  %v1575_v28 = vshll.u32 %v10943_v58, 16 }
 0x14e   : > { %v11112_v52 = vpop.permute.xlu1 %2852  ;;  %3962 = vmatmul.bf16.gmra.mxu0 %v3355_v63  ;;  %v1944_v63 = vld [vmem:[#allocation2 + $0x48] sm:$0xe]  ;;  %v2865_v2 = vpop.permute.xlu2 %2864 }
 0x14f   : > { %v8818_v11 = vrot.slane %v1944_v63, 9  ;;  %v3391_v31 = vsel %vm3332_vm11, %v9620_v51, %v2865_v2  ;;  %v2326_v45 = vrot.slane %v2325_v38, 4  ;;  %v1556_v63 = vshrl.u32 %v1507_v6, 16  ;;  %v11189_v6 = vld [vmem:[#allocation2 + $0x5c] sm:$0x1] }
 0x150   : > { %v1565_v2 = vshll.u32 %v10941_v8, 16 }
 0x151   : > { %v2041_v25 = vsel %vm10953_vm14, %v8818_v11, %v2040_v24  ;;  %v2331_v24 = vsel %vm10190_vm4, %v2326_v45, %v2330_v20  ;;  %v2901_v20 = vpack.c.b16 %v2871_v34, %v2870_v50  ;;  %v2155_v50 = vld [vmem:[#allocation2 + $0x74] sm:$0x1] }
 0x152   : > { %v3070_v27 = vunpack.c.l.b16 %v2041_v25  ;;  %v3217_v61 = vunpack.c.l.b16 %v2331_v24  ;;  %v11160_v9 = vrot.slane %v1565_v2, 5  ;;  %v8812_v25 = vrot.slane %v1343_v22, 9 }
 0x154   : > { %v3097_v30 = vpack.c.b16 %v3071_v29, %v3070_v27  ;;  %v1572_v27 = vor.u32 %v1571_v35, %v11160_v9  ;;  %v2131_v29 = vld [vmem:[#allocation2 + $0x70] sm:$0xf]  ;;  %v11187_v58 = vsel %vm10953_vm14, %v8812_v25, %v1502_v46 }
 0x155   : > { %v2898_v46 = vunpack.c.l.b16 %v11187_v58 }
 0x156   : > { %v2981_v47 = vpop.permute.xlu1 %2980  ;;  %3118 = vrot.lane.b32.xlu2 %v3097_v30, %s10061_s21  ;;  %v2867_v8 = vpop.permute.xlu2 %2866 }
 0x157   : > { %v3399_v43 = vsel %vm3332_vm11, %v2900_v53, %v2981_v47  ;;  %v2321_v53 = vsel %vm10190_vm4, %v2316_v5, %v2320_v57  ;;  %v1413_v57 = vrot.slane %v1411_v44, 4  ;;  %v1558_v47 = vrot.slane %v1556_v63, 4 }
 0x158   : > { %4026 = vmatmul.bf16.vlgmr.msra.gmra.mxu1 %v3399_v43  ;;  %v3007_v18 = vpop.permute.xlu0 %3006  ;;  %v3216_v26 = vunpack.c.l.b16 %v2321_v53  ;;  %v11166_v5 = vsel %vm10953_vm14, %v8799_v56, %v1411_v44  ;;  %v9613_v43 = vld [vmem:[#allocation2 + $0x54] sm:$0xff]  ;;  %v2336_v53 = vshll.u32 %v2130_v0, 16  ;;  %v3395_v45 = vsel %vm3332_vm11, %v9621_v13, %v2867_v8 }
 0x159   : > { %v3451_v51 = vsel %vm3332_vm11, %v2913_v59, %v3007_v18  ;;  %v2896_v59 = vunpack.c.l.b16 %v1496_v23  ;;  %v11172_v38 = vsel %vm10953_vm14, %v1413_v57, %v1414_v3  ;;  %v1562_v32 = vor.u32 %v1561_v21, %v1558_v47 }
 0x15a   : > { %v3242_v11 = vpack.c.b16 %v3217_v61, %v3216_v26  ;;  %v2333_v3 = vshrl.u32 %v2130_v0, 16  ;;  %v2872_v44 = vunpack.c.l.b16 %v11166_v5  ;;  %v2873_v18 = vunpack.c.l.b16 %v11172_v38  ;;  %v9614_v38 = vld [vmem:[#allocation2 + $0x60] sm:$0xff] }
 0x15b   : > { %4007 = vmatmul.bf16.gmra.mxu2 %v3391_v31  ;;  %v1505_v31 = vrot.slane %v10922_v17, 5  ;;  %v2914_v16 = vpack.c.b16 %v2897_v39, %v2896_v59  ;;  %v3363_v17 = vsel %vm3332_vm11, %v9613_v43, %v11088_v37  ;;  %v2047_v23 = vrot.slane %v11177_v15, 5  ;;  %v9851_v59 = vld [vmem:[#allocation2 + $0x28] sm:$0xf]  ;;  %v1509_v43 = vld [vmem:[#allocation2 + $0x18] sm:$0xf] }
 0x15c   : > { %3264 = vrot.lane.b32.xlu0 %v3242_v11, %s10061_s21  ;;  %v2050_v56 = vrot.slane %v11189_v6, 5  ;;  %v1563_v30 = vrot.slane %v1562_v32, 4  ;;  %v2335_v37 = vrot.slane %v2333_v3, 4  ;;  %v2342_v57 = vshll.u32 %v2131_v29, 16 }
 0x15d   : > { %4091 = vmatmul.bf16.gmra.mxu3 %v3451_v51  ;;  %v1506_v26 = vsel %vm10953_vm14, %v1504_v55, %v1505_v31  ;;  %v2049_v24 = vrot.slane %v2047_v23, 4  ;;  %v1573_v61 = vrot.slane %v1572_v27, 4  ;;  %v1577_v63 = vrot.slane %v1575_v28, 5 }
 0x15e   : > { %3967 = vmatmul.bf16.gmra.mxu0 %v3359_v36  ;;  %v2983_v10 = vpop.permute.xlu1 %2982  ;;  %v1945_v36 = vld [vmem:[#allocation2 + $0x54] sm:$0xe]  ;;  %v2338_v34 = vrot.slane %v2336_v53, 5  ;;  %v2899_v2 = vunpack.c.l.b16 %v1506_v26  ;;  %v1418_v39 = vrot.slane %v9851_v59, 5  ;;  %v1421_v47 = vrot.slane %v9852_v54, 5 }
 0x15f   : > { %v3403_v33 = vsel %vm3332_vm11, %v2901_v20, %v2983_v10  ;;  %v8819_v51 = vrot.slane %v1945_v36, 9  ;;  %v2051_v11 = vsel %vm10953_vm14, %v2049_v24, %v2050_v56  ;;  %v1568_v25 = vsel %vm10190_vm4, %v1563_v30, %v11160_v9 }
 0x160   : > { %v3009_v22 = vpop.permute.xlu0 %3008  ;;  %v3073_v35 = vunpack.c.l.b16 %v2051_v11  ;;  %v2339_v13 = vor.u32 %v2338_v34, %v2335_v37  ;;  %v2344_v0 = vrot.slane %v2342_v57, 5  ;;  %v2346_v20 = vshrl.u32 %v2131_v29, 16 }
 0x161   : > { %v2048_v4 = vsel %vm10953_vm14, %v8819_v51, %v2047_v23  ;;  %v2352_v8 = vshll.u32 %v2155_v50, 16  ;;  %v3455_v55 = vsel %vm3332_vm11, %v2914_v16, %v3009_v22  ;;  %v1578_v31 = vsel %vm10190_vm4, %v1573_v61, %v1577_v63  ;;  %v1332_v61 = vld [vmem:[#allocation2 + $0x30] sm:$0xe]  ;;  %v3109_v22 = vpop.permute.xlu2 %3108 }
 0x162   : > { %v3072_v21 = vunpack.c.l.b16 %v2048_v4  ;;  %v2340_v10 = vrot.slane %v2339_v13, 4  ;;  %v8800_v32 = vrot.slane %v1331_v49, 9  ;;  %v1420_v3 = vrot.slane %v1418_v39, 4  ;;  %v2548_v13 = vld [vmem:[#allocation2 + $0x18] sm:$0xe] }
 0x163   : > { %v2348_v27 = vrot.slane %v2346_v20, 4  ;;  %v1580_v53 = vshrl.u32 %v1509_v43, 16  ;;  %v3012_v58 = vunpack.c.l.b16 %v1568_v25  ;;  %v1583_v36 = vshll.u32 %v1509_v43, 16 }
 0x164   : > { %v3098_v28 = vpack.c.b16 %v3073_v35, %v3072_v21  ;;  %v1589_v9 = vshll.u32 %v10983_v60, 16  ;;  %v1593_v29 = vshrl.u32 %v10983_v60, 16  ;;  %v3013_v16 = vunpack.c.l.b16 %v1578_v31 }
 0x165   : > { %v2349_v23 = vor.u32 %v2348_v27, %v2344_v0  ;;  %v1582_v26 = vrot.slane %v1580_v53, 4  ;;  %v1585_v51 = vrot.slane %v1583_v36, 5  ;;  %v2902_v56 = vpack.c.b16 %v2873_v18, %v2872_v44  ;;  %v11228_v18 = vld [vmem:[#allocation2 + $0x64] sm:$0xf]  ;;  %v11245_v27 = vpop.f32.mrf.mxu0 }
 0x166   : > { %3120 = vrot.lane.b32.xlu2 %v3098_v28, %s10061_s21  ;;  %v11216_v24 = vrot.slane %v1589_v9, 5  ;;  %v1595_v37 = vrot.slane %v1593_v29, 4  ;;  %v2985_v60 = vpop.permute.xlu1 %2984  ;;  %v2915_v4 = vpack.c.b16 %v2899_v2, %v2898_v46  ;;  %v11224_v50 = vsel %vm10953_vm14, %v1420_v3, %v1421_v47  ;;  %v11232_v2 = vld [vmem:[#allocation2 + $0x20] sm:$0x1]  ;;  %v2132_v3 = vld [vmem:[#allocation2 + $0x78] sm:$0xf] }
 0x167   : > { %v2350_v30 = vrot.slane %v2349_v23, 4  ;;  %v1586_v63 = vor.u32 %v1585_v51, %v1582_v26  ;;  %v3044_v5 = vpack.c.b16 %v3013_v16, %v3012_v58  ;;  %v1599_v46 = vshll.u32 %v10985_v12, 16  ;;  %v9856_v58 = vld [vmem:[#allocation2 + $0x38] sm:$0x1]  ;;  %v2133_v16 = vld [vmem:[#allocation2 + $0x7c] sm:$0xf] }
 0x168   : > { %4031 = vmatmul.bf16.gmra.mxu1 %v3403_v33  ;;  %v2354_v33 = vrot.slane %v2352_v8, 5  ;;  %v3011_v34 = vpop.permute.xlu0 %3010  ;;  %v1596_v49 = vor.u32 %v1595_v37, %v11216_v24  ;;  %v2617_v54 = vrot.slane %v11232_v2, 5  ;;  %v3407_v47 = vsel %vm3332_vm11, %v2902_v56, %v2985_v60  ;;  %v1946_v8 = vld [vmem:[#allocation2 + $0x60] sm:$0xe] }
 0x169   : > { %v8801_v35 = vrot.slane %v1332_v61, 9  ;;  %v1587_v25 = vrot.slane %v1586_v63, 4  ;;  %v3459_v31 = vsel %vm3332_vm11, %v2915_v4, %v3011_v34  ;;  %v2875_v12 = vunpack.c.l.b16 %v11224_v50  ;;  %v1511_v4 = vld [vmem:[#allocation2 + $0x24] sm:$0xf] }
 0x16a   : > { %v2355_v44 = vsel %vm10190_vm4, %v2350_v30, %v2354_v33  ;;  %v3463_v28 = vsel %vm3332_vm11, %v3044_v5, %v3109_v22  ;;  %v1428_v36 = vrot.slane %v9856_v58, 5  ;;  %v1597_v9 = vrot.slane %v1596_v49, 4  ;;  %v2156_v30 = vld [vmem:[#allocation2 + $0x80] sm:$0x1] }
 0x16b   : > { %4012 = vmatmul.bf16.gmra.mxu2 %v3395_v45  ;;  %v2345_v45 = vsel %vm10190_vm4, %v2340_v10, %v2344_v0  ;;  %v3219_v59 = vunpack.c.l.b16 %v2355_v44  ;;  %v9855_v0 = vld [vmem:[#allocation2 + $0x1c] sm:$0xf]  ;;  %v3367_v10 = vsel %vm3332_vm11, %v9614_v38, %v11112_v52  ;;  %v1601_v29 = vrot.slane %v1599_v46, 5 }
 0x16c   : > { %v3218_v57 = vunpack.c.l.b16 %v2345_v45  ;;  %v2614_v20 = vrot.slane %v9855_v0, 5  ;;  %v8829_v23 = vrot.slane %v2548_v13, 9  ;;  %v8820_v52 = vrot.slane %v1946_v8, 9 }
 0x16d   : > { %4096 = vmatmul.bf16.gmra.mxu3 %v3455_v55  ;;  %v2054_v55 = vrot.slane %v11228_v18, 5  ;;  %v1592_v26 = vsel %vm10190_vm4, %v1587_v25, %v11216_v24  ;;  %v2357_v37 = vshrl.u32 %v2132_v3, 16  ;;  %v2366_v61 = vshll.u32 %v2133_v16, 16 }
 0x16e   : > { %3972 = vmatmul.bf16.gmra.mxu0 %v3363_v17  ;;  %v11220_v17 = vsel %vm10953_vm14, %v8800_v32, %v1418_v39  ;;  %v9853_v39 = vld [vmem:[#allocation2 + $0x34] sm:$0xf]  ;;  %v3243_v43 = vpack.c.b16 %v3219_v59, %v3218_v57  ;;  %v11243_v32 = vld [vmem:[#allocation2 + $0x68] sm:$0x1]  ;;  %v2616_v51 = vrot.slane %v2614_v20, 4  ;;  %v2360_v57 = vshll.u32 %v2132_v3, 16 }
 0x16f   : > { %v1425_v11 = vrot.slane %v9853_v39, 5  ;;  %v2874_v21 = vunpack.c.l.b16 %v11220_v17  ;;  %v2056_v33 = vrot.slane %v2054_v55, 4  ;;  %v2057_v56 = vrot.slane %v11243_v32, 5 }
 0x170   : > { %3266 = vrot.lane.b32.xlu0 %v3243_v43, %s10061_s21  ;;  %v2055_v60 = vsel %vm10953_vm14, %v8820_v52, %v2054_v55  ;;  %v2370_v63 = vshrl.u32 %v2133_v16, 16  ;;  %v1602_v50 = vsel %vm10190_vm4, %v1597_v9, %v1601_v29  ;;  %v2359_v38 = vrot.slane %v2357_v37, 4  ;;  %v2987_v9 = vpop.permute.xlu1 %2986  ;;  %v3253_v17 = vpop.permute.xlu0 %3252 }
 0x171   : > { %v1427_v53 = vrot.slane %v1425_v11, 4  ;;  %v11250_v45 = vsel %vm10953_vm14, %v8801_v35, %v1425_v11  ;;  %v2058_v5 = vsel %vm10953_vm14, %v2056_v33, %v2057_v56  ;;  %v3074_v24 = vunpack.c.l.b16 %v2055_v60  ;;  %v3111_v60 = vpop.permute.xlu2 %3110 }
 0x172   : > { %v3075_v44 = vunpack.c.l.b16 %v2058_v5  ;;  %v2362_v34 = vrot.slane %v2360_v57, 5  ;;  %v2368_v22 = vrot.slane %v2366_v61, 5  ;;  %v2372_v59 = vrot.slane %v2370_v63, 4  ;;  %v1947_v61 = vld [vmem:[#allocation2 + $0x6c] sm:$0xe] }
 0x173   : > { %v1429_v39 = vsel %vm10953_vm14, %v1427_v53, %v1428_v36  ;;  %v2376_v11 = vshll.u32 %v2156_v30, 16  ;;  %v1604_v49 = vshrl.u32 %v1511_v4, 16  ;;  %v1607_v46 = vshll.u32 %v1511_v4, 16  ;;  %v11281_v30 = vld [vmem:[#allocation2 + $0x70] sm:$0xf] }
 0x174   : > { %v3014_v2 = vunpack.c.l.b16 %v1592_v26  ;;  %v2363_v35 = vor.u32 %v2362_v34, %v2359_v38  ;;  %v2373_v13 = vor.u32 %v2372_v59, %v2368_v22  ;;  %v3015_v43 = vunpack.c.l.b16 %v1602_v50  ;;  %v11285_v4 = vld [vmem:[#allocation2 + $0x3c] sm:$0xe]  ;;  %v2549_v5 = vld [vmem:[#allocation2 + $0x24] sm:$0xe]  ;;  %v11288_v59 = vld [vmem:[#allocation2 + $0x74] sm:$0x1] }
 0x175   : > { %v2615_v25 = vsel %vm10953_vm14, %v8829_v23, %v2614_v20  ;;  %v2618_v0 = vsel %vm10953_vm14, %v2616_v51, %v2617_v54  ;;  %v2378_v8 = vrot.slane %v2376_v11, 5  ;;  %v1606_v3 = vrot.slane %v1604_v49, 4  ;;  %v9638_v54 = vld [vmem:[#allocation2 + $0x18] sm:$0xff]  ;;  %v9858_v49 = vld [vmem:[#allocation2 + $0x40] sm:$0xf] }
 0x176   : > { %v2364_v55 = vrot.slane %v2363_v35, 4  ;;  %v1609_v53 = vrot.slane %v1607_v46, 5  ;;  %v2876_v58 = vunpack.c.l.b16 %v11250_v45  ;;  %v1613_v36 = vshll.u32 %v11012_v40, 16  ;;  %v2134_v35 = vld [vmem:[#allocation2 + $0x84] sm:$0xf] }
 0x177   : > { %v1617_v20 = vshrl.u32 %v11012_v40, 16  ;;  %v2877_v29 = vunpack.c.l.b16 %v1429_v39  ;;  %v3284_v16 = vunpack.c.l.b16 %v2615_v25  ;;  %v1623_v40 = vshll.u32 %v11015_v48, 16 }
 0x178   : > { %4036 = vmatmul.bf16.gmra.mxu1 %v3407_v47  ;;  %v3099_v47 = vpack.c.b16 %v3075_v44, %v3074_v24  ;;  %v2369_v23 = vsel %vm10190_vm4, %v2364_v55, %v2368_v22  ;;  %v1610_v45 = vor.u32 %v1609_v53, %v1606_v3  ;;  %v1615_v51 = vrot.slane %v1613_v36, 5  ;;  %v9857_v24 = vld [vmem:[#allocation2 + $0x28] sm:$0xf]  ;;  %v9860_v3 = vld [vmem:[#allocation2 + $0x2c] sm:$0x1] }
 0x179   : > { %v3220_v33 = vunpack.c.l.b16 %v2369_v23  ;;  %v1619_v56 = vrot.slane %v1617_v20, 4  ;;  %v3527_v63 = vsel %vm3332_vm11, %v9638_v54, %v3253_v17  ;;  %v2621_v38 = vrot.slane %v9857_v24, 5  ;;  %v2135_v55 = vld [vmem:[#allocation2 + $0x88] sm:$0xf]  ;;  %v2157_v54 = vld [vmem:[#allocation2 + $0x8c] sm:$0x1] }
 0x17a   : > { %3122 = vrot.lane.b32.xlu2 %v3099_v47, %s10061_s21  ;;  %v8821_v44 = vrot.slane %v1947_v61, 9  ;;  %v2904_v34 = vpack.c.b16 %v2877_v29, %v2876_v58  ;;  %v1611_v48 = vrot.slane %v1610_v45, 4  ;;  %v2061_v39 = vrot.slane %v11281_v30, 5 }
 0x17b   : > { %4115 = vmatmul.bf16.vlgmr.msrb.gmra.mxu2 %v3463_v28  ;;  %v2374_v28 = vrot.slane %v2373_v13, 4  ;;  %v1620_v50 = vor.u32 %v1619_v56, %v1615_v51  ;;  %v1432_v46 = vrot.slane %v9858_v49, 5  ;;  %v1625_v47 = vrot.slane %v1623_v40, 5  ;;  %v1549_v40 = vld [vmem:[#allocation2 + $0x8c] sm:$0x1] }
 0x17c   : > { %v8802_v13 = vrot.slane %v11285_v4, 9  ;;  %v2624_v53 = vrot.slane %v9860_v3, 5  ;;  %v2064_v58 = vrot.slane %v11288_v59, 5  ;;  %v1616_v20 = vsel %vm10190_vm4, %v1611_v48, %v1615_v51  ;;  %v1528_v51 = vld [vmem:[#allocation2 + $0x88] sm:$0xf] }
 0x17d   : > { %4101 = vmatmul.bf16.gmra.mxu3 %v3459_v31  ;;  %v2903_v31 = vpack.c.b16 %v2875_v12, %v2874_v21  ;;  %v2379_v52 = vsel %vm10190_vm4, %v2374_v28, %v2378_v8  ;;  %v3045_v21 = vpack.c.b16 %v3015_v43, %v3014_v2  ;;  %v3285_v12 = vunpack.c.l.b16 %v2618_v0  ;;  %v9859_v43 = vld [vmem:[#allocation2 + $0x44] sm:$0x1] }
 0x17e   : > { %3977 = vmatmul.bf16.gmra.mxu0 %v3367_v10  ;;  %v11271_v10 = vpop.f32.mrf.mxu0  ;;  %v3221_v26 = vunpack.c.l.b16 %v2379_v52  ;;  %v1621_v2 = vrot.slane %v1620_v50, 4  ;;  %v1435_v25 = vrot.slane %v9859_v43, 5  ;;  %v8830_v0 = vrot.slane %v2549_v5, 9  ;;  %v1949_v50 = vld [vmem:[#allocation2 + $0x84] sm:$0xe] }
 0x17f   : > { %v3411_v37 = vsel %vm3332_vm11, %v2903_v31, %v2987_v9  ;;  %v3316_v22 = vpack.c.b16 %v3285_v12, %v3284_v16  ;;  %v3467_v11 = vsel %vm3332_vm11, %v3045_v21, %v3111_v60  ;;  %v2062_v8 = vsel %vm10953_vm14, %v8821_v44, %v2061_v39  ;;  %v2989_v12 = vpop.permute.xlu1 %2988 }
 0x180   : > { %v3244_v57 = vpack.c.b16 %v3221_v26, %v3220_v33  ;;  %v2623_v28 = vrot.slane %v2621_v38, 4  ;;  %v2063_v31 = vrot.slane %v2061_v39, 4  ;;  %v3076_v9 = vunpack.c.l.b16 %v2062_v8 }
 0x181   : > { %v2381_v29 = vshrl.u32 %v2134_v35, 16  ;;  %v2384_v16 = vshll.u32 %v2134_v35, 16  ;;  %v1434_v23 = vrot.slane %v1432_v46, 4  ;;  %v1626_v52 = vsel %vm10190_vm4, %v1621_v2, %v1625_v47 }
 0x182   : > { %3268 = vrot.lane.b32.xlu0 %v3244_v57, %s10061_s21  ;;  %v2065_v17 = vsel %vm10953_vm14, %v2063_v31, %v2064_v58  ;;  %v2390_v21 = vshll.u32 %v2135_v55, 16  ;;  %v2622_v33 = vsel %vm10953_vm14, %v8830_v0, %v2621_v38  ;;  %v3016_v60 = vunpack.c.l.b16 %v1616_v20 }
 0x183   : > { %v3077_v26 = vunpack.c.l.b16 %v2065_v17  ;;  %v2383_v45 = vrot.slane %v2381_v29, 4  ;;  %v2386_v56 = vrot.slane %v2384_v16, 5  ;;  %v2394_v61 = vshrl.u32 %v2135_v55, 16 }
 0x184   : > { %v2392_v57 = vrot.slane %v2390_v21, 5  ;;  %v2400_v4 = vshll.u32 %v2157_v54, 16  ;;  %v3017_v5 = vunpack.c.l.b16 %v1626_v52  ;;  %v2625_v24 = vsel %vm10953_vm14, %v2623_v28, %v2624_v53  ;;  %v3113_v53 = vpop.permute.xlu2 %3112 }
 0x185   : > { %v3100_v44 = vpack.c.b16 %v3077_v26, %v3076_v9  ;;  %v2387_v38 = vor.u32 %v2386_v56, %v2383_v45  ;;  %v3415_v48 = vsel %vm3332_vm11, %v2904_v34, %v2989_v12  ;;  %v11312_v39 = vsel %vm10953_vm14, %v8802_v13, %v1432_v46  ;;  %v1513_v34 = vld [vmem:[#allocation2 + $0x30] sm:$0xf]  ;;  %v11322_v46 = vld [vmem:[%s13879_s2] ss:$0 sm:$0xff]  ;;  %v9861_v26 = vld [vmem:[#allocation2 + $0x4c] sm:$0xf] }
 0x186   : > { %v8823_v49 = vrot.slane %v1949_v50, 9  ;;  %v2075_v2 = vrot.slane %v1528_v51, 5  ;;  %v2078_v47 = vrot.slane %v1549_v40, 5  ;;  %v3286_v35 = vunpack.c.l.b16 %v2622_v33  ;;  %v9639_v51 = vld [vmem:[#allocation2 + $0x24] sm:$0xff] }
 0x187   : > { %3124 = vrot.lane.b32.xlu2 %v3100_v44, %s10061_s21  ;;  %v3287_v43 = vunpack.c.l.b16 %v2625_v24  ;;  %v2402_v8 = vrot.slane %v2400_v4, 5  ;;  %v2878_v31 = vunpack.c.l.b16 %v11312_v39  ;;  %v1628_v52 = vshrl.u32 %v1513_v34, 16  ;;  %v2550_v44 = vld [vmem:[#allocation2 + $0x30] sm:$0xe]  ;;  %v9862_v39 = vld [vmem:[#allocation2 + $0x34] sm:$0xf] }
 0x188   : > { %4041 = vmatmul.bf16.gmra.mxu1 %v3411_v37  ;;  %v2076_v28 = vsel %vm10953_vm14, %v8823_v49, %v2075_v2  ;;  %v2077_v3 = vrot.slane %v2075_v2, 4  ;;  %v1439_v45 = vrot.slane %v9861_v26, 5  ;;  %v1631_v56 = vshll.u32 %v1513_v34, 16  ;;  %v9863_v2 = vld [vmem:[#allocation2 + $0x50] sm:$0x1] }
 0x189   : > { %v3080_v9 = vunpack.c.l.b16 %v2076_v28  ;;  %v1948_v28 = vld [vmem:[#allocation2 + $0x78] sm:$0xe] }
 0x18a   : > { %v2079_v16 = vsel %vm10953_vm14, %v2077_v3, %v2078_v47  ;;  %v1633_v24 = vrot.slane %v1631_v56, 5  ;;  %v1441_v49 = vrot.slane %v1439_v45, 4  ;;  %v1442_v47 = vrot.slane %v9863_v2, 5  ;;  %v9640_v2 = vld [vmem:[#allocation2 + $0x30] sm:$0xff] }
 0x18b   : > { %v11296_v36 = vpop.f32.mrf.mxu0  ;;  %4120 = vmatmul.bf16.gmra.mxu2 %v3467_v11  ;;  %v2388_v11 = vrot.slane %v2387_v38, 4  ;;  %v3081_v33 = vunpack.c.l.b16 %v2079_v16  ;;  %v8822_v26 = vrot.slane %v1948_v28, 9 }
 0x18d   : > { %4204 = vmatmul.bf16.vlgmr.msrb.gmra.mxu3 %v3527_v63  ;;  %v11316_v63 = vsel %vm10953_vm14, %v1434_v23, %v1435_v25  ;;  %v3046_v25 = vpack.c.b16 %v3017_v5, %v3016_v60  ;;  %v2393_v55 = vsel %vm10190_vm4, %v2388_v11, %v2392_v57  ;;  %v1334_v23 = vld [vmem:[#allocation2 + $0x48] sm:$0xe]  ;;  %v3317_v60 = vpack.c.b16 %v3287_v43, %v3286_v35  ;;  %v9864_v43 = vld [vmem:[#allocation2 + $0x34] sm:$0xf] }
 0x18e   : > { %9181 = vmatmul.msk.bf16.vlgmr.msrb.gmra.mxu0 %vm3332_vm11, %v3316_v22  ;;  %v3983_v37 = vpop.f32.mrf.mxu2  ;;  %v2396_v22 = vrot.slane %v2394_v61, 4  ;;  %v2879_v58 = vunpack.c.l.b16 %v11316_v63  ;;  %v3222_v29 = vunpack.c.l.b16 %v2393_v55  ;;  %v3255_v61 = vpop.permute.xlu0 %3254  ;;  %v3102_v4 = vpack.c.b16 %v3081_v33, %v3080_v9  ;;  %v9865_v9 = vld [vmem:[#allocation2 + $0x38] sm:$0x1] }
 0x18f   : > { %v3984_v54 = vadd.f32 %v11322_v46, %v3983_v37  ;;  %v3471_v37 = vsel %vm3332_vm11, %v3046_v25, %v3113_v53  ;;  %v8803_v50 = vrot.slane %v1334_v23, 9  ;;  %v1630_v5 = vrot.slane %v1628_v52, 4 }
 0x190   : > { %v2397_v0 = vor.u32 %v2396_v22, %v2392_v57  ;;  %v1637_v63 = vshll.u32 %v9862_v39, 16  ;;  %v1641_v22 = vshrl.u32 %v9862_v39, 16  ;;  %v1647_v11 = vshll.u32 %v11050_v62, 16  ;;  %3128 = vrot.lane.b32.xlu1 %v3102_v4, %s10061_s21 }
 0x191   : > { %v1634_v35 = vor.u32 %v1633_v24, %v1630_v5  ;;  %v8831_v62 = vrot.slane %v2550_v44, 9  ;;  %v2905_v3 = vpack.c.b16 %v2879_v58, %v2878_v31  ;;  %v11350_v53 = vsel %vm10953_vm14, %v8803_v50, %v1439_v45  ;;  %v1530_v50 = vld [vmem:[#allocation2 + $0x94] sm:$0xf]  ;;  %v1950_v5 = vld [vmem:[#allocation2 + $0x90] sm:$0xe]  ;;  %v2991_v24 = vpop.permute.xlu1 %2990 }
 0x192   : > { %v2398_v20 = vrot.slane %v2397_v0, 4  ;;  %v11342_v0 = vld [vmem:[#allocation2 + $0x7c] sm:$0xf]  ;;  %v1639_v25 = vrot.slane %v1637_v63, 5  ;;  %v1643_v55 = vrot.slane %v1641_v22, 4  ;;  %v1649_v23 = vrot.slane %v1647_v11, 5 }
 0x193   : > { %v11324_v13 = vpop.f32.mrf.mxu0  ;;  %v1443_v31 = vsel %vm10953_vm14, %v1441_v49, %v1442_v47  ;;  %v2068_v45 = vrot.slane %v11342_v0, 5  ;;  %v2880_v44 = vunpack.c.l.b16 %v11350_v53  ;;  %v1550_v22 = vld [vmem:[#allocation2 + $0x98] sm:$0x1]  ;;  %v1335_v11 = vld [vmem:[#allocation2 + $0x54] sm:$0xe]  ;;  %v2082_v28 = vrot.slane %v1530_v50, 5 }
 0x194   : > { %v2403_v12 = vsel %vm10190_vm4, %v2398_v20, %v2402_v8  ;;  %v3531_v8 = vsel %vm3332_vm11, %v9639_v51, %v3255_v61  ;;  %v1635_v20 = vrot.slane %v1634_v35, 4  ;;  %v1644_v16 = vor.u32 %v1643_v55, %v1639_v25  ;;  %v1515_v53 = vld [vmem:[#allocation2 + $0x3c] sm:$0xf] }
 0x195   : > { %v3223_v57 = vunpack.c.l.b16 %v2403_v12  ;;  %v2070_v61 = vrot.slane %v2068_v45, 4 }
 0x196   : > { %v3985_v17 = vpop.f32.mrf.mxu2  ;;  %v4072_v21 = vpop.f32.mrf.mxu3  ;;  %v1640_v58 = vsel %vm10190_vm4, %v1635_v20, %v1639_v25  ;;  %v1645_v56 = vrot.slane %v1644_v16, 4 }
 0x197   : > { %v11337_v40 = vadd.f32 %v4072_v21, %v3984_v54  ;;  %v3245_v38 = vpack.c.b16 %v3223_v57, %v3222_v29  ;;  %v2631_v54 = vrot.slane %v9865_v9, 5  ;;  %v3986_v29 = vadd.f32 %v11322_v46, %v3985_v17  ;;  %v11353_v21 = vld [vmem:[#allocation2 + $0x80] sm:$0x1]  ;;  %v3115_v16 = vpop.permute.xlu2 %3114 }
 0x198   : > { %4046 = vmatmul.bf16.gmra.mxu1 %v3415_v48  ;;  %v2628_v48 = vrot.slane %v9864_v43, 5  ;;  %v3018_v51 = vunpack.c.l.b16 %v1640_v58  ;;  %v2069_v57 = vsel %vm10953_vm14, %v8822_v26, %v2068_v45  ;;  %v2071_v4 = vrot.slane %v11353_v21, 5  ;;  %v9866_v45 = vld [vmem:[#allocation2 + $0x58] sm:$0xf] }
 0x199   : > { %13918 = vst [vmem:[#allocation8_spill] sm:$0xff] %v11337_v40  ;;  %3270 = vrot.lane.b32.xlu0 %v3245_v38, %s10061_s21  ;;  %v2881_v38 = vunpack.c.l.b16 %v1443_v31  ;;  %v1650_v39 = vsel %vm10190_vm4, %v1645_v56, %v1649_v23  ;;  %v3078_v63 = vunpack.c.l.b16 %v2069_v57  ;;  %v2085_v9 = vrot.slane %v1550_v22, 5 }
 0x19a   : > { %v2630_v52 = vrot.slane %v2628_v48, 4  ;;  %v3019_v47 = vunpack.c.l.b16 %v1650_v39  ;;  %v2072_v43 = vsel %vm10953_vm14, %v2070_v61, %v2071_v4  ;;  %v1446_v56 = vrot.slane %v9866_v45, 5  ;;  %v2551_v39 = vld [vmem:[#allocation2 + $0x3c] sm:$0xe] }
 0x19b   : > { %v11345_v34 = vpop.f32.mrf.mxu0  ;;  %4125 = vmatmul.bf16.gmra.mxu2 %v3471_v37  ;;  %v2629_v37 = vsel %vm10953_vm14, %v8831_v62, %v2628_v48  ;;  %v3079_v55 = vunpack.c.l.b16 %v2072_v43  ;;  %v8824_v62 = vrot.slane %v1950_v5, 9  ;;  %v9867_v5 = vld [vmem:[#allocation2 + $0x5c] sm:$0x1] }
 0x19c   : > { %v3288_v35 = vunpack.c.l.b16 %v2629_v37  ;;  %v3047_v20 = vpack.c.b16 %v3019_v47, %v3018_v51  ;;  %v1652_v37 = vshrl.u32 %v1515_v53, 16  ;;  %v2906_v51 = vpack.c.b16 %v2881_v38, %v2880_v44  ;;  %v9868_v38 = vld [vmem:[#allocation2 + $0x40] sm:$0xf] }
 0x19d   : > { %4209 = vmatmul.bf16.gmra.mxu3 %v3531_v8  ;;  %v3257_v8 = vpop.permute.xlu0 %3256  ;;  %v3101_v23 = vpack.c.b16 %v3079_v55, %v3078_v63  ;;  %v2993_v63 = vpop.permute.xlu1 %2992  ;;  %v1655_v44 = vshll.u32 %v1515_v53, 16  ;;  %v1448_v47 = vrot.slane %v1446_v56, 4  ;;  %v2138_v55 = vld [vmem:[#allocation2 + $0x9c] sm:$0xf] }
 0x19e   : > { %9182 = vmatmul.msk.bf16.gmra.mxu0 %vm3332_vm11, %v3317_v60  ;;  %v3988_v12 = vpop.f32.mrf.mxu2  ;;  %v4074_v33 = vpop.f32.mrf.mxu3  ;;  %v2632_v60 = vsel %vm10953_vm14, %v2630_v52, %v2631_v54  ;;  %v8804_v54 = vrot.slane %v1335_v11, 9  ;;  %v2083_v52 = vsel %vm10953_vm14, %v8824_v62, %v2082_v28  ;;  %v3475_v61 = vsel %vm3332_vm11, %v3047_v20, %v3115_v16  ;;  %v9871_v16 = vld [vmem:[#allocation2 + $0x44] sm:$0x1] }
 0x19f   : > { %v11361_v17 = vadd.f32 %v4074_v33, %v3986_v29  ;;  %v3989_v49 = vadd.f32 %v11322_v46, %v3988_v12  ;;  %v3289_v25 = vunpack.c.l.b16 %v2632_v60  ;;  %v3419_v29 = vsel %vm3332_vm11, %v2905_v3, %v2991_v24  ;;  %3126 = vrot.lane.b32.xlu2 %v3101_v23, %s10061_s21  ;;  %v11394_v23 = vld [vmem:[#allocation2 + $0x50] sm:$0x1] }
 0x1a0   : > { %v2084_v12 = vrot.slane %v2082_v28, 4  ;;  %v3535_v33 = vsel %vm3332_vm11, %v9640_v2, %v3257_v8  ;;  %v3082_v26 = vunpack.c.l.b16 %v2083_v52  ;;  %v11390_v50 = vsel %vm10953_vm14, %v8804_v54, %v1446_v56  ;;  %v9870_v8 = vld [vmem:[#allocation2 + $0x40] sm:$0xf] }
 0x1a1   : > { %13919 = vst [vmem:[#allocation9_spill] sm:$0xff] %v11361_v17  ;;  %v3318_v57 = vpack.c.b16 %v3289_v25, %v3288_v35  ;;  %v1449_v24 = vrot.slane %v9867_v5, 5  ;;  %v1654_v22 = vrot.slane %v1652_v37, 4  ;;  %v1661_v11 = vshll.u32 %v9868_v38, 16  ;;  %v9869_v35 = vld [vmem:[#allocation2 + $0x44] sm:$0x1] }
 0x1a2   : > { %v2086_v3 = vsel %vm10953_vm14, %v2084_v12, %v2085_v9  ;;  %v1671_v43 = vshll.u32 %v9869_v35, 16  ;;  %v2635_v25 = vrot.slane %v9870_v8, 5  ;;  %v1657_v28 = vrot.slane %v1655_v44, 5  ;;  %v2159_v5 = vld [vmem:[#allocation2 + $0xa4] sm:$0x1] }
 0x1a3   : > { %v11376_v48 = vpop.f32.mrf.mxu0  ;;  %v3083_v4 = vunpack.c.l.b16 %v2086_v3  ;;  %v1663_v20 = vrot.slane %v1661_v11, 5  ;;  %v8832_v54 = vrot.slane %v2551_v39, 9  ;;  %v2638_v53 = vrot.slane %v9871_v16, 5 }
 0x1a4   : > { %v3423_v12 = vsel %vm3332_vm11, %v2906_v51, %v2993_v63  ;;  %v2882_v45 = vunpack.c.l.b16 %v11390_v50  ;;  %v1658_v56 = vor.u32 %v1657_v28, %v1654_v22  ;;  %v2429_v39 = vshrl.u32 %v2138_v55, 16 }
 0x1a5   : > { %v3103_v2 = vpack.c.b16 %v3083_v4, %v3082_v26  ;;  %v1673_v4 = vrot.slane %v1671_v43, 5  ;;  %v2432_v44 = vshll.u32 %v2138_v55, 16  ;;  %v1450_v63 = vsel %vm10953_vm14, %v1448_v47, %v1449_v24  ;;  %v2136_v55 = vld [vmem:[#allocation2 + $0x90] sm:$0xf] }
 0x1a6   : > { %v3990_v31 = vpop.f32.mrf.mxu2  ;;  %v4077_v58 = vpop.f32.mrf.mxu3  ;;  %v2636_v22 = vsel %vm10953_vm14, %v8832_v54, %v2635_v25  ;;  %v2448_v8 = vshll.u32 %v2159_v5, 16  ;;  %v2883_v28 = vunpack.c.l.b16 %v1450_v63  ;;  %v2405_v5 = vshrl.u32 %v2136_v55, 16 }
 0x1a7   : > { %v11382_v60 = vadd.f32 %v4077_v58, %v3989_v49  ;;  %v1665_v49 = vshrl.u32 %v9868_v38, 16  ;;  %3130 = vrot.lane.b32.xlu0 %v3103_v2, %s10061_s21  ;;  %v2637_v58 = vrot.slane %v2635_v25, 4  ;;  %v3991_v26 = vadd.f32 %v11322_v46, %v3990_v31  ;;  %v11414_v25 = vld [vmem:[#allocation2 + $0x94] sm:$0xf] }
 0x1a8   : > { %4051 = vmatmul.bf16.gmra.mxu1 %v3419_v29  ;;  %v2139_v29 = vld [vmem:[#allocation2 + $0xa0] sm:$0xf]  ;;  %v1659_v31 = vrot.slane %v1658_v56, 4  ;;  %v2907_v52 = vpack.c.b16 %v2883_v28, %v2882_v45 }
 0x1a9   : > { %13920 = vst [vmem:[#allocation10_spill] sm:$0xff] %v11382_v60  ;;  %v1667_v9 = vrot.slane %v1665_v49, 4  ;;  %v2438_v38 = vshll.u32 %v2139_v29, 16  ;;  %v2434_v49 = vrot.slane %v2432_v44, 5  ;;  %v2442_v43 = vshrl.u32 %v2139_v29, 16  ;;  %v3117_v29 = vpop.permute.xlu2 %3116 }
 0x1aa   : > { %v1664_v2 = vsel %vm10190_vm4, %v1659_v31, %v1663_v20  ;;  %v2408_v44 = vshll.u32 %v2136_v55, 16  ;;  %v2407_v31 = vrot.slane %v2405_v5, 4 }
 0x1ab   : > { %v11392_v62 = vpop.f32.mrf.mxu0  ;;  %4130 = vmatmul.bf16.gmra.mxu2 %v3475_v61  ;;  %v1668_v37 = vor.u32 %v1667_v9, %v1663_v20  ;;  %v2440_v35 = vrot.slane %v2438_v38, 5  ;;  %v3020_v47 = vunpack.c.l.b16 %v1664_v2  ;;  %v11419_v20 = vld [vmem:[#allocation2 + $0x98] sm:$0x1]  ;;  %v2414_v38 = vshll.u32 %v11414_v25, 16 }
 0x1ad   : > { %4214 = vmatmul.bf16.gmra.mxu3 %v3535_v33  ;;  %v1669_v11 = vrot.slane %v1668_v37, 4  ;;  %v2639_v33 = vsel %vm10953_vm14, %v2637_v58, %v2638_v53  ;;  %v3290_v58 = vunpack.c.l.b16 %v2636_v22  ;;  %v2418_v22 = vshrl.u32 %v11414_v25, 16 }
 0x1ae   : > { %9183 = vmatmul.msk.bf16.gmra.mxu0 %vm3332_vm11, %v3318_v57  ;;  %v3993_v3 = vpop.f32.mrf.mxu2  ;;  %v4079_v61 = vpop.f32.mrf.mxu3  ;;  %v2431_v57 = vrot.slane %v2429_v39, 4  ;;  %v3291_v56 = vunpack.c.l.b16 %v2639_v33  ;;  %v11426_v33 = vld [vmem:[#allocation2 + $0x50] sm:$0x1] }
 0x1af   : > { %v11402_v51 = vadd.f32 %v4079_v61, %v3991_v26  ;;  %v1674_v24 = vsel %vm10190_vm4, %v1669_v11, %v1673_v4  ;;  %v3994_v54 = vadd.f32 %v11322_v46, %v3993_v3  ;;  %v2444_v26 = vrot.slane %v2442_v43, 4  ;;  %v9641_v43 = vld [vmem:[#allocation2 + $0x3c] sm:$0xff] }
 0x1b0   : > { %v2435_v9 = vor.u32 %v2434_v49, %v2431_v57  ;;  %v3021_v53 = vunpack.c.l.b16 %v1674_v24  ;;  %v2450_v61 = vrot.slane %v2448_v8, 5  ;;  %v2424_v11 = vshll.u32 %v11419_v20, 16  ;;  %v9873_v57 = vld [vmem:[#allocation2 + $0x4c] sm:$0xf]  ;;  %v1517_v24 = vld [vmem:[#allocation2 + $0x48] sm:$0xf] }
 0x1b1   : > { %13921 = vst [vmem:[#allocation11_spill] sm:$0xff] %v11402_v51  ;;  %v2445_v4 = vor.u32 %v2444_v26, %v2440_v35  ;;  %v1689_v49 = vshrl.u32 %v9873_v57, 16  ;;  %v2420_v26 = vrot.slane %v2418_v22, 4  ;;  %v3319_v51 = vpack.c.b16 %v3291_v56, %v3290_v58 }
 0x1b2   : > { %v2436_v37 = vrot.slane %v2435_v9, 4  ;;  %v3048_v39 = vpack.c.b16 %v3021_v53, %v3020_v47  ;;  %v3259_v47 = vpop.permute.xlu0 %3258  ;;  %v2416_v53 = vrot.slane %v2414_v38, 5  ;;  %v2426_v60 = vrot.slane %v2424_v11, 5 }
 0x1b3   : > { %v11417_v16 = vpop.f32.mrf.mxu0  ;;  %v2446_v55 = vrot.slane %v2445_v4, 4  ;;  %v3539_v38 = vsel %vm3332_vm11, %v9641_v43, %v3259_v47  ;;  %v1676_v45 = vshrl.u32 %v1517_v24, 16 }
 0x1b4   : > { %v2441_v3 = vsel %vm10190_vm4, %v2436_v37, %v2440_v35  ;;  %v3479_v8 = vsel %vm3332_vm11, %v3048_v39, %v3117_v29  ;;  %v2410_v35 = vrot.slane %v2408_v44, 5  ;;  %v1336_v37 = vld [vmem:[#allocation2 + $0x60] sm:$0xe]  ;;  %v2995_v29 = vpop.permute.xlu1 %2994  ;;  %v2421_v4 = vor.u32 %v2420_v26, %v2416_v53  ;;  %v9878_v44 = vld [vmem:[#allocation2 + $0x58] sm:$0xf] }
 0x1b5   : > { %v3226_v9 = vunpack.c.l.b16 %v2441_v3  ;;  %v2451_v2 = vsel %vm10190_vm4, %v2446_v55, %v2450_v61  ;;  %v8805_v50 = vrot.slane %v1336_v37, 9  ;;  %v9875_v61 = vld [vmem:[#allocation2 + $0x64] sm:$0xf]  ;;  %v3427_v11 = vsel %vm3332_vm11, %v2907_v52, %v2995_v29 }
 0x1b6   : > { %v3995_v63 = vpop.f32.mrf.mxu2  ;;  %v3227_v39 = vunpack.c.l.b16 %v2451_v2  ;;  %v2422_v56 = vrot.slane %v2421_v4, 4  ;;  %v1453_v22 = vrot.slane %v9875_v61, 5  ;;  %v1679_v2 = vshll.u32 %v1517_v24, 16  ;;  %v2141_v61 = vld [vmem:[#allocation2 + $0xac] sm:$0xf] }
 0x1b7   : > { %v3996_v55 = vadd.f32 %v11322_v46, %v3995_v63 }
 0x1b8   : > { %4056 = vmatmul.bf16.gmra.mxu1 %v3423_v12  ;;  %v4082_v5 = vpop.f32.mrf.mxu3  ;;  %v2411_v12 = vor.u32 %v2410_v35, %v2407_v31  ;;  %v3247_v28 = vpack.c.b16 %v3227_v39, %v3226_v9  ;;  %v1678_v31 = vrot.slane %v1676_v45, 4  ;;  %v2427_v47 = vsel %vm10190_vm4, %v2422_v56, %v2426_v60  ;;  %v2552_v35 = vld [vmem:[#allocation2 + $0x48] sm:$0xe] }
 0x1b9   : > { %v11434_v17 = vadd.f32 %v4082_v5, %v3994_v54  ;;  %v1685_v9 = vshll.u32 %v9873_v57, 16  ;;  %v3225_v26 = vunpack.c.l.b16 %v2427_v47  ;;  %v11453_v24 = vsel %vm10953_vm14, %v8805_v50, %v1453_v22  ;;  %v9876_v5 = vld [vmem:[#allocation2 + $0x68] sm:$0x1] }
 0x1ba   : > { %v2412_v58 = vrot.slane %v2411_v12, 4  ;;  %3274 = vrot.lane.b32.xlu1 %v3247_v28, %s10061_s21  ;;  %v1681_v63 = vrot.slane %v1679_v2, 5  ;;  %v1455_v37 = vrot.slane %v1453_v22, 4  ;;  %v1456_v29 = vrot.slane %v9876_v5, 5  ;;  %v9642_v22 = vld [vmem:[#allocation2 + $0x48] sm:$0xff] }
 0x1bb   : > { %13922 = vst [vmem:[#allocation12_spill] sm:$0xff] %v11434_v17  ;;  %v11438_v3 = vpop.f32.mrf.mxu0  ;;  %4135 = vmatmul.bf16.gmra.mxu2 %v3479_v8  ;;  %v1687_v39 = vrot.slane %v1685_v9, 5  ;;  %v8833_v57 = vrot.slane %v2552_v35, 9  ;;  %v13924_v56 = vshll.u32 %v11426_v33, 16  ;;  %v3261_v35 = vpop.permute.xlu0 %3260  ;;  %v13926_v5 = vrot.slane %v11394_v23, 5 }
 0x1bc   : > { %v2417_v8 = vsel %vm10190_vm4, %v2412_v58, %v2416_v53  ;;  %v1691_v53 = vrot.slane %v1689_v49, 4  ;;  %v1682_v60 = vor.u32 %v1681_v63, %v1678_v31 }
 0x1bd   : > { %4219 = vmatmul.bf16.gmra.mxu3 %v3539_v38  ;;  %v3224_v52 = vunpack.c.l.b16 %v2417_v8  ;;  %v9877_v38 = vld [vmem:[#allocation2 + $0x4c] sm:$0xf]  ;;  %v1697_v50 = vrot.slane %v13924_v56, 5 }
 0x1be   : > { %9184 = vmatmul.msk.bf16.gmra.mxu0 %vm3332_vm11, %v3319_v51  ;;  %v11444_v43 = vpop.f32.mrf.mxu2  ;;  %v2140_v51 = vld [vmem:[#allocation2 + $0xa8] sm:$0xf]  ;;  %v2642_v45 = vrot.slane %v9877_v38, 5  ;;  %v1692_v58 = vor.u32 %v1691_v53, %v1687_v39  ;;  %v1683_v49 = vrot.slane %v1682_v60, 4  ;;  %v2462_v60 = vshll.u32 %v2141_v61, 16 }
 0x1bf   : > { %v3246_v4 = vpack.c.b16 %v3225_v26, %v3224_v52  ;;  %v2453_v2 = vshrl.u32 %v2140_v51, 16  ;;  %v2456_v9 = vshll.u32 %v2140_v51, 16  ;;  %v2466_v38 = vshrl.u32 %v2141_v61, 16 }
 0x1c0   : > { %v4084_v12 = vpop.f32.mrf.mxu3  ;;  %v2643_v31 = vsel %vm10953_vm14, %v8833_v57, %v2642_v45  ;;  %v2644_v47 = vrot.slane %v2642_v45, 4  ;;  %v1693_v52 = vrot.slane %v1692_v58, 4  ;;  %v1688_v63 = vsel %vm10190_vm4, %v1683_v49, %v1687_v39  ;;  %v1519_v45 = vld [vmem:[#allocation2 + $0x54] sm:$0xf] }
 0x1c1   : > { %v11455_v28 = vadd.f32 %v4084_v12, %v3996_v55  ;;  %3272 = vrot.lane.b32.xlu2 %v3246_v4, %s10061_s21  ;;  %v1457_v55 = vsel %vm10953_vm14, %v1455_v37, %v1456_v29  ;;  %v3292_v33 = vunpack.c.l.b16 %v2643_v31  ;;  %v2455_v26 = vrot.slane %v2453_v2, 4  ;;  %v11472_v12 = vld [vmem:[#allocation2 + $0xb0] sm:$0x1]  ;;  %v3119_v2 = vpop.permute.xlu2 %3118 }
 0x1c2   : > { %v2646_v53 = vsel %vm10953_vm14, %v2644_v47, %v13926_v5  ;;  %v2458_v4 = vrot.slane %v2456_v9, 5  ;;  %v1698_v37 = vsel %vm10190_vm4, %v1693_v52, %v1697_v50  ;;  %v3022_v29 = vunpack.c.l.b16 %v1688_v63 }
 0x1c3   : > { %13923 = vst [vmem:[#allocation13_spill] sm:$0xff] %v11455_v28  ;;  %v11459_v8 = vpop.f32.mrf.mxu0  ;;  %v3293_v57 = vunpack.c.l.b16 %v2646_v53  ;;  %v3543_v39 = vsel %vm3332_vm11, %v9642_v22, %v3261_v35  ;;  %v3023_v58 = vunpack.c.l.b16 %v1698_v37  ;;  %v2464_v56 = vrot.slane %v2462_v60, 5  ;;  %v2553_v35 = vld [vmem:[#allocation2 + $0x54] sm:$0xe] }
 0x1c4   : > { %13925 = vst [vmem:[#allocation14_spill] sm:$0xff] %v11459_v8  ;;  %v2459_v23 = vor.u32 %v2458_v4, %v2455_v26  ;;  %v2884_v49 = vunpack.c.l.b16 %v11453_v24  ;;  %v2885_v31 = vunpack.c.l.b16 %v1457_v55  ;;  %v2468_v47 = vrot.slane %v2466_v38, 4 }
 0x1c5   : > { %v2472_v9 = vshll.u32 %v11472_v12, 16  ;;  %v3049_v5 = vpack.c.b16 %v3023_v58, %v3022_v29  ;;  %v3320_v54 = vpack.c.b16 %v3293_v57, %v3292_v33  ;;  %v1700_v52 = vshrl.u32 %v1519_v45, 16  ;;  %v9879_v33 = vld [vmem:[#allocation2 + $0x5c] sm:$0x1]  ;;  %v9880_v58 = vld [vmem:[#allocation2 + $0x58] sm:$0xf] }
 0x1c6   : > { %v11474_v51 = vpop.f32.mrf.mxu2  ;;  %v2460_v50 = vrot.slane %v2459_v23, 4  ;;  %v2469_v63 = vor.u32 %v2468_v47, %v2464_v56  ;;  %v1703_v53 = vshll.u32 %v1519_v45, 16  ;;  %v1709_v22 = vshll.u32 %v9878_v44, 16  ;;  %v1951_v47 = vld [vmem:[#allocation2 + $0x9c] sm:$0xe] }
 0x1c7   : > { %v2474_v61 = vrot.slane %v2472_v9, 5  ;;  %v1702_v55 = vrot.slane %v1700_v52, 4  ;;  %v13928_v4 = vshrl.u32 %v11177_v15, 16  ;;  %v2652_v37 = vrot.slane %v9879_v33, 5  ;;  %v11498_v52 = vld [vmem:[#allocation2 + $0xa4] sm:$0x1] }
 0x1c8   : > { %4061 = vmatmul.bf16.gmra.mxu1 %v3427_v11  ;;  %v3483_v11 = vsel %vm3332_vm11, %v3049_v5, %v3119_v2  ;;  %v2465_v24 = vsel %vm10190_vm4, %v2460_v50, %v2464_v56  ;;  %v2470_v29 = vrot.slane %v2469_v63, 4  ;;  %v1705_v57 = vrot.slane %v1703_v53, 5  ;;  %v11496_v50 = vld [vmem:[#allocation2 + $0xa0] sm:$0xf] }
 0x1c9   : > { %v1715_v60 = vrot.slane %v13928_v4, 4  ;;  %v3228_v38 = vunpack.c.l.b16 %v2465_v24  ;;  %v1711_v45 = vrot.slane %v1709_v22, 5  ;;  %v8834_v44 = vrot.slane %v2553_v35, 9 }
 0x1ca   : > { %v2649_v23 = vrot.slane %v9880_v58, 5  ;;  %v3999_v56 = vadd.f32 %v11322_v46, %v11444_v43  ;;  %v2475_v9 = vsel %vm10190_vm4, %v2470_v29, %v2474_v61  ;;  %v1706_v5 = vor.u32 %v1705_v57, %v1702_v55  ;;  %v2142_v43 = vld [vmem:[#allocation2 + $0xb4] sm:$0xf]  ;;  %v2143_v58 = vld [vmem:[#allocation2 + $0xb8] sm:$0xf] }
 0x1cb   : > { %v11481_v26 = vpop.f32.mrf.mxu0  ;;  %4140 = vmatmul.bf16.gmra.mxu2 %v3483_v11  ;;  %v2908_v63 = vpack.c.b16 %v2885_v31, %v2884_v49  ;;  %v3229_v53 = vunpack.c.l.b16 %v2475_v9  ;;  %v1716_v22 = vor.u32 %v1715_v60, %v1711_v45  ;;  %v13929_v35 = vshll.u32 %v11189_v6, 16 }
 0x1cc   : > { %13927 = vst [vmem:[#allocation15_spill] sm:$0xff] %v11481_v26  ;;  %v1707_v24 = vrot.slane %v1706_v5, 4  ;;  %v2651_v4 = vrot.slane %v2649_v23, 4  ;;  %v8825_v33 = vrot.slane %v1951_v47, 9  ;;  %v2089_v57 = vrot.slane %v11496_v50, 5  ;;  %v9643_v5 = vld [vmem:[#allocation2 + $0x54] sm:$0xff] }
 0x1cd   : > { %4224 = vmatmul.bf16.gmra.mxu3 %v3543_v39  ;;  %v1721_v11 = vrot.slane %v13929_v35, 5  ;;  %v2997_v39 = vpop.permute.xlu1 %2996  ;;  %v3248_v55 = vpack.c.b16 %v3229_v53, %v3228_v38  ;;  %v1717_v29 = vrot.slane %v1716_v22, 4  ;;  %v2092_v49 = vrot.slane %v11498_v52, 5  ;;  %v3263_v35 = vpop.permute.xlu0 %3262  ;;  %v2557_v26 = vld [vmem:[#allocation2 + $0x84] sm:$0xe] }
 0x1ce   : > { %9185 = vmatmul.msk.bf16.gmra.mxu0 %vm3332_vm11, %v3320_v54  ;;  %v11492_v15 = vpop.f32.mrf.mxu2  ;;  %v2650_v54 = vsel %vm10953_vm14, %v8834_v44, %v2649_v23  ;;  %v1712_v6 = vsel %vm10190_vm4, %v1707_v24, %v1711_v45  ;;  %v2653_v60 = vsel %vm10953_vm14, %v2651_v4, %v2652_v37  ;;  %v2477_v9 = vshrl.u32 %v2142_v43, 16  ;;  %v2161_v4 = vld [vmem:[#allocation2 + $0xbc] sm:$0x1] }
 0x1cf   : > { %v3431_v44 = vsel %vm3332_vm11, %v2908_v63, %v2997_v39  ;;  %3276 = vrot.lane.b32.xlu0 %v3248_v55, %s10061_s21  ;;  %v1722_v23 = vsel %vm10190_vm4, %v1717_v29, %v1721_v11  ;;  %v3024_v47 = vunpack.c.l.b16 %v1712_v6  ;;  %v3294_v53 = vunpack.c.l.b16 %v2650_v54  ;;  %v3121_v11 = vpop.permute.xlu2 %3120 }
 0x1d0   : > { %v4087_v61 = vpop.f32.mrf.mxu3  ;;  %v3025_v45 = vunpack.c.l.b16 %v1722_v23  ;;  %v3295_v22 = vunpack.c.l.b16 %v2653_v60  ;;  %v2091_v37 = vrot.slane %v2089_v57, 4  ;;  %v2479_v63 = vrot.slane %v2477_v9, 4  ;;  %v1521_v23 = vld [vmem:[#allocation2 + $0x60] sm:$0xf] }
 0x1d1   : > { %v11506_v31 = vadd.f32 %v4087_v61, %v3999_v56  ;;  %v2090_v56 = vsel %vm10953_vm14, %v8825_v33, %v2089_v57  ;;  %v2480_v39 = vshll.u32 %v2142_v43, 16  ;;  %v2486_v61 = vshll.u32 %v2143_v58, 16 }
 0x1d2   : > { %v3084_v24 = vunpack.c.l.b16 %v2090_v56  ;;  %v1743_v55 = vshll.u32 %v11243_v32, 16  ;;  %v3050_v29 = vpack.c.b16 %v3025_v45, %v3024_v47  ;;  %v2093_v33 = vsel %vm10953_vm14, %v2091_v37, %v2092_v49 }
 0x1d3   : > { %13930 = vst [vmem:[#allocation16_spill] sm:$0xff] %v11506_v31  ;;  %v11514_v38 = vpop.f32.mrf.mxu0  ;;  %v2490_v6 = vshrl.u32 %v2143_v58, 16  ;;  %v4001_v54 = vadd.f32 %v11322_v46, %v11474_v51  ;;  %v3085_v57 = vunpack.c.l.b16 %v2093_v33  ;;  %v2482_v60 = vrot.slane %v2480_v39, 5  ;;  %v2554_v39 = vld [vmem:[#allocation2 + $0x60] sm:$0xe] }
 0x1d4   : > { %13931 = vst [vmem:[#allocation17_spill] sm:$0xff] %v11514_v38  ;;  %v2488_v56 = vrot.slane %v2486_v61, 5  ;;  %v3547_v43 = vsel %vm3332_vm11, %v9643_v5, %v3263_v35  ;;  %v3321_v9 = vpack.c.b16 %v3295_v22, %v3294_v53  ;;  %v2496_v31 = vshll.u32 %v2161_v4, 16  ;;  %v9881_v53 = vld [vmem:[#allocation2 + $0x64] sm:$0xf] }
 0x1d5   : > { %v2492_v32 = vrot.slane %v2490_v6, 4  ;;  %v3487_v47 = vsel %vm3332_vm11, %v3050_v29, %v3121_v11  ;;  %v3104_v45 = vpack.c.b16 %v3085_v57, %v3084_v24  ;;  %v2483_v17 = vor.u32 %v2482_v60, %v2479_v63  ;;  %v9882_v11 = vld [vmem:[#allocation2 + $0x64] sm:$0xf]  ;;  %v1952_v57 = vld [vmem:[#allocation2 + $0xa8] sm:$0xe] }
 0x1d6   : > { %v11521_v2 = vpop.f32.mrf.mxu2  ;;  %v1724_v49 = vshrl.u32 %v1521_v23, 16  ;;  %v2498_v40 = vrot.slane %v2496_v31, 5  ;;  %v1727_v51 = vshll.u32 %v1521_v23, 16  ;;  %v1733_v22 = vshll.u32 %v9881_v53, 16  ;;  %v9883_v60 = vld [vmem:[#allocation2 + $0x68] sm:$0x1] }
 0x1d7   : > { %v2493_v37 = vor.u32 %v2492_v32, %v2488_v56  ;;  %3132 = vrot.lane.b32.xlu2 %v3104_v45, %s10061_s21  ;;  %v13934_v35 = vshrl.u32 %v11228_v18, 16  ;;  %v2656_v29 = vrot.slane %v9882_v11, 5  ;;  %v11545_v45 = vld [vmem:[#allocation2 + $0xac] sm:$0xf] }
 0x1d8   : > { %4066 = vmatmul.bf16.gmra.mxu1 %v3431_v44  ;;  %v4089_v28 = vpop.f32.mrf.mxu3  ;;  %v2484_v44 = vrot.slane %v2483_v17, 4  ;;  %v1726_v5 = vrot.slane %v1724_v49, 4  ;;  %v1729_v63 = vrot.slane %v1727_v51, 5  ;;  %v1735_v61 = vrot.slane %v1733_v22, 5  ;;  %v11549_v51 = vld [vmem:[#allocation2 + $0xb0] sm:$0x1] }
 0x1d9   : > { %v11529_v58 = vadd.f32 %v4089_v28, %v4001_v54  ;;  %v1739_v4 = vrot.slane %v13934_v35, 4  ;;  %v2494_v24 = vrot.slane %v2493_v37, 4  ;;  %v4004_v28 = vadd.f32 %v11322_v46, %v11492_v15  ;;  %13935 = vst [vmem:[#allocation20_spill] sm:$0xff] %v11549_v51 }
 0x1da   : > { %v2489_v31 = vsel %vm10190_vm4, %v2484_v44, %v2488_v56  ;;  %v1730_v23 = vor.u32 %v1729_v63, %v1726_v5  ;;  %v8835_v54 = vrot.slane %v2554_v39, 9  ;;  %v2659_v15 = vrot.slane %v9883_v60, 5  ;;  %v890_v39 = vld [vmem:[#allocation2 + $0xc8] sm:$0x1]  ;;  %v2145_v60 = vld [vmem:[#allocation2 + $0xc4] sm:$0xf] }
 0x1db   : > { %13932 = vst [vmem:[#allocation18_spill] sm:$0xff] %v11529_v58  ;;  %v11531_v33 = vpop.f32.mrf.mxu0  ;;  %4145 = vmatmul.bf16.gmra.mxu2 %v3487_v47  ;;  %v2499_v18 = vsel %vm10190_vm4, %v2494_v24, %v2498_v40  ;;  %v3230_v6 = vunpack.c.l.b16 %v2489_v31  ;;  %v1740_v47 = vor.u32 %v1739_v4, %v1735_v61  ;;  %v1745_v56 = vrot.slane %v1743_v55, 5  ;;  %v2144_v24 = vld [vmem:[#allocation2 + $0xc0] sm:$0xf]  ;;  %v9884_v58 = vld [vmem:[#allocation2 + $0x70] sm:$0xf] }
 0x1dc   : > { %13933 = vst [vmem:[#allocation19_spill] sm:$0xff] %v11531_v33  ;;  %v3231_v32 = vunpack.c.l.b16 %v2499_v18  ;;  %v1731_v49 = vrot.slane %v1730_v23, 4  ;;  %v2658_v37 = vrot.slane %v2656_v29, 4  ;;  %v8826_v22 = vrot.slane %v1952_v57, 9  ;;  %v9644_v31 = vld [vmem:[#allocation2 + $0x60] sm:$0xff] }
 0x1dd   : > { %4229 = vmatmul.bf16.gmra.mxu3 %v3547_v43  ;;  %v726_v43 = vrot.slane %v10893_v41, 4  ;;  %v1741_v53 = vrot.slane %v1740_v47, 4  ;;  %v2657_v41 = vsel %vm10953_vm14, %v8835_v54, %v2656_v29  ;;  %v2096_v4 = vrot.slane %v11545_v45, 5 }
 0x1de   : > { %9186 = vmatmul.msk.bf16.gmra.mxu0 %vm3332_vm11, %v3321_v9  ;;  %v11541_v17 = vpop.f32.mrf.mxu2  ;;  %v3249_v5 = vpack.c.b16 %v3231_v32, %v3230_v6  ;;  %v1736_v55 = vsel %vm10190_vm4, %v1731_v49, %v1735_v61  ;;  %v2660_v18 = vsel %vm10953_vm14, %v2658_v37, %v2659_v15  ;;  %v2099_v61 = vrot.slane %v11549_v51, 5  ;;  %v3265_v6 = vpop.permute.xlu0 %3264  ;;  %v1523_v15 = vld [vmem:[#allocation2 + $0x6c] sm:$0xf] }
 0x1df   : > { %v1746_v11 = vsel %vm10190_vm4, %v1741_v53, %v1745_v56  ;;  %v4006_v29 = vadd.f32 %v11322_v46, %v11521_v2  ;;  %v2097_v54 = vsel %vm10953_vm14, %v8826_v22, %v2096_v4  ;;  %v2098_v57 = vrot.slane %v2096_v4, 4  ;;  %v3123_v32 = vpop.permute.xlu2 %3122  ;;  %v11577_v22 = vpop.f32.mrf.mxu1 }
 0x1e0   : > { %v4092_v44 = vpop.f32.mrf.mxu3  ;;  %3278 = vrot.lane.b32.xlu0 %v3249_v5, %s10061_s21  ;;  %v3027_v23 = vunpack.c.l.b16 %v1746_v11  ;;  %v3296_v47 = vunpack.c.l.b16 %v2657_v41  ;;  %v3086_v49 = vunpack.c.l.b16 %v2097_v54  ;;  %v891_v56 = vsel %vm10439_vm10, %v726_v43, %v890_v39 }
 0x1e1   : > { %v11552_v35 = vadd.f32 %v4092_v44, %v4004_v28  ;;  %v3026_v28 = vunpack.c.l.b16 %v1736_v55  ;;  %v2501_v44 = vshrl.u32 %v2144_v24, 16  ;;  %v3297_v53 = vunpack.c.l.b16 %v2660_v18  ;;  %892 = vst [vmem:[#allocation2 + $0xc8] sm:$0x1] %v891_v56 }
 0x1e2   : > { %v2100_v2 = vsel %vm10953_vm14, %v2098_v57, %v2099_v61  ;;  %v2504_v55 = vshll.u32 %v2144_v24, 16  ;;  %v3551_v4 = vsel %vm3332_vm11, %v9644_v31, %v3265_v6  ;;  %v2510_v54 = vshll.u32 %v2145_v60, 16  ;;  %v2555_v31 = vld [vmem:[#allocation2 + $0x6c] sm:$0xe] }
 0x1e3   : > { %13936 = vst [vmem:[#allocation21_spill] sm:$0xff] %v11552_v35  ;;  %v11560_v63 = vpop.f32.mrf.mxu0  ;;  %v3051_v5 = vpack.c.b16 %v3027_v23, %v3026_v28  ;;  %v3087_v41 = vunpack.c.l.b16 %v2100_v2  ;;  %v2503_v11 = vrot.slane %v2501_v44, 4  ;;  %v2514_v40 = vshrl.u32 %v2145_v60, 16  ;;  %v9885_v2 = vld [vmem:[#allocation2 + $0x70] sm:$0xf] }
 0x1e4   : > { %13937 = vst [vmem:[#allocation22_spill] sm:$0xff] %v11560_v63  ;;  %v2506_v39 = vrot.slane %v2504_v55, 5  ;;  %v1748_v9 = vshrl.u32 %v1523_v15, 16  ;;  %v2512_v18 = vrot.slane %v2510_v54, 5  ;;  %v1751_v23 = vshll.u32 %v1523_v15, 16 }
 0x1e5   : > { %v3491_v43 = vsel %vm3332_vm11, %v3051_v5, %v3123_v32  ;;  %v3105_v28 = vpack.c.b16 %v3087_v41, %v3086_v49  ;;  %v1757_v61 = vshll.u32 %v9884_v58, 16  ;;  %v3322_v24 = vpack.c.b16 %v3297_v53, %v3296_v47 }
 0x1e6   : > { %v11573_v37 = vpop.f32.mrf.mxu2  ;;  %v2507_v56 = vor.u32 %v2506_v39, %v2503_v11  ;;  %v2516_v63 = vrot.slane %v2514_v40, 4  ;;  %v1750_v32 = vrot.slane %v1748_v9, 4  ;;  %v1753_v44 = vrot.slane %v1751_v23, 5 }
 0x1e7   : > { %3134 = vrot.lane.b32.xlu2 %v3105_v28, %s10061_s21  ;;  %v1759_v60 = vrot.slane %v1757_v61, 5  ;;  %v13940_v5 = vshrl.u32 %v11281_v30, 16  ;;  %v4009_v15 = vadd.f32 %v11322_v46, %v11541_v17  ;;  %v8836_v53 = vrot.slane %v2555_v31, 9  ;;  %v1953_v61 = vld [vmem:[#allocation2 + $0xb4] sm:$0xe] }
 0x1e8   : > { %v4094_v35 = vpop.f32.mrf.mxu3  ;;  %v2508_v58 = vrot.slane %v2507_v56, 4  ;;  %v1754_v47 = vor.u32 %v1753_v44, %v1750_v32  ;;  %v2663_v55 = vrot.slane %v9885_v2, 5  ;;  %v13941_v46 = vshll.u32 %v11288_v59, 16  ;;  %v11604_v32 = vld [vmem:[#allocation2 + $0xb8] sm:$0xf] }
 0x1e9   : > { %v11581_v57 = vadd.f32 %v4094_v35, %v4006_v29  ;;  %v1763_v49 = vrot.slane %v13940_v5, 4  ;;  %v2517_v35 = vor.u32 %v2516_v63, %v2512_v18  ;;  %v2162_v29 = vld [vmem:[#allocation2 + $0xc8] sm:$0x1]  ;;  %v9886_v63 = vld [vmem:[#allocation2 + $0x74] sm:$0x1]  ;;  %13942 = vst [vmem:[#allocation25_spill] sm:$0xff] %v11604_v32 }
 0x1ea   : > { %v2513_v30 = vsel %vm10190_vm4, %v2508_v58, %v2512_v18  ;;  %v2520_v11 = vshll.u32 %v2162_v29, 16  ;;  %v1769_v17 = vrot.slane %v13941_v46, 5  ;;  %v2666_v54 = vrot.slane %v9886_v63, 5  ;;  %v11606_v44 = vld [vmem:[#allocation2 + $0xbc] sm:$0x1] }
 0x1eb   : > { %13938 = vst [vmem:[#allocation23_spill] sm:$0xff] %v11581_v57  ;;  %v11583_v6 = vpop.f32.mrf.mxu0  ;;  %4150 = vmatmul.bf16.gmra.mxu2 %v3491_v43  ;;  %v1764_v40 = vor.u32 %v1763_v49, %v1759_v60  ;;  %v2518_v41 = vrot.slane %v2517_v35, 4  ;;  %v1755_v43 = vrot.slane %v1754_v47, 4  ;;  %v2665_v23 = vrot.slane %v2663_v55, 4  ;;  %v1525_v29 = vld [vmem:[#allocation2 + $0x78] sm:$0xf] }
 0x1ec   : > { %13939 = vst [vmem:[#allocation24_spill] sm:$0xff] %v11583_v6  ;;  %v2522_v39 = vrot.slane %v2520_v11, 5  ;;  %v3232_v31 = vunpack.c.l.b16 %v2513_v30  ;;  %v2664_v59 = vsel %vm10953_vm14, %v8836_v53, %v2663_v55  ;;  %v8827_v2 = vrot.slane %v1953_v61, 9  ;;  %v1527_v57 = vld [vmem:[#allocation2 + $0x84] sm:$0xf] }
 0x1ed   : > { %4234 = vmatmul.bf16.gmra.mxu3 %v3551_v4  ;;  %v1765_v28 = vrot.slane %v1764_v40, 4  ;;  %v1785_v4 = vshrl.u32 %v11342_v0, 16  ;;  %v1760_v18 = vsel %vm10190_vm4, %v1755_v43, %v1759_v60  ;;  %13943 = vst [vmem:[#allocation26_spill] sm:$0xff] %v11606_v44  ;;  %v2667_v53 = vsel %vm10953_vm14, %v2665_v23, %v2666_v54  ;;  %v11628_v23 = vld [vmem:[%s13879_s2] ss:$0 sm:$0xff] }
 0x1ee   : > { %9187 = vmatmul.msk.bf16.gmra.mxu0 %vm3332_vm11, %v3322_v24  ;;  %v11591_v9 = vpop.f32.mrf.mxu2  ;;  %v11598_v24 = vpop.f32.mrf.mxu1  ;;  %v2523_v49 = vsel %vm10190_vm4, %v2518_v41, %v2522_v39  ;;  %v3028_v35 = vunpack.c.l.b16 %v1760_v18  ;;  %v3298_v55 = vunpack.c.l.b16 %v2664_v59  ;;  %v3299_v30 = vunpack.c.l.b16 %v2667_v53 }
 0x1ef   : > { %v1770_v58 = vsel %vm10190_vm4, %v1765_v28, %v1769_v17  ;;  %v3233_v47 = vunpack.c.l.b16 %v2523_v49  ;;  %v2106_v11 = vrot.slane %v11606_v44, 5  ;;  %v1772_v63 = vshrl.u32 %v1525_v29, 16  ;;  %v3125_v39 = vpop.permute.xlu2 %3124  ;;  %v3267_v49 = vpop.permute.xlu0 %3266  ;;  %v1529_v44 = vld [vmem:[#allocation2 + $0x90] sm:$0xf] }
 0x1f0   : > { %v4097_v56 = vpop.f32.mrf.mxu3  ;;  %v3029_v60 = vunpack.c.l.b16 %v1770_v58  ;;  %v1775_v17 = vshll.u32 %v1525_v29, 16  ;;  %v1791_v54 = vshll.u32 %v11353_v21, 16  ;;  %v4011_v61 = vadd.f32 %v11628_v23, %v11573_v37 }
 0x1f1   : > { %v11608_v5 = vadd.f32 %v4097_v56, %v4009_v15  ;;  %v2103_v15 = vrot.slane %v11604_v32, 5  ;;  %v3250_v41 = vpack.c.b16 %v3233_v47, %v3232_v31  ;;  %v9645_v31 = vld [vmem:[#allocation2 + $0x6c] sm:$0xff]  ;;  %v1774_v59 = vrot.slane %v1772_v63, 4 }
 0x1f2   : > { %v3052_v46 = vpack.c.b16 %v3029_v60, %v3028_v35  ;;  %v1777_v35 = vrot.slane %v1775_v17, 5  ;;  %v1781_v21 = vshll.u32 %v11342_v0, 16  ;;  %v1787_v29 = vrot.slane %v1785_v4, 4 }
 0x1f3   : > { %13944 = vst [vmem:[#allocation27_spill] sm:$0xff] %v11608_v5  ;;  %v11614_v40 = vpop.f32.mrf.mxu0  ;;  %v2104_v28 = vsel %vm10953_vm14, %v8827_v2, %v2103_v15  ;;  %v2105_v56 = vrot.slane %v2103_v15, 4  ;;  %3280 = vrot.lane.b32.xlu0 %v3250_v41, %s10061_s21  ;;  %v3323_v53 = vpack.c.b16 %v3299_v30, %v3298_v55  ;;  %v2556_v15 = vld [vmem:[#allocation2 + $0x78] sm:$0xe]  ;;  %v3555_v0 = vsel %vm3332_vm11, %v9645_v31, %v3267_v49 }
 0x1f4   : > { %13945 = vst [vmem:[#allocation28_spill] sm:$0xff] %v11614_v40  ;;  %v3088_v18 = vunpack.c.l.b16 %v2104_v28  ;;  %v3495_v60 = vsel %vm3332_vm11, %v3052_v46, %v3125_v39  ;;  %v1778_v41 = vor.u32 %v1777_v35, %v1774_v59  ;;  %v1783_v5 = vrot.slane %v1781_v21, 5  ;;  %v9888_v28 = vld [vmem:[#allocation2 + $0x7c] sm:$0xf]  ;;  %v9889_v40 = vld [vmem:[#allocation2 + $0x80] sm:$0x1] }
 0x1f5   : > { %v2107_v58 = vsel %vm10953_vm14, %v2105_v56, %v2106_v11  ;;  %v2670_v63 = vrot.slane %v9888_v28, 5  ;;  %v2673_v6 = vrot.slane %v9889_v40, 5  ;;  %v1793_v46 = vrot.slane %v1791_v54, 5  ;;  %v9890_v56 = vld [vmem:[#allocation2 + $0x88] sm:$0xf] }
 0x1f6   : > { %v11620_v43 = vpop.f32.mrf.mxu2  ;;  %v3089_v2 = vunpack.c.l.b16 %v2107_v58  ;;  %v11639_v11 = vpop.f32.mrf.mxu1  ;;  %v1779_v55 = vrot.slane %v1778_v41, 4  ;;  %v1788_v30 = vor.u32 %v1787_v29, %v1783_v5  ;;  %v8837_v39 = vrot.slane %v2556_v15, 9  ;;  %v9891_v28 = vld [vmem:[#allocation2 + $0x8c] sm:$0x1] }
 0x1f7   : > { %v4014_v59 = vadd.f32 %v11628_v23, %v11591_v9  ;;  %v1796_v40 = vshrl.u32 %v1527_v57, 16  ;;  %v1799_v58 = vshll.u32 %v1527_v57, 16  ;;  %v2672_v54 = vrot.slane %v2670_v63, 4 }
 0x1f8   : > { %v4099_v47 = vpop.f32.mrf.mxu3  ;;  %v3106_v17 = vpack.c.b16 %v3089_v2, %v3088_v18  ;;  %v1784_v18 = vsel %vm10190_vm4, %v1779_v55, %v1783_v5  ;;  %v1789_v49 = vrot.slane %v1788_v30, 4  ;;  %v1805_v35 = vshll.u32 %v9890_v56, 16  ;;  %v9646_v55 = vld [vmem:[#allocation2 + $0x78] sm:$0xff] }
 0x1f9   : > { %v11637_v37 = vadd.f32 %v4099_v47, %v4011_v61  ;;  %v1809_v61 = vshrl.u32 %v9890_v56, 16  ;;  %v2671_v9 = vsel %vm10953_vm14, %v8837_v39, %v2670_v63  ;;  %v3030_v47 = vunpack.c.l.b16 %v1784_v18  ;;  %v4925_v30 = vld [vmem:[#allocation3] sm:$0xf]  ;;  %v4926_v18 = vld [vmem:[#allocation3 + $0x4] sm:$0xf] }
 0x1fa   : > { %3136 = vrot.lane.b32.xlu2 %v3106_v17, %s10061_s21  ;;  %v1794_v21 = vsel %vm10190_vm4, %v1789_v49, %v1793_v46  ;;  %v1801_v2 = vrot.slane %v1799_v58, 5  ;;  %v2674_v15 = vsel %vm10953_vm14, %v2672_v54, %v2673_v6  ;;  %v11660_v5 = vrot.slane %v1805_v35, 5  ;;  %v3269_v46 = vpop.permute.xlu0 %3268  ;;  %v9892_v49 = vld [vmem:[#allocation2 + $0x8c] sm:$0x1]  ;;  %v9893_v54 = vld [vmem:[#allocation2 + $0x94] sm:$0xf] }
 0x1fb   : > { %13946 = vst [vmem:[#allocation29_spill] sm:$0xff] %v11637_v37  ;;  %v11642_v4 = vpop.f32.mrf.mxu0  ;;  %4155 = vmatmul.bf16.gmra.mxu2 %v3495_v60  ;;  %v3031_v57 = vunpack.c.l.b16 %v1794_v21  ;;  %v1798_v60 = vrot.slane %v1796_v40, 4  ;;  %v1811_v41 = vrot.slane %v1809_v61, 4  ;;  %v3939_v63 = vadd.f32 %v11628_v23, %v11245_v27 }
 0x1fc   : > { %13947 = vst [vmem:[#allocation30_spill] sm:$0xff] %v11642_v4  ;;  %v4974_v39 = vshrl.u32 %v4925_v30, 16  ;;  %v3300_v40 = vunpack.c.l.b16 %v2671_v9  ;;  %v3301_v58 = vunpack.c.l.b16 %v2674_v15  ;;  %v2680_v61 = vrot.slane %v9892_v49, 5 }
 0x1fd   : > { %4239 = vmatmul.bf16.gmra.mxu3 %v3555_v0  ;;  %v1815_v0 = vshll.u32 %v9891_v28, 16  ;;  %v1802_v6 = vor.u32 %v1801_v2, %v1798_v60  ;;  %v1833_v35 = vshrl.u32 %v9893_v54, 16  ;;  %v4016_v21 = vadd.f32 %v11628_v23, %v11620_v43  ;;  %v3127_v28 = vpop.permute.xlu2 %3126  ;;  %v9894_v60 = vld [vmem:[#allocation2 + $0x88] sm:$0xf] }
 0x1fe   : > { %9188 = vmatmul.msk.bf16.gmra.mxu0 %vm3332_vm11, %v3323_v53  ;;  %v11648_v31 = vpop.f32.mrf.mxu2  ;;  %v11666_v56 = vpop.f32.mrf.mxu1  ;;  %v1812_v27 = vor.u32 %v1811_v41, %v11660_v5  ;;  %v4976_v9 = vrot.slane %v4974_v39, 4  ;;  %v2677_v2 = vrot.slane %v9894_v60, 5  ;;  %v4983_v15 = vshll.u32 %v4926_v18, 16 }
 0x1ff   : > { %v1817_v37 = vrot.slane %v1815_v0, 5  ;;  %v4987_v49 = vshrl.u32 %v4926_v18, 16  ;;  %v3324_v43 = vpack.c.b16 %v3301_v58, %v3300_v40  ;;  %v1803_v38 = vrot.slane %v1802_v6, 4 }
 0x200   : > { %v4102_v29 = vpop.f32.mrf.mxu3  ;;  %v4985_v0 = vrot.slane %v4983_v15, 5  ;;  %v1820_v32 = vshrl.u32 %v1529_v44, 16  ;;  %v1823_v60 = vshll.u32 %v1529_v44, 16  ;;  %v1829_v51 = vshll.u32 %v9893_v54, 16 }
 0x201   : > { %v11656_v53 = vadd.f32 %v4102_v29, %v4014_v59  ;;  %v3053_v59 = vpack.c.b16 %v3031_v57, %v3030_v47  ;;  %v4957_v47 = vld [vmem:[#allocation3 + $0x8] sm:$0x1]  ;;  %v4977_v57 = vshll.u32 %v4925_v30, 16  ;;  %v8838_v18 = vrot.slane %v2557_v26, 9 }
 0x202   : > { %v4028_v40 = vadd.f32 %v11577_v22, %v3939_v63  ;;  %v1822_v6 = vrot.slane %v1820_v32, 4 }
 0x203   : > { %13948 = vst [vmem:[#allocation31_spill] sm:$0xff] %v11656_v53  ;;  %v11662_v17 = vpop.f32.mrf.mxu0  ;;  %v3559_v53 = vsel %vm3332_vm11, %v9646_v55, %v3269_v46  ;;  %v3499_v33 = vsel %vm3332_vm11, %v3053_v59, %v3127_v28  ;;  %v4979_v8 = vrot.slane %v4977_v57, 5  ;;  %v1813_v55 = vrot.slane %v1812_v27, 4 }
 0x204   : > { %13949 = vst [vmem:[#allocation32_spill] sm:$0xff] %v11662_v17  ;;  %v4993_v17 = vshll.u32 %v4957_v47, 16  ;;  %v4989_v46 = vrot.slane %v4987_v49, 4  ;;  %v2679_v47 = vrot.slane %v2677_v2, 4  ;;  %v1825_v28 = vrot.slane %v1823_v60, 5  ;;  %v3129_v60 = vpop.permute.xlu1 %3128 }
 0x205   : > { %v4980_v30 = vor.u32 %v4979_v8, %v4976_v9  ;;  %v1808_v8 = vsel %vm10190_vm4, %v1803_v38, %v11660_v5  ;;  %v1818_v26 = vsel %vm10190_vm4, %v1813_v55, %v1817_v37  ;;  %v4117_v22 = vadd.f32 %v11648_v31, %v4028_v40 }
 0x206   : > { %v11670_v29 = vpop.f32.mrf.mxu2  ;;  %v4990_v19 = vor.u32 %v4989_v46, %v4985_v0  ;;  %v4995_v59 = vrot.slane %v4993_v17, 5  ;;  %v11686_v44 = vpop.f32.mrf.mxu1  ;;  %v1835_v17 = vrot.slane %v1833_v35, 4  ;;  %v2678_v63 = vsel %vm10953_vm14, %v8838_v18, %v2677_v2 }
 0x207   : > { %v4981_v58 = vrot.slane %v4980_v30, 4  ;;  %v2681_v38 = vsel %vm10953_vm14, %v2679_v47, %v2680_v61  ;;  %v3032_v54 = vunpack.c.l.b16 %v1808_v8  ;;  %v1826_v27 = vor.u32 %v1825_v28, %v1822_v6  ;;  %v9895_v61 = vld [vmem:[#allocation2 + $0x98] sm:$0x1]  ;;  %v9647_v30 = vld [vmem:[#allocation2 + $0x84] sm:$0xff]  ;;  %v2558_v6 = vld [vmem:[#allocation2 + $0x90] sm:$0xe] }
 0x208   : > { %v4104_v4 = vpop.f32.mrf.mxu3  ;;  %v3944_v35 = vadd.f32 %v11628_v23, %v11296_v36  ;;  %v11705_v57 = vadd.f32 %v11628_v23, %v11324_v13  ;;  %v1839_v2 = vshll.u32 %v9895_v61, 16  ;;  %v11710_v55 = vadd.f32 %v11628_v23, %v11345_v34 }
 0x209   : > { %v11675_v41 = vadd.f32 %v4104_v4, %v4016_v21  ;;  %v4986_v32 = vsel %vm10190_vm4, %v4981_v58, %v4985_v0  ;;  %v3033_v21 = vunpack.c.l.b16 %v1818_v26  ;;  %v3303_v46 = vunpack.c.l.b16 %v2681_v38 }
 0x20a   : > { %v11714_v36 = vadd.f32 %v11628_v23, %v11376_v48  ;;  %v11718_v13 = vadd.f32 %v11628_v23, %v11392_v62  ;;  %v1827_v47 = vrot.slane %v1826_v27, 4  ;;  %v2684_v62 = vrot.slane %v11414_v25, 5 }
 0x20b   : > { %v4294_v39 = vpop.f32.mrf.mxu0  ;;  %4160 = vmatmul.bf16.gmra.mxu2 %v3499_v33  ;;  %v4991_v33 = vrot.slane %v4990_v19, 4  ;;  %v6814_v19 = vunpack.c.l.b16 %v4986_v32  ;;  %v3054_v18 = vpack.c.b16 %v3033_v21, %v3032_v54  ;;  %v3271_v58 = vpop.permute.xlu0 %3270  ;;  %v2687_v28 = vrot.slane %v11419_v20, 5 }
 0x20c   : > { %v1857_v8 = vshrl.u32 %v11496_v50, 16  ;;  %v8839_v20 = vrot.slane %v2558_v6, 9  ;;  %v1853_v61 = vshll.u32 %v11496_v50, 16 }
 0x20d   : > { %4244 = vmatmul.bf16.gmra.mxu3 %v3559_v53  ;;  %v11691_v53 = vrot.slane %v1829_v51, 5  ;;  %v4996_v37 = vsel %vm10190_vm4, %v4991_v33, %v4995_v59  ;;  %v3941_v51 = vadd.f32 %v11628_v23, %v11271_v10  ;;  %v3302_v10 = vunpack.c.l.b16 %v2678_v63  ;;  %v11721_v59 = vld [vmem:[#allocation2 + $0xa4] sm:$0x1] }
 0x20e   : > { %9189 = vmatmul.msk.bf16.gmra.mxu0 %vm3332_vm11, %v3324_v43  ;;  %v11679_v4 = vpop.f32.mrf.mxu2  ;;  %v6815_v31 = vunpack.c.l.b16 %v4996_v37  ;;  %v2694_v34 = vrot.slane %v11721_v59, 5  ;;  %v1841_v33 = vrot.slane %v1839_v2, 5  ;;  %v3563_v37 = vsel %vm3332_vm11, %v9647_v30, %v3271_v58 }
 0x20f   : > { %v1836_v43 = vor.u32 %v1835_v17, %v11691_v53  ;;  %v3325_v63 = vpack.c.b16 %v3303_v46, %v3302_v10  ;;  %v1832_v25 = vsel %vm10190_vm4, %v1827_v47, %v11691_v53  ;;  %v2701_v10 = vrot.slane %v11472_v12, 5  ;;  %v4813_v46 = vld [vmem:[#allocation3 + $0xc] sm:$0xf] }
 0x210   : > { %v4205_v5 = vpop.f32.mrf.mxu3  ;;  %v6846_v49 = vpack.c.b16 %v6815_v31, %v6814_v19  ;;  %v3503_v19 = vsel %vm3332_vm11, %v3054_v18, %v3129_v60  ;;  %v11752_v60 = vrot.slane %v1853_v61, 5  ;;  %v1863_v18 = vshll.u32 %v11498_v52, 16 }
 0x211   : > { %v4206_v9 = vadd.f32 %v4205_v5, %v4117_v22  ;;  %v1837_v26 = vrot.slane %v1836_v43, 4  ;;  %v4033_v22 = vadd.f32 %v11639_v11, %v3944_v35  ;;  %v1531_v5 = vld [vmem:[#allocation2 + $0x9c] sm:$0xf]  ;;  %v1859_v43 = vrot.slane %v1857_v8, 4 }
 0x212   : > { %6862 = vrot.lane.b32.xlu1 %v6846_v49, %s10061_s21  ;;  %v9745_v11 = vld [vmem:[%s13880_s3 + $0x38] sm:$0xff]  ;;  %v1844_v31 = vshrl.u32 %v1531_v5, 16  ;;  %v2685_v58 = vsel %vm10953_vm14, %v8839_v20, %v2684_v62  ;;  %v1865_v20 = vrot.slane %v1863_v18, 5  ;;  %v1881_v61 = vshrl.u32 %v11545_v45, 16 }
 0x213   : > { %v4296_v15 = vpop.f32.mrf.mxu0  ;;  %v4295_v0 = vadd.f32 %v4294_v39, %v4206_v9  ;;  %v4030_v39 = vadd.f32 %v11598_v24, %v3941_v51  ;;  %v11732_v24 = vpop.f32.mrf.mxu1  ;;  %v1842_v35 = vsel %vm10190_vm4, %v1837_v26, %v1841_v33  ;;  %v1847_v9 = vshll.u32 %v1531_v5, 16  ;;  %7954 = vmatpush.bf16.msrb.mxu1 %v9745_v11 }
 0x214   : > { %v1846_v49 = vrot.slane %v1844_v31, 4  ;;  %v11769_v33 = vadd.f32 %v11628_v23, %v11438_v3  ;;  %v3304_v3 = vunpack.c.l.b16 %v2685_v58 }
 0x215   : > { %v4374_v40 = vmax.f32 %v4295_v0, 0.0  ;;  %v4119_v32 = vadd.f32 %v11670_v29, %v4030_v39  ;;  %v2686_v29 = vrot.slane %v2684_v62, 4  ;;  %v11749_v0 = vadd.f32 %v11628_v23, %v11417_v16 }
 0x216   : > { %v11725_v48 = vpop.f32.mrf.mxu2  ;;  %v1849_v30 = vrot.slane %v1847_v9, 5  ;;  %v3034_v16 = vunpack.c.l.b16 %v1832_v25 }
 0x217   : > { %v4460_v17 = vpack.c.bf16 %v4374_v40, %v4374_v40  ;;  %v3035_v40 = vunpack.c.l.b16 %v1842_v35  ;;  %v2688_v26 = vsel %vm10953_vm14, %v2686_v29, %v2687_v28 }
 0x218   : > { %v4207_v38 = vpop.f32.mrf.mxu3  ;;  %v1850_v6 = vor.u32 %v1849_v30, %v1846_v49  ;;  %v3305_v11 = vunpack.c.l.b16 %v2688_v26  ;;  %v4817_v49 = vld [vmem:[#allocation3 + $0x14] sm:$0x1] }
 0x219   : > { %v4493_v54 = vshrl.u32 %v4460_v17, 16  ;;  %v4208_v21 = vadd.f32 %v4207_v38, %v4119_v32  ;;  %v4496_v27 = vshll.u32 %v4460_v17, 16  ;;  %v2559_v17 = vld [vmem:[#allocation2 + $0x9c] sm:$0xe]  ;;  %v3131_v35 = vpop.permute.xlu0 %3130 }
 0x21a   : > { %v1851_v62 = vrot.slane %v1850_v6, 4  ;;  %v8840_v29 = vrot.slane %v2559_v17, 9 }
 0x21b   : > { %v4299_v51 = vpop.f32.mrf.mxu0  ;;  %v11745_v2 = vrot.slane %v4493_v54, 7  ;;  %v4297_v53 = vadd.f32 %v4296_v15, %v4208_v21  ;;  %4165 = vmatmul.bf16.gmra.mxu2 %v3503_v19  ;;  %v4122_v15 = vadd.f32 %v11679_v4, %v4033_v22  ;;  %v1860_v4 = vor.u32 %v1859_v43, %v11752_v60  ;;  %v11773_v28 = vpop.f32.mrf.mxu1  ;;  %v9648_v54 = vld [vmem:[#allocation2 + $0x90] sm:$0xff] }
 0x21c   : > { %v4035_v22 = vadd.f32 %v11666_v56, %v11705_v57  ;;  %v3055_v21 = vpack.c.b16 %v3035_v40, %v3034_v16  ;;  %v3326_v40 = vpack.c.b16 %v3305_v11, %v3304_v3 }
 0x21d   : > { %v4498_v50 = vor.u32 %v4496_v27, %v11745_v2  ;;  %v4375_v47 = vmax.f32 %v4297_v53, 0.0  ;;  %4249 = vmatmul.bf16.gmra.mxu3 %v3563_v37  ;;  %v1861_v25 = vrot.slane %v1860_v4, 4  ;;  %v3273_v27 = vpop.permute.xlu2 %3272  ;;  %v4499_v53 = vrot.slane %v11745_v2, 4 }
 0x21e   : > { %9190 = vmatmul.msk.bf16.gmra.mxu0 %vm3332_vm11, %v3325_v63  ;;  %v11758_v39 = vpop.f32.mrf.mxu2  ;;  %v9897_v63 = vld [vmem:[#allocation2 + $0xa0] sm:$0xf]  ;;  %v4124_v43 = vadd.f32 %v11725_v48, %v4035_v22  ;;  %v3507_v16 = vsel %vm3332_vm11, %v3055_v21, %v3131_v35  ;;  %v1533_v21 = vld [vmem:[#allocation2 + $0xa8] sm:$0xf]  ;;  %v1883_v35 = vrot.slane %v1881_v61, 4 }
 0x21f   : > { %v4814_v8 = vsel %vm10420_vm9, %v4498_v50, %v4813_v46  ;;  %v4461_v52 = vpack.c.bf16 %v4375_v47, %v4375_v47  ;;  %v2691_v38 = vrot.slane %v9897_v63, 5  ;;  %v1856_v46 = vsel %vm10190_vm4, %v1851_v62, %v11752_v60 }
 0x220   : > { %4815 = vst [vmem:[#allocation3 + $0xc] sm:$0xf] %v4814_v8  ;;  %v4210_v32 = vpop.f32.mrf.mxu3  ;;  %v3567_v47 = vsel %vm3332_vm11, %v9648_v54, %v3273_v27 }
 0x221   : > { %v4501_v37 = vshrl.u32 %v4461_v52, 16  ;;  %v4211_v19 = vadd.f32 %v4210_v32, %v4122_v15  ;;  %v4504_v56 = vshll.u32 %v4461_v52, 16  ;;  %v2693_v9 = vrot.slane %v2691_v38, 4 }
 0x222   : > { %v2692_v2 = vsel %vm10953_vm14, %v8840_v29, %v2691_v38  ;;  %v11796_v32 = vunpack.c.l.b16 %v1856_v46  ;;  %v9744_v38 = vld [vmem:[%s13880_s3 + $0x30] sm:$0xff]  ;;  %v1868_v29 = vshrl.u32 %v1533_v21, 16 }
 0x223   : > { %v4301_v5 = vpop.f32.mrf.mxu0  ;;  %v4503_v31 = vrot.slane %v4501_v37, 7  ;;  %v4300_v57 = vadd.f32 %v4299_v51, %v4211_v19  ;;  %v1866_v51 = vsel %vm10190_vm4, %v1861_v25, %v1865_v20  ;;  %v2695_v52 = vsel %vm10953_vm14, %v2693_v9, %v2694_v34  ;;  %7955 = vmatpush.bf16.msrb.mxu1 %v9744_v38  ;;  %v13951_v9 = vld [vmem:[#allocation20_spill] sm:$0xff]  ;;  %v2560_v38 = vld [vmem:[#allocation2 + $0xa8] sm:$0xe] }
 0x224   : > { %v11798_v62 = vunpack.c.l.b16 %v1866_v51  ;;  %v3306_v59 = vunpack.c.l.b16 %v2692_v2  ;;  %v1877_v37 = vshll.u32 %v11545_v45, 16  ;;  %v3307_v54 = vunpack.c.l.b16 %v2695_v52  ;;  %v4820_v45 = vld [vmem:[#allocation3 + $0x18] sm:$0xf] }
 0x225   : > { %v4506_v30 = vor.u32 %v4504_v56, %v4503_v31  ;;  %v4508_v18 = vrot.slane %v4503_v31, 4  ;;  %v4376_v50 = vmax.f32 %v4300_v57, 0.0  ;;  %v1871_v31 = vshll.u32 %v1533_v21, 16 }
 0x226   : > { %v4128_v15 = vpop.f32.mrf.mxu2  ;;  %v4038_v56 = vadd.f32 %v11686_v44, %v11710_v55  ;;  %v4040_v57 = vadd.f32 %v11732_v24, %v11714_v36  ;;  %v11810_v27 = vrot.slane %v1877_v37, 5  ;;  %v1870_v24 = vrot.slane %v1868_v29, 4 }
 0x227   : > { %v4507_v48 = vsel %vm10405_vm8, %v4499_v53, %v4506_v30  ;;  %v4818_v60 = vsel %vm10439_vm10, %v4508_v18, %v4817_v49  ;;  %v4462_v6 = vpack.c.bf16 %v4376_v50, %v4376_v50  ;;  %v4927_v8 = vld [vmem:[#allocation3 + $0xc] sm:$0xf]  ;;  %v1887_v53 = vshll.u32 %v13951_v9, 16  ;;  %v11813_v49 = vpop.f32.mrf.mxu1  ;;  %v9649_v50 = vld [vmem:[#allocation2 + $0x9c] sm:$0xff] }
 0x228   : > { %4816 = vst.msk [vmem:[#allocation3 + $0x10] sm:$0xf] %vm332_vm0, %v4507_v48  ;;  %v4212_v26 = vpop.f32.mrf.mxu3  ;;  %v4998_v4 = vshrl.u32 %v4927_v8, 16  ;;  %v5001_v22 = vshll.u32 %v4927_v8, 16  ;;  %v4127_v55 = vadd.f32 %v11758_v39, %v4038_v56  ;;  %v4129_v36 = vadd.f32 %v4128_v15, %v4040_v57 }
 0x229   : > { %4819 = vst [vmem:[#allocation3 + $0x14] sm:$0x1] %v4818_v60  ;;  %v4510_v17 = vshrl.u32 %v4462_v6, 16  ;;  %v4213_v63 = vadd.f32 %v4212_v26, %v4124_v43  ;;  %v4513_v34 = vshll.u32 %v4462_v6, 16  ;;  %v1873_v30 = vrot.slane %v1871_v31, 5 }
 0x22a   : > { %v5000_v25 = vrot.slane %v4998_v4, 4  ;;  %v5003_v20 = vrot.slane %v5001_v22, 5  ;;  %v1884_v15 = vor.u32 %v1883_v35, %v11810_v27  ;;  %v8841_v35 = vrot.slane %v2560_v38, 9 }
 0x22b   : > { %v4304_v19 = vpop.f32.mrf.mxu0  ;;  %v11804_v3 = vrot.slane %v4510_v17, 7  ;;  %v4302_v11 = vadd.f32 %v4301_v5, %v4213_v63  ;;  %4170 = vmatmul.bf16.gmra.mxu2 %v3507_v16  ;;  %v3056_v16 = vpack.c.b16 %v11798_v62, %v11796_v32  ;;  %v1874_v39 = vor.u32 %v1873_v30, %v1870_v24 }
 0x22c   : > { %v5004_v44 = vor.u32 %v5003_v20, %v5000_v25  ;;  %v3275_v26 = vpop.permute.xlu1 %3274  ;;  %v1889_v25 = vrot.slane %v1887_v53, 5  ;;  %v4824_v20 = vld [vmem:[#allocation3 + $0x20] sm:$0x1]  ;;  %v1885_v29 = vrot.slane %v1884_v15, 4 }
 0x22d   : > { %v4515_v5 = vor.u32 %v4513_v34, %v11804_v3  ;;  %v4377_v43 = vmax.f32 %v4302_v11, 0.0  ;;  %4254 = vmatmul.bf16.gmra.mxu3 %v3567_v47  ;;  %v11824_v47 = vpack.c.b16 %v3307_v54, %v3306_v59  ;;  %v4516_v6 = vrot.slane %v11804_v3, 4 }
 0x22e   : > { %9191 = vmatmul.msk.bf16.gmra.mxu0 %vm3332_vm11, %v3326_v40  ;;  %v11817_v46 = vpop.f32.mrf.mxu2  ;;  %v5005_v4 = vrot.slane %v5004_v44, 4  ;;  %v1875_v62 = vrot.slane %v1874_v39, 4  ;;  %v3571_v54 = vsel %vm3332_vm11, %v9649_v50, %v3275_v26 }
 0x22f   : > { %v4821_v61 = vsel %vm10420_vm9, %v4515_v5, %v4820_v45  ;;  %v4463_v18 = vpack.c.bf16 %v4377_v43, %v4377_v43  ;;  %v4928_v51 = vld [vmem:[#allocation3 + $0x10] sm:$0xf]  ;;  %v11834_v53 = vpop.f32.mrf.mxu1 }
 0x230   : > { %4822 = vst [vmem:[#allocation3 + $0x18] sm:$0xf] %v4821_v61  ;;  %v4215_v40 = vpop.f32.mrf.mxu3  ;;  %v4958_v2 = vld [vmem:[#allocation3 + $0x14] sm:$0x1]  ;;  %v5007_v48 = vshll.u32 %v4928_v51, 16  ;;  %v5011_v60 = vshrl.u32 %v4928_v51, 16 }
 0x231   : > { %v4518_v8 = vshrl.u32 %v4463_v18, 16  ;;  %v4216_v52 = vadd.f32 %v4215_v40, %v4127_v55  ;;  %v5017_v32 = vshll.u32 %v4958_v2, 16  ;;  %v4521_v37 = vshll.u32 %v4463_v18, 16  ;;  %v3133_v11 = vpop.permute.xlu2 %3132 }
 0x232   : > { %v5009_v17 = vrot.slane %v5007_v48, 5  ;;  %v5013_v63 = vrot.slane %v5011_v60, 4  ;;  %v3511_v30 = vsel %vm3332_vm11, %v3056_v16, %v3133_v11  ;;  %v1890_v40 = vsel %vm10190_vm4, %v1885_v29, %v1889_v25  ;;  %v1535_v25 = vld [vmem:[#allocation2 + $0xb4] sm:$0xf] }
 0x233   : > { %v4306_v22 = vpop.f32.mrf.mxu0  ;;  %v4520_v59 = vrot.slane %v4518_v8, 7  ;;  %v4305_v34 = vadd.f32 %v4304_v19, %v4216_v52  ;;  %v5019_v5 = vrot.slane %v5017_v32, 5  ;;  %v1880_v19 = vsel %vm10190_vm4, %v1875_v62, %v11810_v27  ;;  %v9898_v52 = vld [vmem:[#allocation2 + $0xac] sm:$0xf] }
 0x234   : > { %v5010_v21 = vsel %vm10190_vm4, %v5005_v4, %v5009_v17  ;;  %v5014_v3 = vor.u32 %v5013_v63, %v5009_v17  ;;  %v11846_v39 = vunpack.c.l.b16 %v1880_v19  ;;  %v2698_v26 = vrot.slane %v9898_v52, 5 }
 0x235   : > { %v4523_v31 = vor.u32 %v4521_v37, %v4520_v59  ;;  %v4525_v56 = vrot.slane %v4520_v59, 4  ;;  %v4378_v57 = vmax.f32 %v4305_v34, 0.0  ;;  %v6816_v43 = vunpack.c.l.b16 %v5010_v21  ;;  %v4827_v37 = vld [vmem:[#allocation3 + $0x24] sm:$0xf] }
 0x236   : > { %v4133_v45 = vpop.f32.mrf.mxu2  ;;  %v5015_v9 = vrot.slane %v5014_v3, 4  ;;  %v11850_v32 = vunpack.c.l.b16 %v1890_v40  ;;  %v4043_v62 = vadd.f32 %v11773_v28, %v11718_v13  ;;  %v4045_v59 = vadd.f32 %v11813_v49, %v11749_v0 }
 0x237   : > { %v4524_v44 = vsel %vm10405_vm8, %v4516_v6, %v4523_v31  ;;  %v4825_v55 = vsel %vm10439_vm10, %v4525_v56, %v4824_v20  ;;  %v4464_v24 = vpack.c.bf16 %v4378_v57, %v4378_v57  ;;  %v4929_v61 = vld [vmem:[#allocation3 + $0x18] sm:$0xf]  ;;  %v2700_v34 = vrot.slane %v2698_v26, 4  ;;  %v13953_v20 = vld [vmem:[#allocation26_spill] sm:$0xff]  ;;  %v11875_v12 = vpop.f32.mrf.mxu1 }
 0x238   : > { %4823 = vst.msk [vmem:[#allocation3 + $0x1c] sm:$0xf] %vm332_vm0, %v4524_v44  ;;  %v4217_v18 = vpop.f32.mrf.mxu3  ;;  %v5020_v50 = vsel %vm10190_vm4, %v5015_v9, %v5019_v5  ;;  %v5022_v51 = vshrl.u32 %v4929_v61, 16  ;;  %v5025_v27 = vshll.u32 %v4929_v61, 16  ;;  %v1911_v21 = vshll.u32 %v13953_v20, 16  ;;  %v9650_v61 = vld [vmem:[#allocation2 + $0xa8] sm:$0xff] }
 0x239   : > { %4826 = vst [vmem:[#allocation3 + $0x20] sm:$0x1] %v4825_v55  ;;  %v4527_v2 = vshrl.u32 %v4464_v24, 16  ;;  %v4218_v48 = vadd.f32 %v4217_v18, %v4129_v36  ;;  %v6817_v60 = vunpack.c.l.b16 %v5020_v50  ;;  %v4530_v15 = vshll.u32 %v4464_v24, 16  ;;  %v13952_v36 = vld [vmem:[#allocation25_spill] sm:$0xff]  ;;  %v9743_v24 = vld [vmem:[%s13880_s3 + $0x28] sm:$0xff] }
 0x23a   : > { %v5024_v6 = vrot.slane %v5022_v51, 4  ;;  %v5027_v8 = vrot.slane %v5025_v27, 5  ;;  %v1905_v38 = vshrl.u32 %v13952_v36, 16  ;;  %v2699_v13 = vsel %vm10953_vm14, %v8841_v35, %v2698_v26  ;;  %7956 = vmatpush.bf16.msrb.mxu1 %v9743_v24 }
 0x23b   : > { %v4309_v16 = vpop.f32.mrf.mxu0  ;;  %v11848_v4 = vrot.slane %v4527_v2, 7  ;;  %v4307_v17 = vadd.f32 %v4306_v22, %v4218_v48  ;;  %v6847_v63 = vpack.c.b16 %v6817_v60, %v6816_v43  ;;  %4175 = vmatmul.bf16.gmra.mxu2 %v3511_v30  ;;  %v4132_v28 = vadd.f32 %v11817_v46, %v4043_v62 }
 0x23c   : > { %v4134_v29 = vadd.f32 %v4133_v45, %v4045_v59  ;;  %v5028_v0 = vor.u32 %v5027_v8, %v5024_v6  ;;  %v2702_v49 = vsel %vm10953_vm14, %v2700_v34, %v2701_v10  ;;  %v3057_v57 = vpack.c.b16 %v11850_v32, %v11846_v39  ;;  %v4831_v39 = vld [vmem:[#allocation3 + $0x2c] sm:$0x1] }
 0x23d   : > { %v4532_v3 = vor.u32 %v4530_v15, %v11848_v4  ;;  %v4379_v22 = vmax.f32 %v4307_v17, 0.0  ;;  %4259 = vmatmul.bf16.gmra.mxu3 %v3571_v54  ;;  %6864 = vrot.lane.b32.xlu1 %v6847_v63, %s10061_s21  ;;  %v1892_v35 = vshrl.u32 %v1535_v25, 16  ;;  %v3308_v5 = vunpack.c.l.b16 %v2699_v13 }
 0x23e   : > { %v11860_v11 = vpop.f32.mrf.mxu2  ;;  %9192 = vmatmul.msk.bf16.gmra.mxu0 %vm3332_vm11, %v11824_v47  ;;  %v3309_v43 = vunpack.c.l.b16 %v2702_v49  ;;  %v4533_v10 = vrot.slane %v11848_v4, 4  ;;  %v5029_v18 = vrot.slane %v5028_v0, 4  ;;  %v1895_v27 = vshll.u32 %v1535_v25, 16 }
 0x23f   : > { %v4828_v54 = vsel %vm10420_vm9, %v4532_v3, %v4827_v37  ;;  %v4465_v31 = vpack.c.bf16 %v4379_v22, %v4379_v22  ;;  %v4930_v56 = vld [vmem:[#allocation3 + $0x1c] sm:$0xf]  ;;  %v1894_v60 = vrot.slane %v1892_v35, 4  ;;  %v1901_v59 = vshll.u32 %v13952_v36, 16 }
 0x240   : > { %4829 = vst [vmem:[#allocation3 + $0x24] sm:$0xf] %v4828_v54  ;;  %v4220_v46 = vpop.f32.mrf.mxu3  ;;  %v4959_v45 = vld [vmem:[#allocation3 + $0x20] sm:$0x1]  ;;  %v5031_v9 = vshll.u32 %v4930_v56, 16  ;;  %v5035_v47 = vshrl.u32 %v4930_v56, 16  ;;  %v3328_v52 = vpack.c.b16 %v3309_v43, %v3308_v5 }
 0x241   : > { %v4535_v19 = vshrl.u32 %v4465_v31, 16  ;;  %v4221_v44 = vadd.f32 %v4220_v46, %v4132_v28  ;;  %v5041_v55 = vshll.u32 %v4959_v45, 16  ;;  %v4538_v2 = vshll.u32 %v4465_v31, 16  ;;  %v3277_v15 = vpop.permute.xlu0 %3276  ;;  %v3135_v62 = vpop.permute.xlu2 %3134 }
 0x242   : > { %v5033_v50 = vrot.slane %v5031_v9, 5  ;;  %v5037_v51 = vrot.slane %v5035_v47, 4  ;;  %v1897_v26 = vrot.slane %v1895_v27, 5  ;;  %v3575_v37 = vsel %vm3332_vm11, %v9650_v61, %v3277_v15  ;;  %v13954_v61 = vld [vmem:[#allocation14_spill] sm:$0xff] }
 0x243   : > { %v4311_v30 = vpop.f32.mrf.mxu0  ;;  %v4537_v40 = vrot.slane %v4535_v19, 7  ;;  %v4310_v48 = vadd.f32 %v4309_v16, %v4221_v44  ;;  %v5043_v8 = vrot.slane %v5041_v55, 5  ;;  %v1907_v25 = vrot.slane %v1905_v38, 4 }
 0x244   : > { %v5038_v6 = vor.u32 %v5037_v51, %v5033_v50  ;;  %v5034_v16 = vsel %vm10190_vm4, %v5029_v18, %v5033_v50  ;;  %v3515_v28 = vsel %vm3332_vm11, %v3057_v57, %v3135_v62  ;;  %v1898_v56 = vor.u32 %v1897_v26, %v1894_v60  ;;  %v4834_v50 = vld [vmem:[#allocation3 + $0x30] sm:$0xf] }
 0x245   : > { %v4540_v4 = vor.u32 %v4538_v2, %v4537_v40  ;;  %v4542_v17 = vrot.slane %v4537_v40, 4  ;;  %v4380_v63 = vmax.f32 %v4310_v48, 0.0  ;;  %v6818_v46 = vunpack.c.l.b16 %v5034_v16  ;;  %v2561_v40 = vld [vmem:[#allocation2 + $0xb4] sm:$0xe]  ;;  %v9899_v2 = vld [vmem:[#allocation2 + $0xbc] sm:$0x1] }
 0x246   : > { %v11881_v32 = vpop.f32.mrf.mxu2  ;;  %v5039_v34 = vrot.slane %v5038_v6, 4  ;;  %v1899_v43 = vrot.slane %v1898_v56, 4  ;;  %v1903_v57 = vrot.slane %v1901_v59, 5  ;;  %v3961_v18 = vadd.f32 %v11628_v23, %v13954_v61 }
 0x247   : > { %v4541_v3 = vsel %vm10405_vm8, %v4533_v10, %v4540_v4  ;;  %v4832_v22 = vsel %vm10439_vm10, %v4542_v17, %v4831_v39  ;;  %v4466_v13 = vpack.c.bf16 %v4380_v63, %v4380_v63  ;;  %v4931_v0 = vld [vmem:[#allocation3 + $0x24] sm:$0xf]  ;;  %v11895_v10 = vpop.f32.mrf.mxu1  ;;  %v1913_v27 = vrot.slane %v1911_v21, 5  ;;  %v9900_v21 = vld [vmem:[#allocation2 + $0xb8] sm:$0xf] }
 0x248   : > { %4830 = vst.msk [vmem:[#allocation3 + $0x28] sm:$0xf] %vm332_vm0, %v4541_v3  ;;  %v4222_v36 = vpop.f32.mrf.mxu3  ;;  %v5044_v49 = vsel %vm10190_vm4, %v5039_v34, %v5043_v8  ;;  %v5046_v54 = vshrl.u32 %v4931_v0, 16  ;;  %v5049_v31 = vshll.u32 %v4931_v0, 16  ;;  %v1908_v51 = vor.u32 %v1907_v25, %v1903_v57  ;;  %v9742_v3 = vld [vmem:[%s13880_s3 + $0x20] sm:$0xff] }
 0x249   : > { %4833 = vst [vmem:[#allocation3 + $0x2c] sm:$0x1] %v4832_v22  ;;  %v4544_v38 = vshrl.u32 %v4466_v13, 16  ;;  %v4223_v35 = vadd.f32 %v4222_v36, %v4134_v29  ;;  %v6819_v45 = vunpack.c.l.b16 %v5044_v49  ;;  %v4547_v9 = vshll.u32 %v4466_v13, 16  ;;  %7957 = vmatpush.bf16.msrb.mxu1 %v9742_v3 }
 0x24a   : > { %v5048_v5 = vrot.slane %v5046_v54, 4  ;;  %v5051_v24 = vrot.slane %v5049_v31, 5  ;;  %v4048_v29 = vadd.f32 %v11834_v53, %v11769_v33  ;;  %v2708_v48 = vrot.slane %v9899_v2, 5 }
 0x24b   : > { %v4314_v47 = vpop.f32.mrf.mxu0  ;;  %v11897_v19 = vrot.slane %v4544_v38, 7  ;;  %v4312_v44 = vadd.f32 %v4311_v30, %v4223_v35  ;;  %v6848_v55 = vpack.c.b16 %v6819_v45, %v6818_v46  ;;  %4180 = vmatmul.bf16.gmra.mxu2 %v3515_v28  ;;  %v1904_v23 = vsel %vm10190_vm4, %v1899_v43, %v1903_v57  ;;  %v4838_v38 = vld [vmem:[#allocation3 + $0x38] sm:$0x1] }
 0x24c   : > { %v4050_v39 = vadd.f32 %v11875_v12, %v3961_v18  ;;  %v4137_v33 = vadd.f32 %v11860_v11, %v4048_v29  ;;  %v1909_v20 = vrot.slane %v1908_v51, 4  ;;  %v2705_v15 = vrot.slane %v9900_v21, 5 }
 0x24d   : > { %v4549_v60 = vor.u32 %v4547_v9, %v11897_v19  ;;  %v4381_v30 = vmax.f32 %v4312_v44, 0.0  ;;  %4264 = vmatmul.bf16.gmra.mxu3 %v3575_v37  ;;  %6866 = vrot.lane.b32.xlu1 %v6848_v55, %s10061_s21  ;;  %v5052_v4 = vor.u32 %v5051_v24, %v5048_v5  ;;  %v8842_v17 = vrot.slane %v2561_v40, 9  ;;  %v9651_v55 = vld [vmem:[#allocation2 + $0xb4] sm:$0xff] }
 0x24e   : > { %9193 = vmatmul.msk.bf16.gmra.mxu0 %vm3332_vm11, %v3328_v52  ;;  %v11912_v53 = vpop.f32.mrf.mxu2  ;;  %v1914_v11 = vsel %vm10190_vm4, %v1909_v20, %v1913_v27  ;;  %v3040_v52 = vunpack.c.l.b16 %v1904_v23  ;;  %v4550_v37 = vrot.slane %v11897_v19, 4  ;;  %v2707_v36 = vrot.slane %v2705_v15, 4  ;;  %v13955_v23 = vld [vmem:[#allocation15_spill] sm:$0xff] }
 0x24f   : > { %v4835_v6 = vsel %vm10420_vm9, %v4549_v60, %v4834_v50  ;;  %v4467_v8 = vpack.c.bf16 %v4381_v30, %v4381_v30  ;;  %v4932_v26 = vld [vmem:[#allocation3 + $0x28] sm:$0xf]  ;;  %v3041_v0 = vunpack.c.l.b16 %v1914_v11  ;;  %v2706_v56 = vsel %vm10953_vm14, %v8842_v17, %v2705_v15  ;;  %v11926_v5 = vpop.f32.mrf.mxu1 }
 0x250   : > { %4836 = vst [vmem:[#allocation3 + $0x30] sm:$0xf] %v4835_v6  ;;  %v4225_v63 = vpop.f32.mrf.mxu3  ;;  %v4960_v62 = vld [vmem:[#allocation3 + $0x2c] sm:$0x1]  ;;  %v5055_v12 = vshll.u32 %v4932_v26, 16  ;;  %v5059_v59 = vshrl.u32 %v4932_v26, 16  ;;  %v2709_v9 = vsel %vm10953_vm14, %v2707_v36, %v2708_v48  ;;  %v3310_v29 = vunpack.c.l.b16 %v2706_v56 }
 0x251   : > { %v4552_v16 = vshrl.u32 %v4467_v8, 16  ;;  %v4226_v34 = vadd.f32 %v4225_v63, %v4137_v33  ;;  %v5065_v25 = vshll.u32 %v4960_v62, 16  ;;  %v4555_v54 = vshll.u32 %v4467_v8, 16  ;;  %v11940_v30 = vld [vmem:[%s13879_s2] ss:$0 sm:$0xff] }
 0x252   : > { %v5057_v13 = vrot.slane %v5055_v12, 5  ;;  %v5061_v28 = vrot.slane %v5059_v59, 4  ;;  %v5053_v35 = vrot.slane %v5052_v4, 4  ;;  %v3058_v45 = vpack.c.b16 %v3041_v0, %v3040_v52  ;;  %v3279_v48 = vpop.permute.xlu0 %3278  ;;  %v9902_v12 = vld [vmem:[#allocation2 + $0xc4] sm:$0xf] }
 0x253   : > { %v4316_v22 = vpop.f32.mrf.mxu0  ;;  %v4554_v49 = vrot.slane %v4552_v16, 7  ;;  %v4315_v31 = vadd.f32 %v4314_v47, %v4226_v34  ;;  %v5067_v44 = vrot.slane %v5065_v25, 5  ;;  %v3311_v50 = vunpack.c.l.b16 %v2709_v9  ;;  %v2562_v34 = vld [vmem:[#allocation2 + $0xc0] sm:$0xe]  ;;  %v4841_v25 = vld [vmem:[#allocation3 + $0x3c] sm:$0xf] }
 0x254   : > { %v5062_v46 = vor.u32 %v5061_v28, %v5057_v13  ;;  %v5058_v47 = vsel %vm10190_vm4, %v5053_v35, %v5057_v13  ;;  %v3137_v18 = vpop.permute.xlu2 %3136  ;;  %v4139_v40 = vadd.f32 %v11881_v32, %v4050_v39  ;;  %v3964_v33 = vadd.f32 %v11940_v30, %v13955_v23 }
 0x255   : > { %v4557_v43 = vor.u32 %v4555_v54, %v4554_v49  ;;  %v4559_v57 = vrot.slane %v4554_v49, 4  ;;  %v4382_v19 = vmax.f32 %v4315_v31, 0.0  ;;  %v3519_v15 = vsel %vm3332_vm11, %v3058_v45, %v3137_v18  ;;  %v9903_v49 = vld [vmem:[#allocation2 + $0xc8] sm:$0x1]  ;;  %v13956_v18 = vld [vmem:[#allocation17_spill] sm:$0xff] }
 0x256   : > { %v5063_v24 = vrot.slane %v5062_v46, 4  ;;  %v11930_v61 = vpop.f32.mrf.mxu2  ;;  %v6820_v8 = vunpack.c.l.b16 %v5058_v47  ;;  %v3579_v4 = vsel %vm3332_vm11, %v9651_v55, %v3279_v48  ;;  %v3329_v63 = vpack.c.b16 %v3311_v50, %v3310_v29 }
 0x257   : > { %v4558_v51 = vsel %vm10405_vm8, %v4550_v37, %v4557_v43  ;;  %v4839_v27 = vsel %vm10439_vm10, %v4559_v57, %v4838_v38  ;;  %v4468_v2 = vpack.c.bf16 %v4382_v19, %v4382_v19  ;;  %v4933_v60 = vld [vmem:[#allocation3 + $0x30] sm:$0xf]  ;;  %v2712_v59 = vrot.slane %v9902_v12, 5  ;;  %v11954_v38 = vpop.f32.mrf.mxu1 }
 0x258   : > { %4837 = vst.msk [vmem:[#allocation3 + $0x34] sm:$0xf] %vm332_vm0, %v4558_v51  ;;  %v4227_v20 = vpop.f32.mrf.mxu3  ;;  %v5068_v21 = vsel %vm10190_vm4, %v5063_v24, %v5067_v44  ;;  %v5070_v32 = vshrl.u32 %v4933_v60, 16  ;;  %v5073_v62 = vshll.u32 %v4933_v60, 16  ;;  %v4053_v28 = vadd.f32 %v11895_v10, %v3964_v33  ;;  %v9741_v24 = vld [vmem:[%s13880_s3 + $0x18] sm:$0xff] }
 0x259   : > { %4840 = vst [vmem:[#allocation3 + $0x38] sm:$0x1] %v4839_v27  ;;  %v4561_v39 = vshrl.u32 %v4468_v2, 16  ;;  %v4228_v6 = vadd.f32 %v4227_v20, %v4139_v40  ;;  %v6821_v26 = vunpack.c.l.b16 %v5068_v21  ;;  %v4564_v52 = vshll.u32 %v4468_v2, 16  ;;  %7958 = vmatpush.bf16.msrb.mxu1 %v9741_v24  ;;  %v4845_v20 = vld [vmem:[#allocation3 + $0x44] sm:$0x1] }
 0x25a   : > { %v5072_v3 = vrot.slane %v5070_v32, 4  ;;  %v5075_v13 = vrot.slane %v5073_v62, 5  ;;  %v2715_v54 = vrot.slane %v9903_v49, 5  ;;  %v2714_v56 = vrot.slane %v2712_v59, 4 }
 0x25b   : > { %v4319_v17 = vpop.f32.mrf.mxu0  ;;  %v4563_v11 = vrot.slane %v4561_v39, 7  ;;  %v4317_v37 = vadd.f32 %v4316_v22, %v4228_v6  ;;  %v6849_v16 = vpack.c.b16 %v6821_v26, %v6820_v8  ;;  %4185 = vmatmul.bf16.gmra.mxu2 %v3519_v15  ;;  %v8843_v22 = vrot.slane %v2562_v34, 9 }
 0x25c   : > { %v4142_v10 = vadd.f32 %v11912_v53, %v4053_v28  ;;  %v5076_v43 = vor.u32 %v5075_v13, %v5072_v3  ;;  %v3966_v29 = vadd.f32 %v11940_v30, %v13956_v18  ;;  %v2716_v27 = vsel %vm10953_vm14, %v2714_v56, %v2715_v54  ;;  %v13957_v13 = vld [vmem:[#allocation19_spill] sm:$0xff] }
 0x25d   : > { %v4566_v0 = vor.u32 %v4564_v52, %v4563_v11  ;;  %v4383_v36 = vmax.f32 %v4317_v37, 0.0  ;;  %4269 = vmatmul.bf16.gmra.mxu3 %v3579_v4  ;;  %6868 = vrot.lane.b32.xlu2 %v6849_v16, %s10061_s21  ;;  %v2713_v53 = vsel %vm10953_vm14, %v8843_v22, %v2712_v59  ;;  %v4567_v33 = vrot.slane %v4563_v11, 4  ;;  %v9652_v4 = vld [vmem:[#allocation2 + $0xc0] sm:$0xff] }
 0x25e   : > { %9194 = vmatmul.msk.bf16.gmra.mxu0 %vm3332_vm11, %v3329_v63  ;;  %v11952_v31 = vpop.f32.mrf.mxu2  ;;  %v4055_v23 = vadd.f32 %v11926_v5, %v3966_v29  ;;  %v5077_v21 = vrot.slane %v5076_v43, 4  ;;  %v3313_v12 = vunpack.c.l.b16 %v2716_v27  ;;  %v3969_v28 = vadd.f32 %v11940_v30, %v13957_v13 }
 0x25f   : > { %v4842_v35 = vsel %vm10420_vm9, %v4566_v0, %v4841_v25  ;;  %v4469_v46 = vpack.c.bf16 %v4383_v36, %v4383_v36  ;;  %v4934_v45 = vld [vmem:[#allocation3 + $0x34] sm:$0xf]  ;;  %v4059_v0 = vpop.f32.mrf.mxu1 }
 0x260   : > { %4843 = vst [vmem:[#allocation3 + $0x3c] sm:$0xf] %v4842_v35  ;;  %v4230_v9 = vpop.f32.mrf.mxu3  ;;  %v5079_v57 = vshll.u32 %v4934_v45, 16  ;;  %v4961_v55 = vld [vmem:[#allocation3 + $0x38] sm:$0x1]  ;;  %v5083_v47 = vshrl.u32 %v4934_v45, 16  ;;  %v4144_v26 = vadd.f32 %v11930_v61, %v4055_v23 }
 0x261   : > { %v4569_v19 = vshrl.u32 %v4469_v46, 16  ;;  %v4231_v44 = vadd.f32 %v4230_v9, %v4142_v10  ;;  %v4572_v2 = vshll.u32 %v4469_v46, 16  ;;  %v5089_v15 = vshll.u32 %v4961_v55, 16 }
 0x262   : > { %v5081_v51 = vrot.slane %v5079_v57, 5  ;;  %v5085_v60 = vrot.slane %v5083_v47, 4  ;;  %v4848_v57 = vld [vmem:[#allocation3 + $0x48] sm:$0xf]  ;;  %v4058_v55 = vadd.f32 %v11954_v38, %v3969_v28 }
 0x263   : > { %v4321_v50 = vpop.f32.mrf.mxu0  ;;  %v4571_v40 = vrot.slane %v4569_v19, 7  ;;  %v4320_v48 = vadd.f32 %v4319_v17, %v4231_v44  ;;  %v3312_v17 = vunpack.c.l.b16 %v2713_v53  ;;  %v5091_v34 = vrot.slane %v5089_v15, 5 }
 0x264   : > { %v5086_v8 = vor.u32 %v5085_v60, %v5081_v51  ;;  %v5082_v63 = vsel %vm10190_vm4, %v5077_v21, %v5081_v51  ;;  %v4147_v53 = vadd.f32 %v11952_v31, %v4058_v55  ;;  %v13958_v21 = vld [vmem:[#allocation22_spill] sm:$0xff] }
 0x265   : > { %v4574_v32 = vor.u32 %v4572_v2, %v4571_v40  ;;  %v4576_v39 = vrot.slane %v4571_v40, 4  ;;  %v4384_v6 = vmax.f32 %v4320_v48, 0.0  ;;  %v3281_v16 = vpop.permute.xlu0 %3280  ;;  %v6822_v56 = vunpack.c.l.b16 %v5082_v63 }
 0x266   : > { %v11972_v62 = vpop.f32.mrf.mxu2  ;;  %v5087_v52 = vrot.slane %v5086_v8, 4  ;;  %v3583_v54 = vsel %vm3332_vm11, %v9652_v4, %v3281_v16  ;;  %v3330_v10 = vpack.c.b16 %v3313_v12, %v3312_v17  ;;  %v3971_v15 = vadd.f32 %v11940_v30, %v13958_v21  ;;  %v4852_v12 = vld [vmem:[#allocation3 + $0x50] sm:$0x1] }
 0x267   : > { %v4575_v5 = vsel %vm10405_vm8, %v4567_v33, %v4574_v32  ;;  %v4846_v59 = vsel %vm10439_vm10, %v4576_v39, %v4845_v20  ;;  %v4470_v11 = vpack.c.bf16 %v4384_v6, %v4384_v6  ;;  %v4935_v37 = vld [vmem:[#allocation3 + $0x3c] sm:$0xf]  ;;  %v4062_v8 = vpop.f32.mrf.mxu1 }
 0x268   : > { %4844 = vst.msk [vmem:[#allocation3 + $0x40] sm:$0xf] %vm332_vm0, %v4575_v5  ;;  %v4232_v61 = vpop.f32.mrf.mxu3  ;;  %v5094_v25 = vshrl.u32 %v4935_v37, 16  ;;  %v5097_v3 = vshll.u32 %v4935_v37, 16  ;;  %v5092_v22 = vsel %vm10190_vm4, %v5087_v52, %v5091_v34  ;;  %v9740_v20 = vld [vmem:[%s13880_s3 + $0x10] sm:$0xff]  ;;  %v4060_v17 = vadd.f32 %v4059_v0, %v3971_v15 }
 0x269   : > { %4847 = vst [vmem:[#allocation3 + $0x44] sm:$0x1] %v4846_v59  ;;  %v4578_v36 = vshrl.u32 %v4470_v11, 16  ;;  %v4233_v49 = vadd.f32 %v4232_v61, %v4144_v26  ;;  %v4581_v45 = vshll.u32 %v4470_v11, 16  ;;  %v6823_v43 = vunpack.c.l.b16 %v5092_v22  ;;  %7959 = vmatpush.bf16.msrb.mxu1 %v9740_v20  ;;  %v9738_v20 = vld [vmem:[%s13880_s3] sm:$0xff] }
 0x26a   : > { %v5096_v19 = vrot.slane %v5094_v25, 4  ;;  %v5099_v44 = vrot.slane %v5097_v3, 5  ;;  %v4149_v0 = vadd.f32 %v11972_v62, %v4060_v17 }
 0x26b   : > { %v4324_v35 = vpop.f32.mrf.mxu0  ;;  %v4580_v46 = vrot.slane %v4578_v36, 7  ;;  %v4322_v9 = vadd.f32 %v4321_v50, %v4233_v49  ;;  %v6850_v18 = vpack.c.b16 %v6823_v43, %v6822_v56  ;;  %v13959_v43 = vld [vmem:[#allocation24_spill] sm:$0xff] }
 0x26c   : > { %v5100_v2 = vor.u32 %v5099_v44, %v5096_v19 }
 0x26d   : > { %v4583_v47 = vor.u32 %v4581_v45, %v4580_v46  ;;  %v4385_v24 = vmax.f32 %v4322_v9, 0.0  ;;  %4274 = vmatmul.bf16.gmra.mxu3 %v3583_v54  ;;  %6870 = vrot.lane.b32.xlu0 %v6850_v18, %s10061_s21  ;;  %v4584_v11 = vrot.slane %v4580_v46, 4  ;;  %v4855_v18 = vld [vmem:[#allocation3 + $0x54] sm:$0xf] }
 0x26e   : > { %9195 = vmatmul.msk.bf16.gmra.mxu0 %vm3332_vm11, %v3330_v10  ;;  %v11986_v29 = vpop.f32.mrf.mxu2  ;;  %v5101_v5 = vrot.slane %v5100_v2, 4 }
 0x26f   : > { %v4849_v51 = vsel %vm10420_vm9, %v4583_v47, %v4848_v57  ;;  %v4471_v50 = vpack.c.bf16 %v4385_v24, %v4385_v24  ;;  %v4936_v27 = vld [vmem:[#allocation3 + $0x40] sm:$0xf]  ;;  %v3974_v57 = vadd.f32 %v11940_v30, %v13959_v43  ;;  %v9739_v24 = vld [vmem:[%s13880_s3 + $0x8] sm:$0xff] }
 0x270   : > { %4850 = vst [vmem:[#allocation3 + $0x48] sm:$0xf] %v4849_v51  ;;  %v4235_v40 = vpop.f32.mrf.mxu3  ;;  %v4962_v38 = vld [vmem:[#allocation3 + $0x44] sm:$0x1]  ;;  %v5103_v48 = vshll.u32 %v4936_v27, 16  ;;  %v5107_v60 = vshrl.u32 %v4936_v27, 16  ;;  %v4064_v27 = vpop.f32.mrf.mxu1  ;;  %7960 = vmatpush.bf16.msrb.mxu1 %v9739_v24 }
 0x271   : > { %v4586_v23 = vshrl.u32 %v4471_v50, 16  ;;  %v4236_v33 = vadd.f32 %v4235_v40, %v4147_v53  ;;  %v5113_v6 = vshll.u32 %v4962_v38, 16  ;;  %v4589_v4 = vshll.u32 %v4471_v50, 16 }
 0x272   : > { %v5105_v32 = vrot.slane %v5103_v48, 5  ;;  %v5109_v39 = vrot.slane %v5107_v60, 4  ;;  %v4063_v50 = vadd.f32 %v4062_v8, %v3974_v57 }
 0x273   : > { %v4326_v31 = vpop.f32.mrf.mxu0  ;;  %v4588_v26 = vrot.slane %v4586_v23, 7  ;;  %v4325_v63 = vadd.f32 %v4324_v35, %v4236_v33  ;;  %v5115_v25 = vrot.slane %v5113_v6, 5 }
 0x274   : > { %v5110_v59 = vor.u32 %v5109_v39, %v5105_v32  ;;  %v5106_v16 = vsel %vm10190_vm4, %v5101_v5, %v5105_v32  ;;  %v4152_v60 = vadd.f32 %v11986_v29, %v4063_v50  ;;  %7961 = vmatpush.bf16.msrb.mxu1 %v9738_v20 }
 0x275   : > { %v4591_v52 = vor.u32 %v4589_v4, %v4588_v26  ;;  %v4593_v37 = vrot.slane %v4588_v26, 4  ;;  %v4386_v61 = vmax.f32 %v4325_v63, 0.0  ;;  %v6824_v45 = vunpack.c.l.b16 %v5106_v16  ;;  %v13960_v26 = vld [vmem:[#allocation28_spill] sm:$0xff] }
 0x276   : > { %v5111_v34 = vrot.slane %v5110_v59, 4  ;;  %v11999_v3 = vpop.f32.mrf.mxu2  ;;  %v3976_v4 = vadd.f32 %v11940_v30, %v13960_v26 }
 0x277   : > { %v4592_v13 = vsel %vm10405_vm8, %v4584_v11, %v4591_v52  ;;  %v4853_v28 = vsel %vm10439_vm10, %v4593_v37, %v4852_v12  ;;  %v4472_v36 = vpack.c.bf16 %v4386_v61, %v4386_v61  ;;  %v4937_v49 = vld [vmem:[#allocation3 + $0x48] sm:$0xf]  ;;  %v4859_v37 = vld [vmem:[#allocation3 + $0x5c] sm:$0x1] }
 0x278   : > { %4851 = vst.msk [vmem:[#allocation3 + $0x4c] sm:$0xf] %vm332_vm0, %v4592_v13  ;;  %v4237_v54 = vpop.f32.mrf.mxu3  ;;  %v5116_v22 = vsel %vm10190_vm4, %v5111_v34, %v5115_v25  ;;  %v5118_v56 = vshrl.u32 %v4937_v49, 16  ;;  %v5121_v35 = vshll.u32 %v4937_v49, 16  ;;  %v4065_v52 = vadd.f32 %v4064_v27, %v3976_v4  ;;  %v9690_v34 = vld [vmem:[#allocation3] sm:$0xff] }
 0x279   : > { %4854 = vst [vmem:[#allocation3 + $0x50] sm:$0x1] %v4853_v28  ;;  %v4595_v10 = vshrl.u32 %v4472_v36, 16  ;;  %v4238_v46 = vadd.f32 %v4237_v54, %v4149_v0  ;;  %v6825_v9 = vunpack.c.l.b16 %v5116_v22  ;;  %v4598_v44 = vshll.u32 %v4472_v36, 16 }
 0x27a   : > { %v5120_v51 = vrot.slane %v5118_v56, 4  ;;  %v5123_v53 = vrot.slane %v5121_v35, 5  ;;  %v4067_v35 = vpop.f32.mrf.mxu1 }
 0x27b   : > { %v4329_v19 = vpop.f32.mrf.mxu0  ;;  %v4597_v62 = vrot.slane %v4595_v10, 7  ;;  %v4327_v55 = vadd.f32 %v4326_v31, %v4238_v46  ;;  %v6851_v47 = vpack.c.b16 %v6825_v9, %v6824_v45  ;;  %v4154_v45 = vadd.f32 %v11999_v3, %v4065_v52  ;;  %v13961_v3 = vld [vmem:[#allocation30_spill] sm:$0xff] }
 0x27c   : > { %v5124_v31 = vor.u32 %v5123_v53, %v5120_v51  ;;  %v12038_v53 = vld [vmem:[#allocation3 + $0x1c] sm:$0xf]  ;;  %v3979_v50 = vadd.f32 %v11940_v30, %v13961_v3 }
 0x27d   : > { %v4600_v40 = vor.u32 %v4598_v44, %v4597_v62  ;;  %v4387_v38 = vmax.f32 %v4327_v55, 0.0  ;;  %6872 = vrot.lane.b32.xlu1 %v6851_v47, %s10061_s21  ;;  %v4601_v25 = vrot.slane %v4597_v62, 4 }
 0x27e   : > { %v12015_v2 = vpop.f32.mrf.mxu2  ;;  %v5125_v61 = vrot.slane %v5124_v31, 4  ;;  %v4068_v31 = vadd.f32 %v4067_v35, %v3979_v50 }
 0x27f   : > { %v4856_v48 = vsel %vm10420_vm9, %v4600_v40, %v4855_v18  ;;  %v4473_v23 = vpack.c.bf16 %v4387_v38, %v4387_v38  ;;  %v4938_v33 = vld [vmem:[#allocation3 + $0x4c] sm:$0xf] }
 0x280   : > { %4857 = vst [vmem:[#allocation3 + $0x54] sm:$0xf] %v4856_v48  ;;  %v4240_v21 = vpop.f32.mrf.mxu3  ;;  %v4963_v15 = vld [vmem:[#allocation3 + $0x50] sm:$0x1]  ;;  %v5127_v32 = vshll.u32 %v4938_v33, 16  ;;  %v5131_v39 = vshrl.u32 %v4938_v33, 16 }
 0x281   : > { %v4603_v6 = vshrl.u32 %v4473_v23, 16  ;;  %v4241_v8 = vadd.f32 %v4240_v21, %v4152_v60  ;;  %v5137_v12 = vshll.u32 %v4963_v15, 16  ;;  %v4606_v59 = vshll.u32 %v4473_v23, 16  ;;  %v6174_v23 = vld [vmem:[#allocation3 + $0x20] sm:$0x1] }
 0x282   : > { %v5129_v29 = vrot.slane %v5127_v32, 5  ;;  %v5133_v17 = vrot.slane %v5131_v39, 4  ;;  %v4862_v33 = vld [vmem:[#allocation3 + $0x60] sm:$0xf]  ;;  %v6640_v15 = vrot.slane %v12038_v53, 5  ;;  %v6643_v26 = vrot.slane %v6174_v23, 5 }
 0x283   : > { %v4331_v63 = vpop.f32.mrf.mxu0  ;;  %v4605_v5 = vrot.slane %v4603_v6, 7  ;;  %v4330_v11 = vadd.f32 %v4329_v19, %v4241_v8  ;;  %v5139_v54 = vrot.slane %v5137_v12, 5 }
 0x284   : > { %v5134_v16 = vor.u32 %v5133_v17, %v5129_v29  ;;  %v5130_v36 = vsel %vm10190_vm4, %v5125_v61, %v5129_v29  ;;  %v6863_v56 = vpop.permute.xlu1 %6862  ;;  %v6642_v8 = vrot.slane %v6640_v15, 4  ;;  %v4069_v61 = vpop.f32.mrf.mxu1 }
 0x285   : > { %v4608_v13 = vor.u32 %v4606_v59, %v4605_v5  ;;  %v4610_v28 = vrot.slane %v4605_v5, 4  ;;  %v4388_v0 = vmax.f32 %v4330_v11, 0.0  ;;  %v7360_v55 = vsel %vm3332_vm11, %v9690_v34, %v6863_v56 }
 0x286   : > { %v5135_v49 = vrot.slane %v5134_v16, 4  ;;  %v12027_v22 = vpop.f32.mrf.mxu2  ;;  %v6826_v18 = vunpack.c.l.b16 %v5130_v36  ;;  %7962 = vmatmul.bf16.vlgmr.msrb.gmra.mxu1 %v7360_v55 }
 0x287   : > { %v4609_v10 = vsel %vm10405_vm8, %v4601_v25, %v4608_v13  ;;  %v4860_v46 = vsel %vm10439_vm10, %v4610_v28, %v4859_v37  ;;  %v4474_v9 = vpack.c.bf16 %v4388_v0, %v4388_v0  ;;  %v4939_v43 = vld [vmem:[#allocation3 + $0x54] sm:$0xf]  ;;  %v12053_v37 = vsel %vm10953_vm14, %v6642_v8, %v6643_v26  ;;  %v13962_v25 = vld [vmem:[#allocation32_spill] sm:$0xff] }
 0x288   : > { %4858 = vst.msk [vmem:[#allocation3 + $0x58] sm:$0xf] %vm332_vm0, %v4609_v10  ;;  %v4242_v57 = vpop.f32.mrf.mxu3  ;;  %v5140_v19 = vsel %vm10190_vm4, %v5135_v49, %v5139_v54  ;;  %v5142_v62 = vshrl.u32 %v4939_v43, 16  ;;  %v5145_v44 = vshll.u32 %v4939_v43, 16  ;;  %v3981_v13 = vadd.f32 %v11940_v30, %v13962_v25  ;;  %v4866_v10 = vld [vmem:[#allocation3 + $0x68] sm:$0x1] }
 0x289   : > { %4861 = vst [vmem:[#allocation3 + $0x5c] sm:$0x1] %v4860_v46  ;;  %v4612_v47 = vshrl.u32 %v4474_v9, 16  ;;  %v4243_v24 = vadd.f32 %v4242_v57, %v4154_v45  ;;  %v6827_v51 = vunpack.c.l.b16 %v5140_v19  ;;  %v4615_v38 = vshll.u32 %v4474_v9, 16 }
 0x28a   : > { %v5144_v20 = vrot.slane %v5142_v62, 4  ;;  %v5147_v21 = vrot.slane %v5145_v44, 5  ;;  %v4070_v35 = vadd.f32 %v4069_v61, %v3981_v13 }
 0x28b   : > { %v4334_v27 = vpop.f32.mrf.mxu0  ;;  %v4614_v40 = vrot.slane %v4612_v47, 7  ;;  %v4332_v48 = vadd.f32 %v4331_v63, %v4243_v24  ;;  %v6852_v60 = vpack.c.b16 %v6827_v51, %v6826_v18  ;;  %v4157_v63 = vadd.f32 %v12015_v2, %v4068_v31 }
 0x28c   : > { %v5148_v59 = vor.u32 %v5147_v21, %v5144_v20  ;;  %v4159_v18 = vadd.f32 %v12027_v22, %v4070_v35 }
 0x28d   : > { %v4617_v32 = vor.u32 %v4615_v38, %v4614_v40  ;;  %v4389_v39 = vmax.f32 %v4332_v48, 0.0  ;;  %6874 = vrot.lane.b32.xlu2 %v6852_v60, %s10061_s21  ;;  %v4618_v9 = vrot.slane %v4614_v40, 4 }
 0x28e   : > { %v12044_v6 = vpop.f32.mrf.mxu2  ;;  %v5149_v46 = vrot.slane %v5148_v59, 4 }
 0x28f   : > { %v4863_v4 = vsel %vm10420_vm9, %v4617_v32, %v4862_v33  ;;  %v4475_v29 = vpack.c.bf16 %v4389_v39, %v4389_v39  ;;  %v4940_v17 = vld [vmem:[#allocation3 + $0x58] sm:$0xf]  ;;  %v4869_v39 = vld [vmem:[#allocation3 + $0x6c] sm:$0xf] }
 0x290   : > { %4864 = vst [vmem:[#allocation3 + $0x60] sm:$0xf] %v4863_v4  ;;  %v4245_v12 = vpop.f32.mrf.mxu3  ;;  %v4964_v5 = vld [vmem:[#allocation3 + $0x5c] sm:$0x1]  ;;  %v5151_v11 = vshll.u32 %v4940_v17, 16  ;;  %v5155_v52 = vshrl.u32 %v4940_v17, 16 }
 0x291   : > { %v4620_v16 = vshrl.u32 %v4475_v29, 16  ;;  %v4246_v34 = vadd.f32 %v4245_v12, %v4157_v63  ;;  %v5161_v36 = vshll.u32 %v4964_v5, 16  ;;  %v4623_v54 = vshll.u32 %v4475_v29, 16  ;;  %v13963_v12 = vld [vmem:[#allocation8_spill] sm:$0xff] }
 0x292   : > { %v5153_v2 = vrot.slane %v5151_v11, 5  ;;  %v5157_v0 = vrot.slane %v5155_v52, 4  ;;  %v4162_v5 = vadd.f32 %v12044_v6, %v13963_v12 }
 0x293   : > { %v4336_v28 = vpop.f32.mrf.mxu0  ;;  %v4622_v49 = vrot.slane %v4620_v16, 7  ;;  %v4335_v56 = vadd.f32 %v4334_v27, %v4246_v34  ;;  %v5163_v30 = vrot.slane %v5161_v36, 5 }
 0x294   : > { %v5158_v45 = vor.u32 %v5157_v0, %v5153_v2  ;;  %v5154_v62 = vsel %vm10190_vm4, %v5149_v46, %v5153_v2  ;;  %v9753_v2 = vld [vmem:[%s13880_s3 + $0x78] sm:$0xff]  ;;  %v4873_v46 = vld [vmem:[#allocation3 + $0x74] sm:$0x1] }
 0x295   : > { %v4625_v43 = vor.u32 %v4623_v54, %v4622_v49  ;;  %v4627_v57 = vrot.slane %v4622_v49, 4  ;;  %v4390_v19 = vmax.f32 %v4335_v56, 0.0  ;;  %v6828_v23 = vunpack.c.l.b16 %v5154_v62  ;;  %v9761_v0 = vld [vmem:[%s13880_s3 + $0xb8] sm:$0xff]  ;;  %8043 = vmatpush.bf16.msra.mxu2 %v9753_v2 }
 0x296   : > { %v5159_v44 = vrot.slane %v5158_v45, 4  ;;  %v12059_v55 = vpop.f32.mrf.mxu2  ;;  %8132 = vmatpush.bf16.msra.mxu3 %v9761_v0 }
 0x297   : > { %v4626_v47 = vsel %vm10405_vm8, %v4618_v9, %v4625_v43  ;;  %v4867_v24 = vsel %vm10439_vm10, %v4627_v57, %v4866_v10  ;;  %v4476_v51 = vpack.c.bf16 %v4390_v19, %v4390_v19  ;;  %v4941_v3 = vld [vmem:[#allocation3 + $0x60] sm:$0xf] }
 0x298   : > { %4865 = vst.msk [vmem:[#allocation3 + $0x64] sm:$0xf] %vm332_vm0, %v4626_v47  ;;  %v4247_v50 = vpop.f32.mrf.mxu3  ;;  %v5164_v27 = vsel %vm10190_vm4, %v5159_v44, %v5163_v30  ;;  %v5166_v40 = vshrl.u32 %v4941_v3, 16  ;;  %v5169_v38 = vshll.u32 %v4941_v3, 16  ;;  %v13964_v3 = vld [vmem:[#allocation9_spill] sm:$0xff] }
 0x299   : > { %4868 = vst [vmem:[#allocation3 + $0x68] sm:$0x1] %v4867_v24  ;;  %v4629_v48 = vshrl.u32 %v4476_v51, 16  ;;  %v4248_v60 = vadd.f32 %v4247_v50, %v4159_v18  ;;  %v6829_v33 = vunpack.c.l.b16 %v5164_v27  ;;  %v4632_v31 = vshll.u32 %v4476_v51, 16 }
 0x29a   : > { %v5168_v8 = vrot.slane %v5166_v40, 4  ;;  %v5171_v26 = vrot.slane %v5169_v38, 5  ;;  %v4164_v50 = vadd.f32 %v12059_v55, %v13964_v3  ;;  %v9773_v55 = vld [vmem:[%s13880_s3 + $0x118] sm:$0xff] }
 0x29b   : > { %v4339_v20 = vpop.f32.mrf.mxu0  ;;  %v4631_v21 = vrot.slane %v4629_v48, 7  ;;  %v4337_v32 = vadd.f32 %v4336_v28, %v4248_v60  ;;  %v6853_v22 = vpack.c.b16 %v6829_v33, %v6828_v23  ;;  %8314 = vmatpush.bf16.msra.mxu1 %v9773_v55 }
 0x29c   : > { %v5172_v16 = vor.u32 %v5171_v26, %v5168_v8 }
 0x29d   : > { %v4634_v4 = vor.u32 %v4632_v31, %v4631_v21  ;;  %v4391_v63 = vmax.f32 %v4337_v32, 0.0  ;;  %6876 = vrot.lane.b32.xlu0 %v6853_v22, %s10061_s21  ;;  %v4635_v43 = vrot.slane %v4631_v21, 4  ;;  %v9769_v32 = vld [vmem:[%s13880_s3 + $0xf8] sm:$0xff] }
 0x29e   : > { %v12070_v29 = vpop.f32.mrf.mxu2  ;;  %v5173_v45 = vrot.slane %v5172_v16, 4  ;;  %8221 = vmatpush.bf16.msra.mxu0 %v9769_v32  ;;  %v13965_v16 = vld [vmem:[#allocation10_spill] sm:$0xff] }
 0x29f   : > { %v4870_v17 = vsel %vm10420_vm9, %v4634_v4, %v4869_v39  ;;  %v4477_v59 = vpack.c.bf16 %v4391_v63, %v4391_v63  ;;  %v4942_v11 = vld [vmem:[#allocation3 + $0x64] sm:$0xf]  ;;  %v4876_v63 = vld [vmem:[#allocation3 + $0x78] sm:$0xf] }
 0x2a0   : > { %4871 = vst [vmem:[#allocation3 + $0x6c] sm:$0xf] %v4870_v17  ;;  %v4250_v52 = vpop.f32.mrf.mxu3  ;;  %v4965_v61 = vld [vmem:[#allocation3 + $0x68] sm:$0x1]  ;;  %v5175_v34 = vshll.u32 %v4942_v11, 16  ;;  %v5179_v25 = vshrl.u32 %v4942_v11, 16 }
 0x2a1   : > { %v4637_v13 = vshrl.u32 %v4477_v59, 16  ;;  %v4251_v28 = vadd.f32 %v4250_v52, %v4162_v5  ;;  %v5185_v54 = vshll.u32 %v4965_v61, 16  ;;  %v4640_v35 = vshll.u32 %v4477_v59, 16  ;;  %v9691_v11 = vld [vmem:[#allocation3 + $0xc] sm:$0xff] }
 0x2a2   : > { %v5177_v6 = vrot.slane %v5175_v34, 5  ;;  %v5181_v49 = vrot.slane %v5179_v25, 4  ;;  %v4167_v34 = vadd.f32 %v12070_v29, %v13965_v16 }
 0x2a3   : > { %v4341_v36 = vpop.f32.mrf.mxu0  ;;  %v4639_v56 = vrot.slane %v4637_v13, 7  ;;  %v4340_v10 = vadd.f32 %v4339_v20, %v4251_v28  ;;  %v5187_v47 = vrot.slane %v5185_v54, 5 }
 0x2a4   : > { %v5182_v9 = vor.u32 %v5181_v49, %v5177_v6  ;;  %v5178_v44 = vsel %vm10190_vm4, %v5173_v45, %v5177_v6 }
 0x2a5   : > { %v4642_v57 = vor.u32 %v4640_v35, %v4639_v56  ;;  %v4644_v19 = vrot.slane %v4639_v56, 4  ;;  %v4392_v62 = vmax.f32 %v4340_v10, 0.0  ;;  %v6830_v21 = vunpack.c.l.b16 %v5178_v44 }
 0x2a6   : > { %v5183_v30 = vrot.slane %v5182_v9, 4  ;;  %v12084_v24 = vpop.f32.mrf.mxu2 }
 0x2a7   : > { %v4643_v18 = vsel %vm10405_vm8, %v4635_v43, %v4642_v57  ;;  %v4874_v51 = vsel %vm10439_vm10, %v4644_v19, %v4873_v46  ;;  %v4478_v27 = vpack.c.bf16 %v4392_v62, %v4392_v62  ;;  %v4943_v40 = vld [vmem:[#allocation3 + $0x6c] sm:$0xf]  ;;  %v4880_v19 = vld [vmem:[#allocation3 + $0x80] sm:$0x1] }
 0x2a8   : > { %4872 = vst.msk [vmem:[#allocation3 + $0x70] sm:$0xf] %vm332_vm0, %v4643_v18  ;;  %v4252_v38 = vpop.f32.mrf.mxu3  ;;  %v5188_v48 = vsel %vm10190_vm4, %v5183_v30, %v5187_v47  ;;  %v5190_v60 = vshrl.u32 %v4943_v40, 16  ;;  %v5193_v23 = vshll.u32 %v4943_v40, 16 }
 0x2a9   : > { %4875 = vst [vmem:[#allocation3 + $0x74] sm:$0x1] %v4874_v51  ;;  %v4646_v33 = vshrl.u32 %v4478_v27, 16  ;;  %v4253_v20 = vadd.f32 %v4252_v38, %v4164_v50  ;;  %v6831_v31 = vunpack.c.l.b16 %v5188_v48  ;;  %v4649_v8 = vshll.u32 %v4478_v27, 16  ;;  %v13966_v48 = vld [vmem:[#allocation11_spill] sm:$0xff] }
 0x2aa   : > { %v5192_v17 = vrot.slane %v5190_v60, 4  ;;  %v5195_v12 = vrot.slane %v5193_v23, 5  ;;  %v4169_v60 = vadd.f32 %v12084_v24, %v13966_v48 }
 0x2ab   : > { %v4344_v22 = vpop.f32.mrf.mxu0  ;;  %v4648_v39 = vrot.slane %v4646_v33, 7  ;;  %v4342_v26 = vadd.f32 %v4341_v36, %v4253_v20  ;;  %v6854_v4 = vpack.c.b16 %v6831_v31, %v6830_v21 }
 0x2ac   : > { %v5196_v6 = vor.u32 %v5195_v12, %v5192_v17 }
 0x2ad   : > { %v4651_v5 = vor.u32 %v4649_v8, %v4648_v39  ;;  %v4393_v59 = vmax.f32 %v4342_v26, 0.0  ;;  %6878 = vrot.lane.b32.xlu1 %v6854_v4, %s10061_s21  ;;  %v4652_v30 = vrot.slane %v4648_v39, 4 }
 0x2ae   : > { %v12102_v52 = vpop.f32.mrf.mxu2  ;;  %v5197_v62 = vrot.slane %v5196_v6, 4 }
 0x2af   : > { %v4877_v61 = vsel %vm10420_vm9, %v4651_v5, %v4876_v63  ;;  %v4479_v25 = vpack.c.bf16 %v4393_v59, %v4393_v59  ;;  %v6865_v13 = vpop.permute.xlu1 %6864  ;;  %v4944_v28 = vld [vmem:[#allocation3 + $0x70] sm:$0xf]  ;;  %v4883_v5 = vld [vmem:[#allocation3 + $0x84] sm:$0xf] }
 0x2b0   : > { %4878 = vst [vmem:[#allocation3 + $0x78] sm:$0xf] %v4877_v61  ;;  %v4255_v2 = vpop.f32.mrf.mxu3  ;;  %v7364_v0 = vsel %vm3332_vm11, %v9691_v11, %v6865_v13  ;;  %v4966_v36 = vld [vmem:[#allocation3 + $0x74] sm:$0x1]  ;;  %v5199_v49 = vshll.u32 %v4944_v28, 16  ;;  %v5203_v54 = vshrl.u32 %v4944_v28, 16 }
 0x2b1   : > { %v4654_v56 = vshrl.u32 %v4479_v25, 16  ;;  %v4256_v35 = vadd.f32 %v4255_v2, %v4167_v34  ;;  %7967 = vmatmul.bf16.gmra.mxu1 %v7364_v0  ;;  %v5209_v9 = vshll.u32 %v4966_v36, 16  ;;  %v4657_v29 = vshll.u32 %v4479_v25, 16  ;;  %v9692_v34 = vld [vmem:[#allocation3 + $0x18] sm:$0xff]  ;;  %v13967_v13 = vld [vmem:[#allocation12_spill] sm:$0xff] }
 0x2b2   : > { %v5201_v46 = vrot.slane %v5199_v49, 5  ;;  %v5205_v45 = vrot.slane %v5203_v54, 4  ;;  %v4172_v28 = vadd.f32 %v12102_v52, %v13967_v13  ;;  %v9760_v52 = vld [vmem:[%s13880_s3 + $0xb0] sm:$0xff] }
 0x2b3   : > { %v4346_v10 = vpop.f32.mrf.mxu0  ;;  %v4656_v43 = vrot.slane %v4654_v56, 7  ;;  %v4345_v57 = vadd.f32 %v4344_v22, %v4256_v35  ;;  %v5211_v27 = vrot.slane %v5209_v9, 5  ;;  %v9752_v9 = vld [vmem:[%s13880_s3 + $0x70] sm:$0xff]  ;;  %8133 = vmatpush.bf16.msra.mxu3 %v9760_v52 }
 0x2b4   : > { %v5206_v44 = vor.u32 %v5205_v45, %v5201_v46  ;;  %v5202_v3 = vsel %vm10190_vm4, %v5197_v62, %v5201_v46  ;;  %8044 = vmatpush.bf16.msra.mxu2 %v9752_v9 }
 0x2b5   : > { %v4659_v47 = vor.u32 %v4657_v29, %v4656_v43  ;;  %v4661_v18 = vrot.slane %v4656_v43, 4  ;;  %v4394_v51 = vmax.f32 %v4345_v57, 0.0  ;;  %v6832_v8 = vunpack.c.l.b16 %v5202_v3 }
 0x2b6   : > { %v5207_v50 = vrot.slane %v5206_v44, 4  ;;  %v4173_v31 = vpop.f32.mrf.mxu2 }
 0x2b7   : > { %v4660_v40 = vsel %vm10405_vm8, %v4652_v30, %v4659_v47  ;;  %v4881_v38 = vsel %vm10439_vm10, %v4661_v18, %v4880_v19  ;;  %v4480_v23 = vpack.c.bf16 %v4394_v51, %v4394_v51  ;;  %v4945_v33 = vld [vmem:[#allocation3 + $0x78] sm:$0xf]  ;;  %v4887_v18 = vld [vmem:[#allocation3 + $0x8c] sm:$0x1] }
 0x2b8   : > { %4879 = vst.msk [vmem:[#allocation3 + $0x7c] sm:$0xf] %vm332_vm0, %v4660_v40  ;;  %v4257_v20 = vpop.f32.mrf.mxu3  ;;  %v5212_v21 = vsel %vm10190_vm4, %v5207_v50, %v5211_v27  ;;  %v5214_v32 = vshrl.u32 %v4945_v33, 16  ;;  %v5217_v55 = vshll.u32 %v4945_v33, 16 }
 0x2b9   : > { %4882 = vst [vmem:[#allocation3 + $0x80] sm:$0x1] %v4881_v38  ;;  %v4663_v22 = vshrl.u32 %v4480_v23, 16  ;;  %v4258_v39 = vadd.f32 %v4257_v20, %v4169_v60  ;;  %v6833_v26 = vunpack.c.l.b16 %v5212_v21  ;;  %v4666_v63 = vshll.u32 %v4480_v23, 16  ;;  %v13968_v21 = vld [vmem:[#allocation13_spill] sm:$0xff] }
 0x2ba   : > { %v5216_v59 = vrot.slane %v5214_v32, 4  ;;  %v5219_v11 = vrot.slane %v5217_v55, 5  ;;  %v4174_v32 = vadd.f32 %v4173_v31, %v13968_v21 }
 0x2bb   : > { %v4665_v4 = vrot.slane %v4663_v22, 7  ;;  %v4347_v17 = vadd.f32 %v4346_v10, %v4258_v39  ;;  %v6855_v24 = vpack.c.b16 %v6833_v26, %v6832_v8  ;;  %v4349_v12 = vpop.f32.mrf.mxu0 }
 0x2bc   : > { %v5220_v56 = vor.u32 %v5219_v11, %v5216_v59 }
 0x2bd   : > { %v4668_v61 = vor.u32 %v4666_v63, %v4665_v4  ;;  %v4395_v16 = vmax.f32 %v4347_v17, 0.0  ;;  %6880 = vrot.lane.b32.xlu2 %v6855_v24, %s10061_s21  ;;  %v4669_v50 = vrot.slane %v4665_v4, 4 }
 0x2be   : > { %v4176_v43 = vpop.f32.mrf.mxu2  ;;  %v5221_v51 = vrot.slane %v5220_v56, 4 }
 0x2bf   : > { %v4884_v25 = vsel %vm10420_vm9, %v4668_v61, %v4883_v5  ;;  %v4481_v2 = vpack.c.bf16 %v4395_v16, %v4395_v16  ;;  %v6867_v0 = vpop.permute.xlu1 %6866  ;;  %v4946_v36 = vld [vmem:[#allocation3 + $0x7c] sm:$0xf] }
 0x2c0   : > { %4885 = vst [vmem:[#allocation3 + $0x84] sm:$0xf] %v4884_v25  ;;  %v4260_v6 = vpop.f32.mrf.mxu3  ;;  %v7368_v49 = vsel %vm3332_vm11, %v9692_v34, %v6867_v0  ;;  %v4967_v54 = vld [vmem:[#allocation3 + $0x80] sm:$0x1]  ;;  %v5223_v35 = vshll.u32 %v4946_v36, 16  ;;  %v5227_v10 = vshrl.u32 %v4946_v36, 16 }
 0x2c1   : > { %v4671_v46 = vshrl.u32 %v4481_v2, 16  ;;  %v4261_v45 = vadd.f32 %v4260_v6, %v4172_v28  ;;  %7972 = vmatmul.bf16.gmra.mxu1 %v7368_v49  ;;  %v5233_v19 = vshll.u32 %v4967_v54, 16  ;;  %v4674_v44 = vshll.u32 %v4481_v2, 16  ;;  %v9768_v5 = vld [vmem:[%s13880_s3 + $0xf0] sm:$0xff]  ;;  %v4890_v34 = vld [vmem:[#allocation3 + $0x90] sm:$0xf]  ;;  %v6869_v2 = vpop.permute.xlu2 %6868 }
 0x2c2   : > { %v5225_v29 = vrot.slane %v5223_v35, 5  ;;  %v5229_v57 = vrot.slane %v5227_v10, 4  ;;  %8222 = vmatpush.bf16.msra.mxu0 %v9768_v5  ;;  %v9693_v6 = vld [vmem:[#allocation3 + $0x24] sm:$0xff] }
 0x2c3   : > { %v4673_v62 = vrot.slane %v4671_v46, 7  ;;  %v4350_v30 = vadd.f32 %v4349_v12, %v4261_v45  ;;  %v4351_v47 = vpop.f32.mrf.mxu0  ;;  %v5235_v23 = vrot.slane %v5233_v19, 5  ;;  %v13969_v54 = vld [vmem:[#allocation16_spill] sm:$0xff]  ;;  %v7372_v45 = vsel %vm3332_vm11, %v9693_v6, %v6869_v2 }
 0x2c4   : > { %v5230_v3 = vor.u32 %v5229_v57, %v5225_v29  ;;  %v5226_v48 = vsel %vm10190_vm4, %v5221_v51, %v5225_v29  ;;  %v4177_v56 = vadd.f32 %v4176_v43, %v13969_v54 }
 0x2c5   : > { %v4676_v27 = vor.u32 %v4674_v44, %v4673_v62  ;;  %v4678_v40 = vrot.slane %v4673_v62, 4  ;;  %v4396_v38 = vmax.f32 %v4350_v30, 0.0  ;;  %v6834_v24 = vunpack.c.l.b16 %v5226_v48 }
 0x2c6   : > { %v5231_v60 = vrot.slane %v5230_v3, 4  ;;  %v4178_v25 = vpop.f32.mrf.mxu2 }
 0x2c7   : > { %v4677_v33 = vsel %vm10405_vm8, %v4669_v50, %v4676_v27  ;;  %v4888_v20 = vsel %vm10439_vm10, %v4678_v40, %v4887_v18  ;;  %v4482_v55 = vpack.c.bf16 %v4396_v38, %v4396_v38  ;;  %v4947_v22 = vld [vmem:[#allocation3 + $0x84] sm:$0xf]  ;;  %v4894_v50 = vld [vmem:[#allocation3 + $0x98] sm:$0x1] }
 0x2c8   : > { %4886 = vst.msk [vmem:[#allocation3 + $0x88] sm:$0xf] %vm332_vm0, %v4677_v33  ;;  %v4262_v39 = vpop.f32.mrf.mxu3  ;;  %v5236_v8 = vsel %vm10190_vm4, %v5231_v60, %v5235_v23  ;;  %v5238_v26 = vshrl.u32 %v4947_v22, 16  ;;  %v5241_v4 = vshll.u32 %v4947_v22, 16  ;;  %v12150_v33 = vld [vmem:[#allocation2 + $0xc4] sm:$0xf] }
 0x2c9   : > { %4889 = vst [vmem:[#allocation3 + $0x8c] sm:$0x1] %v4888_v20  ;;  %v4680_v63 = vshrl.u32 %v4482_v55, 16  ;;  %v4263_v17 = vadd.f32 %v4262_v39, %v4174_v32  ;;  %v6835_v12 = vunpack.c.l.b16 %v5236_v8  ;;  %v4683_v59 = vshll.u32 %v4482_v55, 16  ;;  %v13970_v8 = vld [vmem:[#allocation18_spill] sm:$0xff] }
 0x2ca   : > { %v5240_v13 = vrot.slane %v5238_v26, 4  ;;  %v5243_v28 = vrot.slane %v5241_v4, 5  ;;  %v4179_v26 = vadd.f32 %v4178_v25, %v13970_v8 }
 0x2cb   : > { %v4682_v31 = vrot.slane %v4680_v63, 7  ;;  %v4352_v11 = vadd.f32 %v4351_v47, %v4263_v17  ;;  %v6856_v61 = vpack.c.b16 %v6835_v12, %v6834_v24  ;;  %v4354_v16 = vpop.f32.mrf.mxu0 }
 0x2cc   : > { %v5244_v52 = vor.u32 %v5243_v28, %v5240_v13 }
 0x2cd   : > { %v4685_v0 = vor.u32 %v4683_v59, %v4682_v31  ;;  %v4397_v36 = vmax.f32 %v4352_v11, 0.0  ;;  %6882 = vrot.lane.b32.xlu0 %v6856_v61, %s10061_s21  ;;  %v4686_v38 = vrot.slane %v4682_v31, 4  ;;  %v2110_v31 = vrot.slane %v12150_v33, 5 }
 0x2ce   : > { %v5245_v27 = vrot.slane %v5244_v52, 4  ;;  %v4181_v20 = vpop.f32.mrf.mxu2 }
 0x2cf   : > { %v4891_v49 = vsel %vm10420_vm9, %v4685_v0, %v4890_v34  ;;  %v4483_v35 = vpack.c.bf16 %v4397_v36, %v4397_v36  ;;  %v4948_v10 = vld [vmem:[#allocation3 + $0x88] sm:$0xf]  ;;  %v12163_v34 = vld [vmem:[#allocation2 + $0xc8] sm:$0x1]  ;;  %v4897_v36 = vld [vmem:[#allocation3 + $0x9c] sm:$0xf] }
 0x2d0   : > { %4892 = vst [vmem:[#allocation3 + $0x90] sm:$0xf] %v4891_v49  ;;  %v4265_v46 = vpop.f32.mrf.mxu3  ;;  %v4968_v9 = vld [vmem:[#allocation3 + $0x8c] sm:$0x1]  ;;  %v5247_v29 = vshll.u32 %v4948_v10, 16  ;;  %v5251_v57 = vshrl.u32 %v4948_v10, 16 }
 0x2d1   : > { %v4688_v19 = vshrl.u32 %v4483_v35, 16  ;;  %v4266_v62 = vadd.f32 %v4265_v46, %v4177_v56  ;;  %7977 = vmatmul.bf16.gmra.mxu1 %v7372_v45  ;;  %v5257_v47 = vshll.u32 %v4968_v9, 16  ;;  %v4691_v51 = vshll.u32 %v4483_v35, 16  ;;  %v1954_v46 = vld [vmem:[#allocation2 + $0xc0] sm:$0xe] }
 0x2d2   : > { %v5249_v44 = vrot.slane %v5247_v29, 5  ;;  %v5253_v30 = vrot.slane %v5251_v57, 4  ;;  %v2112_v35 = vrot.slane %v2110_v31, 4  ;;  %v2113_v10 = vrot.slane %v12163_v34, 5  ;;  %v13971_v9 = vld [vmem:[#allocation21_spill] sm:$0xff]  ;;  %v9694_v57 = vld [vmem:[#allocation3 + $0x30] sm:$0xff] }
 0x2d3   : > { %v4690_v18 = vrot.slane %v4688_v19, 7  ;;  %v4355_v3 = vadd.f32 %v4354_v16, %v4266_v62  ;;  %v4356_v43 = vpop.f32.mrf.mxu0  ;;  %v5259_v55 = vrot.slane %v5257_v47, 5  ;;  %v4182_v52 = vadd.f32 %v4181_v20, %v13971_v9  ;;  %v2146_v62 = vld [vmem:[#allocation2 + $0xcc] sm:$0xf] }
 0x2d4   : > { %v5254_v40 = vor.u32 %v5253_v30, %v5249_v44  ;;  %v5250_v21 = vsel %vm10190_vm4, %v5245_v27, %v5249_v44 }
 0x2d5   : > { %v4693_v48 = vor.u32 %v4691_v51, %v4690_v18  ;;  %v4695_v60 = vrot.slane %v4690_v18, 4  ;;  %v4398_v23 = vmax.f32 %v4355_v3, 0.0  ;;  %v6836_v61 = vunpack.c.l.b16 %v5250_v21 }
 0x2d6   : > { %v5255_v32 = vrot.slane %v5254_v40, 4  ;;  %v4183_v44 = vpop.f32.mrf.mxu2  ;;  %v9751_v40 = vld [vmem:[%s13880_s3 + $0x68] sm:$0xff] }
 0x2d7   : > { %v4694_v22 = vsel %vm10405_vm8, %v4686_v38, %v4693_v48  ;;  %v4895_v39 = vsel %vm10439_vm10, %v4695_v60, %v4894_v50  ;;  %v4484_v4 = vpack.c.bf16 %v4398_v23, %v4398_v23  ;;  %v4949_v63 = vld [vmem:[#allocation3 + $0x90] sm:$0xf]  ;;  %v8828_v48 = vrot.slane %v1954_v46, 9  ;;  %v2147_v23 = vld [vmem:[#allocation2 + $0xd0] sm:$0xf]  ;;  %8045 = vmatpush.bf16.msra.mxu2 %v9751_v40 }
 0x2d8   : > { %4893 = vst.msk [vmem:[#allocation3 + $0x94] sm:$0xf] %vm332_vm0, %v4694_v22  ;;  %v4267_v17 = vpop.f32.mrf.mxu3  ;;  %v5260_v24 = vsel %vm10190_vm4, %v5255_v32, %v5259_v55  ;;  %v5262_v12 = vshrl.u32 %v4949_v63, 16  ;;  %v5265_v5 = vshll.u32 %v4949_v63, 16  ;;  %v9759_v38 = vld [vmem:[%s13880_s3 + $0xa8] sm:$0xff]  ;;  %v12180_v60 = vsel %vm10953_vm14, %v2112_v35, %v2113_v10 }
 0x2d9   : > { %4896 = vst [vmem:[#allocation3 + $0x98] sm:$0x1] %v4895_v39  ;;  %v4697_v59 = vshrl.u32 %v4484_v4, 16  ;;  %v4268_v11 = vadd.f32 %v4267_v17, %v4179_v26  ;;  %v6837_v16 = vunpack.c.l.b16 %v5260_v24  ;;  %v4700_v13 = vshll.u32 %v4484_v4, 16  ;;  %v4901_v4 = vld [vmem:[#allocation3 + $0xa4] sm:$0x1]  ;;  %8134 = vmatpush.bf16.msra.mxu3 %v9759_v38 }
 0x2da   : > { %v5264_v6 = vrot.slane %v5262_v12, 4  ;;  %v5267_v49 = vrot.slane %v5265_v5, 5  ;;  %v2525_v26 = vshrl.u32 %v2146_v62, 16  ;;  %v2528_v12 = vshll.u32 %v2146_v62, 16  ;;  %v9767_v62 = vld [vmem:[%s13880_s3 + $0xe8] sm:$0xff] }
 0x2db   : > { %v4699_v25 = vrot.slane %v4697_v59, 7  ;;  %v4357_v28 = vadd.f32 %v4356_v43, %v4268_v11  ;;  %v6857_v2 = vpack.c.b16 %v6837_v16, %v6836_v61  ;;  %v4359_v0 = vpop.f32.mrf.mxu0  ;;  %v2534_v5 = vshll.u32 %v2147_v23, 16  ;;  %8223 = vmatpush.bf16.msra.mxu0 %v9767_v62  ;;  %v12207_v40 = vld [vmem:[#allocation3 + $0x10] sm:$0xf]  ;;  %v4904_v38 = vld [vmem:[#allocation3 + $0xa8] sm:$0xf] }
 0x2dc   : > { %v5268_v18 = vor.u32 %v5267_v49, %v5264_v6  ;;  %v13972_v49 = vld [vmem:[#allocation23_spill] sm:$0xff]  ;;  %v2111_v46 = vsel %vm10953_vm14, %v8828_v48, %v2110_v31 }
 0x2dd   : > { %v4702_v54 = vor.u32 %v4700_v13, %v4699_v25  ;;  %v4399_v56 = vmax.f32 %v4357_v28, 0.0  ;;  %6884 = vrot.lane.b32.xlu1 %v6857_v2, %s10061_s21  ;;  %v4703_v59 = vrot.slane %v4699_v25, 4 }
 0x2de   : > { %v5269_v17 = vrot.slane %v5268_v18, 4  ;;  %v2530_v18 = vrot.slane %v2528_v12, 5 }
 0x2df   : > { %v4898_v45 = vsel %vm10420_vm9, %v4702_v54, %v4897_v36  ;;  %v4485_v29 = vpack.c.bf16 %v4399_v56, %v4399_v56  ;;  %v4950_v19 = vld [vmem:[#allocation3 + $0x94] sm:$0xf]  ;;  %v6871_v27 = vpop.permute.xlu0 %6870  ;;  %v2538_v36 = vshrl.u32 %v2147_v23, 16  ;;  %v4184_v54 = vadd.f32 %v4183_v44, %v13972_v49  ;;  %v9772_v44 = vld [vmem:[%s13880_s3 + $0x110] sm:$0xff] }
 0x2e0   : > { %4899 = vst [vmem:[#allocation3 + $0x9c] sm:$0xf] %v4898_v45  ;;  %v4270_v30 = vpop.f32.mrf.mxu3  ;;  %v4969_v47 = vld [vmem:[#allocation3 + $0x98] sm:$0x1]  ;;  %v5271_v51 = vshll.u32 %v4950_v19, 16  ;;  %v5275_v3 = vshrl.u32 %v4950_v19, 16  ;;  %v7376_v20 = vsel %vm3332_vm11, %v9694_v57, %v6871_v27  ;;  %8315 = vmatpush.bf16.msra.mxu1 %v9772_v44 }
 0x2e1   : > { %v4705_v43 = vshrl.u32 %v4485_v29, 16  ;;  %v4271_v50 = vadd.f32 %v4270_v30, %v4182_v52  ;;  %v5281_v55 = vshll.u32 %v4969_v47, 16  ;;  %v4708_v39 = vshll.u32 %v4485_v29, 16  ;;  %7982 = vmatmul.bf16.gmra.mxu1 %v7376_v20  ;;  %v4186_v30 = vpop.f32.mrf.mxu2 }
 0x2e2   : > { %v5273_v21 = vrot.slane %v5271_v51, 5  ;;  %v5277_v32 = vrot.slane %v5275_v3, 4  ;;  %v2527_v47 = vrot.slane %v2525_v26, 4  ;;  %v12203_v51 = vrot.slane %v2534_v5, 5 }
 0x2e3   : > { %v4707_v22 = vrot.slane %v4705_v43, 7  ;;  %v4360_v8 = vadd.f32 %v4359_v0, %v4271_v50  ;;  %v4361_v63 = vpop.f32.mrf.mxu0  ;;  %v5283_v2 = vrot.slane %v5281_v55, 5  ;;  %v2540_v31 = vrot.slane %v2538_v36, 4 }
 0x2e4   : > { %v5278_v24 = vor.u32 %v5277_v32, %v5273_v21  ;;  %v5274_v13 = vsel %vm10190_vm4, %v5269_v17, %v5273_v21  ;;  %v3090_v32 = vunpack.c.l.b16 %v2111_v46  ;;  %v3091_v55 = vunpack.c.l.b16 %v12180_v60 }
 0x2e5   : > { %v4710_v11 = vor.u32 %v4708_v39, %v4707_v22  ;;  %v4712_v61 = vrot.slane %v4707_v22, 4  ;;  %v4400_v16 = vmax.f32 %v4360_v8, 0.0  ;;  %v6838_v57 = vunpack.c.l.b16 %v5274_v13  ;;  %v13973_v22 = vld [vmem:[#allocation27_spill] sm:$0xff] }
 0x2e6   : > { %v5279_v28 = vrot.slane %v5278_v24, 4  ;;  %v4187_v39 = vadd.f32 %v4186_v30, %v13973_v22  ;;  %v9695_v8 = vld [vmem:[#allocation3 + $0x3c] sm:$0xff]  ;;  %v3107_v49 = vpack.c.b16 %v3091_v55, %v3090_v32  ;;  %v13974_v55 = vld [vmem:[#allocation29_spill] sm:$0xff] }
 0x2e7   : > { %v4711_v0 = vsel %vm10405_vm8, %v4703_v59, %v4710_v11  ;;  %v4902_v6 = vsel %vm10439_vm10, %v4712_v61, %v4901_v4  ;;  %v4486_v56 = vpack.c.bf16 %v4400_v16, %v4400_v16  ;;  %v4951_v35 = vld [vmem:[#allocation3 + $0x9c] sm:$0xf]  ;;  %v5965_v4 = vld [vmem:[#allocation3 + $0xc] sm:$0xe]  ;;  %v2531_v11 = vor.u32 %v2530_v18, %v2527_v47 }
 0x2e8   : > { %4900 = vst.msk [vmem:[#allocation3 + $0xa0] sm:$0xf] %vm332_vm0, %v4711_v0  ;;  %v4272_v25 = vpop.f32.mrf.mxu3  ;;  %v5284_v10 = vsel %vm10190_vm4, %v5279_v28, %v5283_v2  ;;  %v5286_v45 = vshrl.u32 %v4951_v35, 16  ;;  %v5289_v9 = vshll.u32 %v4951_v35, 16  ;;  %v12216_v59 = vld [vmem:[#allocation2 + $0xd4] sm:$0x1]  ;;  %v2541_v61 = vor.u32 %v2540_v31, %v12203_v51 }
 0x2e9   : > { %4903 = vst [vmem:[#allocation3 + $0xa4] sm:$0x1] %v4902_v6  ;;  %v4714_v52 = vshrl.u32 %v4486_v56, 16  ;;  %v4273_v29 = vadd.f32 %v4272_v25, %v4184_v54  ;;  %v6839_v19 = vunpack.c.l.b16 %v5284_v10  ;;  %v4717_v43 = vshll.u32 %v4486_v56, 16  ;;  %v4188_v62 = vpop.f32.mrf.mxu2 }
 0x2ea   : > { %v5288_v48 = vrot.slane %v5286_v45, 4  ;;  %v5291_v23 = vrot.slane %v5289_v9, 5  ;;  %v9213_v54 = vrot.slane %v5965_v4, 9  ;;  %v2544_v10 = vshll.u32 %v12216_v59, 16  ;;  %v9766_v4 = vld [vmem:[%s13880_s3 + $0xe0] sm:$0xff] }
 0x2eb   : > { %v12205_v3 = vrot.slane %v4714_v52, 7  ;;  %v4362_v50 = vadd.f32 %v4361_v63, %v4273_v29  ;;  %v6858_v27 = vpack.c.b16 %v6839_v19, %v6838_v57  ;;  %v4364_v26 = vpop.f32.mrf.mxu0  ;;  %v6031_v63 = vrot.slane %v12207_v40, 5  ;;  %v9750_v29 = vld [vmem:[%s13880_s3 + $0x60] sm:$0xff]  ;;  %v4908_v19 = vld [vmem:[#allocation3 + $0xb0] sm:$0x1]  ;;  %8224 = vmatpush.bf16.msra.mxu0 %v9766_v4 }
 0x2ec   : > { %v5292_v28 = vor.u32 %v5291_v23, %v5288_v48  ;;  %v9758_v57 = vld [vmem:[%s13880_s3 + $0xa0] sm:$0xff]  ;;  %v2532_v47 = vrot.slane %v2531_v11, 4  ;;  %v2542_v18 = vrot.slane %v2541_v61, 4  ;;  %8046 = vmatpush.bf16.msra.mxu2 %v9750_v29  ;;  %v4189_v22 = vadd.f32 %v4188_v62, %v13974_v55 }
 0x2ed   : > { %v4719_v20 = vor.u32 %v4717_v43, %v12205_v3  ;;  %v4401_v21 = vmax.f32 %v4362_v50, 0.0  ;;  %6886 = vrot.lane.b32.xlu2 %v6858_v27, %s10061_s21  ;;  %v12223_v52 = vsel %vm10953_vm14, %v9213_v54, %v6031_v63  ;;  %v4720_v31 = vrot.slane %v12205_v3, 4  ;;  %8135 = vmatpush.bf16.msra.mxu3 %v9758_v57 }
 0x2ee   : > { %v5293_v44 = vrot.slane %v5292_v28, 4 }
 0x2ef   : > { %v4905_v17 = vsel %vm10420_vm9, %v4719_v20, %v4904_v38  ;;  %v4487_v24 = vpack.c.bf16 %v4401_v21, %v4401_v21  ;;  %v6873_v12 = vpop.permute.xlu1 %6872  ;;  %v4952_v5 = vld [vmem:[#allocation3 + $0xa0] sm:$0xf]  ;;  %v2546_v20 = vrot.slane %v2544_v10, 5  ;;  %v12235_v21 = vld [vmem:[#allocation3 + $0x14] sm:$0x1] }
 0x2f0   : > { %4906 = vst [vmem:[#allocation3 + $0xa8] sm:$0xf] %v4905_v17  ;;  %v4275_v60 = vpop.f32.mrf.mxu3  ;;  %v7380_v16 = vsel %vm3332_vm11, %v9695_v8, %v6873_v12  ;;  %v4970_v13 = vld [vmem:[#allocation3 + $0xa4] sm:$0x1]  ;;  %v5295_v2 = vshll.u32 %v4952_v5, 16  ;;  %v5299_v36 = vshrl.u32 %v4952_v5, 16 }
 0x2f1   : > { %v4722_v0 = vshrl.u32 %v4487_v24, 16  ;;  %v4276_v6 = vadd.f32 %v4275_v60, %v4187_v39  ;;  %v5305_v25 = vshll.u32 %v4970_v13, 16  ;;  %v4725_v45 = vshll.u32 %v4487_v24, 16  ;;  %7987 = vmatmul.bf16.gmra.mxu1 %v7380_v16  ;;  %v4911_v10 = vld [vmem:[#allocation3 + $0xb4] sm:$0xf] }
 0x2f2   : > { %v5297_v56 = vrot.slane %v5295_v2, 5  ;;  %v5301_v35 = vrot.slane %v5299_v36, 4  ;;  %v6033_v5 = vrot.slane %v6031_v63, 4  ;;  %v2537_v2 = vsel %vm10190_vm4, %v2532_v47, %v12203_v51 }
 0x2f3   : > { %v4724_v46 = vrot.slane %v4722_v0, 7  ;;  %v4365_v9 = vadd.f32 %v4364_v26, %v4276_v6  ;;  %v5307_v23 = vrot.slane %v5305_v25, 5  ;;  %v5536_v26 = vld [vmem:[#allocation3 + $0x1c] sm:$0xf]  ;;  %v4366_v24 = vpop.f32.mrf.mxu0  ;;  %v2547_v36 = vsel %vm10190_vm4, %v2542_v18, %v2546_v20  ;;  %v5966_v25 = vld [vmem:[#allocation3 + $0x18] sm:$0xe] }
 0x2f4   : > { %v5302_v30 = vor.u32 %v5301_v35, %v5297_v56  ;;  %v5298_v38 = vsel %vm10190_vm4, %v5293_v44, %v5297_v56  ;;  %v6034_v0 = vrot.slane %v12235_v21, 5  ;;  %v6038_v6 = vrot.slane %v5536_v26, 5  ;;  %v9706_v56 = vld [vmem:[#allocation3 + $0xc] sm:$0xff]  ;;  %v5566_v44 = vld [vmem:[#allocation3 + $0x20] sm:$0x1] }
 0x2f5   : > { %v4727_v43 = vor.u32 %v4725_v45, %v4724_v46  ;;  %v4729_v50 = vrot.slane %v4724_v46, 4  ;;  %v4402_v27 = vmax.f32 %v4365_v9, 0.0  ;;  %3138 = vrot.lane.b32.xlu2 %v3107_v49, %s10061_s21  ;;  %v6840_v13 = vunpack.c.l.b16 %v5298_v38  ;;  %v6142_v9 = vld [vmem:[#allocation3 + $0x18] sm:$0xf] }
 0x2f6   : > { %v5303_v48 = vrot.slane %v5302_v30, 4  ;;  %v12258_v46 = vsel %vm10953_vm14, %v6033_v5, %v6034_v0  ;;  %v3235_v62 = vunpack.c.l.b16 %v2547_v36  ;;  %v7086_v47 = vunpack.c.l.b16 %v12223_v52  ;;  %v4915_v0 = vld [vmem:[#allocation3 + $0xbc] sm:$0x1] }
 0x2f7   : > { %v4728_v32 = vsel %vm10405_vm8, %v4720_v31, %v4727_v43  ;;  %v4909_v3 = vsel %vm10439_vm10, %v4729_v50, %v4908_v19  ;;  %v4488_v39 = vpack.c.bf16 %v4402_v27, %v4402_v27  ;;  %v4953_v8 = vld [vmem:[#allocation3 + $0xa8] sm:$0xf]  ;;  %v3234_v19 = vunpack.c.l.b16 %v2537_v2  ;;  %v6875_v50 = vpop.permute.xlu2 %6874  ;;  %v5967_v2 = vld [vmem:[#allocation3 + $0x24] sm:$0xe] }
 0x2f8   : > { %4907 = vst.msk [vmem:[#allocation3 + $0xac] sm:$0xf] %vm332_vm0, %v4728_v32  ;;  %v4277_v17 = vpop.f32.mrf.mxu3  ;;  %v5308_v12 = vsel %vm10190_vm4, %v5303_v48, %v5307_v23  ;;  %v5310_v11 = vshrl.u32 %v4953_v8, 16  ;;  %v5313_v61 = vshll.u32 %v4953_v8, 16  ;;  %v9214_v18 = vrot.slane %v5966_v25, 9  ;;  %v9696_v48 = vld [vmem:[#allocation3 + $0x48] sm:$0xff] }
 0x2f9   : > { %4910 = vst [vmem:[#allocation3 + $0xb0] sm:$0x1] %v4909_v3  ;;  %v4731_v60 = vshrl.u32 %v4488_v39, 16  ;;  %v4278_v16 = vadd.f32 %v4277_v17, %v4189_v22  ;;  %v6841_v28 = vunpack.c.l.b16 %v5308_v12  ;;  %v4734_v63 = vshll.u32 %v4488_v39, 16  ;;  %v12265_v43 = vld [vmem:[#allocation3 + $0x28] sm:$0xf] }
 0x2fa   : > { %v5312_v45 = vrot.slane %v5310_v11, 4  ;;  %v5315_v51 = vrot.slane %v5313_v61, 5  ;;  %v6040_v31 = vrot.slane %v6038_v6, 4  ;;  %v6191_v20 = vshrl.u32 %v6142_v9, 16 }
 0x2fb   : > { %v12254_v49 = vrot.slane %v4731_v60, 7  ;;  %v4367_v54 = vadd.f32 %v4366_v24, %v4278_v16  ;;  %v6859_v35 = vpack.c.b16 %v6841_v28, %v6840_v13  ;;  %v6194_v32 = vshll.u32 %v6142_v9, 16  ;;  %v9707_v13 = vld [vmem:[#allocation3 + $0x18] sm:$0xff] }
 0x2fc   : > { %v7087_v3 = vunpack.c.l.b16 %v12258_v46  ;;  %v5316_v22 = vor.u32 %v5315_v51, %v5312_v45  ;;  %v3251_v4 = vpack.c.b16 %v3235_v62, %v3234_v19  ;;  %v6039_v17 = vsel %vm10953_vm14, %v9214_v18, %v6038_v6  ;;  %v9904_v46 = vld [vmem:[#allocation3 + $0x1c] sm:$0xf] }
 0x2fd   : > { %v4736_v29 = vor.u32 %v4734_v63, %v12254_v49  ;;  %v4403_v57 = vmax.f32 %v4367_v54, 0.0  ;;  %7006 = vrot.lane.b32.xlu2 %v9706_v56, %s10061_s21  ;;  %6888 = vrot.lane.b32.xlu0 %v6859_v35, %s10061_s21  ;;  %v6041_v24 = vrot.slane %v5566_v44, 5  ;;  %v7384_v12 = vsel %vm3332_vm11, %v9696_v48, %v6875_v50 }
 0x2fe   : > { %v6045_v36 = vrot.slane %v12265_v43, 5  ;;  %v5317_v63 = vrot.slane %v5316_v22, 4  ;;  %v6193_v6 = vrot.slane %v6191_v20, 4  ;;  %v6196_v56 = vrot.slane %v6194_v32, 5 }
 0x2ff   : > { %v4912_v27 = vsel %vm10420_vm9, %v4736_v29, %v4911_v10  ;;  %v4489_v38 = vpack.c.bf16 %v4403_v57, %v4403_v57  ;;  %v4954_v23 = vld [vmem:[#allocation3 + $0xac] sm:$0xf]  ;;  %v6042_v28 = vsel %vm10953_vm14, %v6040_v31, %v6041_v24  ;;  %v4737_v35 = vrot.slane %v12254_v49, 4  ;;  %v12281_v57 = vld [vmem:[#allocation3 + $0x34] sm:$0xf] }
 0x300   : > { %4913 = vst [vmem:[#allocation3 + $0xb4] sm:$0xf] %v4912_v27  ;;  %v4971_v55 = vld [vmem:[#allocation3 + $0xb0] sm:$0x1]  ;;  %v5319_v39 = vshll.u32 %v4954_v23, 16  ;;  %v5323_v8 = vshrl.u32 %v4954_v23, 16  ;;  %v7088_v44 = vunpack.c.l.b16 %v6039_v17  ;;  %v7089_v50 = vunpack.c.l.b16 %v6042_v28 }
 0x301   : > { %v4739_v26 = vshrl.u32 %v4489_v38, 16  ;;  %v5329_v61 = vshll.u32 %v4971_v55, 16  ;;  %v4742_v16 = vshll.u32 %v4489_v38, 16  ;;  %7992 = vmatmul.bf16.gmra.mxu1 %v7384_v12  ;;  %v6200_v45 = vshll.u32 %v9904_v46, 16  ;;  %v5567_v27 = vld [vmem:[#allocation3 + $0x2c] sm:$0x1] }
 0x302   : > { %v5321_v5 = vrot.slane %v5319_v39, 5  ;;  %v5325_v11 = vrot.slane %v5323_v8, 4  ;;  %v6204_v19 = vshrl.u32 %v9904_v46, 16  ;;  %v9215_v18 = vrot.slane %v5967_v2, 9  ;;  %v5968_v39 = vld [vmem:[#allocation3 + $0x30] sm:$0xe] }
 0x303   : > { %v4741_v60 = vrot.slane %v4739_v26, 7  ;;  %v5331_v29 = vrot.slane %v5329_v61, 5  ;;  %v6047_v32 = vrot.slane %v6045_v36, 4  ;;  %v6052_v55 = vrot.slane %v12281_v57, 5  ;;  %v9708_v17 = vld [vmem:[#allocation3 + $0x24] sm:$0xff] }
 0x304   : > { %v5326_v54 = vor.u32 %v5325_v11, %v5321_v5  ;;  %v5322_v51 = vsel %vm10190_vm4, %v5317_v63, %v5321_v5  ;;  %v12293_v22 = vsel %vm10953_vm14, %v9215_v18, %v6045_v36  ;;  %v6197_v8 = vor.u32 %v6196_v56, %v6193_v6  ;;  %v5568_v61 = vld [vmem:[#allocation3 + $0x38] sm:$0x1]  ;;  %v6144_v28 = vld [vmem:[#allocation3 + $0x24] sm:$0xf]  ;;  %v6145_v2 = vld [vmem:[#allocation3 + $0x28] sm:$0xf] }
 0x305   : > { %v4744_v25 = vor.u32 %v4742_v16, %v4741_v60  ;;  %v4746_v10 = vrot.slane %v4741_v60, 4  ;;  %7008 = vrot.lane.b32.xlu2 %v9707_v13, %s10061_s21  ;;  %3282 = vrot.lane.b32.xlu0 %v3251_v4, %s10061_s21  ;;  %v6842_v23 = vunpack.c.l.b16 %v5322_v51  ;;  %v12295_v26 = vrot.slane %v6200_v45, 5  ;;  %v9905_v56 = vld [vmem:[#allocation3 + $0x20] sm:$0x1]  ;;  %v9709_v18 = vld [vmem:[#allocation3 + $0x30] sm:$0xff] }
 0x306   : > { %v5327_v9 = vrot.slane %v5326_v54, 4  ;;  %v6206_v4 = vrot.slane %v6204_v19, 4  ;;  %v7118_v12 = vpack.c.b16 %v7087_v3, %v7086_v47  ;;  %v6048_v11 = vrot.slane %v5567_v27, 5  ;;  %v9697_v47 = vld [vmem:[#allocation3 + $0x54] sm:$0xff] }
 0x307   : > { %v4745_v62 = vsel %vm10405_vm8, %v4737_v35, %v4744_v25  ;;  %v4916_v49 = vsel %vm10439_vm10, %v4746_v10, %v4915_v0  ;;  %v4955_v31 = vld [vmem:[#allocation3 + $0xb4] sm:$0xf]  ;;  %v7119_v60 = vpack.c.b16 %v7089_v50, %v7088_v44  ;;  %v7090_v0 = vunpack.c.l.b16 %v12293_v22  ;;  %v12308_v44 = vld [vmem:[#allocation3 + $0x40] sm:$0xf] }
 0x308   : > { %4914 = vst.msk [vmem:[#allocation3 + $0xb8] sm:$0xf] %vm332_vm0, %v4745_v62  ;;  %v5332_v43 = vsel %vm10190_vm4, %v5327_v9, %v5331_v29  ;;  %v5334_v38 = vshrl.u32 %v4955_v31, 16  ;;  %v5337_v48 = vshll.u32 %v4955_v31, 16  ;;  %v6049_v36 = vsel %vm10953_vm14, %v6047_v32, %v6048_v11  ;;  %v5969_v32 = vld [vmem:[#allocation3 + $0x3c] sm:$0xe] }
 0x309   : > { %4917 = vst [vmem:[#allocation3 + $0xbc] sm:$0x1] %v4916_v49  ;;  %v6843_v20 = vunpack.c.l.b16 %v5332_v43  ;;  %v9216_v63 = vrot.slane %v5968_v39, 9  ;;  %v6054_v52 = vrot.slane %v6052_v55, 4  ;;  %v6055_v3 = vrot.slane %v5568_v61, 5 }
 0x30a   : > { %v5336_v16 = vrot.slane %v5334_v38, 4  ;;  %v5339_v13 = vrot.slane %v5337_v48, 5  ;;  %v6198_v54 = vrot.slane %v6197_v8, 4  ;;  %v6207_v6 = vor.u32 %v6206_v4, %v12295_v26  ;;  %v9749_v4 = vld [vmem:[%s13880_s3 + $0x58] sm:$0xff] }
 0x30b   : > { %v6860_v5 = vpack.c.b16 %v6843_v20, %v6842_v23  ;;  %v6210_v35 = vshll.u32 %v9905_v56, 16  ;;  %v6215_v46 = vshrl.u32 %v6144_v28, 16  ;;  %v6218_v45 = vshll.u32 %v6144_v28, 16  ;;  %8047 = vmatpush.bf16.msra.mxu2 %v9749_v4 }
 0x30c   : > { %v6224_v51 = vshll.u32 %v6145_v2, 16  ;;  %v6228_v9 = vshrl.u32 %v6145_v2, 16  ;;  %v5340_v19 = vor.u32 %v5339_v13, %v5336_v16  ;;  %v7091_v31 = vunpack.c.l.b16 %v6049_v36  ;;  %v6146_v36 = vld [vmem:[#allocation3 + $0x30] sm:$0xf] }
 0x30d   : > { %7010 = vrot.lane.b32.xlu2 %v9708_v17, %s10061_s21  ;;  %7134 = vrot.lane.b32.xlu0 %v7118_v12, %s10061_s21  ;;  %v12312_v43 = vsel %vm10953_vm14, %v9216_v63, %v6052_v55  ;;  %v12316_v50 = vsel %vm10953_vm14, %v6054_v52, %v6055_v3  ;;  %v6203_v27 = vsel %vm10190_vm4, %v6198_v54, %v12295_v26  ;;  %v6208_v20 = vrot.slane %v6207_v6, 4  ;;  %v9757_v17 = vld [vmem:[%s13880_s3 + $0x98] sm:$0xff]  ;;  %v6175_v54 = vld [vmem:[#allocation3 + $0x2c] sm:$0x1] }
 0x30e   : > { %6890 = vrot.lane.b32.xlu1 %v6860_v5, %s10061_s21  ;;  %v6212_v22 = vrot.slane %v6210_v35, 5  ;;  %v6059_v39 = vrot.slane %v12308_v44, 5  ;;  %v6217_v8 = vrot.slane %v6215_v46, 4  ;;  %v6220_v55 = vrot.slane %v6218_v45, 5  ;;  %v5569_v5 = vld [vmem:[#allocation3 + $0x44] sm:$0x1]  ;;  %8136 = vmatpush.bf16.msra.mxu3 %v9757_v17  ;;  %v12348_v44 = vpop.f32.mrf.mxu1 }
 0x30f   : > { %v6877_v25 = vpop.permute.xlu0 %6876  ;;  %v4956_v10 = vld [vmem:[#allocation3 + $0xb8] sm:$0xf]  ;;  %v5341_v26 = vrot.slane %v5340_v19, 4  ;;  %v12328_v11 = vrot.slane %v6224_v51, 5  ;;  %v6230_v61 = vrot.slane %v6228_v9, 4  ;;  %v7120_v16 = vpack.c.b16 %v7091_v31, %v7090_v0 }
 0x310   : > { %v7388_v29 = vsel %vm3332_vm11, %v9697_v47, %v6877_v25  ;;  %v4972_v57 = vld [vmem:[#allocation3 + $0xbc] sm:$0x1]  ;;  %v5343_v62 = vshll.u32 %v4956_v10, 16  ;;  %v5347_v49 = vshrl.u32 %v4956_v10, 16  ;;  %v7092_v13 = vunpack.c.l.b16 %v12312_v43  ;;  %v9765_v25 = vld [vmem:[%s13880_s3 + $0xd8] sm:$0xff] }
 0x311   : > { %v5353_v23 = vshll.u32 %v4972_v57, 16  ;;  %7997 = vmatmul.bf16.gmra.mxu1 %v7388_v29  ;;  %v7093_v28 = vunpack.c.l.b16 %v12316_v50  ;;  %v12334_v2 = vunpack.c.l.b16 %v6203_v27  ;;  %v6213_v3 = vsel %vm10190_vm4, %v6208_v20, %v6212_v22  ;;  %v6149_v10 = vld [vmem:[#allocation3 + $0x40] sm:$0xf]  ;;  %v12346_v19 = vld [vmem:[#allocation3 + $0x4c] sm:$0xf]  ;;  %8225 = vmatpush.bf16.msra.mxu0 %v9765_v25 }
 0x312   : > { %v5345_v38 = vrot.slane %v5343_v62, 5  ;;  %v5349_v48 = vrot.slane %v5347_v49, 4  ;;  %v9217_v0 = vrot.slane %v5969_v32, 9  ;;  %v6061_v6 = vrot.slane %v6059_v39, 4  ;;  %v6148_v43 = vld [vmem:[#allocation3 + $0x3c] sm:$0xf] }
 0x313   : > { %v5355_v47 = vrot.slane %v5353_v23, 5  ;;  %v6062_v56 = vrot.slane %v5569_v5, 5  ;;  %v6221_v35 = vor.u32 %v6220_v55, %v6217_v8  ;;  %v6231_v45 = vor.u32 %v6230_v61, %v12328_v11 }
 0x314   : > { %v5350_v12 = vor.u32 %v5349_v48, %v5345_v38  ;;  %v5346_v63 = vsel %vm10190_vm4, %v5341_v26, %v5345_v38  ;;  %v6239_v51 = vshrl.u32 %v6146_v36, 16  ;;  %v6242_v9 = vshll.u32 %v6146_v36, 16  ;;  %v9710_v38 = vld [vmem:[#allocation3 + $0x3c] sm:$0xff] }
 0x315   : > { %7012 = vrot.lane.b32.xlu2 %v9709_v18, %s10061_s21  ;;  %7136 = vrot.lane.b32.xlu0 %v7119_v60, %s10061_s21  ;;  %v6147_v60 = vld [vmem:[#allocation3 + $0x34] sm:$0xf]  ;;  %v6844_v29 = vunpack.c.l.b16 %v5346_v63  ;;  %v12350_v18 = vunpack.c.l.b16 %v6213_v3  ;;  %v6234_v31 = vshll.u32 %v6175_v54, 16  ;;  %v6272_v50 = vshll.u32 %v6149_v10, 16 }
 0x316   : > { %v5351_v52 = vrot.slane %v5350_v12, 4  ;;  %v6248_v62 = vshll.u32 %v6147_v60, 16  ;;  %v6252_v49 = vshrl.u32 %v6147_v60, 16  ;;  %v6276_v27 = vshrl.u32 %v6149_v10, 16  ;;  %v6176_v10 = vld [vmem:[#allocation3 + $0x38] sm:$0x1] }
 0x317   : > { %v6060_v23 = vsel %vm10953_vm14, %v9217_v0, %v6059_v39  ;;  %v6063_v20 = vsel %vm10953_vm14, %v6061_v6, %v6062_v56  ;;  %v6222_v32 = vrot.slane %v6221_v35, 4  ;;  %v6232_v22 = vrot.slane %v6231_v45, 4  ;;  %v9698_v39 = vld [vmem:[#allocation3 + $0x60] sm:$0xff]  ;;  %v5570_v0 = vld [vmem:[#allocation3 + $0x50] sm:$0x1] }
 0x318   : > { %v5356_v46 = vsel %vm10190_vm4, %v5351_v52, %v5355_v47  ;;  %v6066_v8 = vrot.slane %v12346_v19, 5  ;;  %v6241_v55 = vrot.slane %v6239_v51, 4  ;;  %v6244_v4 = vrot.slane %v6242_v9, 5  ;;  %v12370_v6 = vld [vmem:[#allocation3 + $0x58] sm:$0xf] }
 0x319   : > { %v6845_v57 = vunpack.c.l.b16 %v5356_v46  ;;  %v12359_v17 = vrot.slane %v6248_v62, 5  ;;  %v6254_v26 = vrot.slane %v6252_v49, 4  ;;  %v6263_v12 = vshrl.u32 %v6148_v43, 16  ;;  %v5970_v35 = vld [vmem:[#allocation3 + $0x48] sm:$0xe] }
 0x31a   : > { %v6266_v5 = vshll.u32 %v6148_v43, 16  ;;  %v7121_v61 = vpack.c.b16 %v7093_v28, %v7092_v13  ;;  %v6236_v36 = vrot.slane %v6234_v31, 5  ;;  %v12362_v63 = vrot.slane %v6272_v50, 5  ;;  %v9771_v13 = vld [vmem:[%s13880_s3 + $0x108] sm:$0xff] }
 0x31b   : > { %v6861_v48 = vpack.c.b16 %v6845_v57, %v6844_v29  ;;  %v6278_v52 = vrot.slane %v6276_v27, 4  ;;  %v7262_v3 = vpack.c.b16 %v12350_v18, %v12334_v2  ;;  %v7311_v54 = vunpack.c.l.b16 %v12053_v37  ;;  %8316 = vmatpush.bf16.msra.mxu1 %v9771_v13  ;;  %v6150_v29 = vld [vmem:[#allocation3 + $0x48] sm:$0xf] }
 0x31c   : > { %v6227_v60 = vsel %vm10190_vm4, %v6222_v32, %v12328_v11  ;;  %v7094_v56 = vunpack.c.l.b16 %v6060_v23  ;;  %v6237_v2 = vsel %vm10190_vm4, %v6232_v22, %v6236_v36  ;;  %v6068_v25 = vrot.slane %v6066_v8, 4  ;;  %v6177_v11 = vld [vmem:[#allocation3 + $0x44] sm:$0x1]  ;;  %v9711_v18 = vld [vmem:[#allocation3 + $0x48] sm:$0xff] }
 0x31d   : > { %7014 = vrot.lane.b32.xlu2 %v9710_v38, %s10061_s21  ;;  %7138 = vrot.lane.b32.xlu0 %v7120_v16, %s10061_s21  ;;  %v7095_v16 = vunpack.c.l.b16 %v6063_v20  ;;  %v6245_v46 = vor.u32 %v6244_v4, %v6241_v55  ;;  %v6255_v45 = vor.u32 %v6254_v26, %v12359_v17  ;;  %v6265_v51 = vrot.slane %v6263_v12, 4  ;;  %v6151_v38 = vld [vmem:[#allocation3 + $0x4c] sm:$0xf]  ;;  %v5571_v12 = vld [vmem:[#allocation3 + $0x5c] sm:$0x1] }
 0x31e   : > { %6892 = vrot.lane.b32.xlu1 %v6861_v48, %s10061_s21  ;;  %v6268_v9 = vrot.slane %v6266_v5, 5  ;;  %v12379_v57 = vunpack.c.l.b16 %v6227_v60  ;;  %v6069_v19 = vrot.slane %v5570_v0, 5  ;;  %v6073_v62 = vrot.slane %v12370_v6, 5  ;;  %v12383_v48 = vpop.f32.mrf.mxu1 }
 0x31f   : > { %v6879_v47 = vpop.permute.xlu1 %6878  ;;  %v6279_v49 = vor.u32 %v6278_v52, %v12362_v63  ;;  %v7122_v31 = vpack.c.b16 %v7095_v16, %v7094_v56  ;;  %v7233_v43 = vunpack.c.l.b16 %v6237_v2  ;;  %v9218_v50 = vrot.slane %v5970_v35, 9 }
 0x320   : > { %v7392_v28 = vsel %vm3332_vm11, %v9698_v39, %v6879_v47  ;;  %v6258_v27 = vshll.u32 %v6176_v10, 16  ;;  %v6070_v23 = vsel %vm10953_vm14, %v6068_v25, %v6069_v19  ;;  %v6282_v20 = vshll.u32 %v6177_v11, 16  ;;  %v5971_v39 = vld [vmem:[#allocation3 + $0x54] sm:$0xe] }
 0x321   : > { %8002 = vmatmul.bf16.gmra.mxu1 %v7392_v28  ;;  %v6287_v32 = vshrl.u32 %v6150_v29, 16  ;;  %v6290_v22 = vshll.u32 %v6150_v29, 16  ;;  %v6067_v55 = vsel %vm10953_vm14, %v9218_v50, %v6066_v8  ;;  %v6246_v4 = vrot.slane %v6245_v46, 4  ;;  %v12396_v28 = vld [vmem:[#allocation3 + $0x64] sm:$0xf] }
 0x322   : > { %v6256_v26 = vrot.slane %v6255_v45, 4  ;;  %v6269_v5 = vor.u32 %v6268_v9, %v6265_v51  ;;  %v6075_v36 = vrot.slane %v6073_v62, 4  ;;  %v6280_v52 = vrot.slane %v6279_v49, 4  ;;  %v9712_v9 = vld [vmem:[#allocation3 + $0x54] sm:$0xff] }
 0x323   : > { %v6296_v47 = vshll.u32 %v6151_v38, 16  ;;  %v6300_v16 = vshrl.u32 %v6151_v38, 16  ;;  %v7263_v60 = vpack.c.b16 %v7233_v43, %v12379_v57  ;;  %v7097_v0 = vunpack.c.l.b16 %v6070_v23  ;;  %v6153_v23 = vld [vmem:[#allocation3 + $0x58] sm:$0xf] }
 0x324   : > { %v6260_v6 = vrot.slane %v6258_v27, 5  ;;  %v6076_v8 = vrot.slane %v5571_v12, 5  ;;  %v6284_v13 = vrot.slane %v6282_v20, 5  ;;  %v6289_v56 = vrot.slane %v6287_v32, 4  ;;  %v5572_v12 = vld [vmem:[#allocation3 + $0x68] sm:$0x1] }
 0x325   : > { %7016 = vrot.lane.b32.xlu2 %v9711_v18, %s10061_s21  ;;  %7140 = vrot.lane.b32.xlu0 %v7121_v61, %s10061_s21  ;;  %v6251_v61 = vsel %vm10190_vm4, %v6246_v4, %v12359_v17  ;;  %v6292_v2 = vrot.slane %v6290_v22, 5  ;;  %v9219_v25 = vrot.slane %v5971_v39, 9  ;;  %v6270_v10 = vrot.slane %v6269_v5, 4  ;;  %v6178_v17 = vld [vmem:[#allocation3 + $0x50] sm:$0x1] }
 0x326   : > { %7278 = vrot.lane.b32.xlu1 %v7262_v3, %s10061_s21  ;;  %v7096_v3 = vunpack.c.l.b16 %v6067_v55  ;;  %v6261_v35 = vsel %vm10190_vm4, %v6256_v26, %v6260_v6  ;;  %v6077_v46 = vsel %vm10953_vm14, %v6075_v36, %v6076_v8  ;;  %v6285_v45 = vsel %vm10190_vm4, %v6280_v52, %v6284_v13  ;;  %v6152_v18 = vld [vmem:[#allocation3 + $0x54] sm:$0xf]  ;;  %v5972_v22 = vld [vmem:[#allocation3 + $0x60] sm:$0xe]  ;;  %v6881_v36 = vpop.permute.xlu2 %6880 }
 0x327   : > { %v12404_v11 = vrot.slane %v6296_v47, 5  ;;  %v6302_v51 = vrot.slane %v6300_v16, 4  ;;  %v6074_v57 = vsel %vm10953_vm14, %v9219_v25, %v6073_v62  ;;  %v6275_v19 = vsel %vm10190_vm4, %v6270_v10, %v12362_v63  ;;  %v6154_v13 = vld [vmem:[#allocation3 + $0x60] sm:$0xf]  ;;  %v12431_v25 = vld [vmem:[#allocation3 + $0x70] sm:$0xf] }
 0x328   : > { %v7123_v29 = vpack.c.b16 %v7097_v0, %v7096_v3  ;;  %v6080_v49 = vrot.slane %v12396_v28, 5  ;;  %v1929_v43 = vshrl.u32 %v12150_v33, 16  ;;  %v7234_v50 = vunpack.c.l.b16 %v6251_v61  ;;  %v9699_v61 = vld [vmem:[#allocation3 + $0x6c] sm:$0xff]  ;;  %v6155_v10 = vld [vmem:[#allocation3 + $0x64] sm:$0xf] }
 0x329   : > { %v7235_v27 = vunpack.c.l.b16 %v6261_v35  ;;  %v6293_v38 = vor.u32 %v6292_v2, %v6289_v56  ;;  %v1935_v20 = vshll.u32 %v12163_v34, 16  ;;  %v7099_v62 = vunpack.c.l.b16 %v6077_v46  ;;  %v6180_v33 = vld [vmem:[#allocation3 + $0x68] sm:$0x1] }
 0x32a   : > { %v12416_v32 = vunpack.c.l.b16 %v6285_v45  ;;  %v6306_v63 = vshll.u32 %v6178_v17, 16  ;;  %v7098_v4 = vunpack.c.l.b16 %v6074_v57  ;;  %v12421_v26 = vunpack.c.l.b16 %v6275_v19  ;;  %v1537_v57 = vld [vmem:[#allocation2 + $0xc0] sm:$0xf]  ;;  %v9713_v19 = vld [vmem:[#allocation3 + $0x60] sm:$0xff] }
 0x32b   : > { %v6303_v5 = vor.u32 %v6302_v51, %v12404_v11  ;;  %v6311_v39 = vshrl.u32 %v6152_v18, 16  ;;  %v6314_v52 = vshll.u32 %v6152_v18, 16  ;;  %v6320_v47 = vshll.u32 %v6153_v23, 16  ;;  %v12437_v51 = vld [vmem:[#allocation3 + $0x5c] sm:$0x1] }
 0x32c   : > { %v6324_v16 = vshrl.u32 %v6153_v23, 16  ;;  %v2722_v0 = vrot.slane %v12216_v59, 5  ;;  %v9220_v6 = vrot.slane %v5972_v22, 9  ;;  %v6294_v8 = vrot.slane %v6293_v38, 4  ;;  %v9748_v23 = vld [vmem:[%s13880_s3 + $0x50] sm:$0xff] }
 0x32d   : > { %7018 = vrot.lane.b32.xlu2 %v9712_v9, %s10061_s21  ;;  %7142 = vrot.lane.b32.xlu0 %v7122_v31, %s10061_s21  ;;  %v6082_v31 = vrot.slane %v6080_v49, 4  ;;  %v12427_v56 = vpack.c.b16 %v7099_v62, %v7098_v4  ;;  %v7265_v2 = vpack.c.b16 %v12416_v32, %v12421_v26  ;;  %v6083_v3 = vrot.slane %v5572_v12, 5  ;;  %v5973_v62 = vld [vmem:[#allocation3 + $0x6c] sm:$0xe]  ;;  %v6158_v32 = vld [vmem:[#allocation3 + $0x78] sm:$0xf] }
 0x32e   : > { %7280 = vrot.lane.b32.xlu1 %v7263_v60, %s10061_s21  ;;  %v12419_v55 = vpop.f32.mrf.mxu1  ;;  %v7264_v60 = vpack.c.b16 %v7235_v27, %v7234_v50  ;;  %v6308_v35 = vrot.slane %v6306_v63, 5  ;;  %v7396_v46 = vsel %vm3332_vm11, %v9699_v61, %v6881_v36  ;;  %v6299_v45 = vsel %vm10190_vm4, %v6294_v8, %v12404_v11  ;;  %v9756_v11 = vld [vmem:[%s13880_s3 + $0x90] sm:$0xff]  ;;  %8048 = vmatpush.bf16.msra.mxu2 %v9748_v23 }
 0x32f   : > { %v6304_v17 = vrot.slane %v6303_v5, 4  ;;  %v6313_v9 = vrot.slane %v6311_v39, 4  ;;  %v12441_v18 = vsel %vm10953_vm14, %v6082_v31, %v6083_v3  ;;  %v6316_v50 = vrot.slane %v6314_v52, 5  ;;  %v9906_v31 = vld [vmem:[#allocation2 + $0xc4] sm:$0xf]  ;;  %8137 = vmatpush.bf16.msra.mxu3 %v9756_v11 }
 0x330   : > { %v12443_v27 = vrot.slane %v6320_v47, 5  ;;  %v6326_v38 = vrot.slane %v6324_v16, 4  ;;  %v6087_v22 = vrot.slane %v12431_v25, 5  ;;  %v6335_v63 = vshrl.u32 %v6154_v13, 16  ;;  %v5573_v3 = vld [vmem:[#allocation3 + $0x74] sm:$0x1] }
 0x331   : > { %8007 = vmatmul.bf16.gmra.mxu1 %v7396_v46  ;;  %v6344_v4 = vshll.u32 %v6155_v10, 16  ;;  %v6348_v12 = vshrl.u32 %v6155_v10, 16  ;;  %v12454_v5 = vunpack.c.l.b16 %v6299_v45  ;;  %v1916_v39 = vshrl.u32 %v1537_v57, 16  ;;  %v6157_v45 = vld [vmem:[#allocation3 + $0x70] sm:$0xf] }
 0x332   : > { %v1919_v36 = vshll.u32 %v1537_v57, 16  ;;  %v1925_v52 = vshll.u32 %v9906_v31, 16  ;;  %v6081_v16 = vsel %vm10953_vm14, %v9220_v6, %v6080_v49  ;;  %v7101_v61 = vunpack.c.l.b16 %v12441_v18  ;;  %v9747_v6 = vld [vmem:[%s13880_s3 + $0x48] sm:$0xff]  ;;  %v6156_v18 = vld [vmem:[#allocation3 + $0x6c] sm:$0xf] }
 0x333   : > { %v6338_v8 = vshll.u32 %v6154_v13, 16  ;;  %v9221_v25 = vrot.slane %v5973_v62, 9  ;;  %v6317_v10 = vor.u32 %v6316_v50, %v6313_v9  ;;  %v6327_v46 = vor.u32 %v6326_v38, %v12443_v27  ;;  %v9764_v13 = vld [vmem:[%s13880_s3 + $0xd0] sm:$0xff]  ;;  %8049 = vmatpush.bf16.msra.mxu2 %v9747_v6  ;;  %v9714_v62 = vld [vmem:[#allocation3 + $0x6c] sm:$0xff] }
 0x334   : > { %v6089_v28 = vrot.slane %v6087_v22, 4  ;;  %v6337_v57 = vrot.slane %v6335_v63, 4  ;;  %v6350_v49 = vrot.slane %v6348_v12, 4  ;;  %v12476_v9 = vrot.slane %v1925_v52, 5  ;;  %8226 = vmatpush.bf16.msra.mxu0 %v9764_v13 }
 0x335   : > { %7020 = vrot.lane.b32.xlu2 %v9713_v19, %s10061_s21  ;;  %7144 = vrot.lane.b32.xlu0 %v7123_v29, %s10061_s21  ;;  %v6309_v29 = vsel %vm10190_vm4, %v6304_v17, %v6308_v35  ;;  %v12468_v19 = vrot.slane %v6344_v4, 5  ;;  %v1918_v35 = vrot.slane %v1916_v39, 4  ;;  %v1921_v17 = vrot.slane %v1919_v36, 5 }
 0x336   : > { %7282 = vrot.lane.b32.xlu1 %v7264_v60, %s10061_s21  ;;  %v12457_v47 = vpop.f32.mrf.mxu1  ;;  %v6330_v60 = vshll.u32 %v12437_v51, 16  ;;  %v1931_v51 = vrot.slane %v1929_v43, 4  ;;  %v6090_v50 = vrot.slane %v5573_v3, 5  ;;  %v6340_v38 = vrot.slane %v6338_v8, 5 }
 0x337   : > { %v6368_v23 = vshll.u32 %v6157_v45, 16  ;;  %v6372_v11 = vshrl.u32 %v6157_v45, 16  ;;  %v7100_v63 = vunpack.c.l.b16 %v6081_v16  ;;  %v7239_v4 = vunpack.c.l.b16 %v6309_v29 }
 0x338   : > { %v6318_v12 = vrot.slane %v6317_v10, 4  ;;  %v6328_v31 = vrot.slane %v6327_v46, 4  ;;  %v6088_v39 = vsel %vm10953_vm14, %v9221_v25, %v6087_v22  ;;  %v6091_v36 = vsel %vm10953_vm14, %v6089_v28, %v6090_v50  ;;  %v9700_v25 = vld [vmem:[#allocation3 + $0x78] sm:$0xff] }
 0x339   : > { %v6359_v43 = vshrl.u32 %v6156_v18, 16  ;;  %v6362_v52 = vshll.u32 %v6156_v18, 16  ;;  %v6332_v8 = vrot.slane %v6330_v60, 5  ;;  %v1922_v3 = vor.u32 %v1921_v17, %v1918_v35  ;;  %v5552_v35 = vld [vmem:[#allocation3 + $0x7c] sm:$0xf] }
 0x33a   : > { %v1932_v16 = vor.u32 %v1931_v51, %v12476_v9  ;;  %v6351_v29 = vor.u32 %v6350_v49, %v12468_v19  ;;  %v7125_v10 = vpack.c.b16 %v7101_v61, %v7100_v63  ;;  %v6341_v46 = vor.u32 %v6340_v38, %v6337_v57  ;;  %v6181_v61 = vld [vmem:[#allocation3 + $0x74] sm:$0x1] }
 0x33b   : > { %v12495_v45 = vrot.slane %v6368_v23, 5  ;;  %v6374_v28 = vrot.slane %v6372_v11, 4  ;;  %v7102_v60 = vunpack.c.l.b16 %v6088_v39  ;;  %v6323_v6 = vsel %vm10190_vm4, %v6318_v12, %v12443_v27  ;;  %v9746_v27 = vld [vmem:[%s13880_s3 + $0x40] sm:$0xff]  ;;  %v9715_v12 = vld [vmem:[#allocation3 + $0x78] sm:$0xff] }
 0x33c   : > { %v6333_v49 = vsel %vm10190_vm4, %v6328_v31, %v6332_v8  ;;  %v6354_v13 = vshll.u32 %v6180_v33, 16  ;;  %v6361_v57 = vrot.slane %v6359_v43, 4  ;;  %v6364_v17 = vrot.slane %v6362_v52, 5  ;;  %v5974_v39 = vld [vmem:[#allocation3 + $0x78] sm:$0xe]  ;;  %8050 = vmatpush.bf16.msra.mxu2 %v9746_v27 }
 0x33d   : > { %7022 = vrot.lane.b32.xlu2 %v9714_v62, %s10061_s21  ;;  %7146 = vrot.lane.b32.xlu0 %v12427_v56, %s10061_s21  ;;  %v1923_v51 = vrot.slane %v1922_v3, 4  ;;  %v1933_v18 = vrot.slane %v1932_v16, 4  ;;  %v1937_v50 = vrot.slane %v1935_v20, 5  ;;  %v6352_v38 = vrot.slane %v6351_v29, 4  ;;  %v6159_v3 = vld [vmem:[#allocation3 + $0x7c] sm:$0xf] }
 0x33e   : > { %7284 = vrot.lane.b32.xlu1 %v7265_v2, %s10061_s21  ;;  %v12493_v22 = vpop.f32.mrf.mxu1  ;;  %v7103_v2 = vunpack.c.l.b16 %v6091_v36  ;;  %v6342_v23 = vrot.slane %v6341_v46, 4  ;;  %v6375_v11 = vor.u32 %v6374_v28, %v12495_v45  ;;  %v6383_v62 = vshrl.u32 %v6158_v32, 16  ;;  %v5574_v46 = vld [vmem:[#allocation3 + $0x80] sm:$0x1] }
 0x33f   : > { %v6883_v56 = vpop.permute.xlu0 %6882  ;;  %v6386_v63 = vshll.u32 %v6158_v32, 16  ;;  %v7266_v31 = vpack.c.b16 %v7239_v4, %v12454_v5  ;;  %v6094_v36 = vrot.slane %v5552_v35, 5  ;;  %v6356_v33 = vrot.slane %v6354_v13, 5 }
 0x340   : > { %v7400_v26 = vsel %vm3332_vm11, %v9700_v25, %v6883_v56  ;;  %v6378_v43 = vshll.u32 %v6181_v61, 16  ;;  %v7126_v34 = vpack.c.b16 %v7103_v2, %v7102_v60  ;;  %v7240_v20 = vunpack.c.l.b16 %v6323_v6  ;;  %v5358_v25 = vld [vmem:[#allocation3 + $0xc] sm:$0xe]  ;;  %v12529_v61 = vld [vmem:[#allocation3 + $0x88] sm:$0xf] }
 0x341   : > { %8012 = vmatmul.bf16.gmra.mxu1 %v7400_v26  ;;  %v6347_v52 = vsel %vm10190_vm4, %v6342_v23, %v12468_v19  ;;  %v6365_v8 = vor.u32 %v6364_v17, %v6361_v57  ;;  %v7241_v16 = vunpack.c.l.b16 %v6333_v49  ;;  %v1928_v5 = vsel %vm10190_vm4, %v1923_v51, %v12476_v9 }
 0x342   : > { %v1938_v4 = vsel %vm10190_vm4, %v1933_v18, %v1937_v50  ;;  %v6357_v29 = vsel %vm10190_vm4, %v6352_v38, %v6356_v33  ;;  %v9222_v28 = vrot.slane %v5974_v39, 9  ;;  %v6376_v56 = vrot.slane %v6375_v11, 4  ;;  %v12533_v50 = vld [vmem:[#allocation3 + $0x10] sm:$0xf] }
 0x343   : > { %v6388_v60 = vrot.slane %v6386_v63, 5  ;;  %v6096_v49 = vrot.slane %v6094_v36, 4  ;;  %v6380_v9 = vrot.slane %v6378_v43, 5  ;;  %v6392_v13 = vshll.u32 %v6159_v3, 16  ;;  %v6574_v63 = vld [vmem:[#allocation3 + $0x18] sm:$0xe] }
 0x344   : > { %v6396_v32 = vshrl.u32 %v6159_v3, 16  ;;  %v3042_v26 = vunpack.c.l.b16 %v1928_v5  ;;  %v3043_v2 = vunpack.c.l.b16 %v1938_v4  ;;  %v12527_v35 = vunpack.c.l.b16 %v6357_v29  ;;  %v5357_v5 = vld [vmem:[#allocation3] sm:$0xe] }
 0x345   : > { %7024 = vrot.lane.b32.xlu2 %v9715_v12, %s10061_s21  ;;  %7148 = vrot.lane.b32.xlu0 %v7125_v10, %s10061_s21  ;;  %v6385_v10 = vrot.slane %v6383_v62, 4  ;;  %v6366_v57 = vrot.slane %v6365_v8, 4  ;;  %v6097_v17 = vrot.slane %v5574_v46, 5  ;;  %v12531_v51 = vunpack.c.l.b16 %v6347_v52  ;;  %v9716_v12 = vld [vmem:[#allocation3 + $0x84] sm:$0xff] }
 0x346   : > { %7286 = vrot.lane.b32.xlu1 %v7266_v31, %s10061_s21  ;;  %v12523_v19 = vpop.f32.mrf.mxu1  ;;  %v9198_v18 = vrot.slane %v5358_v25, 9  ;;  %v5430_v38 = vrot.slane %v12533_v50, 5  ;;  %v6095_v27 = vsel %vm10953_vm14, %v9222_v28, %v6094_v36  ;;  %v6381_v11 = vsel %vm10190_vm4, %v6376_v56, %v6380_v9  ;;  %v9701_v28 = vld [vmem:[#allocation3 + $0x84] sm:$0xff] }
 0x347   : > { %v12525_v6 = vpop.permute.xlu2 %6886  ;;  %v6371_v23 = vsel %vm10190_vm4, %v6366_v57, %v12495_v45  ;;  %v6389_v62 = vor.u32 %v6388_v60, %v6385_v10  ;;  %v6098_v31 = vsel %vm10953_vm14, %v6096_v49, %v6097_v17  ;;  %v6101_v39 = vrot.slane %v12529_v61, 5  ;;  %v9908_v45 = vld [vmem:[#allocation3 + $0x4] sm:$0xf]  ;;  %v5575_v10 = vld [vmem:[#allocation3 + $0x8c] sm:$0x1] }
 0x348   : > { %v12546_v33 = vrot.slane %v6392_v13, 5  ;;  %v6398_v43 = vrot.slane %v6396_v32, 4  ;;  %v7267_v52 = vpack.c.b16 %v7241_v16, %v7240_v20  ;;  %v3059_v36 = vpack.c.b16 %v3043_v2, %v3042_v26  ;;  %v12560_v20 = vld [vmem:[#allocation3 + $0x14] sm:$0x1]  ;;  %v6160_v9 = vld [vmem:[#allocation3 + $0x84] sm:$0xf] }
 0x349   : > { %v7268_v8 = vpack.c.b16 %v12527_v35, %v12531_v51  ;;  %v5423_v3 = vrot.slane %v9908_v45, 5  ;;  %v12552_v4 = vunpack.c.l.b16 %v6371_v23  ;;  %v12558_v29 = vsel %vm10953_vm14, %v9198_v18, %v5430_v38  ;;  %v9910_v26 = vld [vmem:[#allocation3 + $0x8] sm:$0x1]  ;;  %v6182_v57 = vld [vmem:[#allocation3 + $0x80] sm:$0x1] }
 0x34a   : > { %v5433_v16 = vrot.slane %v12560_v20, 5  ;;  %v9229_v25 = vrot.slane %v6574_v63, 9  ;;  %v7105_v56 = vunpack.c.l.b16 %v6098_v31  ;;  %v12566_v60 = vunpack.c.l.b16 %v6381_v11  ;;  %v6161_v51 = vld [vmem:[#allocation3 + $0x88] sm:$0xf]  ;;  %v5975_v63 = vld [vmem:[#allocation3 + $0x84] sm:$0xe] }
 0x34b   : > { %v6390_v49 = vrot.slane %v6389_v62, 4  ;;  %v5426_v2 = vrot.slane %v9910_v26, 5  ;;  %v6103_v35 = vrot.slane %v6101_v39, 4  ;;  %v6399_v17 = vor.u32 %v6398_v43, %v12546_v33 }
 0x34c   : > { %v6641_v18 = vsel %vm10953_vm14, %v9229_v25, %v6640_v15  ;;  %v9197_v11 = vrot.slane %v5357_v5, 9  ;;  %v5425_v62 = vrot.slane %v5423_v3, 4  ;;  %v6104_v31 = vrot.slane %v5575_v10, 5  ;;  %v9717_v15 = vld [vmem:[#allocation3 + $0x90] sm:$0xff] }
 0x34d   : > { %7026 = vrot.lane.b32.xlu2 %v9716_v12, %s10061_s21  ;;  %7150 = vrot.lane.b32.xlu0 %v7126_v34, %s10061_s21  ;;  %v7104_v34 = vunpack.c.l.b16 %v6095_v27  ;;  %v12577_v12 = vld [vmem:[#allocation3 + $0x94] sm:$0xf]  ;;  %v6410_v45 = vshll.u32 %v6160_v9, 16  ;;  %v7310_v43 = vunpack.c.l.b16 %v6641_v18  ;;  %v6402_v24 = vshll.u32 %v6182_v57, 16 }
 0x34e   : > { %7288 = vrot.lane.b32.xlu1 %v7267_v52, %s10061_s21  ;;  %v12564_v46 = vpop.f32.mrf.mxu1  ;;  %v6407_v52 = vshrl.u32 %v6160_v9, 16  ;;  %v6416_v53 = vshll.u32 %v6161_v51, 16  ;;  %v6420_v30 = vshrl.u32 %v6161_v51, 16  ;;  %v9223_v25 = vrot.slane %v5975_v63, 9  ;;  %v6163_v63 = vld [vmem:[#allocation3 + $0x94] sm:$0xf] }
 0x34f   : > { %v6885_v13 = vpop.permute.xlu1 %6884  ;;  %v3139_v32 = vpop.permute.xlu2 %3138  ;;  %v7127_v26 = vpack.c.b16 %v7105_v56, %v7104_v34  ;;  %v6108_v5 = vrot.slane %v12577_v12, 5  ;;  %v12587_v10 = vpack.c.b16 %v7311_v54, %v7310_v43  ;;  %v5424_v34 = vsel %vm10953_vm14, %v9197_v11, %v5423_v3  ;;  %v9702_v12 = vld [vmem:[#allocation3 + $0x90] sm:$0xff] }
 0x350   : > { %v3523_v27 = vsel %vm3332_vm11, %v3059_v36, %v3139_v32  ;;  %v7404_v23 = vsel %vm3332_vm11, %v9701_v28, %v6885_v13  ;;  %v6105_v36 = vsel %vm10953_vm14, %v6103_v35, %v6104_v31  ;;  %v9755_v28 = vld [vmem:[%s13880_s3 + $0x88] sm:$0xff]  ;;  %v5427_v56 = vsel %vm10953_vm14, %v5425_v62, %v5426_v2  ;;  %v12604_v2 = vld [vmem:[#allocation3 + $0xc] sm:$0xf] }
 0x351   : > { %4190 = vmatmul.bf16.gmra.mxu2 %v3523_v27  ;;  %8017 = vmatmul.bf16.gmra.mxu1 %v7404_v23  ;;  %v6395_v9 = vsel %vm10190_vm4, %v6390_v49, %v12546_v33  ;;  %v5432_v13 = vrot.slane %v5430_v38, 4  ;;  %v6102_v37 = vsel %vm10953_vm14, %v9223_v25, %v6101_v39  ;;  %v6400_v54 = vrot.slane %v6399_v17, 4  ;;  %v5576_v49 = vld [vmem:[#allocation3 + $0x98] sm:$0x1]  ;;  %v5976_v27 = vld [vmem:[#allocation3 + $0x90] sm:$0xe] }
 0x352   : > { %v6409_v3 = vrot.slane %v6407_v52, 4  ;;  %v6412_v32 = vrot.slane %v6410_v45, 5  ;;  %v7107_v50 = vunpack.c.l.b16 %v6105_v36  ;;  %v7269_v38 = vpack.c.b16 %v12566_v60, %v12552_v4  ;;  %8138 = vmatpush.bf16.msra.mxu3 %v9755_v28  ;;  %v12617_v23 = vld [vmem:[#allocation3 + $0xa0] sm:$0xf]  ;;  %v2563_v31 = vld [vmem:[#allocation2 + $0xcc] sm:$0xe] }
 0x353   : > { %v12611_v35 = vrot.slane %v6416_v53, 5  ;;  %v6422_v61 = vrot.slane %v6420_v30, 4  ;;  %v6894_v57 = vunpack.c.l.b16 %v5424_v34  ;;  %v6895_v39 = vunpack.c.l.b16 %v5427_v56  ;;  %v6183_v45 = vld [vmem:[#allocation3 + $0x8c] sm:$0x1]  ;;  %v9911_v53 = vld [vmem:[#allocation2 + $0xd0] sm:$0xf] }
 0x354   : > { %v6110_v17 = vrot.slane %v6108_v5, 4  ;;  %v6404_v51 = vrot.slane %v6402_v24, 5  ;;  %v7106_v18 = vunpack.c.l.b16 %v6102_v37  ;;  %v6896_v11 = vunpack.c.l.b16 %v12558_v29  ;;  %v9763_v25 = vld [vmem:[%s13880_s3 + $0xc8] sm:$0xff]  ;;  %v9718_v28 = vld [vmem:[#allocation3 + $0x9c] sm:$0xff] }
 0x355   : > { %7028 = vrot.lane.b32.xlu2 %v9717_v15, %s10061_s21  ;;  %7152 = vrot.lane.b32.xlu0 %v7127_v26, %s10061_s21  ;;  %v5582_v4 = vshrl.u32 %v12604_v2, 16  ;;  %v6111_v60 = vrot.slane %v5576_v49, 5  ;;  %v6413_v62 = vor.u32 %v6412_v32, %v6409_v3  ;;  %v12627_v24 = vsel %vm10953_vm14, %v5432_v13, %v5433_v16  ;;  %v6162_v56 = vld [vmem:[#allocation3 + $0x90] sm:$0xf] }
 0x356   : > { %7290 = vrot.lane.b32.xlu1 %v7268_v8, %s10061_s21  ;;  %v12607_v33 = vpop.f32.mrf.mxu1  ;;  %v12615_v8 = vunpack.c.l.b16 %v6395_v9  ;;  %v6405_v30 = vsel %vm10190_vm4, %v6400_v54, %v6404_v51  ;;  %v7128_v52 = vpack.c.b16 %v7107_v50, %v7106_v18  ;;  %v6423_v43 = vor.u32 %v6422_v61, %v12611_v35  ;;  %8227 = vmatpush.bf16.msra.mxu0 %v9763_v25 }
 0x357   : > { %v8844_v26 = vrot.slane %v2563_v31, 9  ;;  %v2719_v15 = vrot.slane %v9911_v53, 5  ;;  %v6926_v36 = vpack.c.b16 %v6895_v39, %v6894_v57  ;;  %v9224_v20 = vrot.slane %v5976_v27, 9  ;;  %v7007_v3 = vpop.permute.xlu2 %7006  ;;  %v5977_v39 = vld [vmem:[#allocation3 + $0x9c] sm:$0xe] }
 0x358   : > { %v6112_v16 = vsel %vm10953_vm14, %v6110_v17, %v6111_v60  ;;  %v6115_v34 = vrot.slane %v12617_v23, 5  ;;  %v6440_v9 = vshll.u32 %v6163_v63, 16  ;;  %v6444_v13 = vshrl.u32 %v6163_v63, 16  ;;  %v5577_v23 = vld [vmem:[#allocation3 + $0xa4] sm:$0x1] }
 0x359   : > { %v2720_v37 = vsel %vm10953_vm14, %v8844_v26, %v2719_v15  ;;  %v2721_v54 = vrot.slane %v2719_v15, 4  ;;  %v7247_v32 = vunpack.c.l.b16 %v6405_v30  ;;  %v6426_v50 = vshll.u32 %v6183_v45, 16  ;;  %v12653_v31 = vld [vmem:[#allocation3 + $0xac] sm:$0xf] }
 0x35a   : > { %v6897_v49 = vunpack.c.l.b16 %v12627_v24  ;;  %v3314_v61 = vunpack.c.l.b16 %v2720_v37  ;;  %v6109_v57 = vsel %vm10953_vm14, %v9224_v20, %v6108_v5  ;;  %v6414_v17 = vrot.slane %v6413_v62, 4  ;;  %v9770_v26 = vld [vmem:[%s13880_s3 + $0x100] sm:$0xff] }
 0x35b   : > { %v6424_v51 = vrot.slane %v6423_v43, 4  ;;  %v2723_v18 = vsel %vm10953_vm14, %v2721_v54, %v2722_v0  ;;  %v7109_v27 = vunpack.c.l.b16 %v6112_v16  ;;  %v6117_v60 = vrot.slane %v6115_v34, 4  ;;  %v9719_v16 = vld [vmem:[#allocation3 + $0xa8] sm:$0xff]  ;;  %8317 = vmatpush.bf16.msra.mxu1 %v9770_v26 }
 0x35c   : > { %v6431_v30 = vshrl.u32 %v6162_v56, 16  ;;  %v3315_v24 = vunpack.c.l.b16 %v2723_v18  ;;  %v6434_v5 = vshll.u32 %v6162_v56, 16  ;;  %v12655_v62 = vrot.slane %v6440_v9, 5 }
 0x35d   : > { %7030 = vrot.lane.b32.xlu2 %v9718_v28, %s10061_s21  ;;  %7154 = vrot.lane.b32.xlu0 %v7128_v52, %s10061_s21  ;;  %v6446_v52 = vrot.slane %v6444_v13, 4  ;;  %v7108_v59 = vunpack.c.l.b16 %v6109_v57  ;;  %v9225_v45 = vrot.slane %v5977_v39, 9  ;;  %v6428_v0 = vrot.slane %v6426_v50, 5  ;;  %v6165_v28 = vld [vmem:[#allocation3 + $0xa0] sm:$0xf] }
 0x35e   : > { %7292 = vrot.lane.b32.xlu1 %v7269_v38, %s10061_s21  ;;  %v7424_v38 = vsel %vm3332_vm11, %v6926_v36, %v7007_v3  ;;  %v12651_v63 = vpop.f32.mrf.mxu1  ;;  %v3331_v43 = vpack.c.b16 %v3315_v24, %v3314_v61  ;;  %v7408_v53 = vsel %vm3332_vm11, %v9702_v12, %v12525_v6  ;;  %v7270_v15 = vpack.c.b16 %v7247_v32, %v12615_v8  ;;  %v6184_v6 = vld [vmem:[#allocation3 + $0x98] sm:$0x1] }
 0x35f   : > { %v6118_v25 = vrot.slane %v5577_v23, 5  ;;  %v6419_v36 = vsel %vm10190_vm4, %v6414_v17, %v12611_v35  ;;  %v7129_v20 = vpack.c.b16 %v7109_v27, %v7108_v59  ;;  %v6116_v56 = vsel %vm10953_vm14, %v9225_v45, %v6115_v34  ;;  %v6164_v34 = vld [vmem:[#allocation3 + $0x9c] sm:$0xf]  ;;  %v5578_v17 = vld [vmem:[#allocation3 + $0xb0] sm:$0x1] }
 0x360   : > { %v6429_v9 = vsel %vm10190_vm4, %v6424_v51, %v6428_v0  ;;  %v6122_v13 = vrot.slane %v12653_v31, 5  ;;  %9196 = vmatmul.msk.bf16.gmra.mxu0 %vm3332_vm11, %v3331_v43  ;;  %v6433_v37 = vrot.slane %v6431_v30, 4  ;;  %v6436_v35 = vrot.slane %v6434_v5, 5  ;;  %v5978_v51 = vld [vmem:[#allocation3 + $0xa8] sm:$0xe] }
 0x361   : > { %8051 = vmatmul.bf16.vlgmr.msra.gmra.mxu2 %v7424_v38  ;;  %8022 = vmatmul.bf16.gmra.mxu1 %v7408_v53  ;;  %v6119_v8 = vsel %vm10953_vm14, %v6117_v60, %v6118_v25  ;;  %v6447_v54 = vor.u32 %v6446_v52, %v12655_v62  ;;  %v6464_v3 = vshll.u32 %v6165_v28, 16  ;;  %v6468_v32 = vshrl.u32 %v6165_v28, 16  ;;  %v9912_v27 = vld [vmem:[#allocation3 + $0x10] sm:$0xf]  ;;  %v12687_v5 = vld [vmem:[#allocation3 + $0xb8] sm:$0xf] }
 0x362   : > { %v12679_v50 = vrot.slane %v5582_v4, 4  ;;  %v5585_v61 = vshll.u32 %v12604_v2, 16  ;;  %v7249_v57 = vunpack.c.l.b16 %v6429_v9  ;;  %v6927_v39 = vpack.c.b16 %v6897_v49, %v6896_v11  ;;  %v9754_v0 = vld [vmem:[%s13880_s3 + $0x80] sm:$0xff]  ;;  %v5979_v9 = vld [vmem:[#allocation3 + $0xb4] sm:$0xe] }
 0x363   : > { %v6450_v18 = vshll.u32 %v6184_v6, 16  ;;  %v5591_v23 = vshll.u32 %v9912_v27, 16  ;;  %v7110_v60 = vunpack.c.l.b16 %v6116_v56  ;;  %v7111_v30 = vunpack.c.l.b16 %v6119_v8  ;;  %8139 = vmatpush.bf16.msra.mxu3 %v9754_v0  ;;  %v7009_v8 = vpop.permute.xlu2 %7008 }
 0x364   : > { %v7248_v24 = vunpack.c.l.b16 %v6419_v36  ;;  %v6124_v38 = vrot.slane %v6122_v13, 4  ;;  %v6437_v4 = vor.u32 %v6436_v35, %v6433_v37  ;;  %v6448_v31 = vrot.slane %v6447_v54, 4  ;;  %v6167_v36 = vld [vmem:[#allocation3 + $0xac] sm:$0xf]  ;;  %v6185_v35 = vld [vmem:[#allocation3 + $0xa4] sm:$0x1] }
 0x365   : > { %7156 = vrot.lane.b32.xlu0 %v7129_v20, %s10061_s21  ;;  %7032 = vrot.lane.b32.xlu2 %v9719_v16, %s10061_s21  ;;  %v6455_v52 = vshrl.u32 %v6164_v34, 16  ;;  %v6458_v59 = vshll.u32 %v6164_v34, 16  ;;  %v9226_v45 = vrot.slane %v5978_v51, 9  ;;  %v6125_v29 = vrot.slane %v5578_v17, 5  ;;  %v9720_v20 = vld [vmem:[#allocation3 + $0xb4] sm:$0xff] }
 0x366   : > { %7294 = vrot.lane.b32.xlu1 %v7270_v15, %s10061_s21  ;;  %v12685_v12 = vpop.f32.mrf.mxu1  ;;  %v12689_v11 = vrot.slane %v6464_v3, 5  ;;  %v6470_v49 = vrot.slane %v6468_v32, 4  ;;  %v7271_v43 = vpack.c.b16 %v7249_v57, %v7248_v24  ;;  %v6452_v26 = vrot.slane %v6450_v18, 5  ;;  %v9913_v3 = vld [vmem:[#allocation3 + $0x1c] sm:$0xf] }
 0x367   : > { %v12694_v53 = vrot.slane %v5591_v23, 5  ;;  %v13975_v15 = vshrl.u32 %v12207_v40, 16  ;;  %v7130_v28 = vpack.c.b16 %v7111_v30, %v7110_v60  ;;  %v6123_v16 = vsel %vm10953_vm14, %v9226_v45, %v6122_v13  ;;  %v6166_v57 = vld [vmem:[#allocation3 + $0xa8] sm:$0xf]  ;;  %v9703_v18 = vld [vmem:[#allocation3 + $0x9c] sm:$0xff] }
 0x368   : > { %v6126_v56 = vsel %vm10953_vm14, %v6124_v38, %v6125_v29  ;;  %v6129_v6 = vrot.slane %v12687_v5, 5  ;;  %v6438_v37 = vrot.slane %v6437_v4, 4  ;;  %v6453_v40 = vsel %vm10190_vm4, %v6448_v31, %v6452_v26  ;;  %v5579_v31 = vld [vmem:[#allocation3 + $0xbc] sm:$0x1] }
 0x369   : > { %v12698_v25 = vrot.slane %v13975_v15, 4  ;;  %v6457_v54 = vrot.slane %v6455_v52, 4  ;;  %v6460_v34 = vrot.slane %v6458_v59, 5  ;;  %v6471_v13 = vor.u32 %v6470_v49, %v12689_v11  ;;  %v5359_v59 = vld [vmem:[#allocation3 + $0x18] sm:$0xe] }
 0x36a   : > { %v5437_v32 = vrot.slane %v9913_v3, 5  ;;  %v6488_v17 = vshll.u32 %v6167_v36, 16  ;;  %v6492_v51 = vshrl.u32 %v6167_v36, 16  ;;  %v7112_v27 = vunpack.c.l.b16 %v6123_v16  ;;  %v9914_v16 = vld [vmem:[#allocation3 + $0x20] sm:$0x1] }
 0x36b   : > { %v7113_v23 = vunpack.c.l.b16 %v6126_v56  ;;  %v6443_v60 = vsel %vm10190_vm4, %v6438_v37, %v12655_v62  ;;  %v9227_v30 = vrot.slane %v5979_v9, 9  ;;  %v7428_v38 = vsel %vm3332_vm11, %v6927_v39, %v7009_v8  ;;  %v6169_v9 = vld [vmem:[#allocation3 + $0xb8] sm:$0xf]  ;;  %v6186_v3 = vld [vmem:[#allocation3 + $0xb0] sm:$0x1] }
 0x36c   : > { %v7251_v4 = vunpack.c.l.b16 %v6453_v40  ;;  %v6131_v5 = vrot.slane %v6129_v6, 4  ;;  %v6474_v52 = vshll.u32 %v6185_v35, 16  ;;  %v6461_v49 = vor.u32 %v6460_v34, %v6457_v54  ;;  %v9653_v54 = vld [vmem:[#allocation2 + $0xcc] sm:$0xff] }
 0x36d   : > { %7158 = vrot.lane.b32.xlu0 %v7130_v28, %s10061_s21  ;;  %7034 = vrot.lane.b32.xlu2 %v9720_v20, %s10061_s21  ;;  %v6479_v0 = vshrl.u32 %v6166_v57, 16  ;;  %v7250_v26 = vunpack.c.l.b16 %v6443_v60  ;;  %v6472_v15 = vrot.slane %v6471_v13, 4  ;;  %v12718_v62 = vrot.slane %v6488_v17, 5 }
 0x36e   : > { %7296 = vrot.lane.b32.xlu1 %v7271_v43, %s10061_s21  ;;  %v12715_v45 = vpop.f32.mrf.mxu1  ;;  %v6482_v43 = vshll.u32 %v6166_v57, 16  ;;  %v6494_v36 = vrot.slane %v6492_v51, 4  ;;  %v6132_v28 = vrot.slane %v5579_v31, 5  ;;  %v9199_v39 = vrot.slane %v5359_v59, 9 }
 0x36f   : > { %v6889_v24 = vpop.permute.xlu0 %6888  ;;  %v5439_v20 = vrot.slane %v5437_v32, 4  ;;  %v5440_v56 = vrot.slane %v9914_v16, 5  ;;  %v7131_v8 = vpack.c.b16 %v7113_v23, %v7112_v27  ;;  %v7272_v37 = vpack.c.b16 %v7251_v4, %v7250_v26  ;;  %v6168_v27 = vld [vmem:[#allocation3 + $0xb4] sm:$0xf] }
 0x370   : > { %v7412_v29 = vsel %vm3332_vm11, %v9703_v18, %v6889_v24  ;;  %v6130_v40 = vsel %vm10953_vm14, %v9227_v30, %v6129_v6  ;;  %v6476_v35 = vrot.slane %v6474_v52, 5  ;;  %v6133_v34 = vsel %vm10953_vm14, %v6131_v5, %v6132_v28 }
 0x371   : > { %8056 = vmatmul.bf16.gmra.mxu2 %v7428_v38  ;;  %8027 = vmatmul.bf16.gmra.mxu1 %v7412_v29  ;;  %v6462_v13 = vrot.slane %v6461_v49, 4  ;;  %v6481_v57 = vrot.slane %v6479_v0, 4  ;;  %v6484_v17 = vrot.slane %v6482_v43, 5  ;;  %v6495_v18 = vor.u32 %v6494_v36, %v12718_v62 }
 0x372   : > { %v6477_v51 = vsel %vm10190_vm4, %v6472_v15, %v6476_v35  ;;  %v6512_v23 = vshll.u32 %v6169_v9, 16  ;;  %v6516_v60 = vshrl.u32 %v6169_v9, 16  ;;  %v5587_v6 = vrot.slane %v5585_v61, 5  ;;  %v9762_v15 = vld [vmem:[%s13880_s3 + $0xc0] sm:$0xff]  ;;  %v6187_v35 = vld [vmem:[#allocation3 + $0xbc] sm:$0x1] }
 0x373   : > { %v5598_v30 = vor.u32 %v12698_v25, %v12694_v53  ;;  %v5438_v24 = vsel %vm10953_vm14, %v9199_v39, %v5437_v32  ;;  %v5441_v38 = vsel %vm10953_vm14, %v5439_v20, %v5440_v56  ;;  %v7114_v31 = vunpack.c.l.b16 %v6130_v40  ;;  %8228 = vmatpush.bf16.msra.mxu0 %v9762_v15  ;;  %v5360_v15 = vld [vmem:[#allocation3 + $0x24] sm:$0xe] }
 0x374   : > { %v7115_v5 = vunpack.c.l.b16 %v6133_v34  ;;  %v6467_v52 = vsel %vm10190_vm4, %v6462_v13, %v12689_v11  ;;  %v6498_v59 = vshll.u32 %v6186_v3, 16  ;;  %v7253_v61 = vunpack.c.l.b16 %v6477_v51 }
 0x375   : > { %7160 = vrot.lane.b32.xlu0 %v7131_v8, %s10061_s21  ;;  %v6485_v25 = vor.u32 %v6484_v17, %v6481_v57  ;;  %v6503_v49 = vshrl.u32 %v6168_v27, 16  ;;  %v6496_v32 = vrot.slane %v6495_v18, 4  ;;  %v6506_v0 = vshll.u32 %v6168_v27, 16  ;;  %v9915_v57 = vld [vmem:[#allocation3 + $0x1c] sm:$0xf]  ;;  %v9704_v27 = vld [vmem:[#allocation3 + $0xa8] sm:$0xff] }
 0x376   : > { %7298 = vrot.lane.b32.xlu1 %v7272_v37, %s10061_s21  ;;  %v12740_v29 = vpop.f32.mrf.mxu1  ;;  %v12743_v43 = vrot.slane %v6512_v23, 5  ;;  %v6518_v26 = vrot.slane %v6516_v60, 4  ;;  %v7252_v36 = vunpack.c.l.b16 %v6467_v52  ;;  %v5588_v11 = vor.u32 %v5587_v6, %v12679_v50  ;;  %v9916_v6 = vld [vmem:[#allocation3 + $0x28] sm:$0xf] }
 0x377   : > { %v3283_v4 = vpop.permute.xlu0 %3282  ;;  %v5599_v28 = vrot.slane %v5598_v30, 4  ;;  %v6899_v39 = vunpack.c.l.b16 %v5441_v38  ;;  %v7132_v20 = vpack.c.b16 %v7115_v5, %v7114_v31  ;;  %v6500_v16 = vrot.slane %v6498_v59, 5 }
 0x378   : > { %v3587_v2 = vsel %vm3332_vm11, %v9653_v54, %v3283_v4  ;;  %v7273_v56 = vpack.c.b16 %v7253_v61, %v7252_v36  ;;  %v13976_v9 = vshll.u32 %v12235_v21, 16  ;;  %v6898_v37 = vunpack.c.l.b16 %v5438_v24  ;;  %v7011_v54 = vpop.permute.xlu2 %7010  ;;  %v5535_v24 = vld [vmem:[#allocation3 + $0x18] sm:$0xf] }
 0x379   : > { %4279 = vmatmul.bf16.gmra.mxu3 %v3587_v2  ;;  %v6486_v40 = vrot.slane %v6485_v25, 4  ;;  %v6501_v34 = vsel %vm10190_vm4, %v6496_v32, %v6500_v16  ;;  %v6505_v13 = vrot.slane %v6503_v49, 4  ;;  %v6508_v50 = vrot.slane %v6506_v0, 5 }
 0x37a   : > { %v5603_v8 = vrot.slane %v13976_v9, 5  ;;  %v6519_v3 = vor.u32 %v6518_v26, %v12743_v43  ;;  %v5619_v17 = vshrl.u32 %v9915_v57, 16  ;;  %v5589_v51 = vrot.slane %v5588_v11, 4  ;;  %v9917_v9 = vld [vmem:[#allocation3 + $0x2c] sm:$0x1] }
 0x37b   : > { %v6928_v18 = vpack.c.b16 %v6899_v39, %v6898_v37  ;;  %v6491_v23 = vsel %vm10190_vm4, %v6486_v40, %v12718_v62  ;;  %v6522_v60 = vshll.u32 %v6187_v35, 16  ;;  %v5444_v30 = vrot.slane %v9916_v6, 5 }
 0x37c   : > { %v5604_v21 = vsel %vm10190_vm4, %v5599_v28, %v5603_v8  ;;  %v5615_v38 = vshll.u32 %v9915_v57, 16  ;;  %v7255_v52 = vunpack.c.l.b16 %v6501_v34  ;;  %v5594_v59 = vsel %vm10190_vm4, %v5589_v51, %v12694_v53  ;;  %v9918_v51 = vld [vmem:[#allocation3 + $0x20] sm:$0x1] }
 0x37d   : > { %7162 = vrot.lane.b32.xlu0 %v7132_v20, %s10061_s21  ;;  %v7432_v5 = vsel %vm3332_vm11, %v6928_v18, %v7011_v54  ;;  %v6509_v61 = vor.u32 %v6508_v50, %v6505_v13  ;;  %v6520_v62 = vrot.slane %v6519_v3, 4  ;;  %v7039_v25 = vunpack.c.l.b16 %v5604_v21 }
 0x37e   : > { %7300 = vrot.lane.b32.xlu1 %v7273_v56, %s10061_s21  ;;  %v12761_v4 = vpop.f32.mrf.mxu1  ;;  %v7254_v49 = vunpack.c.l.b16 %v6491_v23  ;;  %v5606_v32 = vshrl.u32 %v5535_v24, 16  ;;  %v5609_v0 = vshll.u32 %v5535_v24, 16  ;;  %v6524_v26 = vrot.slane %v6522_v60, 5 }
 0x37f   : > { %v5446_v36 = vrot.slane %v5444_v30, 4  ;;  %v5617_v11 = vrot.slane %v5615_v38, 5  ;;  %v5621_v28 = vrot.slane %v5619_v17, 4  ;;  %v7038_v39 = vunpack.c.l.b16 %v5594_v59  ;;  %v7135_v16 = vpop.permute.xlu0 %7134 }
 0x380   : > { %v6891_v31 = vpop.permute.xlu1 %6890  ;;  %v7274_v20 = vpack.c.b16 %v7255_v52, %v7254_v49  ;;  %v6510_v56 = vrot.slane %v6509_v61, 4  ;;  %v6525_v53 = vsel %vm10190_vm4, %v6520_v62, %v6524_v26  ;;  %v5447_v8 = vrot.slane %v9917_v9, 5  ;;  %v7013_v38 = vpop.permute.xlu2 %7012  ;;  %v5537_v49 = vld [vmem:[#allocation3 + $0x24] sm:$0xf] }
 0x381   : > { %v7416_v2 = vsel %vm3332_vm11, %v9704_v27, %v6891_v31  ;;  %8061 = vmatmul.bf16.gmra.mxu2 %v7432_v5  ;;  %v7070_v37 = vpack.c.b16 %v7039_v25, %v7038_v39  ;;  %v9200_v40 = vrot.slane %v5360_v15, 9  ;;  %v5608_v35 = vrot.slane %v5606_v32, 4  ;;  %v9919_v5 = vld [vmem:[#allocation3 + $0x28] sm:$0xf]  ;;  %v9920_v25 = vld [vmem:[#allocation3 + $0x34] sm:$0xf] }
 0x382   : > { %8032 = vmatmul.bf16.gmra.mxu1 %v7416_v2  ;;  %v6515_v54 = vsel %vm10190_vm4, %v6510_v56, %v12743_v43  ;;  %v5448_v34 = vsel %vm10953_vm14, %v5446_v36, %v5447_v8  ;;  %v5611_v13 = vrot.slane %v5609_v0, 5  ;;  %v5622_v50 = vor.u32 %v5621_v28, %v5617_v11  ;;  %v9705_v2 = vld [vmem:[#allocation3 + $0xb4] sm:$0xff] }
 0x383   : > { %v7488_v3 = vsel %vm3332_vm11, %v7070_v37, %v7135_v16  ;;  %v7257_v17 = vunpack.c.l.b16 %v6525_v53  ;;  %v5625_v21 = vshll.u32 %v9918_v51, 16  ;;  %v5445_v18 = vsel %vm10953_vm14, %v9200_v40, %v5444_v30  ;;  %v5361_v16 = vld [vmem:[#allocation3 + $0x30] sm:$0xe] }
 0x384   : > { %v7256_v27 = vunpack.c.l.b16 %v6515_v54  ;;  %v6901_v23 = vunpack.c.l.b16 %v5448_v34  ;;  %v5612_v60 = vor.u32 %v5611_v13, %v5608_v35  ;;  %v5623_v43 = vrot.slane %v5622_v50, 4  ;;  %v9921_v35 = vld [vmem:[#allocation3 + $0x38] sm:$0x1] }
 0x385   : > { %v6900_v24 = vunpack.c.l.b16 %v5445_v18  ;;  %v5627_v31 = vrot.slane %v5625_v21, 5  ;;  %v5643_v52 = vshrl.u32 %v9919_v5, 16  ;;  %v5451_v30 = vrot.slane %v9920_v25, 5  ;;  %v9722_v50 = vld [vmem:[#allocation3 + $0x18] sm:$0xff] }
 0x386   : > { %7302 = vrot.lane.b32.xlu1 %v7274_v20, %s10061_s21  ;;  %v12777_v57 = vpop.f32.mrf.mxu1  ;;  %v7275_v6 = vpack.c.b16 %v7257_v17, %v7256_v27  ;;  %v5613_v61 = vrot.slane %v5612_v60, 4  ;;  %v5639_v32 = vshll.u32 %v9919_v5, 16  ;;  %v5630_v20 = vshrl.u32 %v5537_v49, 16 }
 0x387   : > { %v6929_v59 = vpack.c.b16 %v6901_v23, %v6900_v24  ;;  %v5628_v62 = vsel %vm10190_vm4, %v5623_v43, %v5627_v31  ;;  %v5453_v56 = vrot.slane %v5451_v30, 4  ;;  %v5633_v53 = vshll.u32 %v5537_v49, 16  ;;  %v7137_v40 = vpop.permute.xlu0 %7136  ;;  %v9922_v23 = vld [vmem:[#allocation3 + $0x2c] sm:$0x1] }
 0x388   : > { %v5618_v28 = vsel %vm10190_vm4, %v5613_v61, %v5617_v11  ;;  %v7041_v39 = vunpack.c.l.b16 %v5628_v62  ;;  %v5641_v9 = vrot.slane %v5639_v32, 5  ;;  %v5645_v8 = vrot.slane %v5643_v52, 4  ;;  %v7015_v52 = vpop.permute.xlu2 %7014  ;;  %v9924_v32 = vld [vmem:[#allocation3 + $0x40] sm:$0xf] }
 0x389   : > { %8140 = vmatmul.bf16.vlgmr.msra.gmra.mxu3 %v7488_v3  ;;  %v7436_v15 = vsel %vm3332_vm11, %v6929_v59, %v7013_v38  ;;  %v7040_v37 = vunpack.c.l.b16 %v5618_v28  ;;  %v5454_v54 = vrot.slane %v9921_v35, 5  ;;  %v9201_v13 = vrot.slane %v5361_v16, 9  ;;  %v9925_v16 = vld [vmem:[#allocation3 + $0x28] sm:$0xf] }
 0x38a   : > { %v5632_v17 = vrot.slane %v5630_v20, 4  ;;  %v5635_v11 = vrot.slane %v5633_v53, 5  ;;  %v5646_v51 = vor.u32 %v5645_v8, %v5641_v9  ;;  %v5649_v60 = vshll.u32 %v9922_v23, 16  ;;  %v5362_v8 = vld [vmem:[#allocation3 + $0x3c] sm:$0xe] }
 0x38b   : > { %v7071_v34 = vpack.c.b16 %v7041_v39, %v7040_v37  ;;  %v5455_v3 = vsel %vm10953_vm14, %v5453_v56, %v5454_v54  ;;  %v6647_v56 = vrot.slane %v9925_v16, 5  ;;  %v9929_v16 = vld [vmem:[#allocation3 + $0x40] sm:$0xf] }
 0x38c   : > { %v6903_v24 = vunpack.c.l.b16 %v5455_v3  ;;  %v5636_v38 = vor.u32 %v5635_v11, %v5632_v17  ;;  %v5647_v31 = vrot.slane %v5646_v51, 4  ;;  %v5651_v59 = vrot.slane %v5649_v60, 5 }
 0x38d   : > { %v7492_v27 = vsel %vm3332_vm11, %v7071_v34, %v7137_v40  ;;  %v9202_v51 = vrot.slane %v5362_v8, 9 }
 0x38e   : > { %7304 = vrot.lane.b32.xlu1 %v7275_v6, %s10061_s21  ;;  %v12784_v0 = vpop.f32.mrf.mxu1  ;;  %v5452_v6 = vsel %vm10953_vm14, %v9201_v13, %v5451_v30  ;;  %v5637_v25 = vrot.slane %v5636_v38, 4  ;;  %v5652_v49 = vsel %vm10190_vm4, %v5647_v31, %v5651_v59 }
 0x38f   : > { %v6902_v5 = vunpack.c.l.b16 %v5452_v6  ;;  %v7043_v20 = vunpack.c.l.b16 %v5652_v49  ;;  %v7139_v13 = vpop.permute.xlu0 %7138  ;;  %v9927_v6 = vld [vmem:[#allocation3 + $0x2c] sm:$0x1] }
 0x390   : > { %v6893_v26 = vpop.permute.xlu1 %6892  ;;  %v5642_v39 = vsel %vm10190_vm4, %v5637_v25, %v5641_v9  ;;  %v6575_v9 = vld [vmem:[#allocation3 + $0x24] sm:$0xe] }
 0x391   : > { %v7420_v36 = vsel %vm3332_vm11, %v9705_v2, %v6893_v26  ;;  %8066 = vmatmul.bf16.gmra.mxu2 %v7436_v15  ;;  %v9923_v2 = vld [vmem:[#allocation3 + $0x34] sm:$0xf]  ;;  %v6930_v62 = vpack.c.b16 %v6903_v24, %v6902_v5  ;;  %v5458_v26 = vrot.slane %v9924_v32, 5  ;;  %v5539_v15 = vld [vmem:[#allocation3 + $0x30] sm:$0xf]  ;;  %v7042_v34 = vunpack.c.l.b16 %v5642_v39 }
 0x392   : > { %8037 = vmatmul.bf16.gmra.mxu1 %v7420_v36  ;;  %v5667_v61 = vshrl.u32 %v9923_v2, 16  ;;  %v5663_v36 = vshll.u32 %v9923_v2, 16  ;;  %v5654_v53 = vshrl.u32 %v5539_v15, 16  ;;  %v5657_v40 = vshll.u32 %v5539_v15, 16  ;;  %v9928_v5 = vld [vmem:[#allocation3 + $0x38] sm:$0x1] }
 0x393   : > { %v7440_v30 = vsel %vm3332_vm11, %v6930_v62, %v7015_v52  ;;  %v5460_v37 = vrot.slane %v5458_v26, 4  ;;  %v7072_v11 = vpack.c.b16 %v7043_v20, %v7042_v34  ;;  %v6650_v24 = vrot.slane %v9927_v6, 5 }
 0x394   : > { %v5665_v35 = vrot.slane %v5663_v36, 5  ;;  %v5669_v54 = vrot.slane %v5667_v61, 4  ;;  %v5656_v60 = vrot.slane %v5654_v53, 4  ;;  %v5673_v52 = vshll.u32 %v9928_v5, 16  ;;  %v9932_v5 = vld [vmem:[#allocation3 + $0x50] sm:$0x1] }
 0x395   : > { %v7496_v31 = vsel %vm3332_vm11, %v7072_v11, %v7139_v13  ;;  %v5459_v2 = vsel %vm10953_vm14, %v9202_v51, %v5458_v26  ;;  %v9230_v61 = vrot.slane %v6575_v9, 9  ;;  %v5691_v53 = vshrl.u32 %v9929_v16, 16  ;;  %v5541_v13 = vld [vmem:[#allocation3 + $0x3c] sm:$0xf]  ;;  %v9931_v9 = vld [vmem:[#allocation3 + $0x34] sm:$0xf] }
 0x396   : > { %v12792_v21 = vpop.f32.mrf.mxu1  ;;  %v6904_v36 = vunpack.c.l.b16 %v5459_v2  ;;  %v5675_v20 = vrot.slane %v5673_v52, 5  ;;  %v5468_v52 = vrot.slane %v9932_v5, 5 }
 0x397   : > { %v6648_v49 = vsel %vm10953_vm14, %v9230_v61, %v6647_v56  ;;  %v6576_v61 = vld [vmem:[#allocation3 + $0x30] sm:$0xe] }
 0x398   : > { %v7279_v18 = vpop.permute.xlu1 %7278 }
 0x399   : > { %v7552_v43 = vsel %vm3332_vm11, %v9722_v50, %v7279_v18  ;;  %8145 = vmatmul.bf16.gmra.mxu3 %v7492_v27  ;;  %v9926_v50 = vld [vmem:[#allocation3 + $0x44] sm:$0x1]  ;;  %v6649_v18 = vrot.slane %v6647_v56, 4 }
 0x39a   : > { %8229 = vmatmul.bf16.vlgmr.msra.gmra.mxu0 %v7552_v43  ;;  %v5461_v3 = vrot.slane %v9926_v50, 5  ;;  %v9723_v27 = vld [vmem:[#allocation3 + $0x24] sm:$0xff]  ;;  %v5670_v43 = vor.u32 %v5669_v54, %v5665_v35  ;;  %v9930_v54 = vld [vmem:[#allocation3 + $0x4c] sm:$0xf]  ;;  %v5687_v50 = vshll.u32 %v9929_v16, 16 }
 0x39b   : > { %v6651_v25 = vsel %vm10953_vm14, %v6649_v18, %v6650_v24  ;;  %v5465_v34 = vrot.slane %v9930_v54, 5  ;;  %v6654_v18 = vrot.slane %v9931_v9, 5  ;;  %v5363_v24 = vld [vmem:[#allocation3 + $0x48] sm:$0xe] }
 0x39c   : > { %v5462_v23 = vsel %vm10953_vm14, %v5460_v37, %v5461_v3  ;;  %v5671_v15 = vrot.slane %v5670_v43, 4  ;;  %v7313_v39 = vunpack.c.l.b16 %v6651_v25  ;;  %v7312_v37 = vunpack.c.l.b16 %v6648_v49  ;;  %v9724_v25 = vld [vmem:[#allocation3 + $0x30] sm:$0xff] }
 0x39d   : > { %v6905_v62 = vunpack.c.l.b16 %v5462_v23  ;;  %v5467_v23 = vrot.slane %v5465_v34, 4  ;;  %v5693_v43 = vrot.slane %v5691_v53, 4  ;;  %v9203_v49 = vrot.slane %v5363_v24, 9  ;;  %v9934_v53 = vld [vmem:[#allocation3 + $0x44] sm:$0x1] }
 0x39e   : > { %v12800_v28 = vpop.f32.mrf.mxu1 }
 0x39f   : > { %13977 = vst [vmem:[#allocation7_spill] sm:$0xff] %v12800_v28  ;;  %v6931_v8 = vpack.c.b16 %v6905_v62, %v6904_v36  ;;  %v6656_v62 = vrot.slane %v6654_v18, 4 }
 0x3a0   : > { %v7281_v17 = vpop.permute.xlu1 %7280 }
 0x3a1   : > { %8071 = vmatmul.bf16.gmra.mxu2 %v7440_v30  ;;  %v7556_v59 = vsel %vm3332_vm11, %v9723_v27, %v7281_v17  ;;  %v7017_v30 = vpop.permute.xlu2 %7016  ;;  %v7343_v17 = vpack.c.b16 %v7313_v39, %v7312_v37  ;;  %v5678_v27 = vshrl.u32 %v5541_v13, 16 }
 0x3a2   : > { %9581 = vmatmul.msk.bf16.vlgmr.msra.gmra.mxu1 %vm3332_vm11, %v12587_v10  ;;  %v5659_v10 = vrot.slane %v5657_v40, 5  ;;  %v5676_v40 = vsel %vm10190_vm4, %v5671_v15, %v5675_v20  ;;  %v7444_v56 = vsel %vm3332_vm11, %v6931_v8, %v7017_v30  ;;  %v9933_v30 = vld [vmem:[#allocation3 + $0x38] sm:$0x1]  ;;  %v5697_v8 = vshll.u32 %v9934_v53, 16  ;;  %v5364_v53 = vld [vmem:[#allocation3 + $0x54] sm:$0xe] }
 0x3a3   : > { %v7045_v51 = vunpack.c.l.b16 %v5676_v40  ;;  %v6657_v39 = vrot.slane %v9933_v30, 5  ;;  %v9231_v40 = vrot.slane %v6576_v61, 9 }
 0x3a4   : > { %v5660_v32 = vor.u32 %v5659_v10, %v5656_v60  ;;  %v5681_v60 = vshll.u32 %v5541_v13, 16  ;;  %v5689_v10 = vrot.slane %v5687_v50, 5 }
 0x3a5   : > { %v6658_v13 = vsel %vm10953_vm14, %v6656_v62, %v6657_v39  ;;  %v6655_v50 = vsel %vm10953_vm14, %v9231_v40, %v6654_v18 }
 0x3a6   : > { %v12809_v38 = vpop.f32.mrf.mxu1  ;;  %v5661_v26 = vrot.slane %v5660_v32, 4  ;;  %v5469_v32 = vsel %vm10953_vm14, %v5467_v23, %v5468_v52  ;;  %v5683_v15 = vrot.slane %v5681_v60, 5  ;;  %v5694_v36 = vor.u32 %v5693_v43, %v5689_v10  ;;  %v9935_v23 = vld [vmem:[#allocation3 + $0x4c] sm:$0xf]  ;;  %v5543_v52 = vld [vmem:[#allocation3 + $0x48] sm:$0xf] }
 0x3a7   : > { %13978 = vst [vmem:[#allocation20_spill] sm:$0xff] %v12809_v38  ;;  %v6907_v54 = vunpack.c.l.b16 %v5469_v32  ;;  %v7315_v9 = vunpack.c.l.b16 %v6658_v13  ;;  %v5715_v60 = vshrl.u32 %v9935_v23, 16  ;;  %v5702_v32 = vshrl.u32 %v5543_v52, 16  ;;  %v6577_v13 = vld [vmem:[#allocation3 + $0x3c] sm:$0xe] }
 0x3a8   : > { %v5666_v11 = vsel %vm10190_vm4, %v5661_v26, %v5665_v35  ;;  %v5680_v35 = vrot.slane %v5678_v27, 4  ;;  %v5466_v26 = vsel %vm10953_vm14, %v9203_v49, %v5465_v34  ;;  %v5699_v27 = vrot.slane %v5697_v8, 5 }
 0x3a9   : > { %8150 = vmatmul.bf16.gmra.mxu3 %v7496_v31  ;;  %v7044_v6 = vunpack.c.l.b16 %v5666_v11  ;;  %v7141_v31 = vpop.permute.xlu0 %7140  ;;  %v6906_v11 = vunpack.c.l.b16 %v5466_v26  ;;  %v5717_v39 = vrot.slane %v5715_v60, 4 }
 0x3aa   : > { %8234 = vmatmul.bf16.gmra.mxu0 %v7556_v59  ;;  %v7283_v59 = vpop.permute.xlu1 %7282 }
 0x3ab   : > { %v7073_v2 = vpack.c.b16 %v7045_v51, %v7044_v6  ;;  %v7560_v37 = vsel %vm3332_vm11, %v9724_v25, %v7283_v59  ;;  %v7019_v51 = vpop.permute.xlu2 %7018  ;;  %v6932_v43 = vpack.c.b16 %v6907_v54, %v6906_v11  ;;  %v7314_v6 = vunpack.c.l.b16 %v6655_v50  ;;  %v9937_v25 = vld [vmem:[#allocation3 + $0x40] sm:$0xf] }
 0x3ac   : > { %v5711_v59 = vshll.u32 %v9935_v23, 16  ;;  %v6661_v49 = vrot.slane %v9937_v25, 5 }
 0x3ad   : > { %v7500_v16 = vsel %vm3332_vm11, %v7073_v2, %v7141_v31  ;;  %v9936_v31 = vld [vmem:[#allocation3 + $0x58] sm:$0xf]  ;;  %v7448_v18 = vsel %vm3332_vm11, %v6932_v43, %v7019_v51  ;;  %v7344_v61 = vpack.c.b16 %v7315_v9, %v7314_v6  ;;  %v9940_v6 = vld [vmem:[#allocation3 + $0x50] sm:$0x1] }
 0x3ae   : > { %v12821_v3 = vpop.f32.mrf.mxu1  ;;  %v5472_v5 = vrot.slane %v9936_v31, 5  ;;  %v5713_v30 = vrot.slane %v5711_v59, 5  ;;  %v6663_v50 = vrot.slane %v6661_v49, 4 }
 0x3af   : > { %13979 = vst [vmem:[#allocation25_spill] sm:$0xff] %v12821_v3  ;;  %v12992_v3 = vld [vmem:[#allocation3 + $0x98] sm:$0x1] }
 0x3b0   : > { %v5718_v9 = vor.u32 %v5717_v39, %v5713_v30  ;;  %v9941_v39 = vld [vmem:[#allocation3 + $0x58] sm:$0xf] }
 0x3b1   : > { %8076 = vmatmul.bf16.gmra.mxu2 %v7444_v56  ;;  %v5684_v56 = vor.u32 %v5683_v15, %v5680_v35  ;;  %v5474_v15 = vrot.slane %v5472_v5, 4  ;;  %v7143_v8 = vpop.permute.xlu0 %7142 }
 0x3b2   : > { %9582 = vmatmul.msk.bf16.gmra.mxu1 %vm3332_vm11, %v7343_v17  ;;  %v5695_v17 = vrot.slane %v5694_v36, 4  ;;  %v5705_v36 = vshll.u32 %v5543_v52, 16  ;;  %v7285_v40 = vpop.permute.xlu1 %7284  ;;  %v9232_v52 = vrot.slane %v6577_v13, 9  ;;  %v5735_v13 = vshll.u32 %v9941_v39, 16 }
 0x3b3   : > { %v5685_v34 = vrot.slane %v5684_v56, 4  ;;  %v9725_v56 = vld [vmem:[#allocation3 + $0x3c] sm:$0xff] }
 0x3b4   : > { %v5700_v24 = vsel %vm10190_vm4, %v5695_v17, %v5699_v27  ;;  %v9204_v17 = vrot.slane %v5364_v53, 9  ;;  %v5707_v51 = vrot.slane %v5705_v36, 5  ;;  %v9939_v27 = vld [vmem:[#allocation3 + $0x44] sm:$0x1] }
 0x3b5   : > { %v5690_v62 = vsel %vm10190_vm4, %v5685_v34, %v5689_v10  ;;  %v7047_v35 = vunpack.c.l.b16 %v5700_v24  ;;  %v5704_v10 = vrot.slane %v5702_v32, 4  ;;  %v6664_v23 = vrot.slane %v9939_v27, 5  ;;  %v7021_v32 = vpop.permute.xlu2 %7020 }
 0x3b6   : > { %v12829_v20 = vpop.f32.mrf.mxu1  ;;  %v5721_v34 = vshll.u32 %v9940_v6, 16  ;;  %v7564_v24 = vsel %vm3332_vm11, %v9725_v56, %v7285_v40  ;;  %v5473_v31 = vsel %vm10953_vm14, %v9204_v17, %v5472_v5 }
 0x3b7   : > { %13980 = vst [vmem:[#allocation26_spill] sm:$0xff] %v12829_v20  ;;  %v6908_v25 = vunpack.c.l.b16 %v5473_v31  ;;  %v5365_v31 = vld [vmem:[#allocation3 + $0x60] sm:$0xe]  ;;  %v5551_v20 = vld [vmem:[#allocation3 + $0x78] sm:$0xf] }
 0x3b8   : > { %v5723_v36 = vrot.slane %v5721_v34, 5  ;;  %v5798_v38 = vshrl.u32 %v5551_v20, 16 }
 0x3b9   : > { %8155 = vmatmul.bf16.gmra.mxu3 %v7500_v16  ;;  %v7046_v16 = vunpack.c.l.b16 %v5690_v62  ;;  %v5708_v62 = vor.u32 %v5707_v51, %v5704_v10 }
 0x3ba   : > { %8239 = vmatmul.bf16.gmra.mxu0 %v7560_v37  ;;  %v9938_v37 = vld [vmem:[#allocation3 + $0x5c] sm:$0x1] }
 0x3bb   : > { %v5475_v26 = vrot.slane %v9938_v37, 5  ;;  %v7074_v54 = vpack.c.b16 %v7047_v35, %v7046_v16  ;;  %v5719_v35 = vrot.slane %v5718_v9, 4  ;;  %v5739_v16 = vshrl.u32 %v9941_v39, 16 }
 0x3bc   : > { %v5709_v5 = vrot.slane %v5708_v62, 4  ;;  %v6578_v62 = vld [vmem:[#allocation3 + $0x48] sm:$0xe] }
 0x3bd   : > { %v5476_v11 = vsel %vm10953_vm14, %v5474_v15, %v5475_v26  ;;  %v7504_v43 = vsel %vm3332_vm11, %v7074_v54, %v7143_v8  ;;  %v5724_v37 = vsel %vm10190_vm4, %v5719_v35, %v5723_v36  ;;  %v9942_v26 = vld [vmem:[#allocation3 + $0x64] sm:$0xf]  ;;  %v5545_v54 = vld [vmem:[#allocation3 + $0x54] sm:$0xf]  ;;  %v5741_v6 = vrot.slane %v5739_v16, 4 }
 0x3be   : > { %v12841_v2 = vpop.f32.mrf.mxu1  ;;  %v6909_v59 = vunpack.c.l.b16 %v5476_v11  ;;  %v5479_v40 = vrot.slane %v9942_v26, 5  ;;  %v5714_v56 = vsel %vm10190_vm4, %v5709_v5, %v5713_v30  ;;  %v7049_v17 = vunpack.c.l.b16 %v5724_v37  ;;  %v9943_v11 = vld [vmem:[#allocation3 + $0x4c] sm:$0xf]  ;;  %v9946_v26 = vld [vmem:[#allocation3 + $0x5c] sm:$0x1] }
 0x3bf   : > { %13981 = vst [vmem:[#allocation14_spill] sm:$0xff] %v12841_v2  ;;  %v6668_v51 = vrot.slane %v9943_v11, 5  ;;  %v5726_v9 = vshrl.u32 %v5545_v54, 16 }
 0x3c0   : > { %v6933_v53 = vpack.c.b16 %v6909_v59, %v6908_v25  ;;  %v5481_v27 = vrot.slane %v5479_v40, 4  ;;  %v9944_v59 = vld [vmem:[#allocation3 + $0x68] sm:$0x1] }
 0x3c1   : > { %8081 = vmatmul.bf16.gmra.mxu2 %v7448_v18  ;;  %v6665_v18 = vsel %vm10953_vm14, %v6663_v50, %v6664_v23  ;;  %v5729_v23 = vshll.u32 %v5545_v54, 16  ;;  %v6670_v35 = vrot.slane %v6668_v51, 4  ;;  %v5728_v25 = vrot.slane %v5726_v9, 4 }
 0x3c2   : > { %9583 = vmatmul.msk.bf16.gmra.mxu1 %vm3332_vm11, %v7344_v61  ;;  %v6662_v61 = vsel %vm10953_vm14, %v9232_v52, %v6661_v49  ;;  %v7317_v15 = vunpack.c.l.b16 %v6665_v18  ;;  %v7452_v49 = vsel %vm3332_vm11, %v6933_v53, %v7021_v32  ;;  %v7145_v52 = vpop.permute.xlu0 %7144  ;;  %v5482_v18 = vrot.slane %v9944_v59, 5  ;;  %v9726_v32 = vld [vmem:[#allocation3 + $0x48] sm:$0xff]  ;;  %v9945_v53 = vld [vmem:[#allocation3 + $0x50] sm:$0x1]  ;;  %v9947_v59 = vld [vmem:[#allocation3 + $0x64] sm:$0xf] }
 0x3c3   : > { %v7316_v8 = vunpack.c.l.b16 %v6662_v61  ;;  %v7287_v61 = vpop.permute.xlu1 %7286  ;;  %v5731_v39 = vrot.slane %v5729_v23, 5  ;;  %v5745_v54 = vshll.u32 %v9946_v26, 16 }
 0x3c4   : > { %v5483_v36 = vsel %vm10953_vm14, %v5481_v27, %v5482_v18  ;;  %v5763_v18 = vshrl.u32 %v9947_v59, 16 }
 0x3c5   : > { %v7345_v10 = vpack.c.b16 %v7317_v15, %v7316_v8  ;;  %v9205_v15 = vrot.slane %v5365_v31, 9  ;;  %v6671_v8 = vrot.slane %v9945_v53, 5  ;;  %v5732_v9 = vor.u32 %v5731_v39, %v5728_v25  ;;  %v12891_v25 = vld [vmem:[%s13881_s4] ss:$0 sm:$0xff] }
 0x3c6   : > { %v12849_v60 = vpop.f32.mrf.mxu1  ;;  %v7964_v26 = vadd.f32 %v12891_v25, %v12348_v44 }
 0x3c7   : > { %13982 = vst [vmem:[#allocation15_spill] sm:$0xff] %v12849_v60 }
 0x3c9   : > { %8160 = vmatmul.bf16.gmra.mxu3 %v7504_v43  ;;  %v12867_v43 = vrot.slane %v5735_v13, 5  ;;  %v7568_v13 = vsel %vm3332_vm11, %v9726_v32, %v7287_v61 }
 0x3ca   : > { %8244 = vmatmul.bf16.gmra.mxu0 %v7564_v24  ;;  %v7048_v24 = vunpack.c.l.b16 %v5714_v56  ;;  %v6911_v56 = vunpack.c.l.b16 %v5483_v36 }
 0x3cb   : > { %v5742_v16 = vor.u32 %v5741_v6, %v12867_v43 }
 0x3cc   : > { %v7075_v30 = vpack.c.b16 %v7049_v17, %v7048_v24  ;;  %v6672_v17 = vsel %vm10953_vm14, %v6670_v35, %v6671_v8  ;;  %v7023_v24 = vpop.permute.xlu2 %7022  ;;  %v9948_v35 = vld [vmem:[#allocation3 + $0x70] sm:$0xf]  ;;  %v9949_v8 = vld [vmem:[#allocation3 + $0x58] sm:$0xf] }
 0x3cd   : > { %v5743_v27 = vrot.slane %v5742_v16, 4  ;;  %v7319_v31 = vunpack.c.l.b16 %v6672_v17  ;;  %v5486_v32 = vrot.slane %v9948_v35, 5  ;;  %v5765_v17 = vrot.slane %v5763_v18, 4  ;;  %v9727_v35 = vld [vmem:[#allocation3 + $0x54] sm:$0xff] }
 0x3ce   : > { %v12861_v50 = vpop.f32.mrf.mxu1  ;;  %v7508_v37 = vsel %vm3332_vm11, %v7075_v30, %v7145_v52  ;;  %v5747_v52 = vrot.slane %v5745_v54, 5  ;;  %v5733_v30 = vrot.slane %v5732_v9, 4 }
 0x3cf   : > { %13983 = vst [vmem:[#allocation17_spill] sm:$0xff] %v12861_v50 }
 0x3d0   : > { %v5738_v53 = vsel %vm10190_vm4, %v5733_v30, %v12867_v43  ;;  %v9950_v43 = vld [vmem:[#allocation3 + $0x74] sm:$0x1]  ;;  %v6579_v30 = vld [vmem:[#allocation3 + $0x54] sm:$0xe] }
 0x3d1   : > { %8086 = vmatmul.bf16.gmra.mxu2 %v7452_v49  ;;  %v5480_v49 = vsel %vm10953_vm14, %v9205_v15, %v5479_v40  ;;  %v5547_v15 = vld [vmem:[#allocation3 + $0x60] sm:$0xf]  ;;  %v7050_v9 = vunpack.c.l.b16 %v5738_v53 }
 0x3d2   : > { %9584 = vmatmul.msk.bf16.gmra.mxu1 %vm3332_vm11, %v7345_v10  ;;  %v9233_v10 = vrot.slane %v6578_v62, 9  ;;  %v6910_v6 = vunpack.c.l.b16 %v5480_v49  ;;  %v5748_v62 = vsel %vm10190_vm4, %v5743_v27, %v5747_v52  ;;  %v5488_v49 = vrot.slane %v5486_v32, 4  ;;  %v5366_v27 = vld [vmem:[#allocation3 + $0x6c] sm:$0xe] }
 0x3d3   : > { %v7051_v54 = vunpack.c.l.b16 %v5748_v62 }
 0x3d4   : > { %v12869_v34 = vpop.f32.mrf.mxu2  ;;  %v6669_v11 = vsel %vm10953_vm14, %v9233_v10, %v6668_v51  ;;  %v6934_v40 = vpack.c.b16 %v6911_v56, %v6910_v6  ;;  %v5759_v51 = vshll.u32 %v9947_v59, 16  ;;  %v5753_v10 = vshll.u32 %v5547_v15, 16  ;;  %v7147_v6 = vpop.permute.xlu0 %7146  ;;  %v9951_v59 = vld [vmem:[#allocation3 + $0x5c] sm:$0x1] }
 0x3d5   : > { %v7318_v61 = vunpack.c.l.b16 %v6669_v11  ;;  %v6678_v44 = vrot.slane %v9951_v59, 5  ;;  %v9953_v59 = vld [vmem:[#allocation3 + $0x70] sm:$0xf] }
 0x3d6   : > { %v12874_v5 = vpop.f32.mrf.mxu1  ;;  %v7456_v39 = vsel %vm3332_vm11, %v6934_v40, %v7023_v24  ;;  %v12902_v56 = vrot.slane %v5759_v51, 5  ;;  %v7289_v40 = vpop.permute.xlu1 %7288  ;;  %v5755_v51 = vrot.slane %v5753_v10, 5 }
 0x3d7   : > { %13984 = vst [vmem:[#allocation19_spill] sm:$0xff] %v12874_v5  ;;  %v7346_v16 = vpack.c.b16 %v7319_v31, %v7318_v61  ;;  %v5489_v31 = vrot.slane %v9950_v43, 5  ;;  %v7076_v61 = vpack.c.b16 %v7051_v54, %v7050_v9  ;;  %v12969_v5 = vld [vmem:[#allocation3 + $0x8c] sm:$0x1] }
 0x3d9   : > { %8165 = vmatmul.bf16.gmra.mxu3 %v7508_v37  ;;  %v6675_v37 = vrot.slane %v9949_v8, 5  ;;  %v5490_v18 = vsel %vm10953_vm14, %v5488_v49, %v5489_v31 }
 0x3da   : > { %8249 = vmatmul.bf16.gmra.mxu0 %v7568_v13  ;;  %v5750_v13 = vshrl.u32 %v5547_v15, 16  ;;  %v9206_v15 = vrot.slane %v5366_v27, 9  ;;  %v6913_v49 = vunpack.c.l.b16 %v5490_v18 }
 0x3db   : > { %v6677_v52 = vrot.slane %v6675_v37, 4 }
 0x3dc   : > { %v12884_v23 = vpop.f32.mrf.mxu2  ;;  %v5752_v62 = vrot.slane %v5750_v13, 4  ;;  %v5487_v54 = vsel %vm10953_vm14, %v9206_v15, %v5486_v32  ;;  %v9234_v13 = vrot.slane %v6579_v30, 9  ;;  %v5549_v32 = vld [vmem:[#allocation3 + $0x6c] sm:$0xf]  ;;  %v5783_v30 = vshll.u32 %v9953_v59, 16 }
 0x3dd   : > { %v6679_v9 = vsel %vm10953_vm14, %v6677_v52, %v6678_v44  ;;  %v12923_v52 = vadd.f32 %v12891_v25, %v12383_v48 }
 0x3de   : > { %v12893_v36 = vpop.f32.mrf.mxu1  ;;  %v6676_v10 = vsel %vm10953_vm14, %v9234_v13, %v6675_v37  ;;  %v7321_v31 = vunpack.c.l.b16 %v6679_v9  ;;  %v5777_v13 = vshll.u32 %v5549_v32, 16  ;;  %v12939_v9 = vrot.slane %v5783_v30, 5 }
 0x3df   : > { %13985 = vst [vmem:[#allocation22_spill] sm:$0xff] %v12893_v36  ;;  %v7971_v36 = vadd.f32 %v12891_v25, %v12457_v47  ;;  %v9966_v47 = vld [vmem:[#allocation3 + $0x70] sm:$0xf] }
 0x3e0   : > { %v6689_v60 = vrot.slane %v9966_v47, 5 }
 0x3e1   : > { %8091 = vmatmul.bf16.gmra.mxu2 %v7456_v39  ;;  %v5766_v39 = vor.u32 %v5765_v17, %v12902_v56  ;;  %v5756_v17 = vor.u32 %v5755_v51, %v5752_v62  ;;  %v12927_v62 = vld [vmem:[#allocation3 + $0x7c] sm:$0xf] }
 0x3e2   : > { %9585 = vmatmul.msk.bf16.gmra.mxu1 %vm3332_vm11, %v7346_v16  ;;  %v9952_v16 = vld [vmem:[#allocation3 + $0x68] sm:$0x1]  ;;  %v5493_v18 = vrot.slane %v12927_v62, 5 }
 0x3e3   : > { %v5769_v53 = vshll.u32 %v9952_v16, 16  ;;  %v5767_v27 = vrot.slane %v5766_v39, 4  ;;  %v7320_v16 = vunpack.c.l.b16 %v6676_v10  ;;  %v5757_v44 = vrot.slane %v5756_v17, 4  ;;  %v12941_v10 = vld [vmem:[#allocation3 + $0x74] sm:$0x1] }
 0x3e4   : > { %v8052_v11 = vpop.f32.mrf.mxu2  ;;  %v5793_v17 = vshll.u32 %v12941_v10, 16  ;;  %v5495_v30 = vrot.slane %v5493_v18, 4 }
 0x3e5   : > { %v12904_v24 = vadd.f32 %v8052_v11, %v7964_v26  ;;  %v7512_v26 = vsel %vm3332_vm11, %v7076_v61, %v7147_v6  ;;  %v7572_v11 = vsel %vm3332_vm11, %v9727_v35, %v7289_v40  ;;  %v6912_v6 = vunpack.c.l.b16 %v5487_v54  ;;  %v7025_v61 = vpop.permute.xlu2 %7024 }
 0x3e6   : > { %v12909_v8 = vpop.f32.mrf.mxu1  ;;  %v5787_v40 = vshrl.u32 %v9953_v59, 16  ;;  %v5771_v35 = vrot.slane %v5769_v53, 5  ;;  %v7347_v53 = vpack.c.b16 %v7321_v31, %v7320_v16  ;;  %v5774_v54 = vshrl.u32 %v5549_v32, 16  ;;  %v12944_v31 = vld [vmem:[#allocation3 + $0x74] sm:$0x1] }
 0x3e7   : > { %13986 = vst [vmem:[#allocation24_spill] sm:$0xff] %v12909_v8  ;;  %v6935_v15 = vpack.c.b16 %v6913_v49, %v6912_v6  ;;  %v5762_v48 = vsel %vm10190_vm4, %v5757_v44, %v12902_v56  ;;  %v12952_v32 = vld [vmem:[#allocation3 + $0x80] sm:$0x1]  ;;  %v5779_v8 = vrot.slane %v5777_v13, 5  ;;  %v12966_v44 = vld [vmem:[#allocation3 + $0x88] sm:$0xf] }
 0x3e8   : > { %v5772_v37 = vsel %vm10190_vm4, %v5767_v27, %v5771_v35  ;;  %v5789_v49 = vrot.slane %v5787_v40, 4  ;;  %v9957_v27 = vld [vmem:[#allocation3 + $0x68] sm:$0x1]  ;;  %v7969_v35 = vadd.f32 %v12891_v25, %v12419_v55  ;;  %v12956_v16 = vld [vmem:[#allocation3 + $0x80] sm:$0x1]  ;;  %v5776_v10 = vrot.slane %v5774_v54, 4 }
 0x3e9   : > { %8170 = vmatmul.bf16.gmra.mxu3 %v7512_v26  ;;  %v7460_v39 = vsel %vm3332_vm11, %v6935_v15, %v7025_v61  ;;  %v12933_v26 = vld [vmem:[#allocation3 + $0x64] sm:$0xf]  ;;  %v6685_v6 = vrot.slane %v9957_v27, 5  ;;  %v7053_v61 = vunpack.c.l.b16 %v5772_v37  ;;  %v12949_v15 = vld [vmem:[#allocation3 + $0x7c] sm:$0xf]  ;;  %v7052_v37 = vunpack.c.l.b16 %v5762_v48  ;;  %v7149_v27 = vpop.permute.xlu0 %7148 }
 0x3ea   : > { %8254 = vmatmul.bf16.gmra.mxu0 %v7572_v11  ;;  %v13894_v11 = vrot.slane %v12933_v26, 5  ;;  %v9962_v59 = vld [vmem:[#allocation3 + $0x80] sm:$0x1]  ;;  %v6580_v40 = vld [vmem:[#allocation3 + $0x60] sm:$0xe]  ;;  %v12979_v48 = vadd.f32 %v12891_v25, %v12493_v22 }
 0x3eb   : > { %v9728_v13 = vld [vmem:[#allocation3 + $0x60] sm:$0xff]  ;;  %v12989_v22 = vld [vmem:[#allocation3 + $0x94] sm:$0xf] }
 0x3ec   : > { %v12919_v43 = vpop.f32.mrf.mxu2  ;;  %v6684_v55 = vrot.slane %v13894_v11, 4  ;;  %v7291_v11 = vpop.permute.xlu1 %7290 }
 0x3ee   : > { %v12930_v51 = vpop.f32.mrf.mxu1 }
 0x3ef   : > { %13987 = vst [vmem:[#allocation28_spill] sm:$0xff] %v12930_v51  ;;  %v5496_v51 = vrot.slane %v9962_v59, 5  ;;  %v6581_v59 = vld [vmem:[#allocation3 + $0x6c] sm:$0xe] }
 0x3f1   : > { %8096 = vmatmul.bf16.gmra.mxu2 %v7460_v39  ;;  %v5367_v39 = vld [vmem:[#allocation3 + $0x78] sm:$0xe] }
 0x3f2   : > { %9586 = vmatmul.msk.bf16.gmra.mxu1 %vm3332_vm11, %v7347_v53  ;;  %v5790_v53 = vor.u32 %v5789_v49, %v12939_v9  ;;  %v9207_v50 = vrot.slane %v5367_v39, 9  ;;  %v5497_v49 = vsel %vm10953_vm14, %v5495_v30, %v5496_v51  ;;  %v7576_v39 = vsel %vm3332_vm11, %v9728_v13, %v7291_v11 }
 0x3f3   : > { %v5780_v30 = vor.u32 %v5779_v8, %v5776_v10 }
 0x3f4   : > { %v8057_v62 = vpop.f32.mrf.mxu2  ;;  %v5494_v51 = vsel %vm10953_vm14, %v9207_v50, %v5493_v18  ;;  %v5791_v47 = vrot.slane %v5790_v53, 4  ;;  %v13990_v50 = vld [vmem:[#allocation31_spill] sm:$0xff]  ;;  %v4369_v18 = vpop.f32.mrf.mxu0  ;;  %v6691_v53 = vrot.slane %v6689_v60, 4 }
 0x3f5   : > { %v12961_v56 = vadd.f32 %v8057_v62, %v7969_v35  ;;  %v7077_v35 = vpack.c.b16 %v7053_v61, %v7052_v37  ;;  %v12972_v62 = vld [vmem:[#allocation3 + $0x8c] sm:$0x1]  ;;  %v9235_v61 = vrot.slane %v6580_v40, 9  ;;  %v6686_v37 = vsel %vm10953_vm14, %v6684_v55, %v6685_v6 }
 0x3f6   : > { %v12981_v2 = vpop.f32.mrf.mxu1  ;;  %v6915_v6 = vunpack.c.l.b16 %v5497_v49  ;;  %v13989_v55 = vrot.slane %v12933_v26, 5  ;;  %v4192_v8 = vadd.f32 %v12869_v34, %v13990_v50  ;;  %v7323_v10 = vunpack.c.l.b16 %v6686_v37 }
 0x3f7   : > { %13988 = vst [vmem:[#allocation30_spill] sm:$0xff] %v12981_v2  ;;  %v7516_v54 = vsel %vm3332_vm11, %v7077_v35, %v7149_v27  ;;  %v5795_v27 = vrot.slane %v5793_v17, 5  ;;  %v6914_v13 = vunpack.c.l.b16 %v5494_v51  ;;  %v9236_v2 = vrot.slane %v6581_v59, 9  ;;  %v9969_v59 = vld [vmem:[#allocation3 + $0x88] sm:$0xf] }
 0x3f8   : > { %v6683_v11 = vsel %vm10953_vm14, %v9235_v61, %v13989_v55  ;;  %v5801_v40 = vshll.u32 %v5551_v20, 16  ;;  %v5781_v26 = vrot.slane %v5780_v30, 4  ;;  %v5807_v37 = vshll.u32 %v12949_v15, 16 }
 0x3f9   : > { %8175 = vmatmul.bf16.gmra.mxu3 %v7516_v54  ;;  %v5796_v61 = vsel %vm10190_vm4, %v5791_v47, %v5795_v27  ;;  %v6936_v55 = vpack.c.b16 %v6915_v6, %v6914_v13  ;;  %v7322_v34 = vunpack.c.l.b16 %v6683_v11  ;;  %v13007_v17 = vsel %vm10953_vm14, %v9236_v2, %v6689_v60  ;;  %v5368_v13 = vld [vmem:[#allocation3 + $0x84] sm:$0xe] }
 0x3fa   : > { %8259 = vmatmul.bf16.gmra.mxu0 %v7576_v39  ;;  %v7027_v39 = vpop.permute.xlu2 %7026  ;;  %v5786_v20 = vsel %vm10190_vm4, %v5781_v26, %v12939_v9  ;;  %v13991_v30 = vrot.slane %v12944_v31, 5  ;;  %v7055_v60 = vunpack.c.l.b16 %v5796_v61  ;;  %v5800_v11 = vrot.slane %v5798_v38, 4 }
 0x3fb   : > { %v7464_v2 = vsel %vm3332_vm11, %v6936_v55, %v7027_v39  ;;  %v5803_v50 = vrot.slane %v5801_v40, 5  ;;  %v13028_v9 = vadd.f32 %v12891_v25, %v12564_v46  ;;  %v7054_v27 = vunpack.c.l.b16 %v5786_v20 }
 0x3fc   : > { %v4280_v54 = vpop.f32.mrf.mxu3  ;;  %v8059_v35 = vpop.f32.mrf.mxu2  ;;  %v13017_v47 = vsel %vm10953_vm14, %v6691_v53, %v13991_v30  ;;  %v4194_v40 = vadd.f32 %v12884_v23, %v11675_v41  ;;  %v9971_v23 = vld [vmem:[#allocation3 + $0x8c] sm:$0x1] }
 0x3fd   : > { %v4281_v49 = vadd.f32 %v4280_v54, %v4192_v8  ;;  %v13001_v28 = vadd.f32 %v8059_v35, %v7971_v36  ;;  %v5500_v36 = vrot.slane %v9969_v59, 5  ;;  %v13024_v8 = vadd.f32 %v12891_v25, %v12523_v19  ;;  %v9729_v53 = vld [vmem:[#allocation3 + $0x6c] sm:$0xff] }
 0x3fe   : > { %v13031_v54 = vrot.slane %v5807_v37, 5  ;;  %v13993_v35 = vshrl.u32 %v12949_v15, 16  ;;  %v7325_v39 = vunpack.c.l.b16 %v13017_v47  ;;  %v7078_v61 = vpack.c.b16 %v7055_v60, %v7054_v27  ;;  %v4371_v47 = vpop.f32.mrf.mxu0 }
 0x3ff   : > { %v4370_v51 = vadd.f32 %v4369_v18, %v4281_v49  ;;  %v13019_v6 = vpop.f32.mrf.mxu1  ;;  %v7348_v18 = vpack.c.b16 %v7323_v10, %v7322_v34  ;;  %v5502_v46 = vrot.slane %v5500_v36, 4  ;;  %v5553_v49 = vld [vmem:[#allocation3 + $0x84] sm:$0xf]  ;;  %v5804_v55 = vor.u32 %v5803_v50, %v5800_v11  ;;  %v9970_v34 = vld [vmem:[#allocation3 + $0x7c] sm:$0xf] }
 0x400   : > { %13992 = vst [vmem:[#allocation32_spill] sm:$0xff] %v13019_v6  ;;  %v5813_v38 = vrot.slane %v13993_v35, 4  ;;  %v6696_v37 = vrot.slane %v9970_v34, 5  ;;  %v5831_v15 = vshll.u32 %v12966_v44, 16  ;;  %v5503_v30 = vrot.slane %v9971_v23, 5 }
 0x401   : > { %v4404_v31 = vmax.f32 %v4370_v51, 0.0  ;;  %8101 = vmatmul.bf16.gmra.mxu2 %v7464_v2  ;;  %v7151_v51 = vpop.permute.xlu0 %7150  ;;  %v6582_v2 = vld [vmem:[#allocation3 + $0x78] sm:$0xe]  ;;  %v5822_v60 = vshrl.u32 %v5553_v49, 16  ;;  %v5825_v11 = vshll.u32 %v5553_v49, 16 }
 0x402   : > { %9587 = vmatmul.msk.bf16.gmra.mxu1 %vm3332_vm11, %v7348_v18  ;;  %v9208_v18 = vrot.slane %v5368_v13, 9  ;;  %v5814_v35 = vor.u32 %v5813_v38, %v13031_v54  ;;  %v9237_v23 = vrot.slane %v6582_v2, 9  ;;  %v13051_v6 = vrot.slane %v5831_v15, 5 }
 0x403   : > { %v4490_v19 = vpack.c.bf16 %v4404_v31, %v4404_v31  ;;  %v7293_v31 = vpop.permute.xlu1 %7292  ;;  %v13995_v38 = vshrl.u32 %v12966_v44, 16  ;;  %v6698_v2 = vrot.slane %v6696_v37, 4 }
 0x404   : > { %v4282_v10 = vpop.f32.mrf.mxu3  ;;  %v8062_v26 = vpop.f32.mrf.mxu2  ;;  %v5815_v44 = vrot.slane %v5814_v35, 4 }
 0x405   : > { %v4748_v20 = vshrl.u32 %v4490_v19, 16  ;;  %v4283_v59 = vadd.f32 %v4282_v10, %v4194_v40  ;;  %v13041_v41 = vadd.f32 %v8062_v26, %v12979_v48  ;;  %v4751_v27 = vshll.u32 %v4490_v19, 16  ;;  %v4918_v48 = vld [vmem:[#allocation3 + $0xc0] sm:$0xf] }
 0x406   : > { %v5504_v40 = vsel %vm10953_vm14, %v5502_v46, %v5503_v30  ;;  %v7520_v26 = vsel %vm3332_vm11, %v7078_v61, %v7151_v51  ;;  %v5837_v13 = vrot.slane %v13995_v38, 4  ;;  %v7580_v19 = vsel %vm3332_vm11, %v9729_v53, %v7293_v31 }
 0x407   : > { %v13044_v50 = vrot.slane %v4748_v20, 7  ;;  %v4372_v34 = vadd.f32 %v4371_v47, %v4283_v59  ;;  %v13048_v10 = vpop.f32.mrf.mxu1  ;;  %v5501_v46 = vsel %vm10953_vm14, %v9208_v18, %v5500_v36  ;;  %v6917_v59 = vunpack.c.l.b16 %v5504_v40  ;;  %v13064_v36 = vld [vmem:[#allocation3 + $0x94] sm:$0xf]  ;;  %v7029_v18 = vpop.permute.xlu2 %7028 }
 0x408   : > { %13994 = vst [vmem:[#allocation8_spill] sm:$0xff] %v13048_v10  ;;  %v5805_v30 = vrot.slane %v5804_v55, 4  ;;  %v5824_v47 = vrot.slane %v5822_v60, 4  ;;  %v5827_v61 = vrot.slane %v5825_v11, 5  ;;  %v5507_v55 = vrot.slane %v13064_v36, 5 }
 0x409   : > { %v4753_v49 = vor.u32 %v4751_v27, %v13044_v50  ;;  %v4405_v20 = vmax.f32 %v4372_v34, 0.0  ;;  %8180 = vmatmul.bf16.gmra.mxu3 %v7520_v26  ;;  %v6916_v26 = vunpack.c.l.b16 %v5501_v46  ;;  %v5838_v31 = vor.u32 %v5837_v13, %v13051_v6 }
 0x40a   : > { %8264 = vmatmul.bf16.gmra.mxu0 %v7580_v19  ;;  %v5810_v53 = vsel %vm10190_vm4, %v5805_v30, %v13031_v54  ;;  %v13996_v11 = vshll.u32 %v12952_v32, 16  ;;  %v13997_v38 = vunpack.c.l.b16 %v13007_v17  ;;  %v4922_v30 = vld [vmem:[#allocation3 + $0xc8] sm:$0x1]  ;;  %v13999_v17 = vrot.slane %v12956_v16, 5 }
 0x40b   : > { %v4919_v15 = vsel %vm10420_vm9, %v4753_v49, %v4918_v48  ;;  %v4491_v51 = vpack.c.bf16 %v4405_v20, %v4405_v20  ;;  %v6937_v48 = vpack.c.b16 %v6917_v59, %v6916_v26  ;;  %v13078_v49 = vsel %vm10953_vm14, %v9237_v23, %v6696_v37 }
 0x40c   : > { %4920 = vst [vmem:[#allocation3 + $0xc0] sm:$0xf] %v4919_v15  ;;  %v8064_v27 = vpop.f32.mrf.mxu2  ;;  %v8141_v34 = vpop.f32.mrf.mxu3  ;;  %v5819_v40 = vrot.slane %v13996_v11, 5  ;;  %v7349_v54 = vpack.c.b16 %v7325_v39, %v13997_v38  ;;  %v5828_v20 = vor.u32 %v5827_v61, %v5824_v47  ;;  %v7056_v46 = vunpack.c.l.b16 %v5810_v53  ;;  %v5369_v15 = vld [vmem:[#allocation3 + $0x90] sm:$0xe] }
 0x40d   : > { %v4756_v7 = vshrl.u32 %v4491_v51, 16  ;;  %v13069_v60 = vadd.f32 %v8064_v27, %v13024_v8  ;;  %v8142_v35 = vadd.f32 %v8141_v34, %v12904_v24  ;;  %v4759_v19 = vshll.u32 %v4491_v51, 16  ;;  %v9973_v27 = vld [vmem:[#allocation3 + $0x98] sm:$0x1]  ;;  %v13105_v11 = vld [vmem:[#allocation3 + $0x90] sm:$0xf]  ;;  %v7153_v38 = vpop.permute.xlu0 %7152 }
 0x40e   : > { %v5820_v8 = vsel %vm10190_vm4, %v5815_v44, %v5819_v40  ;;  %v7468_v32 = vsel %vm3332_vm11, %v6937_v48, %v7029_v18  ;;  %v5509_v59 = vrot.slane %v5507_v55, 4  ;;  %v13089_v39 = vsel %vm10953_vm14, %v6698_v2, %v13999_v17  ;;  %v13102_v18 = vld [vmem:[#allocation3 + $0x88] sm:$0xf]  ;;  %v13115_v48 = vld [vmem:[#allocation3 + $0x84] sm:$0xe]  ;;  %v9730_v17 = vld [vmem:[#allocation3 + $0x78] sm:$0xff] }
 0x40f   : > { %v4758_v13 = vrot.slane %v4756_v7, 7  ;;  %v13082_v24 = vpop.f32.mrf.mxu1  ;;  %v5839_v37 = vrot.slane %v5838_v31, 4  ;;  %v4754_v23 = vrot.slane %v13044_v50, 4  ;;  %v7326_v51 = vunpack.c.l.b16 %v13078_v49 }
 0x410   : > { %13998 = vst [vmem:[#allocation9_spill] sm:$0xff] %v13082_v24  ;;  %v7057_v44 = vunpack.c.l.b16 %v5820_v8  ;;  %v5510_v34 = vrot.slane %v9973_v27, 5  ;;  %v5829_v26 = vrot.slane %v5828_v20, 4  ;;  %v14000_v53 = vshll.u32 %v12969_v5, 16 }
 0x411   : > { %v4761_v47 = vor.u32 %v4759_v19, %v4758_v13  ;;  %v4763_v61 = vrot.slane %v4758_v13, 4  ;;  %8106 = vmatmul.bf16.gmra.mxu2 %v7468_v32  ;;  %v8055_v2 = vadd.f32 %v12919_v43, %v12923_v52  ;;  %v13895_v7 = vrot.slane %v13102_v18, 5  ;;  %v7295_v19 = vpop.permute.xlu1 %7294 }
 0x412   : > { %v5843_v16 = vrot.slane %v14000_v53, 5  ;;  %9588 = vmatmul.msk.bf16.gmra.mxu1 %vm3332_vm11, %v7349_v54  ;;  %v9209_v43 = vrot.slane %v5369_v15, 9  ;;  %v5511_v1 = vsel %vm10953_vm14, %v5509_v59, %v5510_v34  ;;  %v5834_v58 = vsel %vm10190_vm4, %v5829_v26, %v13051_v6 }
 0x413   : > { %v4762_v36 = vsel %vm10405_vm8, %v4754_v23, %v4761_v47  ;;  %v4923_v50 = vsel %vm10439_vm10, %v4763_v61, %v4922_v30  ;;  %v6170_v31 = vld [vmem:[#allocation3 + $0xc0] sm:$0xf]  ;;  %v7079_v8 = vpack.c.b16 %v7057_v44, %v7056_v46  ;;  %v7327_v30 = vunpack.c.l.b16 %v13089_v39 }
 0x414   : > { %4921 = vst.msk [vmem:[#allocation3 + $0xc4] sm:$0xf] %vm332_vm0, %v4762_v36  ;;  %v8067_v5 = vpop.f32.mrf.mxu2  ;;  %v8143_v40 = vpop.f32.mrf.mxu3  ;;  %v5844_v52 = vsel %vm10190_vm4, %v5839_v37, %v5843_v16  ;;  %v6527_v20 = vshrl.u32 %v6170_v31, 16  ;;  %v6530_v13 = vshll.u32 %v6170_v31, 16  ;;  %v5846_v6 = vshrl.u32 %v13105_v11, 16 }
 0x415   : > { %4924 = vst [vmem:[#allocation3 + $0xc8] sm:$0x1] %v4923_v50  ;;  %v13118_v54 = vadd.f32 %v8067_v5, %v13028_v9  ;;  %v13120_v49 = vadd.f32 %v8143_v40, %v8055_v2  ;;  %v5855_v32 = vshll.u32 %v12989_v22, 16  ;;  %v5508_v37 = vsel %vm10953_vm14, %v9209_v43, %v5507_v55  ;;  %v5980_v55 = vld [vmem:[#allocation3 + $0xc0] sm:$0xe]  ;;  %v7031_v5 = vpop.permute.xlu2 %7030 }
 0x416   : > { %v13127_v23 = vunpack.c.l.b16 %v5834_v58  ;;  %v13132_v47 = vrot.slane %v13895_v7, 4  ;;  %v7524_v61 = vsel %vm3332_vm11, %v7079_v8, %v7153_v38  ;;  %v6919_v15 = vunpack.c.l.b16 %v5511_v1 }
 0x417   : > { %v8230_v59 = vpop.f32.mrf.mxu0  ;;  %v13134_v46 = vpop.f32.mrf.mxu1  ;;  %v13137_v44 = vunpack.c.l.b16 %v5844_v52  ;;  %v7584_v27 = vsel %vm3332_vm11, %v9730_v17, %v7295_v19  ;;  %v6529_v34 = vrot.slane %v6527_v20, 4  ;;  %v6532_v26 = vrot.slane %v6530_v13, 5  ;;  %v13157_v52 = vld [vmem:[#allocation3 + $0xa0] sm:$0xf]  ;;  %v9976_v17 = vld [vmem:[#allocation3 + $0xa4] sm:$0x1] }
 0x418   : > { %14001 = vst [vmem:[#allocation10_spill] sm:$0xff] %v13134_v46  ;;  %v8231_v39 = vadd.f32 %v8230_v59, %v8142_v35  ;;  %v6918_v16 = vunpack.c.l.b16 %v5508_v37  ;;  %v13141_v2 = vrot.slane %v5846_v6, 4  ;;  %v13143_v36 = vrot.slane %v5855_v32, 5  ;;  %v13187_v46 = vld [vmem:[#allocation3 + $0xd4] sm:$0x1] }
 0x419   : > { %8185 = vmatmul.bf16.gmra.mxu3 %v7524_v61  ;;  %v14002_v35 = vshrl.u32 %v12989_v22, 16  ;;  %v13151_v31 = vadd.f32 %v12891_v25, %v12685_v12  ;;  %v7350_v43 = vpack.c.b16 %v7327_v30, %v7326_v51  ;;  %v13896_v38 = vrot.slane %v13157_v52, 5  ;;  %v6172_v61 = vld [vmem:[#allocation3 + $0xcc] sm:$0xf] }
 0x41a   : > { %8269 = vmatmul.bf16.gmra.mxu0 %v7584_v27  ;;  %v6938_v13 = vpack.c.b16 %v6919_v15, %v6918_v16  ;;  %v9228_v8 = vrot.slane %v5980_v55, 9  ;;  %v6533_v59 = vor.u32 %v6532_v26, %v6529_v34  ;;  %v5517_v37 = vrot.slane %v9976_v17, 5  ;;  %v13180_v34 = vld [vmem:[#allocation3 + $0xd0] sm:$0xf] }
 0x41b   : > { %v13147_v50 = vrot.slane %v14002_v35, 4  ;;  %v9721_v40 = vld [vmem:[#allocation3 + $0xc0] sm:$0xff]  ;;  %v6551_v26 = vshrl.u32 %v6172_v61, 16  ;;  %v6554_v10 = vshll.u32 %v6172_v61, 16  ;;  %v6570_v61 = vshll.u32 %v13187_v46, 16 }
 0x41c   : > { %v13153_v1 = vld [vmem:[#allocation3 + $0xc4] sm:$0xf]  ;;  %v13160_v20 = vpop.f32.mrf.mxu2  ;;  %v8146_v22 = vpop.f32.mrf.mxu3  ;;  %v13162_v19 = vld [vmem:[#allocation3 + $0xc8] sm:$0x1]  ;;  %7036 = vrot.lane.b32.xlu2 %v9721_v40, %s10061_s21  ;;  %v7472_v9 = vsel %vm3332_vm11, %v6938_v13, %v7031_v5  ;;  %v5516_v40 = vrot.slane %v13896_v38, 4  ;;  %v6534_v53 = vrot.slane %v6533_v59, 4 }
 0x41d   : > { %v13155_v58 = vld [vmem:[#allocation3 + $0xc4] sm:$0xf]  ;;  %14003 = vst [vmem:[#allocation11_spill] sm:$0xff] %v13162_v19  ;;  %v6136_v12 = vrot.slane %v13153_v1, 5  ;;  %v13165_v6 = vld [vmem:[#allocation3 + $0xc8] sm:$0x1]  ;;  %v8147_v30 = vadd.f32 %v8146_v22, %v12961_v56 }
 0x41e   : > { %v6139_v32 = vrot.slane %v13162_v19, 5  ;;  %v6536_v55 = vshll.u32 %v13155_v58, 16  ;;  %v6540_v16 = vshrl.u32 %v13155_v58, 16  ;;  %v6546_v56 = vshll.u32 %v13165_v6, 16 }
 0x41f   : > { %v6137_v15 = vsel %vm10953_vm14, %v9228_v8, %v6136_v12  ;;  %v6138_v27 = vrot.slane %v6136_v12, 4  ;;  %v8232_v35 = vpop.f32.mrf.mxu0  ;;  %v8319_v17 = vpop.f32.mrf.mxu1  ;;  %v6553_v24 = vrot.slane %v6551_v26, 4  ;;  %v6560_v19 = vshll.u32 %v13180_v34, 16 }
 0x420   : > { %v8233_v22 = vadd.f32 %v8232_v35, %v13120_v49  ;;  %v6538_v12 = vrot.slane %v6536_v55, 5  ;;  %v6542_v7 = vrot.slane %v6540_v16, 4  ;;  %v13185_v51 = vadd.f32 %v8319_v17, %v8231_v39  ;;  %v5370_v39 = vld [vmem:[#allocation3 + $0x9c] sm:$0xe]  ;;  %v7155_v35 = vpop.permute.xlu0 %7154 }
 0x421   : > { %v6140_v8 = vsel %vm10953_vm14, %v6138_v27, %v6139_v32  ;;  %8111 = vmatmul.bf16.gmra.mxu2 %v7472_v9  ;;  %v7116_v5 = vunpack.c.l.b16 %v6137_v15  ;;  %v6548_v27 = vrot.slane %v6546_v56, 5  ;;  %v6564_v9 = vshrl.u32 %v13180_v34, 16 }
 0x422   : > { %14004 = vst [vmem:[#allocation12_spill] sm:$0xff] %v13185_v51  ;;  %v7117_v13 = vunpack.c.l.b16 %v6140_v8  ;;  %v6543_v38 = vor.u32 %v6542_v7, %v6538_v12  ;;  %9589 = vmatmul.msk.bf16.gmra.mxu1 %vm3332_vm11, %v7350_v43  ;;  %v6539_v32 = vsel %vm10190_vm4, %v6534_v53, %v6538_v12  ;;  %v6556_v16 = vrot.slane %v6554_v10, 5  ;;  %v7297_v8 = vpop.permute.xlu1 %7296 }
 0x423   : > { %v6562_v7 = vrot.slane %v6560_v19, 5  ;;  %v6566_v43 = vrot.slane %v6564_v9, 4  ;;  %v14005_v53 = vshll.u32 %v13105_v11, 16  ;;  %v5862_v17 = vor.u32 %v13147_v50, %v13143_v36 }
 0x424   : > { %v7133_v49 = vpack.c.b16 %v7117_v13, %v7116_v5  ;;  %v13194_v15 = vpop.f32.mrf.mxu2  ;;  %v8148_v59 = vpop.f32.mrf.mxu3  ;;  %v6544_v55 = vrot.slane %v6543_v38, 4  ;;  %v9210_v10 = vrot.slane %v5370_v39, 9  ;;  %v5518_v19 = vsel %vm10953_vm14, %v5516_v40, %v5517_v37 }
 0x425   : > { %v8149_v26 = vadd.f32 %v8148_v59, %v13001_v28  ;;  %v5851_v56 = vrot.slane %v14005_v53, 5  ;;  %v6557_v12 = vor.u32 %v6556_v16, %v6553_v24  ;;  %v9731_v28 = vld [vmem:[#allocation3 + $0x84] sm:$0xff]  ;;  %v7258_v13 = vunpack.c.l.b16 %v6539_v32 }
 0x426   : > { %7164 = vrot.lane.b32.xlu0 %v7133_v49, %s10061_s21  ;;  %v6549_v38 = vsel %vm10190_vm4, %v6544_v55, %v6548_v27  ;;  %v6567_v9 = vor.u32 %v6566_v43, %v6562_v7  ;;  %v6572_v59 = vrot.slane %v6570_v61, 5  ;;  %v14006_v50 = vpack.c.b16 %v13137_v44, %v13127_v23 }
 0x427   : > { %v8235_v5 = vpop.f32.mrf.mxu0  ;;  %v7259_v49 = vunpack.c.l.b16 %v6549_v38  ;;  %v8321_v53 = vpop.f32.mrf.mxu1  ;;  %v14007_v27 = vrot.slane %v13157_v52, 5  ;;  %v6558_v37 = vrot.slane %v6557_v12, 4  ;;  %v7588_v40 = vsel %vm3332_vm11, %v9731_v28, %v7297_v8 }
 0x428   : > { %v8236_v11 = vadd.f32 %v8235_v5, %v8147_v30  ;;  %v7528_v51 = vsel %vm3332_vm11, %v14006_v50, %v7155_v35  ;;  %v13215_v24 = vadd.f32 %v8321_v53, %v8233_v22  ;;  %v6568_v55 = vrot.slane %v6567_v9, 4  ;;  %v9978_v50 = vld [vmem:[#allocation3 + $0xac] sm:$0xf] }
 0x429   : > { %v5515_v39 = vsel %vm10953_vm14, %v9210_v10, %v14007_v27  ;;  %v7276_v32 = vpack.c.b16 %v7259_v49, %v7258_v13  ;;  %8190 = vmatmul.bf16.gmra.mxu3 %v7528_v51  ;;  %v6921_v30 = vunpack.c.l.b16 %v5518_v19  ;;  %v14008_v16 = vrot.slane %v12972_v62, 5  ;;  %v5557_v27 = vld [vmem:[#allocation3 + $0x9c] sm:$0xf] }
 0x42a   : > { %8274 = vmatmul.bf16.gmra.mxu0 %v7588_v40  ;;  %v6563_v44 = vsel %vm10190_vm4, %v6558_v37, %v6562_v7  ;;  %v5852_v52 = vor.u32 %v5851_v56, %v13141_v2  ;;  %v14009_v22 = vrot.slane %v13102_v18, 5  ;;  %v14010_v51 = vrot.slane %v13115_v48, 9  ;;  %v8476_v2 = vld [vmem:[%s13882_s5 + $0x38] sm:$0xff]  ;;  %v7033_v56 = vpop.permute.xlu2 %7032 }
 0x42b   : > { %v6707_v23 = vsel %vm10953_vm14, %v13132_v47, %v14008_v16  ;;  %7306 = vrot.lane.b32.xlu1 %v7276_v32, %s10061_s21  ;;  %v6573_v62 = vsel %vm10190_vm4, %v6568_v55, %v6572_v59  ;;  %v7260_v35 = vunpack.c.l.b16 %v6563_v44  ;;  %v5863_v43 = vrot.slane %v5862_v17, 4  ;;  %8489 = vmatpush.msrb.mxu2 %v8476_v2  ;;  %v9977_v17 = vld [vmem:[#allocation3 + $0xa0] sm:$0xf] }
 0x42c   : > { %v6704_v61 = vsel %vm10953_vm14, %v14010_v51, %v14009_v22  ;;  %v8074_v47 = vpop.f32.mrf.mxu2  ;;  %v8151_v8 = vpop.f32.mrf.mxu3  ;;  %v6920_v38 = vunpack.c.l.b16 %v5515_v39  ;;  %v7261_v7 = vunpack.c.l.b16 %v6573_v62  ;;  %v7329_v10 = vunpack.c.l.b16 %v6707_v23  ;;  %v9979_v23 = vld [vmem:[#allocation3 + $0x94] sm:$0xf] }
 0x42d   : > { %v13239_v18 = vadd.f32 %v8074_v47, %v13151_v31  ;;  %v8152_v48 = vadd.f32 %v8151_v8, %v13041_v41  ;;  %v14011_v19 = vshll.u32 %v12992_v3, 16  ;;  %v5883_v5 = vshrl.u32 %v9977_v17, 16  ;;  %v9980_v8 = vld [vmem:[#allocation3 + $0xb0] sm:$0x1] }
 0x42e   : > { %v6939_v28 = vpack.c.b16 %v6921_v30, %v6920_v38  ;;  %v7328_v13 = vunpack.c.l.b16 %v6704_v61  ;;  %v5853_v49 = vrot.slane %v5852_v52, 4  ;;  %v7277_v59 = vpack.c.b16 %v7261_v7, %v7260_v35  ;;  %v7299_v7 = vpop.permute.xlu1 %7298 }
 0x42f   : > { %v5867_v12 = vrot.slane %v14011_v19, 5  ;;  %v8237_v9 = vpop.f32.mrf.mxu0  ;;  %v5521_v31 = vrot.slane %v9978_v50, 5  ;;  %v5879_v39 = vshll.u32 %v9977_v17, 16  ;;  %v8324_v37 = vpop.f32.mrf.mxu1  ;;  %v7989_v30 = vadd.f32 %v12891_v25, %v12715_v45 }
 0x430   : > { %v8238_v41 = vadd.f32 %v8237_v9, %v8149_v26  ;;  %v7476_v3 = vsel %vm3332_vm11, %v6939_v28, %v7033_v56  ;;  %v13247_v40 = vadd.f32 %v8324_v37, %v8236_v11  ;;  %v7351_v32 = vpack.c.b16 %v7329_v10, %v7328_v13  ;;  %v6584_v28 = vld [vmem:[#allocation3 + $0x90] sm:$0xe]  ;;  %v9981_v9 = vld [vmem:[#allocation3 + $0x98] sm:$0x1] }
 0x431   : > { %v5868_v53 = vsel %vm10190_vm4, %v5863_v43, %v5867_v12  ;;  %8116 = vmatmul.bf16.gmra.mxu2 %v7476_v3  ;;  %v5858_v55 = vsel %vm10190_vm4, %v5853_v49, %v13143_v36  ;;  %v6710_v44 = vrot.slane %v9979_v23, 5  ;;  %v5870_v52 = vshrl.u32 %v5557_v27, 16  ;;  %v5371_v36 = vld [vmem:[#allocation3 + $0xa8] sm:$0xe]  ;;  %v7157_v43 = vpop.permute.xlu0 %7156  ;;  %v9732_v12 = vld [vmem:[#allocation3 + $0x90] sm:$0xff] }
 0x432   : > { %v7061_v16 = vunpack.c.l.b16 %v5868_v53  ;;  %9590 = vmatmul.msk.bf16.gmra.mxu1 %vm3332_vm11, %v7351_v32  ;;  %v5523_v26 = vrot.slane %v5521_v31, 4  ;;  %v5873_v11 = vshll.u32 %v5557_v27, 16  ;;  %v13256_v22 = vrot.slane %v5879_v39, 5  ;;  %v9982_v27 = vld [vmem:[#allocation3 + $0xa4] sm:$0x1] }
 0x433   : > { %7308 = vrot.lane.b32.xlu1 %v7277_v59, %s10061_s21  ;;  %v5885_v51 = vrot.slane %v5883_v5, 4  ;;  %v7060_v35 = vunpack.c.l.b16 %v5858_v55  ;;  %v5524_v38 = vrot.slane %v9980_v8, 5  ;;  %v6712_v56 = vrot.slane %v6710_v44, 4  ;;  %s323_s21 = sand.u32 1, %s10050_s10  }
 0x434   : > { %v8077_v61 = vpop.f32.mrf.mxu2  ;;  %v8153_v62 = vpop.f32.mrf.mxu3  ;;  %v5872_v10 = vrot.slane %v5870_v52, 4  ;;  %v9211_v17 = vrot.slane %v5371_v36, 9  ;;  %v5875_v13 = vrot.slane %v5873_v11, 5  ;;  %v6713_v59 = vrot.slane %v9981_v9, 5  ;;  %s8794_s16 = sshll.u32 %s323_s21, 8  ;;  %s8713_s27 = scalar_lea.sflag [#allocation5], %s323_s21 }
 0x435   : > { %v13258_v47 = vadd.f32 %v8077_v61, %v7989_v30  ;;  %v13261_v45 = vadd.f32 %v8153_v62, %v13069_v60  ;;  %v7081_v2 = vpack.c.b16 %v7061_v16, %v7060_v35  ;;  %v5525_v5 = vsel %vm10953_vm14, %v5523_v26, %v5524_v38  ;;  %v7035_v61 = vpop.permute.xlu2 %7034  ;;  %s13719_s17 = scalar_lea.vmem [#allocation4], %s8794_s16 }
 0x436   : > { %v5886_v49 = vor.u32 %v5885_v51, %v13256_v22  ;;  %v5889_v39 = vshll.u32 %v9982_v27, 16  ;;  %v7592_v3 = vsel %vm3332_vm11, %v9732_v12, %v7299_v7  ;;  %v5522_v32 = vsel %vm10953_vm14, %v9211_v17, %v5521_v31  ;;  %v5559_v12 = vld [vmem:[#allocation3 + $0xa8] sm:$0xf]  ;;  %s8725_s24 = sshll.u32 %s13719_s17, 4  ;;  %s8726_s24 = int_to_ptr.vmem [resolvable:$true] %s8725_s24 }
 0x437   : > { %v8240_v19 = vpop.f32.mrf.mxu0  ;;  %v8326_v53 = vpop.f32.mrf.mxu1  ;;  %v7532_v50 = vsel %vm3332_vm11, %v7081_v2, %v7157_v43  ;;  %v6923_v55 = vunpack.c.l.b16 %v5525_v5  ;;  %v9239_v30 = vrot.slane %v6584_v28, 9  ;;  %v6714_v16 = vsel %vm10953_vm14, %v6712_v56, %v6713_v59  ;;  %v9983_v43 = vld [vmem:[#allocation3 + $0xac] sm:$0xf] }
 0x438   : > { %v8241_v60 = vadd.f32 %v8240_v19, %v8152_v48  ;;  %v13267_v37 = vadd.f32 %v8326_v53, %v8238_v41  ;;  %v7991_v48 = vadd.f32 %v12891_v25, %v12740_v29  ;;  %v5876_v23 = vor.u32 %v5875_v13, %v5872_v10 }
 0x439   : > { %8195 = vmatmul.bf16.gmra.mxu3 %v7532_v50  ;;  %v5887_v52 = vrot.slane %v5886_v49, 4  ;;  %v6922_v11 = vunpack.c.l.b16 %v5522_v32  ;;  %v6711_v51 = vsel %vm10953_vm14, %v9239_v30, %v6710_v44  ;;  %v7331_v35 = vunpack.c.l.b16 %v6714_v16  ;;  %v9984_v49 = vld [vmem:[#allocation3 + $0xa0] sm:$0xf]  ;;  %v7159_v32 = vpop.permute.xlu0 %7158 }
 0x43a   : > { %8279 = vmatmul.bf16.gmra.mxu0 %v7592_v3  ;;  %v5891_v36 = vrot.slane %v5889_v39, 5  ;;  %v5907_v8 = vshrl.u32 %v9983_v43, 16  ;;  %v7330_v29 = vunpack.c.l.b16 %v6711_v51  ;;  %v5877_v2 = vrot.slane %v5876_v23, 4  ;;  %v6585_v23 = vld [vmem:[#allocation3 + $0x9c] sm:$0xe] }
 0x43b   : > { %v6940_v38 = vpack.c.b16 %v6923_v55, %v6922_v11  ;;  %v5903_v10 = vshll.u32 %v9983_v43, 16  ;;  %v7994_v28 = vadd.f32 %v12891_v25, %v12761_v4  ;;  %v6717_v9 = vrot.slane %v9984_v49, 5  ;;  %v9985_v11 = vld [vmem:[#allocation3 + $0xa4] sm:$0x1]  ;;  %v9986_v43 = vld [vmem:[#allocation3 + $0xb0] sm:$0x1] }
 0x43c   : > { %v8079_v26 = vpop.f32.mrf.mxu2  ;;  %v8156_v41 = vpop.f32.mrf.mxu3  ;;  %v5892_v56 = vsel %vm10190_vm4, %v5887_v52, %v5891_v36  ;;  %v5882_v5 = vsel %vm10190_vm4, %v5877_v2, %v13256_v22  ;;  %v5894_v59 = vshrl.u32 %v5559_v12, 16  ;;  %v5897_v53 = vshll.u32 %v5559_v12, 16  ;;  %v13309_v2 = vld [vmem:[%s13881_s4] ss:$0 sm:$0xff]  ;;  %v9988_v49 = vld [vmem:[#allocation3 + $0xb8] sm:$0xf] }
 0x43d   : > { %v13278_v62 = vadd.f32 %v8079_v26, %v7991_v48  ;;  %v8157_v31 = vadd.f32 %v8156_v41, %v13118_v54  ;;  %v7480_v44 = vsel %vm3332_vm11, %v6940_v38, %v7035_v61  ;;  %v7352_v54 = vpack.c.b16 %v7331_v35, %v7330_v29  ;;  %v7301_v22 = vpop.permute.xlu1 %7300  ;;  %v9733_v48 = vld [vmem:[#allocation3 + $0x9c] sm:$0xff] }
 0x43e   : > { %v7063_v13 = vunpack.c.l.b16 %v5892_v56  ;;  %v13292_v50 = vrot.slane %v5903_v10, 5  ;;  %v7062_v3 = vunpack.c.l.b16 %v5882_v5  ;;  %v6719_v4 = vrot.slane %v6717_v9, 4 }
 0x43f   : > { %v8242_v7 = vpop.f32.mrf.mxu0  ;;  %v8329_v19 = vpop.f32.mrf.mxu1  ;;  %v5896_v52 = vrot.slane %v5894_v59, 4  ;;  %v5899_v26 = vrot.slane %v5897_v53, 5  ;;  %v6720_v51 = vrot.slane %v9985_v11, 5  ;;  %v5931_v59 = vshrl.u32 %v9988_v49, 16 }
 0x440   : > { %v13284_v17 = vadd.f32 %v8329_v19, %v8241_v60  ;;  %v5909_v60 = vrot.slane %v5907_v8, 4  ;;  %v7082_v30 = vpack.c.b16 %v7063_v13, %v7062_v3  ;;  %v8243_v25 = vadd.f32 %v8242_v7, %v13261_v45  ;;  %v5561_v3 = vld [vmem:[#allocation3 + $0xb4] sm:$0xf] }
 0x441   : > { %8121 = vmatmul.bf16.gmra.mxu2 %v7480_v44  ;;  %v5913_v8 = vshll.u32 %v9986_v43, 16  ;;  %v7596_v45 = vsel %vm3332_vm11, %v9733_v48, %v7301_v22  ;;  %v9240_v7 = vrot.slane %v6585_v23, 9  ;;  %v6721_v29 = vsel %vm10953_vm14, %v6719_v4, %v6720_v51 }
 0x442   : > { %9591 = vmatmul.msk.bf16.gmra.mxu1 %vm3332_vm11, %v7352_v54  ;;  %v5910_v41 = vor.u32 %v5909_v60, %v13292_v50  ;;  %v7536_v36 = vsel %vm3332_vm11, %v7082_v30, %v7159_v32  ;;  %v5900_v56 = vor.u32 %v5899_v26, %v5896_v52  ;;  %v8475_v54 = vld [vmem:[%s13882_s5 + $0x30] sm:$0xff]  ;;  %v5927_v32 = vshll.u32 %v9988_v49, 16  ;;  %v9989_v52 = vld [vmem:[#allocation3 + $0xac] sm:$0xf] }
 0x443   : > { %v6718_v12 = vsel %vm10953_vm14, %v9240_v7, %v6717_v9  ;;  %v5915_v13 = vrot.slane %v5913_v8, 5  ;;  %8490 = vmatpush.msrb.mxu2 %v8475_v54  ;;  %v7981_v9 = vadd.f32 %v13309_v2, %v12607_v33  ;;  %v7984_v30 = vadd.f32 %v13309_v2, %v12651_v63 }
 0x444   : > { %v8082_v27 = vpop.f32.mrf.mxu2  ;;  %v13294_v39 = vpop.f32.mrf.mxu3  ;;  %v5911_v10 = vrot.slane %v5910_v41, 4  ;;  %v5901_v60 = vrot.slane %v5900_v56, 4  ;;  %v7999_v48 = vadd.f32 %v13309_v2, %v12784_v0  ;;  %v6724_v26 = vrot.slane %v9989_v52, 5 }
 0x445   : > { %v13296_v55 = vadd.f32 %v8082_v27, %v7994_v28  ;;  %v7333_v28 = vunpack.c.l.b16 %v6721_v29  ;;  %v5918_v41 = vshrl.u32 %v5561_v3, 16  ;;  %v8070_v33 = vadd.f32 %v13160_v20, %v7981_v9  ;;  %v7303_v7 = vpop.permute.xlu1 %7302 }
 0x446   : > { %v5916_v27 = vsel %vm10190_vm4, %v5911_v10, %v5915_v13  ;;  %v5921_v11 = vshll.u32 %v5561_v3, 16  ;;  %v5929_v63 = vrot.slane %v5927_v32, 5  ;;  %v5933_v51 = vrot.slane %v5931_v59, 4  ;;  %v9990_v13 = vld [vmem:[#allocation3 + $0xb0] sm:$0x1] }
 0x447   : > { %v8245_v16 = vpop.f32.mrf.mxu0  ;;  %v8331_v35 = vpop.f32.mrf.mxu1  ;;  %v7065_v23 = vunpack.c.l.b16 %v5916_v27  ;;  %v8159_v8 = vadd.f32 %v13294_v39, %v8070_v33  ;;  %v5920_v54 = vrot.slane %v5918_v41, 4  ;;  %v6727_v49 = vrot.slane %v9990_v13, 5  ;;  %v6587_v13 = vld [vmem:[#allocation3 + $0xb4] sm:$0xe] }
 0x448   : > { %v8246_v61 = vadd.f32 %v8245_v16, %v8157_v31  ;;  %v13301_v38 = vadd.f32 %v8331_v35, %v8243_v25  ;;  %v7996_v31 = vadd.f32 %v13309_v2, %v12777_v57  ;;  %v7332_v57 = vunpack.c.l.b16 %v6718_v12  ;;  %v6586_v12 = vld [vmem:[#allocation3 + $0xa8] sm:$0xe] }
 0x449   : > { %8200 = vmatmul.bf16.gmra.mxu3 %v7536_v36  ;;  %v5906_v16 = vsel %vm10190_vm4, %v5901_v60, %v13292_v50  ;;  %v7161_v50 = vpop.permute.xlu0 %7160  ;;  %v9991_v60 = vld [vmem:[#allocation3 + $0xbc] sm:$0x1]  ;;  %v8001_v32 = vadd.f32 %v13309_v2, %v12792_v21  ;;  %vm8504_vm0 = vcmask 31744  }
 0x44a   : > { %8284 = vmatmul.bf16.gmra.mxu0 %v7596_v45  ;;  %v7353_v25 = vpack.c.b16 %v7333_v28, %v7332_v57  ;;  %v7064_v43 = vunpack.c.l.b16 %v5906_v16  ;;  %v5934_v28 = vor.u32 %v5933_v51, %v5929_v63  ;;  %v5937_v27 = vshll.u32 %v9991_v60, 16 }
 0x44c   : > { %v8084_v19 = vpop.f32.mrf.mxu2  ;;  %v8161_v44 = vpop.f32.mrf.mxu3  ;;  %v7083_v20 = vpack.c.b16 %v7065_v23, %v7064_v43  ;;  %v5939_v41 = vrot.slane %v5937_v27, 5 }
 0x44d   : > { %v13318_v5 = vadd.f32 %v8084_v19, %v7996_v31  ;;  %v6726_v31 = vrot.slane %v6724_v26, 4  ;;  %v9734_v19 = vld [vmem:[#allocation3 + $0xa8] sm:$0xff] }
 0x44e   : > { %v7540_v39 = vsel %vm3332_vm11, %v7083_v20, %v7161_v50 }
 0x44f   : > { %v8247_v53 = vpop.f32.mrf.mxu0  ;;  %v8334_v22 = vpop.f32.mrf.mxu1  ;;  %v6728_v3 = vsel %vm10953_vm14, %v6726_v31, %v6727_v49  ;;  %v9993_v49 = vld [vmem:[#allocation3 + $0xb8] sm:$0xf] }
 0x450   : > { %v13326_v4 = vadd.f32 %v8334_v22, %v8246_v61  ;;  %v8073_v61 = vadd.f32 %v13194_v15, %v7984_v30  ;;  %v8248_v56 = vadd.f32 %v8247_v53, %v8159_v8  ;;  %v5923_v15 = vrot.slane %v5921_v11, 5  ;;  %v9992_v8 = vld [vmem:[#allocation3 + $0xb8] sm:$0xf] }
 0x451   : > { %v9241_v53 = vrot.slane %v6586_v12, 9  ;;  %v5935_v22 = vrot.slane %v5934_v28, 4  ;;  %v7335_v52 = vunpack.c.l.b16 %v6728_v3  ;;  %v7305_v12 = vpop.permute.xlu1 %7304  ;;  %v9735_v28 = vld [vmem:[#allocation3 + $0xb4] sm:$0xff] }
 0x452   : > { %9592 = vmatmul.msk.bf16.gmra.mxu1 %vm3332_vm11, %v7353_v25  ;;  %v8162_v29 = vadd.f32 %v8161_v44, %v8073_v61  ;;  %v7600_v44 = vsel %vm3332_vm11, %v9734_v19, %v7303_v7  ;;  %v5924_v9 = vor.u32 %v5923_v15, %v5920_v54  ;;  %v6731_v7 = vrot.slane %v9992_v8, 5 }
 0x453   : > { %v6725_v16 = vsel %vm10953_vm14, %v9241_v53, %v6724_v26  ;;  %v5940_v61 = vsel %vm10190_vm4, %v5935_v22, %v5939_v41  ;;  %v7604_v3 = vsel %vm3332_vm11, %v9735_v28, %v7305_v12  ;;  %v8474_v41 = vld [vmem:[%s13882_s5 + $0x28] sm:$0xff] }
 0x454   : > { %v8087_v35 = vpop.f32.mrf.mxu2  ;;  %v8163_v36 = vpop.f32.mrf.mxu3  ;;  %v7334_v11 = vunpack.c.l.b16 %v6725_v16  ;;  %v5925_v51 = vrot.slane %v5924_v9, 4  ;;  %v7067_v50 = vunpack.c.l.b16 %v5940_v61  ;;  %v6733_v15 = vrot.slane %v6731_v7, 4  ;;  %v14013_v9 = vld [vmem:[#allocation20_spill] sm:$0xff]  ;;  %v9995_v61 = vld [vmem:[#allocation3 + $0xbc] sm:$0x1]  ;;  %8491 = vmatpush.msrb.mxu2 %v8474_v41 }
 0x455   : > { %v13337_v0 = vadd.f32 %v8087_v35, %v7999_v48  ;;  %v8164_v45 = vadd.f32 %v8163_v36, %v13239_v18  ;;  %v8006_v22 = vadd.f32 %v13309_v2, %v14013_v9 }
 0x456   : > { %v7354_v43 = vpack.c.b16 %v7335_v52, %v7334_v11  ;;  %v5930_v26 = vsel %vm10190_vm4, %v5925_v51, %v5929_v63  ;;  %v5372_v52 = vld [vmem:[#allocation3 + $0xb4] sm:$0xe] }
 0x457   : > { %v8250_v10 = vpop.f32.mrf.mxu0  ;;  %v8336_v57 = vpop.f32.mrf.mxu1 }
 0x458   : > { %v8251_v59 = vadd.f32 %v8250_v10, %v8162_v29  ;;  %v13341_v18 = vadd.f32 %v8336_v57, %v8248_v56  ;;  %v7066_v56 = vunpack.c.l.b16 %v5930_v26  ;;  %v7163_v10 = vpop.permute.xlu0 %7162  ;;  %v9994_v57 = vld [vmem:[#allocation3 + $0xbc] sm:$0x1]  ;;  %v9212_v26 = vrot.slane %v5372_v52, 9 }
 0x459   : > { %8205 = vmatmul.bf16.gmra.mxu3 %v7540_v39  ;;  %v6734_v39 = vrot.slane %v9994_v57, 5 }
 0x45a   : > { %8289 = vmatmul.bf16.gmra.mxu0 %v7600_v44  ;;  %v7084_v54 = vpack.c.b16 %v7067_v50, %v7066_v56  ;;  %v14014_v56 = vld [vmem:[#allocation25_spill] sm:$0xff] }
 0x45c   : > { %v8089_v30 = vpop.f32.mrf.mxu2  ;;  %v8166_v25 = vpop.f32.mrf.mxu3  ;;  %v7544_v44 = vsel %vm3332_vm11, %v7084_v54, %v7163_v10  ;;  %v8009_v10 = vadd.f32 %v13309_v2, %v14014_v56 }
 0x45d   : > { %v13350_v48 = vadd.f32 %v8089_v30, %v8001_v32  ;;  %v8167_v23 = vadd.f32 %v8166_v25, %v13258_v47  ;;  %v14012_v47 = vld [vmem:[#allocation7_spill] sm:$0xff]  ;;  %v6735_v32 = vsel %vm10953_vm14, %v6733_v15, %v6734_v39  ;;  %v6741_v39 = vrot.slane %v13165_v6, 5 }
 0x45e   : > { %v8004_v29 = vadd.f32 %v13309_v2, %v14012_v47  ;;  %v7337_v51 = vunpack.c.l.b16 %v6735_v32  ;;  %v14015_v32 = vld [vmem:[#allocation26_spill] sm:$0xff] }
 0x45f   : > { %v8252_v33 = vpop.f32.mrf.mxu0  ;;  %v8339_v35 = vpop.f32.mrf.mxu1 }
 0x460   : > { %v8253_v21 = vadd.f32 %v8252_v33, %v8164_v45  ;;  %v13355_v36 = vadd.f32 %v8339_v35, %v8251_v59  ;;  %v5528_v59 = vrot.slane %v9993_v49, 5 }
 0x462   : > { %9593 = vmatmul.msk.bf16.gmra.mxu1 %vm3332_vm11, %v7354_v43  ;;  %v5530_v30 = vrot.slane %v5528_v59, 4 }
 0x464   : > { %v8092_v20 = vpop.f32.mrf.mxu2  ;;  %v8168_v31 = vpop.f32.mrf.mxu3 }
 0x465   : > { %v13362_v45 = vadd.f32 %v8092_v20, %v8004_v29  ;;  %v8169_v19 = vadd.f32 %v8168_v31, %v13278_v62  ;;  %v9242_v62 = vrot.slane %v6587_v13, 9  ;;  %v5529_v20 = vsel %vm10953_vm14, %v9212_v26, %v5528_v59  ;;  %v6588_v59 = vld [vmem:[#allocation3 + $0xc0] sm:$0xe]  ;;  %v14017_v26 = vld [vmem:[#allocation14_spill] sm:$0xff] }
 0x466   : > { %v6924_v15 = vunpack.c.l.b16 %v5529_v20 }
 0x467   : > { %v8255_v63 = vpop.f32.mrf.mxu0  ;;  %v8341_v27 = vpop.f32.mrf.mxu1 }
 0x468   : > { %v8256_v60 = vadd.f32 %v8255_v63, %v8167_v23  ;;  %v13366_v53 = vadd.f32 %v8341_v27, %v8253_v21  ;;  %v6732_v23 = vsel %vm10953_vm14, %v9242_v62, %v6731_v7  ;;  %v5531_v21 = vrot.slane %v9995_v61, 5 }
 0x469   : > { %8210 = vmatmul.bf16.gmra.mxu3 %v7544_v44  ;;  %v7336_v43 = vunpack.c.l.b16 %v6732_v23  ;;  %v5955_v23 = vshrl.u32 %v13153_v1, 16 }
 0x46a   : > { %8294 = vmatmul.bf16.gmra.mxu0 %v7604_v3  ;;  %v5532_v50 = vsel %vm10953_vm14, %v5530_v30, %v5531_v21  ;;  %v9243_v3 = vrot.slane %v6588_v59, 9  ;;  %v5563_v21 = vld [vmem:[#allocation3 + $0xc0] sm:$0xf] }
 0x46b   : > { %v7355_v29 = vpack.c.b16 %v7337_v51, %v7336_v43  ;;  %v6925_v31 = vunpack.c.l.b16 %v5532_v50  ;;  %v8014_v50 = vadd.f32 %v13309_v2, %v14017_v26 }
 0x46c   : > { %v8094_v25 = vpop.f32.mrf.mxu2  ;;  %v8171_v16 = vpop.f32.mrf.mxu3 }
 0x46d   : > { %v13378_v33 = vadd.f32 %v8094_v25, %v8006_v22  ;;  %v8172_v11 = vadd.f32 %v8171_v16, %v13296_v55  ;;  %v6738_v55 = vrot.slane %v13155_v58, 5  ;;  %v6941_v28 = vpack.c.b16 %v6925_v31, %v6924_v15 }
 0x46f   : > { %v8257_v35 = vpop.f32.mrf.mxu0  ;;  %v8344_v7 = vpop.f32.mrf.mxu1  ;;  %v6740_v13 = vrot.slane %v6738_v55, 4  ;;  %v6739_v30 = vsel %vm10953_vm14, %v9243_v3, %v6738_v55 }
 0x470   : > { %v8258_v8 = vadd.f32 %v8257_v35, %v8169_v19  ;;  %v13383_v47 = vadd.f32 %v8344_v7, %v8256_v60  ;;  %v7338_v41 = vunpack.c.l.b16 %v6739_v30 }
 0x471   : > { %v6742_v62 = vsel %vm10953_vm14, %v6740_v13, %v6741_v39  ;;  %v6748_v39 = vrot.slane %v13187_v46, 5 }
 0x472   : > { %9594 = vmatmul.msk.bf16.gmra.mxu1 %vm3332_vm11, %v7355_v29  ;;  %v7339_v16 = vunpack.c.l.b16 %v6742_v62  ;;  %v5957_v29 = vrot.slane %v5955_v23, 4 }
 0x474   : > { %v8097_v12 = vpop.f32.mrf.mxu2  ;;  %v8173_v54 = vpop.f32.mrf.mxu3  ;;  %v7356_v43 = vpack.c.b16 %v7339_v16, %v7338_v41 }
 0x475   : > { %v13391_v63 = vadd.f32 %v8097_v12, %v8009_v10  ;;  %v8174_v19 = vadd.f32 %v8173_v54, %v13318_v5  ;;  %v8011_v5 = vadd.f32 %v13309_v2, %v14015_v32 }
 0x476   : > { %v7037_v57 = vpop.permute.xlu2 %7036 }
 0x477   : > { %v8260_v49 = vpop.f32.mrf.mxu0  ;;  %v8346_v60 = vpop.f32.mrf.mxu1  ;;  %v7484_v27 = vsel %vm3332_vm11, %v6941_v28, %v7037_v57  ;;  %v14018_v28 = vld [vmem:[#allocation11_spill] sm:$0xff] }
 0x478   : > { %v8261_v58 = vadd.f32 %v8260_v49, %v8172_v11  ;;  %v13396_v44 = vadd.f32 %v8346_v60, %v8258_v8  ;;  %8126 = vmatmul.bf16.gmra.mxu2 %v7484_v27  ;;  %v5951_v11 = vshll.u32 %v13153_v1, 16  ;;  %v5942_v8 = vshrl.u32 %v5563_v21, 16  ;;  %v6589_v60 = vld [vmem:[#allocation3 + $0xcc] sm:$0xe] }
 0x479   : > { %v5961_v13 = vshll.u32 %v14018_v28, 16  ;;  %v6745_v27 = vrot.slane %v13180_v34, 5  ;;  %v9244_v32 = vrot.slane %v6589_v60, 9 }
 0x47a   : > { %v5953_v7 = vrot.slane %v5951_v11, 5  ;;  %v5944_v10 = vrot.slane %v5942_v8, 4 }
 0x47b   : > { %v5963_v62 = vrot.slane %v5961_v13, 5  ;;  %v6746_v46 = vsel %vm10953_vm14, %v9244_v32, %v6745_v27 }
 0x47c   : > { %v8099_v9 = vpop.f32.mrf.mxu2  ;;  %v8176_v22 = vpop.f32.mrf.mxu3  ;;  %v5958_v54 = vor.u32 %v5957_v29, %v5953_v7  ;;  %v7340_v23 = vunpack.c.l.b16 %v6746_v46 }
 0x47d   : > { %v13404_v6 = vadd.f32 %v8099_v9, %v8011_v5  ;;  %v8177_v25 = vadd.f32 %v8176_v22, %v13337_v0  ;;  %v5945_v0 = vshll.u32 %v5563_v21, 16  ;;  %v6747_v5 = vrot.slane %v6745_v27, 4  ;;  %v8472_v27 = vld [vmem:[%s13882_s5 + $0x18] sm:$0xff] }
 0x47e   : > { %v5959_v59 = vrot.slane %v5958_v54, 4 }
 0x47f   : > { %v8262_v52 = vpop.f32.mrf.mxu0  ;;  %v8349_v61 = vpop.f32.mrf.mxu1  ;;  %v5947_v12 = vrot.slane %v5945_v0, 5  ;;  %v6749_v16 = vsel %vm10953_vm14, %v6747_v5, %v6748_v39  ;;  %v8502_v5 = vld [vmem:[%s13884_s7] sm:$0xf] }
 0x480   : > { %v8263_v51 = vadd.f32 %v8262_v52, %v8174_v19  ;;  %v13409_v35 = vadd.f32 %v8349_v61, %v8261_v58  ;;  %v5964_v30 = vsel %vm10190_vm4, %v5959_v59, %v5963_v62  ;;  %v7341_v41 = vunpack.c.l.b16 %v6749_v16  ;;  %v9737_v59 = vld [vmem:[#allocation3 + $0xcc] sm:$0xff]  ;;  %9598 = vmatpush.msk.msrb.mxu3 %vm8508_vm15, %v8502_v5  ;;  %v8471_v16 = vld [vmem:[%s13882_s5 + $0x10] sm:$0xff] }
 0x481   : > { %v5948_v57 = vor.u32 %v5947_v12, %v5944_v10  ;;  %v7069_v11 = vunpack.c.l.b16 %v5964_v30  ;;  %v8412_v5 = vsel %vm3332_vm11, %v13341_v18, 0.0 }
 0x482   : > { %14016 = vst [vmem:[#allocation13_spill] sm:$0xff] %v13409_v35  ;;  %9595 = vmatmul.msk.bf16.gmra.mxu1 %vm3332_vm11, %v7356_v43 }
 0x483   : > { %v5949_v22 = vrot.slane %v5948_v57, 4 }
 0x484   : > { %v8102_v20 = vpop.f32.mrf.mxu2  ;;  %v8178_v31 = vpop.f32.mrf.mxu3 }
 0x485   : > { %v13414_v55 = vadd.f32 %v8102_v20, %v8014_v50  ;;  %v8179_v1 = vadd.f32 %v8178_v31, %v13350_v48  ;;  %v8473_v48 = vld [vmem:[%s13882_s5 + $0x20] sm:$0xff] }
 0x486   : > { %8492 = vmatpush.msrb.mxu2 %v8473_v48 }
 0x487   : > { %v8265_v56 = vpop.f32.mrf.mxu0  ;;  %v8351_v19 = vpop.f32.mrf.mxu1 }
 0x488   : > { %v8266_v15 = vadd.f32 %v8265_v56, %v8177_v25  ;;  %v13418_v49 = vadd.f32 %v8351_v19, %v8263_v51  ;;  %v7357_v51 = vpack.c.b16 %v7341_v41, %v7340_v23  ;;  %8493 = vmatpush.msrb.mxu2 %v8472_v27  ;;  %v8408_v27 = vsel %vm3332_vm11, %v13301_v38, 0.0 }
 0x48a   : > { %14019 = vst [vmem:[#allocation16_spill] sm:$0xff] %v13418_v49  ;;  %8494 = vmatpush.msrb.mxu2 %v8471_v16 }
 0x48c   : > { %v8181_v58 = vpop.f32.mrf.mxu3 }
 0x48d   : > { %v8182_v3 = vadd.f32 %v8181_v58, %v13362_v45  ;;  %v5954_v45 = vsel %vm10190_vm4, %v5949_v22, %v5953_v7  ;;  %v9736_v7 = vld [vmem:[#allocation3 + $0xc0] sm:$0xff] }
 0x48e   : > { %v7068_v21 = vunpack.c.l.b16 %v5954_v45 }
 0x48f   : > { %v8267_v9 = vpop.f32.mrf.mxu0  ;;  %v8354_v34 = vpop.f32.mrf.mxu1 }
 0x490   : > { %v8268_v25 = vadd.f32 %v8267_v9, %v8179_v1  ;;  %v13432_v52 = vadd.f32 %v8354_v34, %v8266_v15  ;;  %v7085_v26 = vpack.c.b16 %v7069_v11, %v7068_v21  ;;  %v13462_v34 = vpop.f32.mrf.mxu2 }
 0x492   : > { %14020 = vst [vmem:[#allocation18_spill] sm:$0xff] %v13432_v52  ;;  %9596 = vmatmul.msk.bf16.gmra.mxu1 %vm3332_vm11, %v7357_v51 }
 0x494   : > { %v8183_v61 = vpop.f32.mrf.mxu3 }
 0x495   : > { %v8184_v43 = vadd.f32 %v8183_v61, %v13378_v33 }
 0x497   : > { %v8270_v50 = vpop.f32.mrf.mxu0  ;;  %v8356_v0 = vpop.f32.mrf.mxu1 }
 0x498   : > { %v7165_v8 = vpop.permute.xlu0 %7164  ;;  %v8271_v42 = vadd.f32 %v8270_v50, %v8182_v3  ;;  %v13439_v20 = vadd.f32 %v8356_v0, %v8268_v25  ;;  %v13471_v41 = vpop.f32.mrf.mxu2 }
 0x499   : > { %v7548_v29 = vsel %vm3332_vm11, %v7085_v26, %v7165_v8  ;;  %v8470_v8 = vld [vmem:[%s13882_s5 + $0x8] sm:$0xff] }
 0x49a   : > { %14021 = vst [vmem:[#allocation21_spill] sm:$0xff] %v13439_v20  ;;  %8215 = vmatmul.bf16.gmra.mxu3 %v7548_v29  ;;  %8495 = vmatpush.msrb.mxu2 %v8470_v8 }
 0x49c   : > { %v8186_v14 = vpop.f32.mrf.mxu3 }
 0x49d   : > { %v7307_v31 = vpop.permute.xlu1 %7306  ;;  %v8187_v1 = vadd.f32 %v8186_v14, %v13391_v63 }
 0x49e   : > { %v7608_v56 = vsel %vm3332_vm11, %v9736_v7, %v7307_v31 }
 0x49f   : > { %8299 = vmatmul.bf16.gmra.mxu0 %v7608_v56  ;;  %v8272_v33 = vpop.f32.mrf.mxu0  ;;  %v8359_v12 = vpop.f32.mrf.mxu1  ;;  %v8400_v56 = vsel %vm3332_vm11, %v13215_v24, 0.0 }
 0x4a0   : > { %v8273_v10 = vadd.f32 %v8272_v33, %v8184_v43  ;;  %v13443_v54 = vadd.f32 %v8359_v12, %v8271_v42  ;;  %v13479_v21 = vpop.f32.mrf.mxu2 }
 0x4a2   : > { %14022 = vst [vmem:[#allocation23_spill] sm:$0xff] %v13443_v54 }
 0x4a4   : > { %v8188_v15 = vpop.f32.mrf.mxu3 }
 0x4a5   : > { %v8189_v19 = vadd.f32 %v8188_v15, %v13404_v6  ;;  %v7309_v58 = vpop.permute.xlu1 %7308  ;;  %v8402_v15 = vsel %vm3332_vm11, %v13247_v40, 0.0 }
 0x4a6   : > { %v7612_v63 = vsel %vm3332_vm11, %v9737_v59, %v7309_v58 }
 0x4a7   : > { %v8275_v28 = vpop.f32.mrf.mxu0  ;;  %v8361_v57 = vpop.f32.mrf.mxu1 }
 0x4a8   : > { %v8276_v13 = vadd.f32 %v8275_v28, %v8187_v1  ;;  %v13446_v39 = vadd.f32 %v8361_v57, %v8273_v10  ;;  %v13490_v42 = vpop.f32.mrf.mxu2  ;;  %v14024_v10 = vld [vmem:[#allocation12_spill] sm:$0xff] }
 0x4a9   : > { %v8399_v12 = vsel %vm3332_vm11, %v14024_v10, 0.0 }
 0x4aa   : > { %14023 = vst [vmem:[#allocation27_spill] sm:$0xff] %v13446_v39  ;;  %v8401_v28 = vadd.f32 %v8400_v56, %v8399_v12  ;;  %v8469_v56 = vld [vmem:[%s13882_s5] sm:$0xff]  ;;  %v8416_v12 = vsel %vm3332_vm11, %v13366_v53, 0.0 }
 0x4ab   : > { %8496 = vmatpush.msrb.mxu2 %v8469_v56 }
 0x4ac   : > { %v8191_v60 = vpop.f32.mrf.mxu3  ;;  %v8403_v57 = vadd.f32 %v8402_v15, %v8401_v28  ;;  %v8418_v28 = vsel %vm3332_vm11, %v13383_v47, 0.0 }
 0x4ad   : > { %v8192_v48 = vadd.f32 %v8191_v60, %v13414_v55  ;;  %v8406_v60 = vsel %vm3332_vm11, %v13284_v17, 0.0 }
 0x4af   : > { %8304 = vmatmul.bf16.gmra.mxu0 %v7612_v63  ;;  %v8277_v3 = vpop.f32.mrf.mxu0  ;;  %v8364_v62 = vpop.f32.mrf.mxu1 }
 0x4b0   : > { %v8278_v6 = vadd.f32 %v8277_v3, %v8189_v19  ;;  %v13453_v32 = vadd.f32 %v8364_v62, %v8276_v13  ;;  %v13498_v7 = vpop.f32.mrf.mxu2  ;;  %v8404_v13 = vsel %vm3332_vm11, %v13267_v37, 0.0  ;;  %v8410_v3 = vsel %vm3332_vm11, %v13326_v4, 0.0 }
 0x4b1   : > { %v8405_v63 = vadd.f32 %v8404_v13, %v8403_v57  ;;  %v8420_v57 = vsel %vm3332_vm11, %v13396_v44, 0.0 }
 0x4b4   : > { %v13467_v23 = vpop.f32.mrf.mxu3 }
 0x4b7   : > { %v8280_v9 = vpop.f32.mrf.mxu0  ;;  %v8366_v30 = vpop.f32.mrf.mxu1 }
 0x4b8   : > { %v8281_v22 = vadd.f32 %v8280_v9, %v8192_v48  ;;  %v13458_v46 = vadd.f32 %v8366_v30, %v8278_v6  ;;  %v13512_v19 = vpop.f32.mrf.mxu2  ;;  %v8407_v48 = vadd.f32 %v8406_v60, %v8405_v63  ;;  %v8414_v30 = vsel %vm3332_vm11, %v13355_v36, 0.0 }
 0x4ba   : > { %v8409_v6 = vadd.f32 %v8408_v27, %v8407_v48  ;;  %v8422_v27 = vsel %vm3332_vm11, %v13409_v35, 0.0 }
 0x4bc   : > { %v13473_v11 = vpop.f32.mrf.mxu3 }
 0x4bf   : > { %v8369_v25 = vpop.f32.mrf.mxu1  ;;  %v13475_v51 = vpop.f32.mrf.mxu0 }
 0x4c0   : > { %v13460_v55 = vadd.f32 %v8369_v25, %v8281_v22  ;;  %v13530_v9 = vpop.f32.mrf.mxu2  ;;  %v8411_v22 = vadd.f32 %v8410_v3, %v8409_v6  ;;  %v8424_v6 = vsel %vm3332_vm11, %v13418_v49, 0.0 }
 0x4c2   : > { %v8413_v25 = vadd.f32 %v8412_v5, %v8411_v22 }
 0x4c4   : > { %v13481_v43 = vpop.f32.mrf.mxu3  ;;  %v8415_v15 = vadd.f32 %v8414_v30, %v8413_v25  ;;  %v8426_v25 = vsel %vm3332_vm11, %v13432_v52, 0.0  ;;  %v14027_v52 = vld [vmem:[#allocation19_spill] sm:$0xff] }
 0x4c6   : > { %v8417_v13 = vadd.f32 %v8416_v12, %v8415_v15  ;;  %v14025_v12 = vld [vmem:[#allocation15_spill] sm:$0xff] }
 0x4c7   : > { %v13469_v45 = vpop.f32.mrf.mxu1  ;;  %v13483_v26 = vpop.f32.mrf.mxu0  ;;  %v8016_v15 = vadd.f32 %v13309_v2, %v14025_v12  ;;  %v8432_v12 = vsel %vm3332_vm11, %v13446_v39, 0.0 }
 0x4c8   : > { %v8419_v60 = vadd.f32 %v8418_v28, %v8417_v13  ;;  %v8122_v48 = vpop.f32.mrf.mxu2  ;;  %v8428_v28 = vsel %vm3332_vm11, %v13439_v20, 0.0 }
 0x4ca   : > { %v8421_v3 = vadd.f32 %v8420_v57, %v8419_v60  ;;  %v14026_v57 = vld [vmem:[#allocation17_spill] sm:$0xff] }
 0x4cb   : > { %v8019_v60 = vadd.f32 %v13309_v2, %v14026_v57  ;;  %v14028_v57 = vld [vmem:[#allocation22_spill] sm:$0xff] }
 0x4cc   : > { %v13492_v0 = vpop.f32.mrf.mxu3  ;;  %v8423_v5 = vadd.f32 %v8422_v27, %v8421_v3  ;;  %v8105_v27 = vadd.f32 %v13462_v34, %v8016_v15  ;;  %v8430_v3 = vsel %vm3332_vm11, %v13443_v54, 0.0  ;;  %v8024_v34 = vadd.f32 %v13309_v2, %v14028_v57 }
 0x4ce   : > { %v8425_v56 = vadd.f32 %v8424_v6, %v8423_v5  ;;  %v8021_v6 = vadd.f32 %v13309_v2, %v14027_v52  ;;  %v8108_v5 = vadd.f32 %v13471_v41, %v8019_v60  ;;  %v14029_v60 = vld [vmem:[#allocation24_spill] sm:$0xff] }
 0x4cf   : > { %v13477_v61 = vpop.f32.mrf.mxu1  ;;  %v13494_v29 = vpop.f32.mrf.mxu0  ;;  %v8026_v39 = vadd.f32 %v13309_v2, %v14029_v60 }
 0x4d0   : > { %v8427_v13 = vadd.f32 %v8426_v25, %v8425_v56  ;;  %v8194_v25 = vadd.f32 %v13467_v23, %v8105_v27  ;;  %v8124_v56 = vpop.f32.mrf.mxu2  ;;  %v8197_v52 = vadd.f32 %v13473_v11, %v8108_v5  ;;  %v8113_v23 = vadd.f32 %v13490_v42, %v8024_v34  ;;  %v14030_v11 = vld [vmem:[#allocation28_spill] sm:$0xff] }
 0x4d1   : > { %v8115_v42 = vadd.f32 %v13498_v7, %v8026_v39  ;;  %v14032_v34 = vld [vmem:[#allocation32_spill] sm:$0xff] }
 0x4d2   : > { %v8429_v49 = vadd.f32 %v8428_v28, %v8427_v13  ;;  %v8110_v28 = vadd.f32 %v13479_v21, %v8021_v6  ;;  %v8434_v13 = vsel %vm3332_vm11, %v13453_v32, 0.0  ;;  %v8283_v41 = vadd.f32 %v13475_v51, %v8194_v25 }
 0x4d3   : > { %v8286_v21 = vadd.f32 %v13483_v26, %v8197_v52  ;;  %v8029_v51 = vadd.f32 %v13309_v2, %v14030_v11  ;;  %v8202_v25 = vadd.f32 %v13492_v0, %v8113_v23  ;;  %v14031_v26 = vld [vmem:[#allocation30_spill] sm:$0xff]  ;;  %v14033_v52 = vld [vmem:[#allocation8_spill] sm:$0xff] }
 0x4d4   : > { %v13500_v31 = vpop.f32.mrf.mxu3  ;;  %v8431_v15 = vadd.f32 %v8430_v3, %v8429_v49  ;;  %v8436_v49 = vsel %vm3332_vm11, %v13458_v46, 0.0  ;;  %v8199_v3 = vadd.f32 %v13481_v43, %v8110_v28  ;;  %v13591_v6 = vadd.f32 %v13469_v45, %v8283_v41 }
 0x4d5   : > { %v13601_v43 = vadd.f32 %v13477_v61, %v8286_v21  ;;  %v8031_v45 = vadd.f32 %v13309_v2, %v14031_v26  ;;  %v8118_v0 = vadd.f32 %v13512_v19, %v8029_v51  ;;  %v8204_v7 = vadd.f32 %v13500_v31, %v8115_v42  ;;  %v14034_v21 = vld [vmem:[#allocation9_spill] sm:$0xff] }
 0x4d6   : > { %v8433_v27 = vadd.f32 %v8432_v12, %v8431_v15  ;;  %v8438_v12 = vsel %vm3332_vm11, %v13460_v55, 0.0  ;;  %v8288_v57 = vadd.f32 %v13494_v29, %v8199_v3  ;;  %v8034_v15 = vadd.f32 %v13309_v2, %v14032_v34 }
 0x4d7   : > { %v13485_v50 = vpop.f32.mrf.mxu1  ;;  %v13502_v1 = vpop.f32.mrf.mxu0  ;;  %v8440_v39 = vsel %vm3332_vm11, %v13591_v6, 0.0  ;;  %v8036_v41 = vadd.f32 %v13309_v2, %v14033_v52  ;;  %v8120_v60 = vadd.f32 %v13530_v9, %v8031_v45  ;;  %v8442_v3 = vsel %vm3332_vm11, %v13601_v43, 0.0 }
 0x4d8   : > { %v8435_v5 = vadd.f32 %v8434_v13, %v8433_v27  ;;  %v8291_v13 = vadd.f32 %v13502_v1, %v8202_v25  ;;  %v13613_v29 = vadd.f32 %v13485_v50, %v8288_v57  ;;  %v8039_v11 = vadd.f32 %v13309_v2, %v14034_v21 }
 0x4da   : > { %v8437_v28 = vadd.f32 %v8436_v49, %v8435_v5  ;;  %v8123_v49 = vadd.f32 %v8122_v48, %v8034_v15  ;;  %v8125_v5 = vadd.f32 %v8124_v56, %v8036_v41 }
 0x4dc   : > { %v13516_v59 = vpop.f32.mrf.mxu3  ;;  %v8439_v23 = vadd.f32 %v8438_v12, %v8437_v28 }
 0x4dd   : > { %v8207_v31 = vadd.f32 %v13516_v59, %v8118_v0 }
 0x4de   : > { %v8441_v51 = vadd.f32 %v8440_v39, %v8439_v23 }
 0x4df   : > { %v13496_v14 = vpop.f32.mrf.mxu1  ;;  %v13518_v58 = vpop.f32.mrf.mxu0 }
 0x4e0   : > { %v13619_v27 = vadd.f32 %v13496_v14, %v8291_v13  ;;  %v8293_v50 = vadd.f32 %v13518_v58, %v8204_v7  ;;  %v8444_v14 = vsel %vm3332_vm11, %v13613_v29, 0.0  ;;  %v8443_v12 = vadd.f32 %v8442_v3, %v8441_v51  ;;  %v14035_v7 = vld [vmem:[#allocation10_spill] sm:$0xff] }
 0x4e2   : > { %v8446_v58 = vsel %vm3332_vm11, %v13619_v27, 0.0  ;;  %v8445_v34 = vadd.f32 %v8444_v14, %v8443_v12 }
 0x4e4   : > { %v13534_v16 = vpop.f32.mrf.mxu3  ;;  %v8447_v28 = vadd.f32 %v8446_v58, %v8445_v34 }
 0x4e5   : > { %v8209_v9 = vadd.f32 %v13534_v16, %v8120_v60 }
 0x4e7   : > { %v13506_v33 = vpop.f32.mrf.mxu1  ;;  %v13536_v8 = vpop.f32.mrf.mxu0 }
 0x4e8   : > { %v8296_v48 = vadd.f32 %v13536_v8, %v8207_v31  ;;  %v13632_v42 = vadd.f32 %v13506_v33, %v8293_v50 }
 0x4ea   : > { %v8448_v8 = vsel %vm3332_vm11, %v13632_v42, 0.0 }
 0x4ec   : > { %v13553_v22 = vpop.f32.mrf.mxu3 }
 0x4ed   : > { %v8212_v59 = vadd.f32 %v13553_v22, %v8123_v49 }
 0x4ef   : > { %v13526_v62 = vpop.f32.mrf.mxu1  ;;  %v13555_v30 = vpop.f32.mrf.mxu0 }
 0x4f0   : > { %v8298_v57 = vadd.f32 %v13555_v30, %v8209_v9  ;;  %v13639_v56 = vadd.f32 %v13526_v62, %v8296_v48 }
 0x4f2   : > { %v8450_v30 = vsel %vm3332_vm11, %v13639_v56, 0.0 }
 0x4f4   : > { %v8213_v54 = vpop.f32.mrf.mxu3 }
 0x4f5   : > { %v8214_v16 = vadd.f32 %v8213_v54, %v8125_v5 }
 0x4f7   : > { %v13547_v63 = vpop.f32.mrf.mxu1 }
 0x4f8   : > { %v13644_v33 = vadd.f32 %v13547_v63, %v8298_v57 }
 0x4fa   : > { %v8452_v63 = vsel %vm3332_vm11, %v13644_v33, 0.0 }
 0x4fb   : > { %v8127_v61 = vpop.f32.mrf.mxu2 }
 0x4fc   : > { %v8128_v26 = vadd.f32 %v8127_v61, %v8039_v11  ;;  %v8041_v61 = vadd.f32 %v13309_v2, %v14035_v7 }
 0x4ff   : > { %v13568_v35 = vpop.f32.mrf.mxu1 }
 0x503   : > { %v8129_v39 = vpop.f32.mrf.mxu2 }
 0x504   : > { %v8130_v23 = vadd.f32 %v8129_v39, %v8041_v61 }
 0x507   : > { %v8391_v1 = vpop.f32.mrf.mxu1 }
 0x50f   : > { %v8394_v13 = vpop.f32.mrf.mxu1 }
 0x517   : > { %v8396_v51 = vpop.f32.mrf.mxu1 }
 0x51c   : > { %v8300_v20 = vpop.f32.mrf.mxu0 }
 0x51d   : > { %v8216_v25 = vpop.f32.mrf.mxu3  ;;  %v8301_v45 = vadd.f32 %v8300_v20, %v8212_v59  ;;  %v8449_v20 = vadd.f32 %v8448_v8, %v8447_v28 }
 0x51e   : > { %v8217_v22 = vadd.f32 %v8216_v25, %v8128_v26 }
 0x51f   : > { %v13649_v62 = vadd.f32 %v13568_v35, %v8301_v45  ;;  %v8451_v41 = vadd.f32 %v8450_v30, %v8449_v20  ;;  %v8477_v45 = vld [vmem:[%s13883_s6] sm:$0x1] }
 0x521   : > { %v8453_v35 = vadd.f32 %v8452_v63, %v8451_v41 }
 0x524   : > { %v8302_v19 = vpop.f32.mrf.mxu0 }
 0x525   : > { %v8303_v15 = vadd.f32 %v8302_v19, %v8214_v16  ;;  %v8218_v60 = vpop.f32.mrf.mxu3  ;;  %v8454_v19 = vsel %vm3332_vm11, %v13649_v62, 0.0 }
 0x526   : > { %v8219_v31 = vadd.f32 %v8218_v60, %v8130_v23  ;;  %v8455_v50 = vadd.f32 %v8454_v19, %v8453_v35 }
 0x527   : > { %v13655_v52 = vadd.f32 %v8391_v1, %v8303_v15  ;;  %v8503_v15 = vld [vmem:[%s13885_s8] sm:$0x1] }
 0x529   : > { %v8456_v3 = vsel %vm3332_vm11, %v13655_v52, 0.0 }
 0x52a   : > { %v8457_v11 = vadd.f32 %v8456_v3, %v8455_v50 }
 0x52c   : > { %v8305_v0 = vpop.f32.mrf.mxu0 }
 0x52d   : > { %v8306_v54 = vadd.f32 %v8305_v0, %v8217_v22 }
 0x52f   : > { %v13659_v49 = vadd.f32 %v8394_v13, %v8306_v54 }
 0x531   : > { %v8458_v21 = vsel %vm3332_vm11, %v13659_v49, 0.0 }
 0x532   : > { %v8459_v9 = vadd.f32 %v8458_v21, %v8457_v11  ;;  %v8552_v11 = vld [vmem:[%s10332_s26 + $0x8] sm:$0xff] }
 0x534   : > { %v8307_v2 = vpop.f32.mrf.mxu0 }
 0x535   : > { %v8308_v1 = vadd.f32 %v8307_v2, %v8219_v31 }
 0x537   : > { %v13665_v5 = vadd.f32 %v8396_v51, %v8308_v1  ;;  %v8551_v1 = vld [vmem:[%s10332_s26] sm:$0xff]  ;;  %v8553_v51 = vld [vmem:[%s10332_s26 + $0x10] sm:$0xff] }
 0x539   : > { %v8460_v25 = vsel %vm3332_vm11, %v13665_v5, 0.0 }
 0x53a   : > { %v8461_v14 = vadd.f32 %v8460_v25, %v8459_v9  ;;  %v8554_v25 = vld [vmem:[%s10332_s26 + $0x18] sm:$0xff] }
 0x53c   : > { %v8462_v48 = vrot.slane %v8461_v14, 4 }
 0x53e   : > { %v8463_v59 = vadd.f32 %v8462_v48, %v8461_v14  ;;  %v8555_v14 = vld [vmem:[%s10332_s26 + $0x20] sm:$0xff] }
 0x540   : > { %v8464_v12 = vrot.slane %v8463_v59, 2 }
 0x542   : > { %v8465_v58 = vadd.f32 %v8464_v12, %v8463_v59 }
 0x544   : > { %v8466_v57 = vrot.slane %v8465_v58, 1 }
 0x546   : > { %v8467_v16 = vadd.f32 %v8466_v57, %v8465_v58 }
 0x548   : > { %v8468_v26 = vmul.f32 0.00390625, %v8467_v16  ;;  %v8558_v16 = vld [vmem:[%s10332_s26 + $0x38] sm:$0xff] }
 0x54a   : > { %9597 = vmatmul.msk.f32.vlgmr.msrb.gmra.mxu2 %vm3332_vm11, %v8468_v26 }
 0x5cd   : > { %v8498_v34 = vpop.f32.mrf.mxu2 }
 0x5ce   : > { %v8499_v8 = vadd.f32 %v8498_v34, %v8477_v45  ;;  %v8559_v45 = vld [vmem:[%s10332_s26 + $0x40] sm:$0xff] }
 0x5d0   : > { %v8501_v22 = vmax.f32 %v8499_v8, 0.0 }
 0x5d2   : > { %9599 = vmatmul.msk.f32.vlgmr.msrb.gmra.mxu3 %vm8504_vm0, %v8501_v22  ;;  %v8560_v22 = vld [vmem:[%s10332_s26 + $0x48] sm:$0xff] }
 0x655   : > { %v8529_v28 = vpop.f32.mrf.mxu3 }
 0x656   : > { %v8530_v13 = vadd.f32 %v8529_v28, %v8503_v15 }
 0x658   : > { %v8532_v0 = vsub.f32 0.0, %v8530_v13 }
 0x65a   : > { %v8533_v30 = vmul.f32 1.442695, %v8532_v0  ;;  %v8561_v0 = vld [vmem:[%s10332_s26 + $0x50] sm:$0xff] }
 0x65c   : > { %9836 = vpow2.f32 %v8533_v30 }
 0x662   : > { %v9837_v54 = vpop.eup %9836 }
 0x663   : > { %v8535_v20 = vadd.f32 1.0, %v9837_v54 }
 0x665   : > { %9838 = vrcp.f32 %v8535_v20  ;;  %v8547_v60 = vand.u32 2147483648, %v8535_v20  ;;  %vm8541_vm2 = vweird.f32 %v8535_v20  ;;  %v8545_v23 = vand.u32 2147483647, %v8535_v20 }
 0x667   : > { %v8548_v35 = vor.u32 1.1754944e-38, %v8547_v60  ;;  %vm8546_vm4 = vcmp.eq.f32.partialorder %v8545_v23, 8.507059e+37  ;;  %v8564_v23 = vld [vmem:[%s10332_s26 + $0x68] sm:$0xff] }
 0x66b   : > { %v9839_v39 = vpop.eup %9838 }
 0x66c   : > { %v8537_v7 = vmul.f32 %v9839_v39, %v8535_v20  ;;  %vm8542_vm1 = vweird.f32 %v9839_v39  ;;  %v8562_v20 = vld [vmem:[%s10332_s26 + $0x58] sm:$0xff] }
 0x66d   : > { %vm8543_vm3 = vmor %vm8541_vm2, %vm8542_vm1 }
 0x66e   : > { %v8538_v61 = vsub.f32 1.0, %v8537_v7 }
 0x670   : > { %v8539_v63 = vmul.f32 %v9839_v39, %v8538_v61  ;;  %v8563_v61 = vld [vmem:[%s10332_s26 + $0x60] sm:$0xff] }
 0x672   : > { %v8540_v41 = vadd.f32 %v9839_v39, %v8539_v63 }
 0x674   : > { %v8544_v19 = vsel %vm8543_vm3, %v9839_v39, %v8540_v41  ;;  %v14036_v39 = vld [vmem:[#allocation13_spill] sm:$0xff] }
 0x675   : > { %v8549_v3 = vsel %vm8546_vm4, %v8548_v35, %v8544_v19  ;;  %v14038_v19 = vld [vmem:[#allocation18_spill] sm:$0xff] }
 0x676   : > { %v13676_v31 = vperm.slane %v8549_v3, 0 }
 0x678   : > { %v8584_v50 = vmul.f32 %v13676_v31, %v14024_v10  ;;  %v8585_v2 = vmul.f32 %v13676_v31, %v13215_v24  ;;  %v8586_v21 = vmul.f32 %v13676_v31, %v13247_v40  ;;  %v8587_v9 = vmul.f32 %v13676_v31, %v13267_v37  ;;  %v8556_v40 = vld [vmem:[%s10332_s26 + $0x28] sm:$0xff]  ;;  %v8557_v37 = vld [vmem:[%s10332_s26 + $0x30] sm:$0xff] }
 0x679   : > { %v8588_v10 = vmul.f32 %v13676_v31, %v13284_v17  ;;  %v8589_v24 = vmul.f32 %v13676_v31, %v13301_v38  ;;  %v8590_v48 = vmul.f32 %v13676_v31, %v13326_v4  ;;  %v8591_v57 = vmul.f32 %v13676_v31, %v13341_v18 }
 0x67a   : > { %v8616_v59 = vadd.f32 %v8584_v50, %v8551_v1  ;;  %v8617_v12 = vadd.f32 %v8585_v2, %v8552_v11  ;;  %v8618_v58 = vadd.f32 %v8586_v21, %v8553_v51  ;;  %v8619_v17 = vadd.f32 %v8587_v9, %v8554_v25  ;;  %v8565_v2 = vld [vmem:[%s10332_s26 + $0x70] sm:$0xff]  ;;  %v14039_v21 = vld [vmem:[#allocation21_spill] sm:$0xff]  ;;  %v8566_v9 = vld [vmem:[%s10332_s26 + $0x78] sm:$0xff] }
 0x67b   : > { %v8592_v38 = vmul.f32 %v13676_v31, %v13355_v36  ;;  %v8620_v26 = vadd.f32 %v8588_v10, %v8555_v14  ;;  %v8593_v34 = vmul.f32 %v13676_v31, %v13366_v53  ;;  %v8594_v4 = vmul.f32 %v13676_v31, %v13383_v47  ;;  %v14040_v25 = vld [vmem:[#allocation23_spill] sm:$0xff] }
 0x67c   : > { %v8621_v8 = vadd.f32 %v8589_v24, %v8556_v40  ;;  %v8622_v15 = vadd.f32 %v8590_v48, %v8557_v37  ;;  %v8648_v28 = vmax.f32 %v8616_v59, 0.0  ;;  %v8649_v18 = vmax.f32 %v8617_v12, 0.0  ;;  %v8567_v40 = vld [vmem:[%s10332_s26 + $0x80] sm:$0xff]  ;;  %v14041_v48 = vld [vmem:[#allocation27_spill] sm:$0xff]  ;;  %v8568_v37 = vld [vmem:[%s10332_s26 + $0x88] sm:$0xff] }
 0x67d   : > { %v8650_v13 = vmax.f32 %v8618_v58, 0.0  ;;  %v8595_v36 = vmul.f32 %v13676_v31, %v13396_v44  ;;  %v8623_v30 = vadd.f32 %v8591_v57, %v8558_v16  ;;  %v8651_v54 = vmax.f32 %v8619_v17, 0.0  ;;  %v14037_v44 = vld [vmem:[#allocation16_spill] sm:$0xff] }
 0x67e   : > { %v8596_v53 = vmul.f32 %v13676_v31, %v14036_v39  ;;  %v8624_v47 = vadd.f32 %v8592_v38, %v8559_v45  ;;  %v8652_v7 = vmax.f32 %v8620_v26, 0.0  ;;  %8680 = vst.msk [vmem:[%s13719_s17] sm:$0xff] %vm3332_vm11, %v8648_v28  ;;  %v8597_v63 = vmul.f32 %v13676_v31, %v14037_v44  ;;  %v8569_v38 = vld [vmem:[%s10332_s26 + $0x90] sm:$0xff]  ;;  %v8574_v39 = vld [vmem:[%s10332_s26 + $0xb8] sm:$0xff] }
 0x67f   : > { %v8625_v41 = vadd.f32 %v8593_v34, %v8560_v22  ;;  %v8653_v60 = vmax.f32 %v8621_v8, 0.0  ;;  %8681 = vst.msk [vmem:[%s13719_s17 + $0x8] sm:$0xff] %vm3332_vm11, %v8649_v18  ;;  %v8598_v35 = vmul.f32 %v13676_v31, %v14038_v19  ;;  %v8626_v3 = vadd.f32 %v8594_v4, %v8561_v0  ;;  %v8570_v4 = vld [vmem:[%s10332_s26 + $0x98] sm:$0xff] }
 0x680   : > { %v8654_v50 = vmax.f32 %v8622_v15, 0.0  ;;  %8682 = vst.msk [vmem:[%s13719_s17 + $0x10] sm:$0xff] %vm3332_vm11, %v8650_v13  ;;  %v8599_v1 = vmul.f32 %v13676_v31, %v14039_v21  ;;  %v8627_v11 = vadd.f32 %v8595_v36, %v8562_v20  ;;  %v8655_v51 = vmax.f32 %v8623_v30, 0.0  ;;  %v8571_v15 = vld [vmem:[%s10332_s26 + $0xa0] sm:$0xff]  ;;  %v8572_v13 = vld [vmem:[%s10332_s26 + $0xa8] sm:$0xff]  ;;  %v8573_v30 = vld [vmem:[%s10332_s26 + $0xb0] sm:$0xff] }
 0x681   : > { %8683 = vst.msk [vmem:[%s13719_s17 + $0x18] sm:$0xff] %vm3332_vm11, %v8651_v54  ;;  %v8600_v10 = vmul.f32 %v13676_v31, %v14040_v25  ;;  %v8628_v14 = vadd.f32 %v8596_v53, %v8563_v61  ;;  %v8656_v24 = vmax.f32 %v8624_v47, 0.0  ;;  %v8601_v59 = vmul.f32 %v13676_v31, %v14041_v48  ;;  %v8579_v21 = vld [vmem:[%s10332_s26 + $0xe0] sm:$0xff] }
 0x682   : > { %8684 = vst.msk [vmem:[%s13719_s17 + $0x20] sm:$0xff] %vm3332_vm11, %v8652_v7  ;;  %v8629_v12 = vadd.f32 %v8597_v63, %v8564_v23  ;;  %v8657_v58 = vmax.f32 %v8625_v41, 0.0  ;;  %v8602_v57 = vmul.f32 %v13676_v31, %v13453_v32  ;;  %v8630_v17 = vadd.f32 %v8598_v35, %v8565_v2  ;;  %v8575_v7 = vld [vmem:[%s10332_s26 + $0xc0] sm:$0xff]  ;;  %v8576_v63 = vld [vmem:[%s10332_s26 + $0xc8] sm:$0xff]  ;;  %v8577_v23 = vld [vmem:[%s10332_s26 + $0xd0] sm:$0xff] }
 0x683   : > { %8685 = vst.msk [vmem:[%s13719_s17 + $0x28] sm:$0xff] %vm3332_vm11, %v8653_v60  ;;  %v8658_v16 = vmax.f32 %v8626_v3, 0.0  ;;  %v8603_v26 = vmul.f32 %v13676_v31, %v13458_v46  ;;  %v8631_v45 = vadd.f32 %v8599_v1, %v8566_v9  ;;  %v8659_v34 = vmax.f32 %v8627_v11, 0.0  ;;  %v8578_v3 = vld [vmem:[%s10332_s26 + $0xd8] sm:$0xff] }
 0x684   : > { %8686 = vst.msk [vmem:[%s13719_s17 + $0x30] sm:$0xff] %vm3332_vm11, %v8654_v50  ;;  %v8604_v32 = vmul.f32 %v13676_v31, %v13460_v55  ;;  %v8632_v8 = vadd.f32 %v8600_v10, %v8567_v40  ;;  %v8660_v22 = vmax.f32 %v8628_v14, 0.0  ;;  %v8605_v46 = vmul.f32 %v13676_v31, %v13591_v6  ;;  %v8581_v10 = vld [vmem:[%s10332_s26 + $0xf0] sm:$0xff]  ;;  %v8582_v40 = vld [vmem:[%s10332_s26 + $0xf8] sm:$0xff] }
 0x685   : > { %8687 = vst.msk [vmem:[%s13719_s17 + $0x38] sm:$0xff] %vm3332_vm11, %v8655_v51  ;;  %v8633_v28 = vadd.f32 %v8601_v59, %v8568_v37  ;;  %v8661_v18 = vmax.f32 %v8629_v12, 0.0  ;;  %v8606_v55 = vmul.f32 %v13676_v31, %v13601_v43  ;;  %v8634_v0 = vadd.f32 %v8602_v57, %v8569_v38  ;;  %v8580_v51 = vld [vmem:[%s10332_s26 + $0xe8] sm:$0xff]  ;;  %s8724_s26 = scalar_lea.hbm %s13886_s9, %s9774_s22  ;;  %s10016_s22 = scalar_lea.hbm %s13886_s9, 512 }
 0x686   : > { %8688 = vst.msk [vmem:[%s13719_s17 + $0x40] sm:$0xff] %vm3332_vm11, %v8656_v24  ;;  %v8662_v36 = vmax.f32 %v8630_v17, 0.0  ;;  %v8607_v6 = vmul.f32 %v13676_v31, %v13613_v29  ;;  %v8635_v54 = vadd.f32 %v8603_v26, %v8570_v4  ;;  %v8663_v20 = vmax.f32 %v8631_v45, 0.0  ;;  %s8727_s25 = sshll.u32 %s8724_s26, 4  ;;  %s8728_s25 = int_to_ptr.hbm [resolvable:$true] %s8727_s25 }
 0x687   : > { %8689 = vst.msk [vmem:[%s13719_s17 + $0x48] sm:$0xff] %vm3332_vm11, %v8657_v58  ;;  %v8608_v43 = vmul.f32 %v13676_v31, %v13619_v27  ;;  %v8636_v53 = vadd.f32 %v8604_v32, %v8571_v15  ;;  %v8664_v47 = vmax.f32 %v8632_v8, 0.0  ;;  %v8609_v29 = vmul.f32 %v13676_v31, %v13632_v42  ;;  %s10010_s28 = sshra.s32 %s8728_s25, 4  ;;  %s10011_s28 = int_to_ptr.hbm [resolvable:$true] %s10010_s28 }
 0x688   : > { %8690 = vst.msk [vmem:[%s13719_s17 + $0x50] sm:$0xff] %vm3332_vm11, %v8658_v16  ;;  %v8637_v61 = vadd.f32 %v8605_v46, %v8572_v13  ;;  %v8665_v44 = vmax.f32 %v8633_v28, 0.0  ;;  %v8610_v27 = vmul.f32 %v13676_v31, %v13639_v56  ;;  %v8638_v41 = vadd.f32 %v8606_v55, %v8573_v30  ;;  %s10012_s29 = scalar_lea.hbm %s10011_s28, 256  ;;  %p10017_p0 = scmp.lt.s32.totalorder %s10011_s28, %s13886_s9 }
 0x689   : > { %8691 = vst.msk [vmem:[%s13719_s17 + $0x58] sm:$0xff] %vm3332_vm11, %v8659_v34  ;;  %v8666_v60 = vmax.f32 %v8634_v0, 0.0  ;;  %v8611_v42 = vmul.f32 %v13676_v31, %v13644_v33  ;;  %v8639_v19 = vadd.f32 %v8607_v6, %v8574_v39  ;;  %v8667_v35 = vmax.f32 %v8635_v54, 0.0  ;;  %p10013_p11 = scmp.ne.s32.totalorder %s10011_s28, %s10012_s29  ;;  %p10018_p1 = scmp.lt.s32.totalorder %s10016_s22, %s10012_s29 }
 0x68a   : > { %8692 = vst.msk [vmem:[%s13719_s17 + $0x60] sm:$0xff] %vm3332_vm11, %v8660_v22  ;;  %v8612_v56 = vmul.f32 %v13676_v31, %v13649_v62  ;;  %v8640_v50 = vadd.f32 %v8608_v43, %v8575_v7  ;;  %v8668_v2 = vmax.f32 %v8636_v53, 0.0  ;;  %v8613_v33 = vmul.f32 %v13676_v31, %v13655_v52 }
 0x68b   : > { %8693 = vst.msk [vmem:[%s13719_s17 + $0x68] sm:$0xff] %vm3332_vm11, %v8661_v18  ;;  %v8641_v1 = vadd.f32 %v8609_v29, %v8576_v63  ;;  %v8669_v11 = vmax.f32 %v8637_v61, 0.0  ;;  %v8614_v62 = vmul.f32 %v13676_v31, %v13659_v49  ;;  %v8642_v9 = vadd.f32 %v8610_v27, %v8577_v23  ;;  %p10014_p12 = pnand %p10013_p11, %p10152_p5  ;;  %p10019_p2 = por %p10018_p1, %p10017_p0 }
 0x68c   : > { %8694 = vst.msk [vmem:[%s13719_s17 + $0x70] sm:$0xff] %vm3332_vm11, %v8662_v36  ;;  %v8670_v25 = vmax.f32 %v8638_v41, 0.0  ;;  %v8615_v14 = vmul.f32 %v13676_v31, %v13665_v5  ;;  %v8643_v52 = vadd.f32 %v8611_v42, %v8578_v3  ;;  %v8671_v24 = vmax.f32 %v8639_v19, 0.0 }
 0x68d   : > { %8695 = vst.msk [vmem:[%s13719_s17 + $0x78] sm:$0xff] %vm3332_vm11, %v8663_v20  ;;  %v8644_v48 = vadd.f32 %v8612_v56, %v8579_v21  ;;  %v8672_v49 = vmax.f32 %v8640_v50, 0.0  ;;  %v8645_v59 = vadd.f32 %v8613_v33, %v8580_v51  ;;  %v8673_v12 = vmax.f32 %v8641_v1, 0.0  ;;  %p10015_p13 = pneg %p10014_p12 }
 0x68e   : > { %8696 = vst.msk [vmem:[%s13719_s17 + $0x80] sm:$0xff] %vm3332_vm11, %v8664_v47  ;;  %v8646_v5 = vadd.f32 %v8614_v62, %v8581_v10  ;;  %v8674_v31 = vmax.f32 %v8642_v9, 0.0  ;;  %v8647_v58 = vadd.f32 %v8615_v14, %v8582_v40  ;;  %v8675_v37 = vmax.f32 %v8643_v52, 0.0 }
 0x68f   : > { %8697 = vst.msk [vmem:[%s13719_s17 + $0x88] sm:$0xff] %vm3332_vm11, %v8665_v44  ;;  %v8676_v57 = vmax.f32 %v8644_v48, 0.0  ;;  %v8677_v17 = vmax.f32 %v8645_v59, 0.0  ;;  %p10020_p3 = pnand %p10019_p2, %p10015_p13 }
 0x690   : > { %8698 = vst.msk [vmem:[%s13719_s17 + $0x90] sm:$0xff] %vm3332_vm11, %v8666_v60  ;;  %v8678_v16 = vmax.f32 %v8646_v5, 0.0  ;;  %v8679_v38 = vmax.f32 %v8647_v58, 0.0 }
 0x691   : > { %8699 = vst.msk [vmem:[%s13719_s17 + $0x98] sm:$0xff] %vm3332_vm11, %v8667_v35 }
 0x692   : > { %8700 = vst.msk [vmem:[%s13719_s17 + $0xa0] sm:$0xff] %vm3332_vm11, %v8668_v2 }
 0x693   : > { %8701 = vst.msk [vmem:[%s13719_s17 + $0xa8] sm:$0xff] %vm3332_vm11, %v8669_v11 }
 0x694   : > { %8702 = vst.msk [vmem:[%s13719_s17 + $0xb0] sm:$0xff] %vm3332_vm11, %v8670_v25 }
 0x695   : > { %8703 = vst.msk [vmem:[%s13719_s17 + $0xb8] sm:$0xff] %vm3332_vm11, %v8671_v24 }
 0x696   : > { %8704 = vst.msk [vmem:[%s13719_s17 + $0xc0] sm:$0xff] %vm3332_vm11, %v8672_v49 }
 0x697   : > { %8705 = vst.msk [vmem:[%s13719_s17 + $0xc8] sm:$0xff] %vm3332_vm11, %v8673_v12 }
 0x698   : > { %8706 = vst.msk [vmem:[%s13719_s17 + $0xd0] sm:$0xff] %vm3332_vm11, %v8674_v31 }
 0x699   : > { %8707 = vst.msk [vmem:[%s13719_s17 + $0xd8] sm:$0xff] %vm3332_vm11, %v8675_v37 }
 0x69a   : > { %8708 = vst.msk [vmem:[%s13719_s17 + $0xe0] sm:$0xff] %vm3332_vm11, %v8676_v57 }
 0x69b   : > { %8709 = vst.msk [vmem:[%s13719_s17 + $0xe8] sm:$0xff] %vm3332_vm11, %v8677_v17 }
 0x69c   : > { %8710 = vst.msk [vmem:[%s13719_s17 + $0xf0] sm:$0xff] %vm3332_vm11, %v8678_v16 }
 0x69d   : > { %8711 = vst.msk [vmem:[%s13719_s17 + $0xf8] sm:$0xff] %vm3332_vm11, %v8679_v38 }
 0x69e   : > { %10023 = shalt.err (!%p10020_p3)
}
 0x69f   : > { %s10062_s21 = smov 128   ;;  %s10063_s17 = smov 8  }
 0x6a0   : > { %9791 = dma.vmem_to_hbm [thread:$0]  (%p10152_p5), %s8726_s24, 4096, %s8728_s25, %s8713_s27, %s10062_s21, %s10062_s21, %s10063_s17  }
 0x6a1 PF: > { %p9797_p4 = scmp.ge.s32.totalorder %s10058_s12, 2  ;;  %s8742_s26 = sand.u32 1, %s10046_s30  }
 0x6a2   : > { %s8743_s14 = scalar_lea.sflag [#allocation5], %s8742_s26 }
 0x6a3   : > { %p9794_p7 = pnand %p9797_p4, %p10156_p6 }
 0x6a5   : > { %p9795_p8 = pneg %p9794_p7 }
 0x6a7   : > { %10041 = dma.done.wait (%p9795_p8), %s8743_s14, 4096  }
 0x6a8   : > { %10043 = vsyncadd (%p9795_p8), %s8743_s14, 4294963200  ;;  %p19_p9 = scmp.ge.s32.totalorder %s10139_s15, 4   ;;  %s14042_s30 = smov %s10050_s10 }
 0x6a9   : > { %s14043_s10 = smov %s10054_s11  ;;  %s14044_s11 = smov %s10150_s18 }
 0x6aa   : > { %s14045_s12 = smov %s10139_s15  ;;  %21 = sbr.rel (!%p19_p9) target bundleno = 3 (0x3), region = 95 }
 0x6af   :  { %8749 = vsyncpa [#allocation5], 1 }
 0x6b0   :  { %8751 = vsyncpa [#allocation5 + $0x1], 1 }

</bundles_post_ra>
